<compile_context>
chip_gen: v7x
topology: tpu7x:2x2x1
jax: 0.10.0
libtpu: 0.0.40
codegen_flags: <defaults>
</compile_context>

<pallas_src>
import functools
import math

import jax
import jax.numpy as jnp
from jax.experimental import pallas as pl
from jax.experimental.pallas import tpu as pltpu


_LAYERS = [(2, 32), (32, 64), (64, 32), (32, 2)]   # (Cin, Cout) per conv


# ----------------------------------------------------------------------------
# One 3x3 / pad=1 conv layer over an in-VMEM row slab (im2col + single matmul)
# ----------------------------------------------------------------------------
def _conv3x3_block(a, wf, b, rows_out, width, g0, img_h, relu, mask_rows):
    """a  : (rows_out + 2, width, Cin) bf16 activation slab (rows outside the
            image are already zero).
       wf : (9*Cin, Cout) bf16 weights, flattened (dy, dx, cin)-major.
       b  : (1, Cout) f32 bias.
       g0 : global image row of output row 0 (may be negative in the halo).
       -> (rows_out, width, Cout) f32; out-of-image rows zeroed when mask_rows
          (they become the next layer's zero padding)."""
    rows_in = rows_out + 2
    cin = a.shape[-1]
    cout = wf.shape[-1]

    # Column zero padding (the conv's pad=1 along W), done in VMEM.
    zcol = jnp.zeros((rows_in, 1, cin), a.dtype)
    ap = jnp.concatenate([zcol, a, zcol], axis=1)             # (rows_in, W+2, Cin)

    # im2col: 9 shifted slices -> one lane-dim concat -> single K=9*Cin matmul.
    taps = [ap[dy:dy + rows_out, dx:dx + width, :]
            for dy in range(3) for dx in range(3)]
    patches = jnp.concatenate(taps, axis=-1)                  # (rows_out, W, 9*Cin)
    patches = patches.reshape(rows_out * width, 9 * cin)

    y = jnp.dot(patches, wf, preferred_element_type=jnp.float32) + b
    if relu:
        y = jnp.maximum(y, 0.0)
    y = y.reshape(rows_out, width, cout)

    if mask_rows:
        # Rows outside the image must be exactly zero: they are the padding
        # consumed by the next layer (halo-recompute correctness at the
        # image top/bottom boundary).
        rid = g0 + jax.lax.broadcasted_iota(jnp.int32, (rows_out, 1, 1), 0)
        y = jnp.where((rid >= 0) & (rid < img_h), y, 0.0)
    return y


# ----------------------------------------------------------------------------
# Fused 4-layer kernel: one (batch, row-tile) per grid step
# ----------------------------------------------------------------------------
def _fused_kernel(x_ref, w1, b1, w2, b2, w3, b3, w4, b4, o_ref,
                  *, th, img_h, width):
    r0 = pl.program_id(1) * th      # first output row of this tile

    # Halo'd input slab: image rows [r0-4, r0+th+4) == padded rows [r0, r0+th+8).
    xs = x_ref[0, pl.ds(r0, th + 8), :, :]                    # (th+8, W, 2) bf16

    y1 = _conv3x3_block(xs, w1[...], b1[...], th + 6, width, r0 - 3, img_h,
                        relu=True, mask_rows=True)
    y2 = _conv3x3_block(y1.astype(jnp.bfloat16), w2[...], b2[...], th + 4, width,
                        r0 - 2, img_h, relu=True, mask_rows=True)
    y3 = _conv3x3_block(y2.astype(jnp.bfloat16), w3[...], b3[...], th + 2, width,
                        r0 - 1, img_h, relu=True, mask_rows=True)
    y4 = _conv3x3_block(y3.astype(jnp.bfloat16), w4[...], b4[...], th, width,
                        r0, img_h, relu=False, mask_rows=False)  # (th, W, 2) f32

    # Write NCHW directly: W stays on the lane dim (lane-dense stores),
    # no wrapper transpose pass needed.
    o_ref[0, 0, :, :] = y4[:, :, 0]
    o_ref[0, 1, :, :] = y4[:, :, 1]


# ----------------------------------------------------------------------------
# Wrapper
# ----------------------------------------------------------------------------
def _pick_row_tile(h, w):
    """Output rows per grid step: whole image when small, else the largest
    multiple of 8 dividing H with roughly <= 64K output pixels per step
    (keeps the fused per-tile working set well inside v7x's 64 MiB VMEM)."""
    if h % 8 != 0 or h * w <= 64 * 1024:
        return h
    target = max(8, (64 * 1024) // max(w, 1))
    th = max(8, (min(h, target) // 8) * 8)
    while th > 8 and h % th != 0:
        th -= 8
    return th if h % th == 0 else h


def mri_recon_forward(params, x_nchw):
    n, cin, h, w = x_nchw.shape
    assert cin == 2
    th = _pick_row_tile(h, w)

    # Tiny host-side prep of the 2-channel input only: NCHW -> NHWC (bf16)
    # plus 4 zero halo rows top/bottom.  All intermediates stay in VMEM.
    xh = jnp.transpose(x_nchw, (0, 2, 3, 1)).astype(jnp.bfloat16)
    xh = jnp.pad(xh, ((0, 0), (4, 4), (0, 0), (0, 0)))        # (N, H+8, W, 2)

    operands = [xh]
    in_specs = [pl.BlockSpec((1, h + 8, w, 2), lambda i, r: (i, 0, 0, 0))]
    for l, (ci, co) in enumerate(_LAYERS, start=1):
        wf = params[f"w{l}"].reshape(9 * ci, co).astype(jnp.bfloat16)
        bf = params[f"b{l}"].reshape(1, co).astype(jnp.float32)
        operands += [wf, bf]
        in_specs += [pl.BlockSpec((9 * ci, co), lambda i, r: (0, 0)),
                     pl.BlockSpec((1, co), lambda i, r: (0, 0))]

    kern = functools.partial(_fused_kernel, th=th, img_h=h, width=w)
    return pl.pallas_call(
        kern,
        out_shape=jax.ShapeDtypeStruct((n, 2, h, w), jnp.float32),
        grid=(n, h // th),
        in_specs=in_specs,
        out_specs=pl.BlockSpec((1, 2, th, w), lambda i, r: (i, 0, r, 0)),
        compiler_params=pltpu.CompilerParams(
            dimension_semantics=("parallel", "parallel"),
            vmem_limit_bytes=32 * 1024 * 1024,
        ),
    )(*operands)


# ----------------------------------------------------------------------------
# Parameter init (shapes match the PyTorch module)
# ----------------------------------------------------------------------------
def init_params(key):
    keys = jax.random.split(key, len(_LAYERS))
    p = {}
    for i, ((ci, co), k) in enumerate(zip(_LAYERS, keys), start=1):
        kw, kb = jax.random.split(k)
        bound = 1.0 / math.sqrt(ci * 9)
        p[f"w{i}"] = jax.random.uniform(kw, (3, 3, ci, co), jnp.float32,
                                        -bound, bound)
        p[f"b{i}"] = jax.random.uniform(kb, (co,), jnp.float32, -bound, bound)
    return p


# ----------------------------------------------------------------------------
# Reference (same bf16-in / f32-accumulate numerics) for a correctness check
# ----------------------------------------------------------------------------
def _conv3x3_ref(x, w, b, relu):
    y = jax.lax.conv_general_dilated(
        x.astype(jnp.bfloat16), w.astype(jnp.bfloat16),
        window_strides=(1, 1), padding=((1, 1), (1, 1)),
        dimension_numbers=("NHWC", "HWIO", "NHWC"),
        preferred_element_type=jnp.float32)
    y = y + b.astype(jnp.float32)
    if relu:
        y = jnp.maximum(y, 0.0)
    return y


def reference_forward(params, x_nchw):
    x = jnp.transpose(x_nchw, (0, 2, 3, 1))
    x = _conv3x3_ref(x, params["w1"], params["b1"], True).astype(jnp.bfloat16)
    x = _conv3x3_ref(x, params["w2"], params["b2"], True).astype(jnp.bfloat16)
    x = _conv3x3_ref(x, params["w3"], params["b3"], True).astype(jnp.bfloat16)
    x = _conv3x3_ref(x, params["w4"], params["b4"], False)
    return jnp.transpose(x, (0, 3, 1, 2))


# ----------------------------------------------------------------------------
if __name__ == "__main__":
    key = jax.random.PRNGKey(0)
    kp, kx = jax.random.split(key)

    params = init_params(kp)
    # PyTorch-style NCHW input: batch=2, channels=2, spatial 16x16.
    x = jax.random.normal(kx, (2, 2, 16, 16), dtype=jnp.float32)

    out = jax.block_until_ready(jax.jit(mri_recon_forward)(params, x))

    assert out.shape == (2, 2, 16, 16), out.shape
    assert bool(jnp.all(jnp.isfinite(out)))

    ref = jax.block_until_ready(jax.jit(reference_forward)(params, x))
    assert bool(jnp.allclose(out, ref, atol=2e-2, rtol=2e-2)), "mismatch vs reference"

    print("KERNEL_OK")
</pallas_src>

<mosaic_0001>
module attributes {stable_mosaic.version = 11 : i64} {
  func.func @_fused_kernel(%arg0: i32, %arg1: i32, %arg2: memref<1x24x16x2xbf16, #tpu.memory_space<vmem>>, %arg3: memref<18x32xbf16, #tpu.memory_space<vmem>>, %arg4: memref<1x32xf32, #tpu.memory_space<vmem>>, %arg5: memref<288x64xbf16, #tpu.memory_space<vmem>>, %arg6: memref<1x64xf32, #tpu.memory_space<vmem>>, %arg7: memref<576x32xbf16, #tpu.memory_space<vmem>>, %arg8: memref<1x32xf32, #tpu.memory_space<vmem>>, %arg9: memref<288x2xbf16, #tpu.memory_space<vmem>>, %arg10: memref<1x2xf32, #tpu.memory_space<vmem>>, %arg11: memref<1x2x16x16xf32, #tpu.memory_space<vmem>>) attributes {dimension_semantics = [#tpu.dimension_semantics<parallel>, #tpu.dimension_semantics<parallel>], iteration_bounds = array<i64: 2, 1>, scalar_prefetch = 0 : i64, scratch_operands = 0 : i64, tpu.core_type = #tpu.core_type<tc>, window_params = [{transform_indices = @transform_0, window_bounds = array<i64: 1, 24, 16, 2>}, {pipeline_mode = #tpu.pipeline_mode<synchronous>, transform_indices = @transform_1, window_bounds = array<i64: 18, 32>}, {pipeline_mode = #tpu.pipeline_mode<synchronous>, transform_indices = @transform_2, window_bounds = array<i64: 1, 32>}, {pipeline_mode = #tpu.pipeline_mode<synchronous>, transform_indices = @transform_3, window_bounds = array<i64: 288, 64>}, {pipeline_mode = #tpu.pipeline_mode<synchronous>, transform_indices = @transform_4, window_bounds = array<i64: 1, 64>}, {pipeline_mode = #tpu.pipeline_mode<synchronous>, transform_indices = @transform_5, window_bounds = array<i64: 576, 32>}, {pipeline_mode = #tpu.pipeline_mode<synchronous>, transform_indices = @transform_6, window_bounds = array<i64: 1, 32>}, {pipeline_mode = #tpu.pipeline_mode<synchronous>, transform_indices = @transform_7, window_bounds = array<i64: 288, 2>}, {pipeline_mode = #tpu.pipeline_mode<synchronous>, transform_indices = @transform_8, window_bounds = array<i64: 1, 2>}, {transform_indices = @transform_9, window_bounds = array<i64: 1, 2, 16, 16>}]} {
    %c16_i32 = arith.constant 16 : i32
    %0 = arith.muli %arg1, %c16_i32 : i32
    %c0 = arith.constant 0 : index
    %1 = arith.index_cast %0 : i32 to index
    %c0_0 = arith.constant 0 : index
    %c0_1 = arith.constant 0 : index
    %2 = vector.load %arg2[%c0, %1, %c0_0, %c0_1] : memref<1x24x16x2xbf16, #tpu.memory_space<vmem>>, vector<1x24x16x2xbf16>
    %3 = vector.shape_cast %2 : vector<1x24x16x2xbf16> to vector<24x16x2xbf16>
    %c0_2 = arith.constant 0 : index
    %c0_3 = arith.constant 0 : index
    %4 = vector.load %arg3[%c0_2, %c0_3] : memref<18x32xbf16, #tpu.memory_space<vmem>>, vector<18x32xbf16>
    %c0_4 = arith.constant 0 : index
    %c0_5 = arith.constant 0 : index
    %5 = vector.load %arg4[%c0_4, %c0_5] : memref<1x32xf32, #tpu.memory_space<vmem>>, vector<1x32xf32>
    %c3_i32 = arith.constant 3 : i32
    %6 = arith.subi %0, %c3_i32 : i32
    %cst = arith.constant 0.000000e+00 : bf16
    %7 = vector.broadcast %cst : bf16 to vector<24x1x2xbf16>
    %8 = tpu.concatenate %7, %3, %7 in 1 : vector<24x1x2xbf16>, vector<24x16x2xbf16>, vector<24x1x2xbf16> -> vector<24x18x2xbf16>
    %9 = vector.extract_strided_slice %8 {offsets = [0, 0, 0], sizes = [22, 16, 2], strides = [1, 1, 1]} : vector<24x18x2xbf16> to vector<22x16x2xbf16>
    %10 = vector.extract_strided_slice %8 {offsets = [0, 1, 0], sizes = [22, 16, 2], strides = [1, 1, 1]} : vector<24x18x2xbf16> to vector<22x16x2xbf16>
    %11 = vector.extract_strided_slice %8 {offsets = [0, 2, 0], sizes = [22, 16, 2], strides = [1, 1, 1]} : vector<24x18x2xbf16> to vector<22x16x2xbf16>
    %12 = vector.extract_strided_slice %8 {offsets = [1, 0, 0], sizes = [22, 16, 2], strides = [1, 1, 1]} : vector<24x18x2xbf16> to vector<22x16x2xbf16>
    %13 = vector.extract_strided_slice %8 {offsets = [1, 1, 0], sizes = [22, 16, 2], strides = [1, 1, 1]} : vector<24x18x2xbf16> to vector<22x16x2xbf16>
    %14 = vector.extract_strided_slice %8 {offsets = [1, 2, 0], sizes = [22, 16, 2], strides = [1, 1, 1]} : vector<24x18x2xbf16> to vector<22x16x2xbf16>
    %15 = vector.extract_strided_slice %8 {offsets = [2, 0, 0], sizes = [22, 16, 2], strides = [1, 1, 1]} : vector<24x18x2xbf16> to vector<22x16x2xbf16>
    %16 = vector.extract_strided_slice %8 {offsets = [2, 1, 0], sizes = [22, 16, 2], strides = [1, 1, 1]} : vector<24x18x2xbf16> to vector<22x16x2xbf16>
    %17 = vector.extract_strided_slice %8 {offsets = [2, 2, 0], sizes = [22, 16, 2], strides = [1, 1, 1]} : vector<24x18x2xbf16> to vector<22x16x2xbf16>
    %18 = tpu.concatenate %9, %10, %11, %12, %13, %14, %15, %16, %17 in 2 : vector<22x16x2xbf16>, vector<22x16x2xbf16>, vector<22x16x2xbf16>, vector<22x16x2xbf16>, vector<22x16x2xbf16>, vector<22x16x2xbf16>, vector<22x16x2xbf16>, vector<22x16x2xbf16>, vector<22x16x2xbf16> -> vector<22x16x18xbf16>
    %19 = vector.shape_cast %18 : vector<22x16x18xbf16> to vector<352x18xbf16>
    %cst_6 = arith.constant dense<0.000000e+00> : vector<352x32xf32>
    %20 = tpu.matmul %19, %4, %cst_6 {dimension_numbers = #tpu.dot_dimension_numbers<[1], [0], [0], [1], [0, 0, 1, 1], [], []>} : vector<352x18xbf16>, vector<18x32xbf16>, vector<352x32xf32> -> vector<352x32xf32>
    %21 = vector.broadcast %5 : vector<1x32xf32> to vector<352x32xf32>
    %22 = arith.addf %20, %21 : vector<352x32xf32>
    %cst_7 = arith.constant 0.000000e+00 : f32
    %23 = vector.broadcast %cst_7 : f32 to vector<352x32xf32>
    %24 = arith.maximumf %22, %23 : vector<352x32xf32>
    %25 = vector.shape_cast %24 : vector<352x32xf32> to vector<22x16x32xf32>
    %26 = tpu.iota {dimensions = array<i32: 0>} : vector<22x1x1xi32>
    %27 = vector.broadcast %6 : i32 to vector<22x1x1xi32>
    %28 = arith.addi %27, %26 : vector<22x1x1xi32>
    %c0_i32 = arith.constant 0 : i32
    %29 = vector.broadcast %c0_i32 : i32 to vector<22x1x1xi32>
    %30 = arith.cmpi sge, %28, %29 : vector<22x1x1xi32>
    %c16_i32_8 = arith.constant 16 : i32
    %31 = vector.broadcast %c16_i32_8 : i32 to vector<22x1x1xi32>
    %32 = arith.cmpi slt, %28, %31 : vector<22x1x1xi32>
    %33 = arith.andi %30, %32 : vector<22x1x1xi1>
    %cst_9 = arith.constant 0.000000e+00 : f32
    %34 = vector.shape_cast %33 : vector<22x1x1xi1> to vector<22x1x1xi1>
    %35 = vector.broadcast %34 : vector<22x1x1xi1> to vector<22x16x32xi1>
    %36 = vector.broadcast %cst_9 : f32 to vector<22x16x32xf32>
    %37 = arith.select %35, %25, %36 : vector<22x16x32xi1>, vector<22x16x32xf32>
    %38 = arith.truncf %37 : vector<22x16x32xf32> to vector<22x16x32xbf16>
    %c0_10 = arith.constant 0 : index
    %c0_11 = arith.constant 0 : index
    %39 = vector.load %arg5[%c0_10, %c0_11] : memref<288x64xbf16, #tpu.memory_space<vmem>>, vector<288x64xbf16>
    %c0_12 = arith.constant 0 : index
    %c0_13 = arith.constant 0 : index
    %40 = vector.load %arg6[%c0_12, %c0_13] : memref<1x64xf32, #tpu.memory_space<vmem>>, vector<1x64xf32>
    %c2_i32 = arith.constant 2 : i32
    %41 = arith.subi %0, %c2_i32 : i32
    %cst_14 = arith.constant 0.000000e+00 : bf16
    %42 = vector.broadcast %cst_14 : bf16 to vector<22x1x32xbf16>
    %43 = tpu.concatenate %42, %38, %42 in 1 : vector<22x1x32xbf16>, vector<22x16x32xbf16>, vector<22x1x32xbf16> -> vector<22x18x32xbf16>
    %44 = vector.extract_strided_slice %43 {offsets = [0, 0, 0], sizes = [20, 16, 32], strides = [1, 1, 1]} : vector<22x18x32xbf16> to vector<20x16x32xbf16>
    %45 = vector.extract_strided_slice %43 {offsets = [0, 1, 0], sizes = [20, 16, 32], strides = [1, 1, 1]} : vector<22x18x32xbf16> to vector<20x16x32xbf16>
    %46 = vector.extract_strided_slice %43 {offsets = [0, 2, 0], sizes = [20, 16, 32], strides = [1, 1, 1]} : vector<22x18x32xbf16> to vector<20x16x32xbf16>
    %47 = vector.extract_strided_slice %43 {offsets = [1, 0, 0], sizes = [20, 16, 32], strides = [1, 1, 1]} : vector<22x18x32xbf16> to vector<20x16x32xbf16>
    %48 = vector.extract_strided_slice %43 {offsets = [1, 1, 0], sizes = [20, 16, 32], strides = [1, 1, 1]} : vector<22x18x32xbf16> to vector<20x16x32xbf16>
    %49 = vector.extract_strided_slice %43 {offsets = [1, 2, 0], sizes = [20, 16, 32], strides = [1, 1, 1]} : vector<22x18x32xbf16> to vector<20x16x32xbf16>
    %50 = vector.extract_strided_slice %43 {offsets = [2, 0, 0], sizes = [20, 16, 32], strides = [1, 1, 1]} : vector<22x18x32xbf16> to vector<20x16x32xbf16>
    %51 = vector.extract_strided_slice %43 {offsets = [2, 1, 0], sizes = [20, 16, 32], strides = [1, 1, 1]} : vector<22x18x32xbf16> to vector<20x16x32xbf16>
    %52 = vector.extract_strided_slice %43 {offsets = [2, 2, 0], sizes = [20, 16, 32], strides = [1, 1, 1]} : vector<22x18x32xbf16> to vector<20x16x32xbf16>
    %53 = tpu.concatenate %44, %45, %46, %47, %48, %49, %50, %51, %52 in 2 : vector<20x16x32xbf16>, vector<20x16x32xbf16>, vector<20x16x32xbf16>, vector<20x16x32xbf16>, vector<20x16x32xbf16>, vector<20x16x32xbf16>, vector<20x16x32xbf16>, vector<20x16x32xbf16>, vector<20x16x32xbf16> -> vector<20x16x288xbf16>
    %54 = vector.shape_cast %53 : vector<20x16x288xbf16> to vector<320x288xbf16>
    %cst_15 = arith.constant dense<0.000000e+00> : vector<320x64xf32>
    %55 = tpu.matmul %54, %39, %cst_15 {dimension_numbers = #tpu.dot_dimension_numbers<[1], [0], [0], [1], [0, 0, 1, 1], [], []>} : vector<320x288xbf16>, vector<288x64xbf16>, vector<320x64xf32> -> vector<320x64xf32>
    %56 = vector.broadcast %40 : vector<1x64xf32> to vector<320x64xf32>
    %57 = arith.addf %55, %56 : vector<320x64xf32>
    %cst_16 = arith.constant 0.000000e+00 : f32
    %58 = vector.broadcast %cst_16 : f32 to vector<320x64xf32>
    %59 = arith.maximumf %57, %58 : vector<320x64xf32>
    %60 = vector.shape_cast %59 : vector<320x64xf32> to vector<20x16x64xf32>
    %61 = tpu.iota {dimensions = array<i32: 0>} : vector<20x1x1xi32>
    %62 = vector.broadcast %41 : i32 to vector<20x1x1xi32>
    %63 = arith.addi %62, %61 : vector<20x1x1xi32>
    %c0_i32_17 = arith.constant 0 : i32
    %64 = vector.broadcast %c0_i32_17 : i32 to vector<20x1x1xi32>
    %65 = arith.cmpi sge, %63, %64 : vector<20x1x1xi32>
    %c16_i32_18 = arith.constant 16 : i32
    %66 = vector.broadcast %c16_i32_18 : i32 to vector<20x1x1xi32>
    %67 = arith.cmpi slt, %63, %66 : vector<20x1x1xi32>
    %68 = arith.andi %65, %67 : vector<20x1x1xi1>
    %cst_19 = arith.constant 0.000000e+00 : f32
    %69 = vector.shape_cast %68 : vector<20x1x1xi1> to vector<20x1x1xi1>
    %70 = vector.broadcast %69 : vector<20x1x1xi1> to vector<20x16x64xi1>
    %71 = vector.broadcast %cst_19 : f32 to vector<20x16x64xf32>
    %72 = arith.select %70, %60, %71 : vector<20x16x64xi1>, vector<20x16x64xf32>
    %73 = arith.truncf %72 : vector<20x16x64xf32> to vector<20x16x64xbf16>
    %c0_20 = arith.constant 0 : index
    %c0_21 = arith.constant 0 : index
    %74 = vector.load %arg7[%c0_20, %c0_21] : memref<576x32xbf16, #tpu.memory_space<vmem>>, vector<576x32xbf16>
    %c0_22 = arith.constant 0 : index
    %c0_23 = arith.constant 0 : index
    %75 = vector.load %arg8[%c0_22, %c0_23] : memref<1x32xf32, #tpu.memory_space<vmem>>, vector<1x32xf32>
    %c1_i32 = arith.constant 1 : i32
    %76 = arith.subi %0, %c1_i32 : i32
    %cst_24 = arith.constant 0.000000e+00 : bf16
    %77 = vector.broadcast %cst_24 : bf16 to vector<20x1x64xbf16>
    %78 = tpu.concatenate %77, %73, %77 in 1 : vector<20x1x64xbf16>, vector<20x16x64xbf16>, vector<20x1x64xbf16> -> vector<20x18x64xbf16>
    %79 = vector.extract_strided_slice %78 {offsets = [0, 0, 0], sizes = [18, 16, 64], strides = [1, 1, 1]} : vector<20x18x64xbf16> to vector<18x16x64xbf16>
    %80 = vector.extract_strided_slice %78 {offsets = [0, 1, 0], sizes = [18, 16, 64], strides = [1, 1, 1]} : vector<20x18x64xbf16> to vector<18x16x64xbf16>
    %81 = vector.extract_strided_slice %78 {offsets = [0, 2, 0], sizes = [18, 16, 64], strides = [1, 1, 1]} : vector<20x18x64xbf16> to vector<18x16x64xbf16>
    %82 = vector.extract_strided_slice %78 {offsets = [1, 0, 0], sizes = [18, 16, 64], strides = [1, 1, 1]} : vector<20x18x64xbf16> to vector<18x16x64xbf16>
    %83 = vector.extract_strided_slice %78 {offsets = [1, 1, 0], sizes = [18, 16, 64], strides = [1, 1, 1]} : vector<20x18x64xbf16> to vector<18x16x64xbf16>
    %84 = vector.extract_strided_slice %78 {offsets = [1, 2, 0], sizes = [18, 16, 64], strides = [1, 1, 1]} : vector<20x18x64xbf16> to vector<18x16x64xbf16>
    %85 = vector.extract_strided_slice %78 {offsets = [2, 0, 0], sizes = [18, 16, 64], strides = [1, 1, 1]} : vector<20x18x64xbf16> to vector<18x16x64xbf16>
    %86 = vector.extract_strided_slice %78 {offsets = [2, 1, 0], sizes = [18, 16, 64], strides = [1, 1, 1]} : vector<20x18x64xbf16> to vector<18x16x64xbf16>
    %87 = vector.extract_strided_slice %78 {offsets = [2, 2, 0], sizes = [18, 16, 64], strides = [1, 1, 1]} : vector<20x18x64xbf16> to vector<18x16x64xbf16>
    %88 = tpu.concatenate %79, %80, %81, %82, %83, %84, %85, %86, %87 in 2 : vector<18x16x64xbf16>, vector<18x16x64xbf16>, vector<18x16x64xbf16>, vector<18x16x64xbf16>, vector<18x16x64xbf16>, vector<18x16x64xbf16>, vector<18x16x64xbf16>, vector<18x16x64xbf16>, vector<18x16x64xbf16> -> vector<18x16x576xbf16>
    %89 = vector.shape_cast %88 : vector<18x16x576xbf16> to vector<288x576xbf16>
    %cst_25 = arith.constant dense<0.000000e+00> : vector<288x32xf32>
    %90 = tpu.matmul %89, %74, %cst_25 {dimension_numbers = #tpu.dot_dimension_numbers<[1], [0], [0], [1], [0, 0, 1, 1], [], []>} : vector<288x576xbf16>, vector<576x32xbf16>, vector<288x32xf32> -> vector<288x32xf32>
    %91 = vector.broadcast %75 : vector<1x32xf32> to vector<288x32xf32>
    %92 = arith.addf %90, %91 : vector<288x32xf32>
    %cst_26 = arith.constant 0.000000e+00 : f32
    %93 = vector.broadcast %cst_26 : f32 to vector<288x32xf32>
    %94 = arith.maximumf %92, %93 : vector<288x32xf32>
    %95 = vector.shape_cast %94 : vector<288x32xf32> to vector<18x16x32xf32>
    %96 = tpu.iota {dimensions = array<i32: 0>} : vector<18x1x1xi32>
    %97 = vector.broadcast %76 : i32 to vector<18x1x1xi32>
    %98 = arith.addi %97, %96 : vector<18x1x1xi32>
    %c0_i32_27 = arith.constant 0 : i32
    %99 = vector.broadcast %c0_i32_27 : i32 to vector<18x1x1xi32>
    %100 = arith.cmpi sge, %98, %99 : vector<18x1x1xi32>
    %c16_i32_28 = arith.constant 16 : i32
    %101 = vector.broadcast %c16_i32_28 : i32 to vector<18x1x1xi32>
    %102 = arith.cmpi slt, %98, %101 : vector<18x1x1xi32>
    %103 = arith.andi %100, %102 : vector<18x1x1xi1>
    %cst_29 = arith.constant 0.000000e+00 : f32
    %104 = vector.shape_cast %103 : vector<18x1x1xi1> to vector<18x1x1xi1>
    %105 = vector.broadcast %104 : vector<18x1x1xi1> to vector<18x16x32xi1>
    %106 = vector.broadcast %cst_29 : f32 to vector<18x16x32xf32>
    %107 = arith.select %105, %95, %106 : vector<18x16x32xi1>, vector<18x16x32xf32>
    %108 = arith.truncf %107 : vector<18x16x32xf32> to vector<18x16x32xbf16>
    %c0_30 = arith.constant 0 : index
    %c0_31 = arith.constant 0 : index
    %109 = vector.load %arg9[%c0_30, %c0_31] : memref<288x2xbf16, #tpu.memory_space<vmem>>, vector<288x2xbf16>
    %c0_32 = arith.constant 0 : index
    %c0_33 = arith.constant 0 : index
    %110 = vector.load %arg10[%c0_32, %c0_33] : memref<1x2xf32, #tpu.memory_space<vmem>>, vector<1x2xf32>
    %cst_34 = arith.constant 0.000000e+00 : bf16
    %111 = vector.broadcast %cst_34 : bf16 to vector<18x1x32xbf16>
    %112 = tpu.concatenate %111, %108, %111 in 1 : vector<18x1x32xbf16>, vector<18x16x32xbf16>, vector<18x1x32xbf16> -> vector<18x18x32xbf16>
    %113 = vector.extract_strided_slice %112 {offsets = [0, 0, 0], sizes = [16, 16, 32], strides = [1, 1, 1]} : vector<18x18x32xbf16> to vector<16x16x32xbf16>
    %114 = vector.extract_strided_slice %112 {offsets = [0, 1, 0], sizes = [16, 16, 32], strides = [1, 1, 1]} : vector<18x18x32xbf16> to vector<16x16x32xbf16>
    %115 = vector.extract_strided_slice %112 {offsets = [0, 2, 0], sizes = [16, 16, 32], strides = [1, 1, 1]} : vector<18x18x32xbf16> to vector<16x16x32xbf16>
    %116 = vector.extract_strided_slice %112 {offsets = [1, 0, 0], sizes = [16, 16, 32], strides = [1, 1, 1]} : vector<18x18x32xbf16> to vector<16x16x32xbf16>
    %117 = vector.extract_strided_slice %112 {offsets = [1, 1, 0], sizes = [16, 16, 32], strides = [1, 1, 1]} : vector<18x18x32xbf16> to vector<16x16x32xbf16>
    %118 = vector.extract_strided_slice %112 {offsets = [1, 2, 0], sizes = [16, 16, 32], strides = [1, 1, 1]} : vector<18x18x32xbf16> to vector<16x16x32xbf16>
    %119 = vector.extract_strided_slice %112 {offsets = [2, 0, 0], sizes = [16, 16, 32], strides = [1, 1, 1]} : vector<18x18x32xbf16> to vector<16x16x32xbf16>
    %120 = vector.extract_strided_slice %112 {offsets = [2, 1, 0], sizes = [16, 16, 32], strides = [1, 1, 1]} : vector<18x18x32xbf16> to vector<16x16x32xbf16>
    %121 = vector.extract_strided_slice %112 {offsets = [2, 2, 0], sizes = [16, 16, 32], strides = [1, 1, 1]} : vector<18x18x32xbf16> to vector<16x16x32xbf16>
    %122 = tpu.concatenate %113, %114, %115, %116, %117, %118, %119, %120, %121 in 2 : vector<16x16x32xbf16>, vector<16x16x32xbf16>, vector<16x16x32xbf16>, vector<16x16x32xbf16>, vector<16x16x32xbf16>, vector<16x16x32xbf16>, vector<16x16x32xbf16>, vector<16x16x32xbf16>, vector<16x16x32xbf16> -> vector<16x16x288xbf16>
    %123 = vector.shape_cast %122 : vector<16x16x288xbf16> to vector<256x288xbf16>
    %cst_35 = arith.constant dense<0.000000e+00> : vector<256x2xf32>
    %124 = tpu.matmul %123, %109, %cst_35 {dimension_numbers = #tpu.dot_dimension_numbers<[1], [0], [0], [1], [0, 0, 1, 1], [], []>} : vector<256x288xbf16>, vector<288x2xbf16>, vector<256x2xf32> -> vector<256x2xf32>
    %125 = vector.broadcast %110 : vector<1x2xf32> to vector<256x2xf32>
    %126 = arith.addf %124, %125 : vector<256x2xf32>
    %127 = vector.shape_cast %126 : vector<256x2xf32> to vector<16x16x2xf32>
    %128 = vector.extract_strided_slice %127 {offsets = [0, 0, 0], sizes = [16, 16, 1], strides = [1, 1, 1]} : vector<16x16x2xf32> to vector<16x16x1xf32>
    %129 = vector.shape_cast %128 : vector<16x16x1xf32> to vector<16x16xf32>
    %c0_36 = arith.constant 0 : index
    %c0_37 = arith.constant 0 : index
    %c0_38 = arith.constant 0 : index
    %c0_39 = arith.constant 0 : index
    %130 = vector.load %arg11[%c0_36, %c0_37, %c0_38, %c0_39] : memref<1x2x16x16xf32, #tpu.memory_space<vmem>>, vector<1x1x16x16xf32>
    %131 = vector.shape_cast %130 : vector<1x1x16x16xf32> to vector<16x16xf32>
    %132 = vector.shape_cast %129 : vector<16x16xf32> to vector<1x1x16x16xf32>
    tpu.vector_store %arg11[%c0_36, %c0_37, %c0_38, %c0_39], %132 {strides = array<i32>} : memref<1x2x16x16xf32, #tpu.memory_space<vmem>>, vector<1x1x16x16xf32>,
    %133 = vector.extract_strided_slice %127 {offsets = [0, 0, 1], sizes = [16, 16, 1], strides = [1, 1, 1]} : vector<16x16x2xf32> to vector<16x16x1xf32>
    %134 = vector.shape_cast %133 : vector<16x16x1xf32> to vector<16x16xf32>
    %c0_40 = arith.constant 0 : index
    %c1 = arith.constant 1 : index
    %c0_41 = arith.constant 0 : index
    %c0_42 = arith.constant 0 : index
    %135 = vector.load %arg11[%c0_40, %c1, %c0_41, %c0_42] : memref<1x2x16x16xf32, #tpu.memory_space<vmem>>, vector<1x1x16x16xf32>
    %136 = vector.shape_cast %135 : vector<1x1x16x16xf32> to vector<16x16xf32>
    %137 = vector.shape_cast %134 : vector<16x16xf32> to vector<1x1x16x16xf32>
    tpu.vector_store %arg11[%c0_40, %c1, %c0_41, %c0_42], %137 {strides = array<i32>} : memref<1x2x16x16xf32, #tpu.memory_space<vmem>>, vector<1x1x16x16xf32>,
    return
  }
  func.func @transform_0(%arg0: i32, %arg1: i32) -> (i32, i32, i32, i32) {
    %c0_i32 = arith.constant 0 : i32
    %c0_i32_0 = arith.constant 0 : i32
    %c0_i32_1 = arith.constant 0 : i32
    %c0_i32_2 = arith.constant 0 : i32
    return %arg0, %c0_i32, %c0_i32_0, %c0_i32_1 : i32, i32, i32, i32
  }
  func.func @transform_1(%arg0: i32, %arg1: i32) -> (i32, i32) {
    %c0_i32 = arith.constant 0 : i32
    %c0_i32_0 = arith.constant 0 : i32
    %c0_i32_1 = arith.constant 0 : i32
    return %c0_i32, %c0_i32_0 : i32, i32
  }
  func.func @transform_2(%arg0: i32, %arg1: i32) -> (i32, i32) {
    %c0_i32 = arith.constant 0 : i32
    %c0_i32_0 = arith.constant 0 : i32
    %c0_i32_1 = arith.constant 0 : i32
    return %c0_i32, %c0_i32_0 : i32, i32
  }
  func.func @transform_3(%arg0: i32, %arg1: i32) -> (i32, i32) {
    %c0_i32 = arith.constant 0 : i32
    %c0_i32_0 = arith.constant 0 : i32
    %c0_i32_1 = arith.constant 0 : i32
    return %c0_i32, %c0_i32_0 : i32, i32
  }
  func.func @transform_4(%arg0: i32, %arg1: i32) -> (i32, i32) {
    %c0_i32 = arith.constant 0 : i32
    %c0_i32_0 = arith.constant 0 : i32
    %c0_i32_1 = arith.constant 0 : i32
    return %c0_i32, %c0_i32_0 : i32, i32
  }
  func.func @transform_5(%arg0: i32, %arg1: i32) -> (i32, i32) {
    %c0_i32 = arith.constant 0 : i32
    %c0_i32_0 = arith.constant 0 : i32
    %c0_i32_1 = arith.constant 0 : i32
    return %c0_i32, %c0_i32_0 : i32, i32
  }
  func.func @transform_6(%arg0: i32, %arg1: i32) -> (i32, i32) {
    %c0_i32 = arith.constant 0 : i32
    %c0_i32_0 = arith.constant 0 : i32
    %c0_i32_1 = arith.constant 0 : i32
    return %c0_i32, %c0_i32_0 : i32, i32
  }
  func.func @transform_7(%arg0: i32, %arg1: i32) -> (i32, i32) {
    %c0_i32 = arith.constant 0 : i32
    %c0_i32_0 = arith.constant 0 : i32
    %c0_i32_1 = arith.constant 0 : i32
    return %c0_i32, %c0_i32_0 : i32, i32
  }
  func.func @transform_8(%arg0: i32, %arg1: i32) -> (i32, i32) {
    %c0_i32 = arith.constant 0 : i32
    %c0_i32_0 = arith.constant 0 : i32
    %c0_i32_1 = arith.constant 0 : i32
    return %c0_i32, %c0_i32_0 : i32, i32
  }
  func.func @transform_9(%arg0: i32, %arg1: i32) -> (i32, i32, i32, i32) {
    %c0_i32 = arith.constant 0 : i32
    %c0_i32_0 = arith.constant 0 : i32
    %c0_i32_1 = arith.constant 0 : i32
    return %arg0, %c0_i32, %arg1, %c0_i32_0 : i32, i32, i32, i32
  }
}

</mosaic_0001>

<bundles_post_ra>
// kernel: mri_recon_forward.1
= control target key start
LH: loop header
LB: loop body
LE: loop exit
PB: predicated region body
PF: predicated region fallthrough
CT: control target
= control target key end

     0   :  { %14 = vsyncpa [#allocation3], 0  ;;  %s13447_s0 = inlined_call_operand.vmem [shape: bf16[2,24,16,2], index: 0, kind: input, shape index: {}]   ;;  %s13448_s1 = inlined_call_operand.vmem [shape: bf16[18,32], index: 1, kind: input, shape index: {}]   ;;  %s13449_s2 = inlined_call_operand.vmem [shape: f32[1,32], index: 2, kind: input, shape index: {}]   ;;  %s13450_s3 = inlined_call_operand.vmem [shape: bf16[288,64], index: 3, kind: input, shape index: {}]   ;;  %s13451_s4 = inlined_call_operand.vmem [shape: f32[1,64], index: 4, kind: input, shape index: {}]   ;;  %s13452_s5 = inlined_call_operand.vmem [shape: bf16[576,32], index: 5, kind: input, shape index: {}]   ;;  %s13453_s6 = inlined_call_operand.vmem [shape: f32[1,32], index: 6, kind: input, shape index: {}]   ;;  %s13454_s7 = inlined_call_operand.vmem [shape: bf16[288,2], index: 7, kind: input, shape index: {}]   ;;  %s13455_s8 = inlined_call_operand.vmem [shape: f32[1,2], index: 8, kind: input, shape index: {}]   ;;  %s13456_s9 = inlined_call_operand.hbm [shape: f32[2,2,16,16], index: 9, kind: output, shape index: {}]  }
   0x1   :  { %16 = vsyncpa [#allocation3 + $0x1], 0  ;;  %s9513_s30 = smov 0   ;;  %s9515_s10 = smov 0  }
   0x2   :  { %s9517_s11 = smov 0   ;;  %s9519_s12 = smov 0  }
   0x3   :  { %s9521_s13 = smov 0   ;;  %s9523_s14 = smov 0  }
   0x4 LB: > { %s8452_s15 = sadd.s32 4294967295, %s9446_s14   ;;  %s8453_s16 = sadd.s32 4294967294, %s9446_s14   ;;  %s9446_s14 = sphi %s9523_s14, %s22_s14   ;;  %s9442_s13 = sphi %s9521_s13, %s13534_s13   ;;  %s9438_s12 = sphi %s9519_s12, %s13533_s12   ;;  %s9434_s11 = sphi %s9517_s11, %s13532_s11   ;;  %s9430_s10 = sphi %s9515_s10, %s13531_s10   ;;  %s9426_s30 = sphi %s9513_s30, %s13530_s30  }
   0x5   : > { %s34_s17 = sadd.s32 1, %s9442_s13  ;;  %s237_s18 = sadd.s32 1, %s9434_s11 }
   0x6   : > { %p36_p0 = scmp.ge.s32.totalorder %s34_s17, 2  ;;  %p247_p1 = scmp.ne.s32.totalorder %s9434_s11, %s9430_s10 }
   0x7   : > { %p248_p2 = scmp.eq.s32.totalorder %s8452_s15, 1  ;;  %p253_p3 = scmp.ne.s32.totalorder %s9430_s10, %s9426_s30 }
   0x8   : > { %s13536_s17 = smov (%p36_p0, %s34_s17), 0  ;;  %p254_p5 = scmp.eq.s32.totalorder %s8453_s16, 1 }
   0x9   : > { %p9553_p4 = por %p248_p2, %p247_p1  ;;  %s232_s20 = ssub.s32 %s9442_s13, %s13536_s17 }
   0xa   : > { %p8456_p6 = scmp.ge.s32.totalorder %s9446_s14, 1  ;;  %p235_p7 = scmp.eq.s32.totalorder %s232_s20, 0 }
   0xb   : > { %p9560_p8 = por %p254_p5, %p253_p3  ;;  %p304_p9 = scmp.lt.s32.totalorder %s9446_s14, 3 }
   0xc   : > { %s9566_s22 = scalar_select %p235_p7, %s9434_s11, %s237_s18  }
   0xd   : > { %p305_p10 = pnand %p8456_p6, %p304_p9 }
   0xf   : > { %308 = sbr.rel (%p305_p10) target bundleno = 2391 (0x957), region = 56 }
  0x16   : > { %p340_p11 = scmp.lt.s32.totalorder %s9438_s12, 1  ;;  %vm741_vm0 = vsmask.f32 256  ;;  %vm740_vm1 = vcmask 1040384   ;;  %v13484_v9 = vmov 0  ;;  %vm1144_vm3 = vcmask 1046528  }
  0x17   : > { %vm9580_vm2 = vmand %vm740_vm1, %vm741_vm0  ;;  %s9448_s28 = smov 6   ;;  %s9449_s29 = smov 12   ;;  %vm791_vm4 = vsmask.f32 7424  ;;  %v9279_v56 = vld [vmem:[%s13448_s1] sm:$0xff]   ;;  %vm1553_vm5 = vcmask 15360  }
  0x18   : > { %s341_s23 = scalar_select %p340_p11, %s9438_s12, 1  ;;  %v13485_v9 = vsel %vm9580_vm2, 4294967295, %v13484_v9  ;;  %8843 = vmatprep.subr.bf16.mxu1 %v9279_v56  ;;  %vm1598_vm6 = vcmask 31744   ;;  %vm1643_vm7 = vcmask 48128   ;;  %vm1688_vm8 = vcmask 64512  }
  0x19   : > { %13486 = vst [vmem:[#allocation5_spill] sm:$0xff] %v13485_v9  ;;  %s9450_s15 = smov 4   ;;  %s9451_s16 = smov 10   ;;  %8844 = vmatpush3.bf16.msra.mxu1 %v9279_v56  ;;  %vm1733_vm9 = vcmask 80896   ;;  %vm1778_vm10 = vcmask 97280   ;;  %vm1823_vm11 = vcmask 113664  }
  0x1a   : > { %s9116_s24 = smul.u32 192, %s341_s23  ;;  %s9452_s23 = smov 2   ;;  %vm1868_vm12 = vcmask 130048   ;;  %vm1928_vm13 = vcmask 146432   ;;  %vm3322_vm14 = vcmask 261120   ;;  %vm3363_vm15 = vcmask 523264  }
  0x1b   : > { %s9453_s26 = smov 8   ;;  %s9454_s18 = smov 14   ;;  %vm3404_vm0 = vcmask 785408  }
  0x1c   : > { %s9573_s27 = scalar_lea.vmem %s13447_s0, %s9116_s24  ;;  %s9455_s20 = smov 16  }
  0x1d   : > { %v9268_v0 = vld [vmem:[%s9573_s27 + $0x10] sm:$0xff]   ;;  %v9269_v1 = vld [vmem:[%s9573_s27 + $0x8] sm:$0xff]   ;;  %v9270_v6 = vld [vmem:[%s9573_s27 + $0x18] sm:$0xff]   ;;  %s9457_s25 = smov 32  }
  0x1e   : > { %v539_v2 = vshrl.u32 %v9268_v0, 16  ;;  %v542_v3 = vshll.u32 %v9268_v0, 16  ;;  %v532_v4 = vshrl.u32 %v9269_v1, 16  ;;  %v535_v5 = vshll.u32 %v9269_v1, 16  ;;  %v9271_v7 = vld [vmem:[%s9573_s27] sm:$0xff]  }
  0x1f   : > { %v546_v11 = vshrl.u32 %v9270_v6, 16  ;;  %v549_v12 = vshll.u32 %v9270_v6, 16  ;;  %v525_v13 = vshrl.u32 %v9271_v7, 16  ;;  %v528_v15 = vshll.u32 %v9271_v7, 16  ;;  %v9272_v55 = vld [vmem:[%s9573_s27 + $0x20] sm:$0xff]  }
  0x20   : > { %v541_v8 = vrot.slane %v539_v2, 7  ;;  %v534_v10 = vrot.slane %v532_v4, 7  ;;  %v553_v0 = vshrl.u32 %v9272_v55, 16  ;;  %v9280_v1 = vld [vmem:[%s13448_s1 + $0x8] ss:$0 sps:$4 sm:$0x11]  }
  0x21   : > { %v548_v17 = vrot.slane %v546_v11, 7  ;;  %v527_v19 = vrot.slane %v525_v13, 7  ;;  %v556_v6 = vshll.u32 %v9272_v55, 16  ;;  %9115 = vmatprep.subr.msk.bf16.mxu1 %vm740_vm1, %v9280_v1 }
  0x22   : > { %v544_v14 = vor.u32 %v542_v3, %v541_v8  ;;  %v537_v16 = vor.u32 %v535_v5, %v534_v10  ;;  %v768_v18 = vsel %vm9580_vm2, %v534_v10, 0  ;;  %v769_v35 = vsel %vm9580_vm2, %v541_v8, 0  ;;  %v9273_v10 = vld [vmem:[%s9573_s27 + $0x28] sm:$0xff]  }
  0x23   : > { %v551_v22 = vor.u32 %v549_v12, %v548_v17  ;;  %v530_v23 = vor.u32 %v528_v15, %v527_v19  ;;  %v767_v24 = vsel %vm9580_vm2, %v527_v19, 0  ;;  %v1149_v26 = vrot.slane %v768_v18, 1 }
  0x24   : > { %v9588_v20 = vsel %vm9580_vm2, 0, %v544_v14  ;;  %v9594_v21 = vsel %vm9580_vm2, 0, %v537_v16  ;;  %v1146_v27 = vrot.slane %v767_v24, 1  ;;  %v800_v30 = vshll.u32 %v767_v24, 16 }
  0x25   : > { %1258 = vrot.lane.b32.xlu1 %v9588_v20, %s9448_s28  ;;  %1256 = vrot.lane.b32.xlu0 %v9594_v21, %s9448_s28  ;;  %v1148_v25 = vrot.slane %v9594_v21, 1  ;;  %v9603_v28 = vsel %vm9580_vm2, 0, %v551_v22  ;;  %v9607_v29 = vsel %vm9580_vm2, 0, %v530_v23  ;;  %v807_v31 = vshll.u32 %v9594_v21, 16 }
  0x26   : > { %v1145_v32 = vrot.slane %v9607_v29, 1  ;;  %v793_v33 = vshrl.u32 %v9607_v29, 16  ;;  %v795_v34 = vshll.u32 %v9607_v29, 16  ;;  %v812_v38 = vshll.u32 %v768_v18, 16 }
  0x27   : > { %v819_v39 = vshll.u32 %v9588_v20, 16  ;;  %v1150_v40 = vsel %vm1144_vm3, %v1148_v25, %v1149_v26  ;;  %v802_v41 = vrot.slane %v800_v30, 1  ;;  %v805_v42 = vshrl.u32 %v9594_v21, 16 }
  0x28   : > { %v1147_v36 = vsel %vm1144_vm3, %v1145_v32, %v1146_v27  ;;  %v797_v37 = vrot.slane %v795_v34, 1  ;;  %v809_v43 = vrot.slane %v807_v31, 1  ;;  %v1151_v45 = vrot.slane %v9588_v20, 1  ;;  %v9274_v32 = vld [vmem:[%s9573_s27 + $0x30] sm:$0xff]  }
  0x29   : > { %1407 = vrot.lane.b32.xlu1 %v9603_v28, %s9449_s29  ;;  %1405 = vrot.lane.b32.xlu0 %v9588_v20, %s9449_s29  ;;  %v1152_v46 = vrot.slane %v769_v35, 1  ;;  %v817_v47 = vshrl.u32 %v9588_v20, 16  ;;  %v824_v48 = vshll.u32 %v769_v35, 16  ;;  %v821_v49 = vrot.slane %v819_v39, 1 }
  0x2a   : > { %v798_v44 = vor.u32 %v797_v37, %v793_v33  ;;  %v831_v50 = vshll.u32 %v9603_v28, 16  ;;  %v810_v52 = vor.u32 %v809_v43, %v805_v42  ;;  %v814_v53 = vrot.slane %v812_v38, 1 }
  0x2b   : > { %v770_v54 = vsel %vm9580_vm2, %v548_v17, 0  ;;  %v1153_v57 = vsel %vm1144_vm3, %v1151_v45, %v1152_v46  ;;  %v829_v58 = vshrl.u32 %v9603_v28, 16  ;;  %v822_v59 = vor.u32 %v821_v49, %v817_v47  ;;  %v9275_v46 = vld [vmem:[%s9573_s27 + $0x38] sm:$0xff]  }
  0x2c   : > { %v803_v51 = vsel %vm791_vm4, %v798_v44, %v802_v41  ;;  %v826_v60 = vrot.slane %v824_v48, 1  ;;  %v833_v61 = vrot.slane %v831_v50, 1  ;;  %v836_v62 = vshll.u32 %v770_v54, 16 }
  0x2d   : > { %1211 = vrot.lane.b32.xlu1 %v1147_v36, %s9450_s15  ;;  %1360 = vrot.lane.b32.xlu0 %v1150_v40, %s9451_s16  ;;  %v815_v63 = vsel %vm791_vm4, %v810_v52, %v814_v53  ;;  %v555_v5 = vrot.slane %v553_v0, 7  ;;  %v1154_v11 = vrot.slane %v9603_v28, 1  ;;  %v1155_v12 = vrot.slane %v770_v54, 1 }
  0x2e   : > { %v827_v2 = vsel %vm791_vm4, %v822_v59, %v826_v60  ;;  %v834_v3 = vor.u32 %v833_v61, %v829_v58  ;;  %v838_v4 = vrot.slane %v836_v62, 1  ;;  %v560_v14 = vshrl.u32 %v9273_v10, 16 }
  0x2f   : > { %v558_v8 = vor.u32 %v556_v6, %v555_v5  ;;  %v771_v15 = vsel %vm9580_vm2, %v555_v5, 0  ;;  %v1156_v17 = vsel %vm1144_vm3, %v1154_v11, %v1155_v12  ;;  %v563_v19 = vshll.u32 %v9273_v10, 16 }
  0x30   : > { %v839_v7 = vsel %vm791_vm4, %v834_v3, %v838_v4  ;;  %v562_v18 = vrot.slane %v560_v14, 7  ;;  %v848_v22 = vshll.u32 %v771_v15, 16  ;;  %v1975_v30 = vsel %vm740_vm1, %v9280_v1, 0 }
  0x31   : > { %1213 = vrot.lane.b32.xlu1 %v1150_v40, %s9450_s15  ;;  %1056 = vrot.lane.b32.xlu0 %v803_v51, %s9452_s23  ;;  %v9656_v13 = vsel %vm9580_vm2, 0, %v558_v8  ;;  %v1158_v33 = vrot.slane %v771_v15, 1  ;;  %v567_v38 = vshrl.u32 %v9274_v32, 16  ;;  %v570_v44 = vshll.u32 %v9274_v32, 16 }
  0x32   : > { %v843_v16 = vshll.u32 %v9656_v13, 16  ;;  %v841_v23 = vshrl.u32 %v9656_v13, 16  ;;  %v565_v25 = vor.u32 %v563_v19, %v562_v18  ;;  %v850_v27 = vrot.slane %v848_v22, 1  ;;  %8846 = vmatpush3.bf16.msra.mxu1 %v1975_v30 }
  0x33   : > { %v1157_v35 = vrot.slane %v9656_v13, 1  ;;  %v772_v36 = vsel %vm9580_vm2, %v562_v18, 0  ;;  %v569_v43 = vrot.slane %v567_v38, 7  ;;  %v574_v51 = vshrl.u32 %v9275_v46, 16 }
  0x34   : > { %v845_v24 = vrot.slane %v843_v16, 1  ;;  %v9672_v31 = vsel %vm9580_vm2, 0, %v565_v25  ;;  %v860_v39 = vshll.u32 %v772_v36, 16  ;;  %v1161_v50 = vrot.slane %v772_v36, 1 }
  0x35   : > { %1362 = vrot.lane.b32.xlu1 %v1153_v57, %s9451_s16  ;;  %1058 = vrot.lane.b32.xlu0 %v815_v63, %s9452_s23  ;;  %v855_v37 = vshll.u32 %v9672_v31, 16  ;;  %v1159_v40 = vsel %vm1144_vm3, %v1157_v35, %v1158_v33  ;;  %v853_v41 = vshrl.u32 %v9672_v31, 16  ;;  %v572_v48 = vor.u32 %v570_v44, %v569_v43 }
  0x36   : > { %v846_v26 = vor.u32 %v845_v24, %v841_v23  ;;  %v862_v45 = vrot.slane %v860_v39, 1  ;;  %v1160_v52 = vrot.slane %v9672_v31, 1  ;;  %v773_v54 = vsel %vm9580_vm2, %v569_v43, 0 }
  0x37   : > { %v857_v42 = vrot.slane %v855_v37, 1  ;;  %v9699_v53 = vsel %vm9580_vm2, 0, %v572_v48  ;;  %v576_v56 = vrot.slane %v574_v51, 7  ;;  %v872_v61 = vshll.u32 %v773_v54, 16  ;;  %v9278_v48 = vld [vmem:[%s9573_s27 + $0x50] sm:$0xff]  }
  0x38   : > { %v851_v34 = vsel %vm791_vm4, %v846_v26, %v850_v27  ;;  %v867_v55 = vshll.u32 %v9699_v53, 16  ;;  %v1162_v58 = vsel %vm1144_vm3, %v1160_v52, %v1161_v50  ;;  %v865_v59 = vshrl.u32 %v9699_v53, 16 }
  0x39   : > { %1314 = vrot.lane.b32.xlu1 %v827_v2, %s9453_s26  ;;  %1312 = vrot.lane.b32.xlu0 %v815_v63, %s9453_s26  ;;  %v858_v47 = vor.u32 %v857_v42, %v853_v41  ;;  %v874_v0 = vrot.slane %v872_v61, 1  ;;  %v774_v3 = vsel %vm9580_vm2, %v576_v56, 0  ;;  %v1164_v5 = vrot.slane %v773_v54, 1 }
  0x3a   : > { %v869_v60 = vrot.slane %v867_v55, 1  ;;  %v884_v8 = vshll.u32 %v774_v3, 16  ;;  %v1167_v23 = vrot.slane %v774_v3, 1  ;;  %v595_v54 = vshrl.u32 %v9278_v48, 16  ;;  %v9281_v3 = vld [vmem:[%s9573_s27 + $0x58] sm:$0xff]  }
  0x3b   : > { %v863_v49 = vsel %vm791_vm4, %v858_v47, %v862_v45  ;;  %vm7940_vm1 = vcmask 130112  }
  0x3c   : > { %v870_v63 = vor.u32 %v869_v60, %v865_v59  ;;  %v886_v16 = vrot.slane %v884_v8, 1  ;;  %v598_v59 = vshll.u32 %v9278_v48, 16  ;;  %v602_v8 = vshrl.u32 %v9281_v3, 16 }
  0x3d   : > { %1463 = vrot.lane.b32.xlu1 %v839_v7, %s9454_s18  ;;  %1461 = vrot.lane.b32.xlu0 %v827_v2, %s9454_s18 }
  0x3e   : > { %v875_v4 = vsel %vm791_vm4, %v870_v63, %v874_v0 }
  0x41   : > { %1060 = vrot.lane.b32.xlu1 %v827_v2, %s9452_s23  ;;  %1509 = vrot.lane.b32.xlu0 %v1153_v57, %s9455_s20  ;;  %v1163_v2 = vrot.slane %v9699_v53, 1 }
  0x43   : > { %v1165_v10 = vsel %vm1144_vm3, %v1163_v2, %v1164_v5 }
  0x45   : > { %1062 = vrot.lane.b32.xlu1 %v839_v7, %s9452_s23  ;;  %1511 = vrot.lane.b32.xlu0 %v1156_v17, %s9455_s20 }
  0x49   : > { %1217 = vrot.lane.b32.xlu1 %v1156_v17, %s9450_s15  ;;  %1215 = vrot.lane.b32.xlu0 %v1153_v57, %s9450_s15  ;;  %v577_v57 = vshll.u32 %v9275_v46, 16 }
  0x4b   : > { %v579_v62 = vor.u32 %v577_v57, %v576_v56 }
  0x4d   : > { %1262 = vrot.lane.b32.xlu1 %v9656_v13, %s9448_s28  ;;  %1260 = vrot.lane.b32.xlu0 %v9603_v28, %s9448_s28  ;;  %v9716_v1 = vsel %vm9580_vm2, 0, %v579_v62 }
  0x4e   : > { %v879_v6 = vshll.u32 %v9716_v1, 16  ;;  %v877_v11 = vshrl.u32 %v9716_v1, 16  ;;  %v1166_v22 = vrot.slane %v9716_v1, 1 }
  0x50   : > { %v881_v12 = vrot.slane %v879_v6, 1  ;;  %v1168_v30 = vsel %vm1144_vm3, %v1166_v22, %v1167_v23 }
  0x51   : > { %1318 = vrot.lane.b32.xlu1 %v851_v34, %s9453_s26  ;;  %1316 = vrot.lane.b32.xlu0 %v839_v7, %s9453_s26  ;;  %v9276_v7 = vld [vmem:[%s9573_s27 + $0x40] sm:$0xff]  }
  0x52   : > { %v581_v14 = vshrl.u32 %v9276_v7, 16  ;;  %v882_v15 = vor.u32 %v881_v12, %v877_v11  ;;  %v584_v19 = vshll.u32 %v9276_v7, 16 }
  0x54   : > { %v583_v18 = vrot.slane %v581_v14, 7  ;;  %v887_v24 = vsel %vm791_vm4, %v882_v15, %v886_v16  ;;  %v604_v15 = vrot.slane %v602_v8, 7  ;;  %v605_v16 = vshll.u32 %v9281_v3, 16 }
  0x55   : > { %1366 = vrot.lane.b32.xlu1 %v1159_v40, %s9451_s16  ;;  %1364 = vrot.lane.b32.xlu0 %v1156_v17, %s9451_s16  ;;  %v9277_v17 = vld [vmem:[%s9573_s27 + $0x48] sm:$0xff]  }
  0x56   : > { %v586_v25 = vor.u32 %v584_v19, %v583_v18  ;;  %v588_v26 = vshrl.u32 %v9277_v17, 16  ;;  %v591_v27 = vshll.u32 %v9277_v17, 16  ;;  %v775_v33 = vsel %vm9580_vm2, %v583_v18, 0 }
  0x57   : > { %v896_v36 = vshll.u32 %v775_v33, 16  ;;  %v1170_v45 = vrot.slane %v775_v33, 1  ;;  %v778_v48 = vsel %vm9580_vm2, %v604_v15, 0 }
  0x58   : > { %v9746_v32 = vsel %vm9580_vm2, 0, %v586_v25  ;;  %v590_v35 = vrot.slane %v588_v26, 7  ;;  %v607_v25 = vor.u32 %v605_v16, %v604_v15 }
  0x59   : > { %1411 = vrot.lane.b32.xlu1 %v9672_v31, %s9449_s29  ;;  %1409 = vrot.lane.b32.xlu0 %v9656_v13, %s9449_s29  ;;  %v889_v37 = vshrl.u32 %v9746_v32, 16  ;;  %v898_v41 = vrot.slane %v896_v36, 1  ;;  %v1169_v44 = vrot.slane %v9746_v32, 1 }
  0x5a   : > { %v593_v39 = vor.u32 %v591_v27, %v590_v35  ;;  %v776_v47 = vsel %vm9580_vm2, %v590_v35, 0  ;;  %v9820_v36 = vsel %vm9580_vm2, 0, %v607_v25 }
  0x5b   : > { %v908_v52 = vshll.u32 %v776_v47, 16  ;;  %v1173_v63 = vrot.slane %v776_v47, 1 }
  0x5c   : > { %v9760_v42 = vsel %vm9580_vm2, 0, %v593_v39 }
  0x5d   : > { %1467 = vrot.lane.b32.xlu1 %v863_v49, %s9454_s18  ;;  %1465 = vrot.lane.b32.xlu0 %v851_v34, %s9454_s18  ;;  %v903_v46 = vshll.u32 %v9760_v42, 16  ;;  %v901_v50 = vshrl.u32 %v9760_v42, 16  ;;  %v910_v56 = vrot.slane %v908_v52, 1  ;;  %v1172_v62 = vrot.slane %v9760_v42, 1 }
  0x5f   : > { %v905_v51 = vrot.slane %v903_v46, 1  ;;  %v9793_v5 = vsel %vm1144_vm3, %v1172_v62, %v1173_v63 }
  0x61   : > { %1064 = vrot.lane.b32.xlu1 %v851_v34, %s9452_s23  ;;  %1513 = vrot.lane.b32.xlu0 %v1159_v40, %s9455_s20  ;;  %v891_v34 = vshll.u32 %v9746_v32, 16  ;;  %v906_v55 = vor.u32 %v905_v51, %v901_v50 }
  0x63   : > { %v893_v38 = vrot.slane %v891_v34, 1  ;;  %v9783_v61 = vsel %vm791_vm4, %v906_v55, %v910_v56  ;;  %v925_v55 = vshrl.u32 %v9820_v36, 16 }
  0x65   : > { %1066 = vrot.lane.b32.xlu1 %v863_v49, %s9452_s23  ;;  %1515 = vrot.lane.b32.xlu0 %v1162_v58, %s9455_s20 }
  0x69   : > { %1221 = vrot.lane.b32.xlu1 %v1162_v58, %s9450_s15  ;;  %1219 = vrot.lane.b32.xlu0 %v1159_v40, %s9450_s15  ;;  %v894_v40 = vor.u32 %v893_v38, %v889_v37 }
  0x6b   : > { %v899_v43 = vsel %vm791_vm4, %v894_v40, %v898_v41 }
  0x6d   : > { %1266 = vrot.lane.b32.xlu1 %v9699_v53, %s9448_s28  ;;  %1264 = vrot.lane.b32.xlu0 %v9672_v31, %s9448_s28 }
  0x71   : > { %1322 = vrot.lane.b32.xlu1 %v875_v4, %s9453_s26  ;;  %1320 = vrot.lane.b32.xlu0 %v863_v49, %s9453_s26  ;;  %v1171_v49 = vsel %vm1144_vm3, %v1169_v44, %v1170_v45  ;;  %v927_v45 = vshll.u32 %v9820_v36, 16 }
  0x73   : > { %v929_v56 = vrot.slane %v927_v45, 1 }
  0x75   : > { %1370 = vrot.lane.b32.xlu1 %v1165_v10, %s9451_s16  ;;  %1368 = vrot.lane.b32.xlu0 %v1162_v58, %s9451_s16  ;;  %v597_v58 = vrot.slane %v595_v54, 7 }
  0x77   : > { %v600_v2 = vor.u32 %v598_v59, %v597_v58  ;;  %v777_v14 = vsel %vm9580_vm2, %v597_v58, 0 }
  0x78   : > { %v920_v23 = vshll.u32 %v777_v14, 16  ;;  %v1176_v41 = vrot.slane %v777_v14, 1  ;;  %v1179_v14 = vrot.slane %v778_v48, 1 }
  0x79   : > { %1415 = vrot.lane.b32.xlu1 %v9716_v1, %s9449_s29  ;;  %1413 = vrot.lane.b32.xlu0 %v9699_v53, %s9449_s29  ;;  %v9797_v7 = vsel %vm9580_vm2, 0, %v600_v2 }
  0x7a   : > { %v915_v11 = vshll.u32 %v9797_v7, 16  ;;  %v913_v19 = vshrl.u32 %v9797_v7, 16  ;;  %v922_v34 = vrot.slane %v920_v23, 1  ;;  %v1175_v40 = vrot.slane %v9797_v7, 1 }
  0x7c   : > { %v917_v22 = vrot.slane %v915_v11, 1  ;;  %v1177_v52 = vsel %vm1144_vm3, %v1175_v40, %v1176_v41 }
  0x7d   : > { %1471 = vrot.lane.b32.xlu1 %v887_v24, %s9454_s18  ;;  %1469 = vrot.lane.b32.xlu0 %v875_v4, %s9454_s18 }
  0x7e   : > { %v918_v33 = vor.u32 %v917_v22, %v913_v19 }
  0x80   : > { %v923_v44 = vsel %vm791_vm4, %v918_v33, %v922_v34 }
  0x81   : > { %1519 = vrot.lane.b32.xlu1 %v1168_v30, %s9455_s20  ;;  %1517 = vrot.lane.b32.xlu0 %v1165_v10, %s9455_s20 }
  0x85   : > { %1070 = vrot.lane.b32.xlu1 %v887_v24, %s9452_s23  ;;  %1068 = vrot.lane.b32.xlu0 %v875_v4, %s9452_s23 }
  0x89   : > { %1225 = vrot.lane.b32.xlu1 %v1168_v30, %s9450_s15  ;;  %1223 = vrot.lane.b32.xlu0 %v1165_v10, %s9450_s15 }
  0x8d   : > { %1270 = vrot.lane.b32.xlu1 %v9746_v32, %s9448_s28  ;;  %1268 = vrot.lane.b32.xlu0 %v9716_v1, %s9448_s28 }
  0x91   : > { %1326 = vrot.lane.b32.xlu1 %v899_v43, %s9453_s26  ;;  %1324 = vrot.lane.b32.xlu0 %v887_v24, %s9453_s26 }
  0x95   : > { %1374 = vrot.lane.b32.xlu1 %v1171_v49, %s9451_s16  ;;  %1372 = vrot.lane.b32.xlu0 %v1168_v30, %s9451_s16 }
  0x97   : > { %v1259_v57 = vpop.permute.xlu1 %1258  ;;  %v1257_v60 = vpop.permute.xlu0 %1256 }
  0x99   : > { %1419 = vrot.lane.b32.xlu1 %v9760_v42, %s9449_s29  ;;  %1417 = vrot.lane.b32.xlu0 %v9746_v32, %s9449_s29 }
  0x9b   : > { %v9786_v0 = vpop.permute.xlu1 %1407  ;;  %v1406_v4 = vpop.permute.xlu0 %1405 }
  0x9d   : > { %1475 = vrot.lane.b32.xlu1 %v9783_v61, %s9454_s18  ;;  %1473 = vrot.lane.b32.xlu0 %v899_v43, %s9454_s18 }
  0x9f   : > { %v1212_v6 = vpop.permute.xlu1 %1211  ;;  %v1361_v10 = vpop.permute.xlu0 %1360 }
  0xa1   : > { %1523 = vrot.lane.b32.xlu1 %v9793_v5, %s9455_s20  ;;  %1521 = vrot.lane.b32.xlu0 %v1171_v49, %s9455_s20 }
  0xa3   : > { %v1214_v12 = vpop.permute.xlu1 %1213  ;;  %v1057_v17 = vpop.permute.xlu0 %1056 }
  0xa4   : > { %v1555_v18 = vsel %vm1553_vm5, %v9607_v29, %v1057_v17  ;;  %v9283_v17 = vld [vmem:[%s9573_s27 + $0x68] sm:$0xff]  }
  0xa5   : > { %1074 = vrot.lane.b32.xlu1 %v9783_v61, %s9452_s23  ;;  %1072 = vrot.lane.b32.xlu0 %v899_v43, %s9452_s23  ;;  %v1600_v27 = vsel %vm1598_vm6, %v1555_v18, %v1212_v6  ;;  %v619_v33 = vshll.u32 %v9283_v17, 16 }
  0xa6   : > { %v1645_v37 = vsel %vm1643_vm7, %v1600_v27, %v1257_v60 }
  0xa7   : > { %v1363_v24 = vpop.permute.xlu1 %1362  ;;  %v1059_v26 = vpop.permute.xlu0 %1058 }
  0xa8   : > { %v1557_v30 = vsel %vm1553_vm5, %v9594_v21, %v1059_v26 }
  0xa9   : > { %1229 = vrot.lane.b32.xlu1 %v9793_v5, %s9450_s15  ;;  %v1602_v29 = vsel %vm1598_vm6, %v1557_v30, %v1214_v12  ;;  %1227 = vrot.lane.b32.xlu0 %v1171_v49, %s9450_s15  ;;  %v9282_v49 = vld [vmem:[%s9573_s27 + $0x60] sm:$0xff]   ;;  %v1178_v12 = vrot.slane %v9820_v36, 1 }
  0xaa   : > { %v1647_v21 = vsel %vm1643_vm7, %v1602_v29, %v1259_v57  ;;  %v932_v57 = vshll.u32 %v778_v48, 16  ;;  %v609_v59 = vshrl.u32 %v9282_v49, 16  ;;  %v612_v8 = vshll.u32 %v9282_v49, 16 }
  0xab   : > { %v1315_v35 = vpop.permute.xlu1 %1314  ;;  %v1313_v38 = vpop.permute.xlu0 %1312  ;;  %v1180_v19 = vsel %vm1144_vm3, %v1178_v12, %v1179_v14 }
  0xac   : > { %v1690_v39 = vsel %vm1688_vm8, %v1645_v37, %v1313_v38  ;;  %v1692_v46 = vsel %vm1688_vm8, %v1647_v21, %v1315_v35  ;;  %v934_v3 = vrot.slane %v932_v57, 1  ;;  %v611_v6 = vrot.slane %v609_v59, 7 }
  0xad   : > { %1274 = vrot.lane.b32.xlu1 %v9797_v7, %s9448_s28  ;;  %v1735_v43 = vsel %vm1733_vm9, %v1690_v39, %v1361_v10  ;;  %1272 = vrot.lane.b32.xlu0 %v9760_v42, %s9448_s28  ;;  %v1737_v54 = vsel %vm1733_vm9, %v1692_v46, %v1363_v24  ;;  %v616_v24 = vshrl.u32 %v9283_v17, 16 }
  0xae   : > { %v1780_v51 = vsel %vm1778_vm10, %v1735_v43, %v1406_v4  ;;  %v1782_v63 = vsel %vm1778_vm10, %v1737_v54, %v9786_v0  ;;  %v614_v16 = vor.u32 %v612_v8, %v611_v6  ;;  %v779_v30 = vsel %vm9580_vm2, %v611_v6, 0 }
  0xaf   : > { %v1464_v47 = vpop.permute.xlu1 %1463  ;;  %v1462_v50 = vpop.permute.xlu0 %1461  ;;  %v618_v29 = vrot.slane %v616_v24, 7  ;;  %v944_v37 = vshll.u32 %v779_v30, 16  ;;  %v1182_v48 = vrot.slane %v779_v30, 1 }
  0xb0   : > { %v1825_v60 = vsel %vm1823_vm11, %v1780_v51, %v1462_v50  ;;  %v1827_v10 = vsel %vm1823_vm11, %v1782_v63, %v1464_v47  ;;  %v9869_v23 = vsel %vm9580_vm2, 0, %v614_v16 }
  0xb1   : > { %1330 = vrot.lane.b32.xlu1 %v923_v44, %s9453_s26  ;;  %1328 = vrot.lane.b32.xlu0 %v9783_v61, %s9453_s26  ;;  %v930_v61 = vor.u32 %v929_v56, %v925_v55  ;;  %v939_v26 = vshll.u32 %v9869_v23, 16  ;;  %v937_v35 = vshrl.u32 %v9869_v23, 16  ;;  %v621_v39 = vor.u32 %v619_v33, %v618_v29  ;;  %v9284_v56 = vld [vmem:[%s9573_s27 + $0x70] sm:$0xff]  }
  0xb2   : > { %v946_v43 = vrot.slane %v944_v37, 1  ;;  %v1181_v47 = vrot.slane %v9869_v23, 1  ;;  %v780_v51 = vsel %vm9580_vm2, %v618_v29, 0 }
  0xb3   : > { %v1061_v58 = vpop.permute.xlu1 %1060  ;;  %v1510_v62 = vpop.permute.xlu0 %1509  ;;  %v941_v21 = vrot.slane %v939_v26, 1  ;;  %v9883_v46 = vsel %vm9580_vm2, 0, %v621_v39  ;;  %v1185_v30 = vrot.slane %v780_v51, 1 }
  0xb4   : > { %v1870_v2 = vsel %vm1868_vm12, %v1825_v60, %v1510_v62  ;;  %v1559_v49 = vsel %vm1553_vm5, %v9588_v20, %v1061_v58  ;;  %v1183_v58 = vsel %vm1144_vm3, %v1181_v47, %v1182_v48  ;;  %v956_v60 = vshll.u32 %v780_v51, 16 }
  0xb5   : > { %1378 = vrot.lane.b32.xlu1 %v1177_v52, %s9451_s16  ;;  %1376 = vrot.lane.b32.xlu0 %v9793_v5, %s9451_s16  ;;  %v935_v5 = vsel %vm791_vm4, %v930_v61, %v934_v3  ;;  %v942_v41 = vor.u32 %v941_v21, %v937_v35 }
  0xb6   : > { %8847 = vmatprep.mubr.msk.bf16.mxu1 %vm1928_vm13, %v1870_v2  ;;  %v949_v2 = vshrl.u32 %v9883_v46, 16 }
  0xb7   : > { %v9852_v4 = vpop.permute.xlu1 %1062  ;;  %v1512_v11 = vpop.permute.xlu0 %1511  ;;  %v9893_v50 = vsel %vm791_vm4, %v942_v41, %v946_v43 }
  0xb8   : > { %v1872_v0 = vsel %vm1868_vm12, %v1827_v10, %v1512_v11  ;;  %v1561_v62 = vsel %vm1553_vm5, %v9603_v28, %v9852_v4  ;;  %v623_v10 = vshrl.u32 %v9284_v56, 16 }
  0xb9   : > { %1423 = vrot.lane.b32.xlu1 %v9820_v36, %s9449_s29  ;;  %1421 = vrot.lane.b32.xlu0 %v9797_v7, %s9449_s29 }
  0xba   : > { %8848 = vmatmul.mubr.msk.bf16.vlgmr.msra.gmra.mrb[0].mxu1 %vm1928_vm13, %v1872_v0 }
  0xbb   : > { %v1218_v15 = vpop.permute.xlu1 %1217  ;;  %v1216_v18 = vpop.permute.xlu0 %1215 }
  0xbc   : > { %v1604_v54 = vsel %vm1598_vm6, %v1559_v49, %v1216_v18  ;;  %v1606_v3 = vsel %vm1598_vm6, %v1561_v62, %v1218_v15  ;;  %v958_v15 = vrot.slane %v956_v60, 1  ;;  %v625_v18 = vrot.slane %v623_v10, 7 }
  0xbd   : > { %1479 = vrot.lane.b32.xlu1 %v935_v5, %s9454_s18  ;;  %1477 = vrot.lane.b32.xlu0 %v923_v44, %s9454_s18 }
  0xbf   : > { %v1263_v22 = vpop.permute.xlu1 %1262  ;;  %v1261_v25 = vpop.permute.xlu0 %1260 }
  0xc0   : > { %v1649_v57 = vsel %vm1643_vm7, %v1604_v54, %v1261_v25  ;;  %v1651_v11 = vsel %vm1643_vm7, %v1606_v3, %v1263_v22  ;;  %v626_v22 = vshll.u32 %v9284_v56, 16 }
  0xc1   : > { %1527 = vrot.lane.b32.xlu1 %v1180_v19, %s9455_s20  ;;  %1525 = vrot.lane.b32.xlu0 %v1177_v52, %s9455_s20 }
  0xc2   : > { %v628_v33 = vor.u32 %v626_v22, %v625_v18 }
  0xc3   : > { %v1319_v27 = vpop.permute.xlu1 %1318  ;;  %v1317_v34 = vpop.permute.xlu0 %1316 }
  0xc4   : > { %v1694_v20 = vsel %vm1688_vm8, %v1649_v57, %v1317_v34  ;;  %v1696_v28 = vsel %vm1688_vm8, %v1651_v11, %v1319_v27  ;;  %v1184_v27 = vrot.slane %v9883_v46, 1  ;;  %v9285_v34 = vld [vmem:[%s9573_s27 + $0x78] sm:$0xff]  }
  0xc5   : > { %1078 = vrot.lane.b32.xlu1 %v935_v5, %s9452_s23  ;;  %1076 = vrot.lane.b32.xlu0 %v923_v44, %s9452_s23  ;;  %v630_v39 = vshrl.u32 %v9285_v34, 16  ;;  %v633_v47 = vshll.u32 %v9285_v34, 16 }
  0xc6   : > { %v9938_v21 = vsel %vm1144_vm3, %v1184_v27, %v1185_v30 }
  0xc7   : > { %v1367_v38 = vpop.permute.xlu1 %1366  ;;  %v1365_v40 = vpop.permute.xlu0 %1364 }
  0xc8   : > { %v1739_v63 = vsel %vm1733_vm9, %v1694_v20, %v1365_v40 }
  0xc9   : > { %1233 = vrot.lane.b32.xlu1 %v1180_v19, %s9450_s15  ;;  %1231 = vrot.lane.b32.xlu0 %v1177_v52, %s9450_s15  ;;  %v951_v52 = vshll.u32 %v9883_v46, 16 }
  0xcb   : > { %v1412_v45 = vpop.permute.xlu1 %1411  ;;  %v1410_v44 = vpop.permute.xlu0 %1409  ;;  %v953_v61 = vrot.slane %v951_v52, 1 }
  0xcc   : > { %v1784_v6 = vsel %vm1778_vm10, %v1739_v63, %v1410_v44  ;;  %v632_v44 = vrot.slane %v630_v39, 7 }
  0xcd   : > { %1278 = vrot.lane.b32.xlu1 %v9869_v23, %s9448_s28  ;;  %1276 = vrot.lane.b32.xlu0 %v9820_v36, %s9448_s28  ;;  %v954_v14 = vor.u32 %v953_v61, %v949_v2 }
  0xcf   : > { %v1468_v55 = vpop.permute.xlu1 %1467  ;;  %v1466_v59 = vpop.permute.xlu0 %1465 }
  0xd0   : > { %v1829_v0 = vsel %vm1823_vm11, %v1784_v6, %v1466_v59 }
  0xd1   : > { %1334 = vrot.lane.b32.xlu1 %v9893_v50, %s9453_s26  ;;  %1332 = vrot.lane.b32.xlu0 %v935_v5, %s9453_s26  ;;  %v1741_v5 = vsel %vm1733_vm9, %v1696_v28, %v1367_v38  ;;  %v9942_v38 = vsel %vm9580_vm2, 0, %v628_v33 }
  0xd2   : > { %v1786_v16 = vsel %vm1778_vm10, %v1741_v5, %v1412_v45  ;;  %v963_v41 = vshll.u32 %v9942_v38, 16  ;;  %v781_v45 = vsel %vm9580_vm2, %v625_v18, 0  ;;  %v961_v49 = vshrl.u32 %v9942_v38, 16 }
  0xd3   : > { %v9913_v8 = vpop.permute.xlu1 %1064  ;;  %v1514_v12 = vpop.permute.xlu0 %1513  ;;  %v1831_v24 = vsel %vm1823_vm11, %v1786_v16, %v1468_v55  ;;  %v968_v52 = vshll.u32 %v781_v45, 16  ;;  %v635_v55 = vor.u32 %v633_v47, %v632_v44  ;;  %v1187_v63 = vrot.slane %v9942_v38, 1 }
  0xd4   : > { %v1874_v4 = vsel %vm1868_vm12, %v1829_v0, %v1514_v12  ;;  %v965_v51 = vrot.slane %v963_v41, 1  ;;  %v1188_v2 = vrot.slane %v781_v45, 1  ;;  %v782_v0 = vsel %vm9580_vm2, %v632_v44, 0  ;;  %v9286_v12 = vld [vmem:[%s9573_s27 + $0x80] sm:$0xff]  }
  0xd5   : > { %1382 = vrot.lane.b32.xlu1 %v1183_v58, %s9451_s16  ;;  %1380 = vrot.lane.b32.xlu0 %v1180_v19, %s9451_s16  ;;  %v959_v19 = vsel %vm791_vm4, %v954_v14, %v958_v15  ;;  %v970_v59 = vrot.slane %v968_v52, 1  ;;  %v9959_v60 = vsel %vm9580_vm2, 0, %v635_v55  ;;  %v980_v22 = vshll.u32 %v782_v0, 16 }
  0xd6   : > { %8851 = vmatprep.mubr.msk.bf16.mxu1 %vm1928_vm13, %v1874_v4  ;;  %v966_v57 = vor.u32 %v965_v51, %v961_v49  ;;  %v975_v6 = vshll.u32 %v9959_v60, 16  ;;  %v1189_v14 = vsel %vm1144_vm3, %v1187_v63, %v1188_v2  ;;  %v973_v15 = vshrl.u32 %v9959_v60, 16 }
  0xd7   : > { %v1067_v17 = vpop.permute.xlu1 %1066  ;;  %v1516_v25 = vpop.permute.xlu0 %1515  ;;  %v637_v27 = vshrl.u32 %v9286_v12, 16  ;;  %v1191_v45 = vrot.slane %v782_v0, 1 }
  0xd8   : > { %v1876_v26 = vsel %vm1868_vm12, %v1831_v24, %v1516_v25  ;;  %v1565_v62 = vsel %vm1553_vm5, %v9672_v31, %v1067_v17  ;;  %v971_v3 = vsel %vm791_vm4, %v966_v57, %v970_v59  ;;  %v977_v18 = vrot.slane %v975_v6, 1 }
  0xd9   : > { %1427 = vrot.lane.b32.xlu1 %v9883_v46, %s9449_s29  ;;  %1425 = vrot.lane.b32.xlu0 %v9869_v23, %s9449_s29  ;;  %v639_v39 = vrot.slane %v637_v27, 7 }
  0xda   : > { %8852 = vmatmul.mubr.msk.bf16.gmra.mrb[4].mxu1 %vm1928_vm13, %v1876_v26 }
  0xdb   : > { %v1222_v29 = vpop.permute.xlu1 %1221  ;;  %v1220_v35 = vpop.permute.xlu0 %1219 }
  0xdc   : > { %v1610_v61 = vsel %vm1598_vm6, %v1565_v62, %v1222_v29 }
  0xdd   : > { %1483 = vrot.lane.b32.xlu1 %v959_v19, %s9454_s18  ;;  %1481 = vrot.lane.b32.xlu0 %v9893_v50, %s9454_s18 }
  0xdf   : > { %v1267_v37 = vpop.permute.xlu1 %1266  ;;  %v1265_v40 = vpop.permute.xlu0 %1264 }
  0xe0   : > { %v1655_v10 = vsel %vm1643_vm7, %v1610_v61, %v1267_v37 }
  0xe1   : > { %1531 = vrot.lane.b32.xlu1 %v9938_v21, %s9455_s20  ;;  %1529 = vrot.lane.b32.xlu0 %v1183_v58, %s9455_s20 }
  0xe3   : > { %v1323_v43 = vpop.permute.xlu1 %1322  ;;  %v1321_v48 = vpop.permute.xlu0 %1320 }
  0xe5   : > { %1082 = vrot.lane.b32.xlu1 %v959_v19, %s9452_s23  ;;  %1080 = vrot.lane.b32.xlu0 %v9893_v50, %s9452_s23 }
  0xe7   : > { %v1371_v54 = vpop.permute.xlu1 %1370  ;;  %v1369_v56 = vpop.permute.xlu0 %1368 }
  0xe9   : > { %1237 = vrot.lane.b32.xlu1 %v9938_v21, %s9450_s15  ;;  %1235 = vrot.lane.b32.xlu0 %v1183_v58, %s9450_s15  ;;  %v1563_v58 = vsel %vm1553_vm5, %v9656_v13, %v9913_v8  ;;  %v1700_v8 = vsel %vm1688_vm8, %v1655_v10, %v1323_v43 }
  0xea   : > { %v1608_v31 = vsel %vm1598_vm6, %v1563_v58, %v1220_v35  ;;  %v1745_v5 = vsel %vm1733_vm9, %v1700_v8, %v1371_v54  ;;  %v982_v35 = vrot.slane %v980_v22, 1 }
  0xeb   : > { %v1416_v20 = vpop.permute.xlu1 %1415  ;;  %v1414_v50 = vpop.permute.xlu0 %1413  ;;  %v1653_v13 = vsel %vm1643_vm7, %v1608_v31, %v1265_v40  ;;  %v640_v40 = vshll.u32 %v9286_v12, 16 }
  0xec   : > { %v1698_v4 = vsel %vm1688_vm8, %v1653_v13, %v1321_v48  ;;  %v1790_v17 = vsel %vm1778_vm10, %v1745_v5, %v1416_v20  ;;  %v9287_v48 = vld [vmem:[%s9573_s27 + $0x88] sm:$0xff]   ;;  %v783_v20 = vsel %vm9580_vm2, %v639_v39, 0 }
  0xed   : > { %1282 = vrot.lane.b32.xlu1 %v9942_v38, %s9448_s28  ;;  %1280 = vrot.lane.b32.xlu0 %v9883_v46, %s9448_s28  ;;  %v1743_v16 = vsel %vm1733_vm9, %v1698_v4, %v1369_v56  ;;  %v642_v47 = vor.u32 %v640_v40, %v639_v39  ;;  %v644_v55 = vshrl.u32 %v9287_v48, 16  ;;  %v647_v62 = vshll.u32 %v9287_v48, 16 }
  0xee   : > { %v1788_v24 = vsel %vm1778_vm10, %v1743_v16, %v1414_v50  ;;  %v992_v61 = vshll.u32 %v783_v20, 16  ;;  %v1194_v4 = vrot.slane %v783_v20, 1 }
  0xef   : > { %v1472_v11 = vpop.permute.xlu1 %1471  ;;  %v1470_v28 = vpop.permute.xlu0 %1469  ;;  %v10013_v54 = vsel %vm9580_vm2, 0, %v642_v47  ;;  %v646_v50 = vrot.slane %v644_v55, 7 }
  0xf0   : > { %v1835_v25 = vsel %vm1823_vm11, %v1790_v17, %v1472_v11  ;;  %v1833_v30 = vsel %vm1823_vm11, %v1788_v24, %v1470_v28  ;;  %v987_v57 = vshll.u32 %v10013_v54, 16  ;;  %v985_v2 = vshrl.u32 %v10013_v54, 16  ;;  %v9288_v24 = vld [vmem:[%s9573_s27 + $0x90] sm:$0xff]  }
  0xf1   : > { %1338 = vrot.lane.b32.xlu1 %v971_v3, %s9453_s26  ;;  %1336 = vrot.lane.b32.xlu0 %v959_v19, %s9453_s26  ;;  %v978_v19 = vor.u32 %v977_v18, %v973_v15  ;;  %v649_v31 = vor.u32 %v647_v62, %v646_v50  ;;  %v994_v0 = vrot.slane %v992_v61, 1  ;;  %v1193_v28 = vrot.slane %v10013_v54, 1 }
  0xf2   : > { %v989_v58 = vrot.slane %v987_v57, 1  ;;  %v784_v22 = vsel %vm9580_vm2, %v646_v50, 0 }
  0xf3   : > { %v1520_v26 = vpop.permute.xlu1 %1519  ;;  %v1518_v33 = vpop.permute.xlu0 %1517  ;;  %v983_v43 = vsel %vm791_vm4, %v978_v19, %v982_v35  ;;  %v10029_v13 = vsel %vm9580_vm2, 0, %v649_v31  ;;  %v1197_v20 = vrot.slane %v784_v22, 1 }
  0xf4   : > { %v1880_v29 = vsel %vm1868_vm12, %v1835_v25, %v1520_v26  ;;  %v1878_v34 = vsel %vm1868_vm12, %v1833_v30, %v1518_v33  ;;  %v990_v11 = vor.u32 %v989_v58, %v985_v2  ;;  %v999_v16 = vshll.u32 %v10029_v13, 16 }
  0xf5   : > { %1386 = vrot.lane.b32.xlu1 %v1189_v14, %s9451_s16  ;;  %1384 = vrot.lane.b32.xlu0 %v9938_v21, %s9451_s16  ;;  %v1190_v21 = vrot.slane %v9959_v60, 1  ;;  %v997_v33 = vshrl.u32 %v10029_v13, 16 }
  0xf6   : > { %8855 = vmatprep.mubr.msk.bf16.mxu1 %vm1928_vm13, %v1878_v34  ;;  %v10042_v15 = vsel %vm791_vm4, %v990_v11, %v994_v0  ;;  %v1001_v35 = vrot.slane %v999_v16, 1 }
  0xf7   : > { %8856 = vmatmul.mubr.msk.bf16.gmra.mrb[8].mxu1 %vm1928_vm13, %v1880_v29  ;;  %v1071_v37 = vpop.permute.xlu1 %1070  ;;  %v1069_v41 = vpop.permute.xlu0 %1068  ;;  %v10009_v51 = vsel %vm1144_vm3, %v1190_v21, %v1191_v45  ;;  %v1195_v29 = vsel %vm1144_vm3, %v1193_v28, %v1194_v4  ;;  %v651_v21 = vshrl.u32 %v9288_v24, 16  ;;  %v13458_v28 = vmov 0  }
  0xf8   : > { %v1569_v8 = vsel %vm1553_vm5, %v9716_v1, %v1071_v37  ;;  %v1567_v5 = vsel %vm1553_vm5, %v9699_v53, %v1069_v41  ;;  %v1004_v37 = vshll.u32 %v784_v22, 16  ;;  %3799 = vmatprep.subr.bf16.mxu1 %v13458_v28  ;;  %9226 = vset.pattern.permute.xlu1 %v13458_v28 }
  0xf9   : > { %1431 = vrot.lane.b32.xlu1 %v9959_v60, %s9449_s29  ;;  %1429 = vrot.lane.b32.xlu0 %v9942_v38, %s9449_s29  ;;  %v653_v55 = vrot.slane %v651_v21, 7 }
  0xfa   : > { %9228 = vset.pattern.permute.xlu0 %v13458_v28 }
  0xfb   : > { %v1226_v44 = vpop.permute.xlu1 %1225  ;;  %v1224_v49 = vpop.permute.xlu0 %1223 }
  0xfc   : > { %v1612_v1 = vsel %vm1598_vm6, %v1567_v5, %v1224_v49  ;;  %v1006_v49 = vrot.slane %v1004_v37, 1 }
  0xfd   : > { %1487 = vrot.lane.b32.xlu1 %v983_v43, %s9454_s18  ;;  %1485 = vrot.lane.b32.xlu0 %v971_v3, %s9454_s18 }
  0xff   : > { %v1271_v52 = vpop.permute.xlu1 %1270  ;;  %v1269_v56 = vpop.permute.xlu0 %1268 }
 0x100   : > { %v1657_v53 = vsel %vm1643_vm7, %v1612_v1, %v1269_v56  ;;  %v654_v56 = vshll.u32 %v9288_v24, 16 }
 0x101   : > { %1535 = vrot.lane.b32.xlu1 %v10009_v51, %s9455_s20  ;;  %1533 = vrot.lane.b32.xlu0 %v1189_v14, %s9455_s20 }
 0x102   : > { %v656_v62 = vor.u32 %v654_v56, %v653_v55 }
 0x103   : > { %v1327_v59 = vpop.permute.xlu1 %1326  ;;  %v1325_v63 = vpop.permute.xlu0 %1324 }
 0x104   : > { %v1702_v27 = vsel %vm1688_vm8, %v1657_v53, %v1325_v63  ;;  %v9289_v63 = vld [vmem:[%s9573_s27 + $0x98] sm:$0xff]  }
 0x105   : > { %1086 = vrot.lane.b32.xlu1 %v983_v43, %s9452_s23  ;;  %1084 = vrot.lane.b32.xlu0 %v971_v3, %s9452_s23  ;;  %v658_v31 = vshrl.u32 %v9289_v63, 16 }
 0x107   : > { %v1375_v6 = vpop.permute.xlu1 %1374  ;;  %v1373_v10 = vpop.permute.xlu0 %1372 }
 0x108   : > { %v1747_v34 = vsel %vm1733_vm9, %v1702_v27, %v1373_v10 }
 0x109   : > { %1241 = vrot.lane.b32.xlu1 %v10009_v51, %s9450_s15  ;;  %1239 = vrot.lane.b32.xlu0 %v1189_v14, %s9450_s15  ;;  %v1614_v14 = vsel %vm1598_vm6, %v1569_v8, %v1226_v44  ;;  %v661_v8 = vshll.u32 %v9289_v63, 16 }
 0x10a   : > { %v1659_v17 = vsel %vm1643_vm7, %v1614_v14, %v1271_v52 }
 0x10b   : > { %v1420_v12 = vpop.permute.xlu1 %1419  ;;  %v1418_v3 = vpop.permute.xlu0 %1417  ;;  %v1704_v25 = vsel %vm1688_vm8, %v1659_v17, %v1327_v59 }
 0x10c   : > { %v1749_v30 = vsel %vm1733_vm9, %v1704_v25, %v1375_v6  ;;  %v1792_v39 = vsel %vm1778_vm10, %v1747_v34, %v1418_v3  ;;  %v10089_v6 = vsel %vm9580_vm2, 0, %v656_v62  ;;  %v660_v3 = vrot.slane %v658_v31, 7 }
 0x10d   : > { %1286 = vrot.lane.b32.xlu1 %v10013_v54, %s9448_s28  ;;  %1284 = vrot.lane.b32.xlu0 %v9959_v60, %s9448_s28  ;;  %v1794_v19 = vsel %vm1778_vm10, %v1749_v30, %v1420_v12  ;;  %v1011_v11 = vshll.u32 %v10089_v6, 16  ;;  %v785_v12 = vsel %vm9580_vm2, %v653_v55, 0  ;;  %v1009_v5 = vshrl.u32 %v10089_v6, 16 }
 0x10e   : > { %v1016_v16 = vshll.u32 %v785_v12, 16  ;;  %v663_v17 = vor.u32 %v661_v8, %v660_v3  ;;  %v1199_v27 = vrot.slane %v10089_v6, 1  ;;  %v1200_v30 = vrot.slane %v785_v12, 1 }
 0x10f   : > { %v1476_v18 = vpop.permute.xlu1 %1475  ;;  %v1474_v26 = vpop.permute.xlu0 %1473  ;;  %v1013_v14 = vrot.slane %v1011_v11, 1  ;;  %v9294_v11 = vld [vmem:[%s13450_s3 + $0x80] sm:$0xff]  }
 0x110   : > { %v1839_v40 = vsel %vm1823_vm11, %v1794_v19, %v1476_v18  ;;  %v1837_v45 = vsel %vm1823_vm11, %v1792_v39, %v1474_v26  ;;  %v1018_v24 = vrot.slane %v1016_v16, 1  ;;  %v10110_v25 = vsel %vm9580_vm2, 0, %v663_v17  ;;  %8891 = vmatprep.subr.bf16.mxu0 %v9294_v11  ;;  %v9291_v17 = vld [vmem:[%s9573_s27 + $0xa8] sm:$0xff]  }
 0x111   : > { %1342 = vrot.lane.b32.xlu1 %v10042_v15, %s9453_s26  ;;  %1340 = vrot.lane.b32.xlu0 %v983_v43, %s9453_s26  ;;  %v1002_v43 = vor.u32 %v1001_v35, %v997_v33  ;;  %v1014_v22 = vor.u32 %v1013_v14, %v1009_v5  ;;  %v1023_v19 = vshll.u32 %v10110_v25, 16  ;;  %v786_v39 = vsel %vm9580_vm2, %v660_v3, 0 }
 0x112   : > { %v1028_v55 = vshll.u32 %v786_v39, 16  ;;  %8892 = vmatpush3.bf16.msra.mxu0 %v9294_v11  ;;  %v1202_v16 = vrot.slane %v10110_v25, 1 }
 0x113   : > { %v1524_v41 = vpop.permute.xlu1 %1523  ;;  %v1522_v47 = vpop.permute.xlu0 %1521  ;;  %v10076_v59 = vsel %vm791_vm4, %v1002_v43, %v1006_v49  ;;  %v10123_v34 = vsel %vm791_vm4, %v1014_v22, %v1018_v24 }
 0x114   : > { %v1884_v44 = vsel %vm1868_vm12, %v1839_v40, %v1524_v41  ;;  %v1882_v48 = vsel %vm1868_vm12, %v1837_v45, %v1522_v47  ;;  %v9290_v40 = vld [vmem:[%s9573_s27 + $0xa0] sm:$0xff]   ;;  %v10138_v47 = vsel %vm1144_vm3, %v1199_v27, %v1200_v30  ;;  %v1030_v31 = vrot.slane %v1028_v55, 1 }
 0x115   : > { %1390 = vrot.lane.b32.xlu1 %v1195_v29, %s9451_s16  ;;  %1388 = vrot.lane.b32.xlu0 %v10009_v51, %s9451_s16  ;;  %v1196_v51 = vrot.slane %v10029_v13, 1  ;;  %v668_v3 = vshll.u32 %v9290_v40, 16  ;;  %v672_v27 = vshrl.u32 %v9291_v17, 16 }
 0x116   : > { %8859 = vmatprep.mubr.msk.bf16.mxu1 %vm1928_vm13, %v1882_v48  ;;  %v1021_v48 = vshrl.u32 %v10110_v25, 16 }
 0x117   : > { %8860 = vmatmul.mubr.msk.bf16.gmra.mrb[12].mxu1 %vm1928_vm13, %v1884_v44  ;;  %v1075_v52 = vpop.permute.xlu1 %1074  ;;  %v1073_v57 = vpop.permute.xlu0 %1072  ;;  %v10085_v58 = vsel %vm1144_vm3, %v1196_v51, %v1197_v20  ;;  %v665_v20 = vshrl.u32 %v9290_v40, 16 }
 0x118   : > { %v1573_v26 = vsel %vm1553_vm5, %v9760_v42, %v1075_v52  ;;  %v1025_v52 = vrot.slane %v1023_v19, 1 }
 0x119   : > { %1435 = vrot.lane.b32.xlu1 %v10029_v13, %s9449_s29  ;;  %1433 = vrot.lane.b32.xlu0 %v10013_v54, %s9449_s29  ;;  %v667_v12 = vrot.slane %v665_v20, 7 }
 0x11b   : > { %v1230_v50 = vpop.permute.xlu1 %1229  ;;  %v1228_v2 = vpop.permute.xlu0 %1227  ;;  %v670_v24 = vor.u32 %v668_v3, %v667_v12 }
 0x11c   : > { %v1618_v33 = vsel %vm1598_vm6, %v1573_v26, %v1230_v50 }
 0x11d   : > { %1491 = vrot.lane.b32.xlu1 %v10076_v59, %s9454_s18  ;;  %1489 = vrot.lane.b32.xlu0 %v10042_v15, %s9454_s18 }
 0x11f   : > { %v1275_v61 = vpop.permute.xlu1 %1274  ;;  %v1273_v10 = vpop.permute.xlu0 %1272 }
 0x120   : > { %v1663_v35 = vsel %vm1643_vm7, %v1618_v33, %v1275_v61 }
 0x121   : > { %1539 = vrot.lane.b32.xlu1 %v10085_v58, %s9455_s20  ;;  %1537 = vrot.lane.b32.xlu0 %v1195_v29, %s9455_s20 }
 0x123   : > { %v1331_v0 = vpop.permute.xlu1 %1330  ;;  %v1329_v4 = vpop.permute.xlu0 %1328 }
 0x124   : > { %v1708_v41 = vsel %vm1688_vm8, %v1663_v35, %v1331_v0  ;;  %v675_v35 = vshll.u32 %v9291_v17, 16 }
 0x125   : > { %1090 = vrot.lane.b32.xlu1 %v10076_v59, %s9452_s23  ;;  %1088 = vrot.lane.b32.xlu0 %v10042_v15, %s9452_s23 }
 0x127   : > { %v1379_v1 = vpop.permute.xlu1 %1378  ;;  %v1377_v18 = vpop.permute.xlu0 %1376 }
 0x128   : > { %v1753_v44 = vsel %vm1733_vm9, %v1708_v41, %v1379_v1  ;;  %v1203_v1 = vrot.slane %v786_v39, 1  ;;  %v787_v39 = vsel %vm9580_vm2, %v667_v12, 0 }
 0x129   : > { %1245 = vrot.lane.b32.xlu1 %v10085_v58, %s9450_s15  ;;  %1243 = vrot.lane.b32.xlu0 %v1195_v29, %s9450_s15  ;;  %v1571_v29 = vsel %vm1553_vm5, %v9746_v32, %v1073_v57 }
 0x12a   : > { %v1616_v42 = vsel %vm1598_vm6, %v1571_v29, %v1228_v2  ;;  %v2469_v2 = vrot.slane %v13458_v28, 7  ;;  %v10190_v26 = vsel %vm1144_vm3, %v1202_v16, %v1203_v1  ;;  %v10196_v29 = vsel %vm9580_vm2, 0, %v670_v24 }
 0x12b   : > { %v1424_v53 = vpop.permute.xlu1 %1423  ;;  %v1422_v15 = vpop.permute.xlu0 %1421  ;;  %v1661_v32 = vsel %vm1643_vm7, %v1616_v42, %v1273_v10  ;;  %v1035_v19 = vshll.u32 %v10196_v29, 16  ;;  %v674_v42 = vrot.slane %v672_v27, 7 }
 0x12c   : > { %v1706_v45 = vsel %vm1688_vm8, %v1661_v32, %v1329_v4  ;;  %v1798_v49 = vsel %vm1778_vm10, %v1753_v44, %v1424_v53  ;;  %v10158_v10 = vsel %vm9580_vm2, %v2469_v2, 0  ;;  %v1033_v32 = vshrl.u32 %v10196_v29, 16 }
 0x12d   : > { %1290 = vrot.lane.b32.xlu1 %v10089_v6, %s9448_s28  ;;  %1288 = vrot.lane.b32.xlu0 %v10029_v13, %s9448_s28  ;;  %v1751_v43 = vsel %vm1733_vm9, %v1706_v45, %v1377_v18  ;;  %v3029_v5 = vrot.slane %v10158_v10, 1  ;;  %v9295_v18 = vld [vmem:[%s13450_s3 + $0x88] sm:$0xff]   ;;  %v1037_v41 = vrot.slane %v1035_v19, 1  ;;  %v677_v45 = vor.u32 %v675_v35, %v674_v42 }
 0x12e   : > { %v1796_v56 = vsel %vm1778_vm10, %v1751_v43, %v1422_v15  ;;  %8893 = vmatprep.subr.bf16.mxu0 %v9295_v18 }
 0x12f   : > { %v1480_v37 = vpop.permute.xlu1 %1479  ;;  %v1478_v21 = vpop.permute.xlu0 %1477  ;;  %8894 = vmatpush3.bf16.msra.mxu0 %v9295_v18  ;;  %v1038_v43 = vor.u32 %v1037_v41, %v1033_v32 }
 0x130   : > { %v1843_v57 = vsel %vm1823_vm11, %v1798_v49, %v1480_v37  ;;  %v1841_v50 = vsel %vm1823_vm11, %v1796_v56, %v1478_v21  ;;  %5615 = vmatprep.subr.bf16.mxu0 %v13458_v28  ;;  %v1040_v21 = vshll.u32 %v787_v39, 16  ;;  %v1205_v56 = vrot.slane %v10196_v29, 1 }
 0x131   : > { %1346 = vrot.lane.b32.xlu1 %v10123_v34, %s9453_s26  ;;  %1344 = vrot.lane.b32.xlu0 %v10076_v59, %s9453_s26  ;;  %v1026_v59 = vor.u32 %v1025_v52, %v1021_v48  ;;  %v10217_v52 = vsel %vm9580_vm2, 0, %v677_v45 }
 0x132   : > { %v1042_v49 = vrot.slane %v1040_v21, 1  ;;  %v1047_v20 = vshll.u32 %v10217_v52, 16  ;;  %v9293_v21 = vld [vmem:[%s9573_s27 + $0xb8] sm:$0xff]  }
 0x133   : > { %v1528_v51 = vpop.permute.xlu1 %1527  ;;  %v1526_v63 = vpop.permute.xlu0 %1525  ;;  %v10175_v14 = vsel %vm791_vm4, %v1026_v59, %v1030_v31  ;;  %v788_v59 = vsel %vm9580_vm2, %v674_v42, 0 }
 0x134   : > { %v1888_v62 = vsel %vm1868_vm12, %v1843_v57, %v1528_v51  ;;  %v1886_v61 = vsel %vm1868_vm12, %v1841_v50, %v1526_v63  ;;  %v1206_v57 = vrot.slane %v787_v39, 1  ;;  %v9292_v63 = vld [vmem:[%s9573_s27 + $0xb0] sm:$0xff]   ;;  %v1052_v1 = vshll.u32 %v788_v59, 16 }
 0x135   : > { %1394 = vrot.lane.b32.xlu1 %v10138_v47, %s9451_s16  ;;  %1392 = vrot.lane.b32.xlu0 %v10085_v58, %s9451_s16  ;;  %v10166_v58 = vsel %vm9580_vm2, 0, %v2469_v2  ;;  %v679_v17 = vshrl.u32 %v9292_v63, 16  ;;  %v682_v35 = vshll.u32 %v9292_v63, 16  ;;  %v1209_v32 = vrot.slane %v788_v59, 1 }
 0x136   : > { %8863 = vmatprep.mubr.msk.bf16.mxu1 %vm1928_vm13, %v1886_v61  ;;  %v3028_v4 = vrot.slane %v10166_v58, 1  ;;  %v1054_v19 = vrot.slane %v1052_v1, 1 }
 0x137   : > { %8864 = vmatmul.mubr.msk.bf16.gmra.mrb[16].mxu1 %vm1928_vm13, %v1888_v62  ;;  %v1079_v0 = vpop.permute.xlu1 %1078  ;;  %v1077_v8 = vpop.permute.xlu0 %1076  ;;  %v10231_v62 = vsel %vm791_vm4, %v1038_v43, %v1042_v49  ;;  %v681_v42 = vrot.slane %v679_v17, 7  ;;  %v686_v49 = vshrl.u32 %v9293_v21, 16 }
 0x138   : > { %v10185_v15 = vsel %vm1144_vm3, %v3028_v4, %v3029_v5  ;;  %v1577_v51 = vsel %vm1553_vm5, %v9820_v36, %v1079_v0  ;;  %v1207_v0 = vsel %vm1144_vm3, %v1205_v56, %v1206_v57  ;;  %v1049_v4 = vrot.slane %v1047_v20, 1 }
 0x139   : > { %1439 = vrot.lane.b32.xlu1 %v10110_v25, %s9449_s29  ;;  %1437 = vrot.lane.b32.xlu0 %v10089_v6, %s9449_s29  ;;  %13487 = vst [vmem:[#allocation6_spill] sm:$0xff] %v10185_v15  ;;  %v684_v41 = vor.u32 %v682_v35, %v681_v42  ;;  %v789_v57 = vsel %vm9580_vm2, %v681_v42, 0  ;;  %v689_v20 = vshll.u32 %v9293_v21, 16 }
 0x13a   : > { %8895 = vmatprep.mubr.msk.bf16.mxu0 %vm3322_vm14, %v10185_v15  ;;  %v1358_v17 = vrot.slane %v789_v57, 1 }
 0x13b   : > { %v1234_v22 = vpop.permute.xlu1 %1233  ;;  %v1232_v53 = vpop.permute.xlu0 %1231  ;;  %v10275_v43 = vsel %vm9580_vm2, 0, %v684_v41 }
 0x13c   : > { %v1622_v50 = vsel %vm1598_vm6, %v1577_v51, %v1234_v22  ;;  %v1303_v56 = vshll.u32 %v10275_v43, 16  ;;  %v688_v51 = vrot.slane %v686_v49, 7  ;;  %v1301_v63 = vshrl.u32 %v10275_v43, 16 }
 0x13d   : > { %1495 = vrot.lane.b32.xlu1 %v10175_v14, %s9454_s18  ;;  %1493 = vrot.lane.b32.xlu0 %v10123_v34, %s9454_s18 }
 0x13f   : > { %v1279_v30 = vpop.permute.xlu1 %1278  ;;  %v1277_v33 = vpop.permute.xlu0 %1276 }
 0x140   : > { %v1667_v36 = vsel %vm1643_vm7, %v1622_v50, %v1279_v30 }
 0x141   : > { %1543 = vrot.lane.b32.xlu1 %v10190_v26, %s9455_s20  ;;  %1541 = vrot.lane.b32.xlu0 %v10138_v47, %s9455_s20 }
 0x143   : > { %v1335_v37 = vpop.permute.xlu1 %1334  ;;  %v1333_v40 = vpop.permute.xlu0 %1332 }
 0x145   : > { %1094 = vrot.lane.b32.xlu1 %v10175_v14, %s9452_s23  ;;  %1092 = vrot.lane.b32.xlu0 %v10123_v34, %s9452_s23 }
 0x147   : > { %v1383_v44 = vpop.permute.xlu1 %1382  ;;  %v1381_v48 = vpop.permute.xlu0 %1380 }
 0x149   : > { %1249 = vrot.lane.b32.xlu1 %v10190_v26, %s9450_s15  ;;  %1247 = vrot.lane.b32.xlu0 %v10138_v47, %s9450_s15  ;;  %v1575_v47 = vsel %vm1553_vm5, %v9797_v7, %v1077_v8  ;;  %v1712_v7 = vsel %vm1688_vm8, %v1667_v36, %v1335_v37  ;;  %v1045_v8 = vshrl.u32 %v10217_v52, 16  ;;  %v1308_v36 = vshll.u32 %v789_v57, 16  ;;  %v9296_v57 = vld [vmem:[%s13450_s3] sm:$0xff]  }
 0x14a   : > { %v1620_v2 = vsel %vm1598_vm6, %v1575_v47, %v1232_v53  ;;  %v1757_v3 = vsel %vm1733_vm9, %v1712_v7, %v1383_v44  ;;  %3800 = vmatpush1.bf16.msra.mxu1 %v9296_v57  ;;  %v9303_v57 = vld [vmem:[%s13450_s3 + $0x38] sm:$0xff]  }
 0x14b   : > { %v1428_v34 = vpop.permute.xlu1 %1427  ;;  %v1426_v55 = vpop.permute.xlu0 %1425  ;;  %v1665_v31 = vsel %vm1643_vm7, %v1620_v2, %v1277_v33  ;;  %v1305_v2 = vrot.slane %v1303_v56, 1  ;;  %3801 = vmatprep.subr.bf16.mxu1 %v13458_v28 }
 0x14c   : > { %v1710_v12 = vsel %vm1688_vm8, %v1665_v31, %v1333_v40  ;;  %v1802_v16 = vsel %vm1778_vm10, %v1757_v3, %v1428_v34 }
 0x14d   : > { %1294 = vrot.lane.b32.xlu1 %v10196_v29, %s9448_s28  ;;  %1292 = vrot.lane.b32.xlu0 %v10110_v25, %s9448_s28  ;;  %v1755_v5 = vsel %vm1733_vm9, %v1710_v12, %v1381_v48  ;;  %v1306_v7 = vor.u32 %v1305_v2, %v1301_v63  ;;  %v2716_v2 = vshll.u32 %v10158_v10, 16 }
 0x14e   : > { %v1800_v18 = vsel %vm1778_vm10, %v1755_v5, %v1426_v55  ;;  %v1357_v5 = vrot.slane %v10275_v43, 1 }
 0x14f   : > { %v1484_v61 = vpop.permute.xlu1 %1483  ;;  %v1482_v11 = vpop.permute.xlu0 %1481 }
 0x150   : > { %v1847_v22 = vsel %vm1823_vm11, %v1802_v16, %v1484_v61  ;;  %v1845_v53 = vsel %vm1823_vm11, %v1800_v18, %v1482_v11  ;;  %v691_v61 = vor.u32 %v689_v20, %v688_v51  ;;  %v1310_v11 = vrot.slane %v1308_v36, 1 }
 0x151   : > { %1350 = vrot.lane.b32.xlu1 %v10231_v62, %s9453_s26  ;;  %1348 = vrot.lane.b32.xlu0 %v10175_v14, %s9453_s26  ;;  %v1050_v14 = vor.u32 %v1049_v4, %v1045_v8 }
 0x152   : > { %v10292_v12 = vsel %vm9580_vm2, 0, %v691_v61  ;;  %v9297_v61 = vld [vmem:[%s13450_s3 + $0x8] sm:$0xff]  }
 0x153   : > { %v1532_v24 = vpop.permute.xlu1 %1531  ;;  %v1530_v30 = vpop.permute.xlu0 %1529  ;;  %v1055_v40 = vsel %vm791_vm4, %v1050_v14, %v1054_v19  ;;  %v1452_v16 = vshll.u32 %v10292_v12, 16  ;;  %v1506_v20 = vrot.slane %v10292_v12, 1  ;;  %3802 = vmatpush1.bf16.msra.mxu1 %v9297_v61  ;;  %v9306_v61 = vld [vmem:[%s13450_s3 + $0x50] sm:$0xff]  }
 0x154   : > { %v1892_v27 = vsel %vm1868_vm12, %v1847_v22, %v1532_v24  ;;  %v1890_v33 = vsel %vm1868_vm12, %v1845_v53, %v1530_v30  ;;  %3803 = vmatprep.subr.bf16.mxu1 %v13458_v28 }
 0x155   : > { %1398 = vrot.lane.b32.xlu1 %v1207_v0, %s9451_s16  ;;  %1396 = vrot.lane.b32.xlu0 %v10190_v26, %s9451_s16  ;;  %v1208_v26 = vrot.slane %v10217_v52, 1  ;;  %v1454_v19 = vrot.slane %v1452_v16, 1  ;;  %v9191_v16 = vpack.i.bf16 %v10185_v15, %v10166_v58 }
 0x156   : > { %8867 = vmatprep.mubr.msk.bf16.mxu1 %vm1928_vm13, %v1890_v33 }
 0x157   : > { %8868 = vmatmul.mubr.msk.bf16.gmra.mrb[20].mxu1 %vm1928_vm13, %v1892_v27  ;;  %v1083_v37 = vpop.permute.xlu1 %1082  ;;  %v1081_v39 = vpop.permute.xlu0 %1080  ;;  %v10271_v48 = vsel %vm1144_vm3, %v1208_v26, %v1209_v32 }
 0x158   : > { %v1581_v4 = vsel %vm1553_vm5, %v9883_v46, %v1083_v37  ;;  %v790_v46 = vsel %vm9580_vm2, %v688_v51, 0 }
 0x159   : > { %1443 = vrot.lane.b32.xlu1 %v10217_v52, %s9449_s29  ;;  %1441 = vrot.lane.b32.xlu0 %v10196_v29, %s9449_s29  ;;  %v1457_v42 = vshll.u32 %v790_v46, 16 }
 0x15b   : > { %v1238_v45 = vpop.permute.xlu1 %1237  ;;  %v1236_v44 = vpop.permute.xlu0 %1235 }
 0x15c   : > { %v1626_v1 = vsel %vm1598_vm6, %v1581_v4, %v1238_v45 }
 0x15d   : > { %1499 = vrot.lane.b32.xlu1 %v1055_v40, %s9454_s18  ;;  %1497 = vrot.lane.b32.xlu0 %v10231_v62, %s9454_s18 }
 0x15f   : > { %v1283_v34 = vpop.permute.xlu1 %1282  ;;  %v1281_v55 = vpop.permute.xlu0 %1280 }
 0x160   : > { %v1671_v22 = vsel %vm1643_vm7, %v1626_v1, %v1283_v34  ;;  %v9300_v1 = vld [vmem:[%s13450_s3 + $0x20] sm:$0xff]  }
 0x161   : > { %1547 = vrot.lane.b32.xlu1 %v10271_v48, %s9455_s20  ;;  %1545 = vrot.lane.b32.xlu0 %v1207_v0, %s9455_s20 }
 0x163   : > { %v1339_v47 = vpop.permute.xlu1 %1338  ;;  %v1337_v50 = vpop.permute.xlu0 %1336 }
 0x164   : > { %v1716_v27 = vsel %vm1688_vm8, %v1671_v22, %v1339_v47 }
 0x165   : > { %1098 = vrot.lane.b32.xlu1 %v1055_v40, %s9452_s23  ;;  %1096 = vrot.lane.b32.xlu0 %v10231_v62, %s9452_s23  ;;  %v1311_v62 = vsel %vm791_vm4, %v1306_v7, %v1310_v11  ;;  %v2718_v7 = vrot.slane %v2716_v2, 1  ;;  %v9298_v11 = vld [vmem:[%s13450_s3 + $0x10] sm:$0xff]   ;;  %s8644_s23 = sshll.u32 %s9438_s12, 9 }
 0x166   : > { %3804 = vmatpush1.bf16.msra.mxu1 %v9298_v11  ;;  %s13389_s27 = scalar_lea.hbm %s13456_s9, %s8644_s23 }
 0x167   : > { %v1387_v59 = vpop.permute.xlu1 %1386  ;;  %v1385_v31 = vpop.permute.xlu0 %1384  ;;  %3805 = vmatprep.subr.bf16.mxu1 %v13458_v28 }
 0x168   : > { %v1761_v14 = vsel %vm1733_vm9, %v1716_v27, %v1387_v59 }
 0x169   : > { %1253 = vrot.lane.b32.xlu1 %v10271_v48, %s9450_s15  ;;  %1251 = vrot.lane.b32.xlu0 %v1207_v0, %s9450_s15  ;;  %v1579_v0 = vsel %vm1553_vm5, %v9869_v23, %v1081_v39  ;;  %v1450_v23 = vshrl.u32 %v10292_v12, 16  ;;  %v1359_v39 = vsel %vm1144_vm3, %v1357_v5, %v1358_v17  ;;  %s9459_s15 = smov 64  }
 0x16a   : > { %v1624_v18 = vsel %vm1598_vm6, %v1579_v0, %v1236_v44 }
 0x16b   : > { %v1432_v3 = vpop.permute.xlu1 %1431  ;;  %v1430_v8 = vpop.permute.xlu0 %1429  ;;  %v1669_v53 = vsel %vm1643_vm7, %v1624_v18, %v1281_v55  ;;  %v1455_v34 = vor.u32 %v1454_v19, %v1450_v23  ;;  %v1459_v55 = vrot.slane %v1457_v42, 1 }
 0x16c   : > { %v1714_v33 = vsel %vm1688_vm8, %v1669_v53, %v1337_v50  ;;  %v1806_v37 = vsel %vm1778_vm10, %v1761_v14, %v1432_v3  ;;  %v2709_v50 = vshrl.u32 %v10166_v58, 16 }
 0x16d   : > { %1298 = vrot.lane.b32.xlu1 %v10275_v43, %s9448_s28  ;;  %1296 = vrot.lane.b32.xlu0 %v10217_v52, %s9448_s28  ;;  %v1759_v35 = vsel %vm1733_vm9, %v1714_v33, %v1385_v31  ;;  %v1460_v47 = vsel %vm791_vm4, %v1455_v34, %v1459_v55  ;;  %s9458_s28 = smov 96  }
 0x16e   : > { %v1804_v26 = vsel %vm1778_vm10, %v1759_v35, %v1430_v8  ;;  %v10360_v8 = vpack.i.bf16 %v10185_v15, %v10185_v15 }
 0x16f   : > { %v1488_v24 = vpop.permute.xlu1 %1487  ;;  %v1486_v30 = vpop.permute.xlu0 %1485 }
 0x170   : > { %v1851_v32 = vsel %vm1823_vm11, %v1806_v37, %v1488_v24  ;;  %v1849_v21 = vsel %vm1823_vm11, %v1804_v26, %v1486_v30  ;;  %v9301_v24 = vld [vmem:[%s13450_s3 + $0x28] sm:$0xff]   ;;  %v9302_v26 = vld [vmem:[%s13450_s3 + $0x30] sm:$0xff]  }
 0x171   : > { %1354 = vrot.lane.b32.xlu1 %v1311_v62, %s9453_s26  ;;  %1352 = vrot.lane.b32.xlu0 %v1055_v40, %s9453_s26  ;;  %v2711_v40 = vshll.u32 %v10166_v58, 16 }
 0x173   : > { %v1536_v41 = vpop.permute.xlu1 %1535  ;;  %v1534_v44 = vpop.permute.xlu0 %1533  ;;  %v2713_v63 = vrot.slane %v2711_v40, 1 }
 0x174   : > { %v1896_v45 = vsel %vm1868_vm12, %v1851_v32, %v1536_v41  ;;  %v1894_v49 = vsel %vm1868_vm12, %v1849_v21, %v1534_v44 }
 0x175   : > { %1402 = vrot.lane.b32.xlu1 %v1359_v39, %s9451_s16  ;;  %8871 = vmatprep.mubr.msk.bf16.mxu1 %vm1928_vm13, %v1894_v49  ;;  %v2714_v31 = vor.u32 %v2713_v63, %v2709_v50  ;;  %v9305_v63 = vld [vmem:[%s13450_s3 + $0x48] sm:$0xff]  }
 0x176   : > { %1400 = vrot.lane.b32.xlu0 %v10271_v48, %s9451_s16  ;;  %8872 = vmatmul.mubr.msk.bf16.gmra.mrb[24].mxu1 %vm1928_vm13, %v1896_v45  ;;  %v1507_v48 = vrot.slane %v790_v46, 1  ;;  %v10381_v46 = vpack.i.bf16 %v10166_v58, %v10166_v58 }
 0x177   : > { %v1087_v56 = vpop.permute.xlu1 %1086  ;;  %v1085_v51 = vpop.permute.xlu0 %1084  ;;  %v10356_v3 = vsel %vm791_vm4, %v2714_v31, %v2718_v7 }
 0x178   : > { %v1585_v53 = vsel %vm1553_vm5, %v9959_v60, %v1087_v56  ;;  %v1583_v30 = vsel %vm1553_vm5, %v9942_v38, %v1085_v51 }
 0x179   : > { %1447 = vrot.lane.b32.xlu1 %v10292_v12, %s9449_s29 }
 0x17a   : > { %1445 = vrot.lane.b32.xlu0 %v10275_v43, %s9449_s29  ;;  %v1508_v43 = vsel %vm1144_vm3, %v1506_v20, %v1507_v48  ;;  %v9304_v48 = vld [vmem:[%s13450_s3 + $0x40] sm:$0xff]  }
 0x17b   : > { %v1242_v36 = vpop.permute.xlu1 %1241  ;;  %v1240_v59 = vpop.permute.xlu0 %1239 }
 0x17c   : > { %v1630_v23 = vsel %vm1598_vm6, %v1585_v53, %v1242_v36  ;;  %v1628_v14 = vsel %vm1598_vm6, %v1583_v30, %v1240_v59 }
 0x17d   : > { %1503 = vrot.lane.b32.xlu1 %v1460_v47, %s9454_s18 }
 0x17e   : > { %1501 = vrot.lane.b32.xlu0 %v1311_v62, %s9454_s18  ;;  %v9299_v62 = vld [vmem:[%s13450_s3 + $0x18] sm:$0xff]  }
 0x17f   : > { %v1287_v10 = vpop.permute.xlu1 %1286  ;;  %v1285_v12 = vpop.permute.xlu0 %1284  ;;  %3806 = vmatpush1.bf16.msra.mxu1 %v9299_v62  ;;  %v10446_v62 = vld [vmem:[%s13449_s2] ss:$0 sm:$0xff] }
 0x180   : > { %3807 = vmatprep.subr.bf16.mxu1 %v13458_v28  ;;  %v1675_v19 = vsel %vm1643_vm7, %v1630_v23, %v1287_v10  ;;  %v1673_v35 = vsel %vm1643_vm7, %v1628_v14, %v1285_v12  ;;  %v9308_v10 = vld [vmem:[%s13450_s3 + $0x60] sm:$0xff]  }
 0x181   : > { %1551 = vrot.lane.b32.xlu1 %v1508_v43, %s9455_s20  ;;  %v9307_v43 = vld [vmem:[%s13450_s3 + $0x58] sm:$0xff]  }
 0x182   : > { %1549 = vrot.lane.b32.xlu0 %v1359_v39, %s9455_s20 }
 0x183   : > { %v1343_v4 = vpop.permute.xlu1 %1342  ;;  %v1341_v5 = vpop.permute.xlu0 %1340  ;;  %3808 = vmatpush1.bf16.msra.mxu1 %v9300_v1 }
 0x184   : > { %3809 = vmatprep.subr.bf16.mxu1 %v13458_v28  ;;  %v1720_v37 = vsel %vm1688_vm8, %v1675_v19, %v1343_v4  ;;  %v1718_v32 = vsel %vm1688_vm8, %v1673_v35, %v1341_v5 }
 0x185   : > { %2948 = vrot.lane.b32.xlu1 %v10356_v3, %s9457_s25 }
 0x186   : > { %9187 = vrot.lane.b32.xlu0 %v10360_v8, %s9457_s25 }
 0x187   : > { %v1391_v0 = vpop.permute.xlu1 %1390  ;;  %v1389_v17 = vpop.permute.xlu0 %1388  ;;  %3810 = vmatpush1.bf16.msra.mxu1 %v9301_v24 }
 0x188   : > { %3811 = vmatprep.subr.bf16.mxu1 %v13458_v28  ;;  %v1765_v41 = vsel %vm1733_vm9, %v1720_v37, %v1391_v0  ;;  %v1763_v21 = vsel %vm1733_vm9, %v1718_v32, %v1389_v17 }
 0x189   : > { %3278 = vrot.lane.b32.xlu1 %v10356_v3, %s9458_s28 }
 0x18a   : > { %9192 = vrot.lane.b32.xlu0 %v9191_v16, %s9459_s15  ;;  %v9309_v16 = vld [vmem:[%s13450_s3 + $0x68] sm:$0xff]  }
 0x18b   : > { %v1436_v18 = vpop.permute.xlu1 %1435  ;;  %v1434_v22 = vpop.permute.xlu0 %1433  ;;  %3812 = vmatpush1.bf16.msra.mxu1 %v9302_v26 }
 0x18c   : > { %v1810_v45 = vsel %vm1778_vm10, %v1765_v41, %v1436_v18  ;;  %v1808_v44 = vsel %vm1778_vm10, %v1763_v21, %v1434_v22  ;;  %3813 = vmatprep.subr.bf16.mxu1 %v13458_v28 }
 0x18d   : > { %v8849_v27 = vpop.f32.mrb[0].mxu1  ;;  %2950 = vrot.lane.b32.xlu1 %v10356_v3, %s9457_s25 }
 0x18e   : > { %v2011_v33 = vpop.f32.mrb[1].mxu1  ;;  %9197 = vrot.lane.b32.xlu0 %v10381_v46, %s9458_s28 }
 0x18f   : > { %v8850_v42 = vpop.f32.mrb[2].mxu1  ;;  %v1492_v60 = vpop.permute.xlu1 %1491  ;;  %3814 = vmatpush1.bf16.msra.mxu1 %v9303_v57 }
 0x190   : > { %v2014_v38 = vpop.f32.mrb[3].mxu1  ;;  %v1490_v39 = vpop.permute.xlu0 %1489  ;;  %v1855_v49 = vsel %vm1823_vm11, %v1810_v45, %v1492_v60  ;;  %3815 = vmatprep.subr.bf16.mxu1 %v13458_v28  ;;  %v9310_v42 = vld [vmem:[%s13450_s3 + $0x70] sm:$0xff]  }
 0x191   : > { %9202 = vrot.lane.b32.xlu1 %v10360_v8, %s9459_s15  ;;  %v1853_v55 = vsel %vm1823_vm11, %v1808_v44, %v1490_v39 }
 0x192   : > { %2952 = vrot.lane.b32.xlu0 %v10356_v3, %s9457_s25 }
 0x193   : > { %v1540_v34 = vpop.permute.xlu1 %1539  ;;  %3816 = vmatpush1.bf16.msra.mxu1 %v9304_v48 }
 0x194   : > { %v1900_v40 = vsel %vm1868_vm12, %v1855_v49, %v1540_v34  ;;  %v1538_v56 = vpop.permute.xlu0 %1537  ;;  %3817 = vmatprep.subr.bf16.mxu1 %v13458_v28 }
 0x195   : > { %v1898_v51 = vsel %vm1868_vm12, %v1853_v55, %v1538_v56  ;;  %v9311_v55 = vld [vmem:[%s13450_s3 + $0x78] sm:$0xff]  }
 0x196   : > { %8875 = vmatprep.mubr.msk.bf16.mxu1 %vm1928_vm13, %v1898_v51 }
 0x197   : > { %8876 = vmatmul.mubr.msk.bf16.gmra.mrb[28].mxu1 %vm1928_vm13, %v1900_v40  ;;  %v1091_v20 = vpop.permute.xlu1 %1090 }
 0x198   : > { %v1089_v47 = vpop.permute.xlu0 %1088  ;;  %3818 = vmatpush1.bf16.msra.mxu1 %v9305_v63  ;;  %v1589_v0 = vsel %vm1553_vm5, %v10029_v13, %v1091_v20 }
 0x199   : > { %3819 = vmatprep.subr.bf16.mxu1 %v13458_v28  ;;  %v1587_v17 = vsel %vm1553_vm5, %v10013_v54, %v1089_v47 }
 0x19b   : > { %v1246_v50 = vpop.permute.xlu1 %1245 }
 0x19c   : > { %v1244_v2 = vpop.permute.xlu0 %1243  ;;  %3820 = vmatpush1.bf16.msra.mxu1 %v9306_v61  ;;  %v1634_v18 = vsel %vm1598_vm6, %v1589_v0, %v1246_v50 }
 0x19d   : > { %3821 = vmatprep.subr.bf16.mxu1 %v13458_v28  ;;  %v1632_v53 = vsel %vm1598_vm6, %v1587_v17, %v1244_v2 }
 0x19f   : > { %v1291_v36 = vpop.permute.xlu1 %1290 }
 0x1a0   : > { %v1289_v59 = vpop.permute.xlu0 %1288  ;;  %3822 = vmatpush1.bf16.msra.mxu1 %v9307_v43  ;;  %v1679_v27 = vsel %vm1643_vm7, %v1634_v18, %v1291_v36 }
 0x1a1   : > { %3823 = vmatprep.subr.bf16.mxu1 %v13458_v28  ;;  %v1677_v13 = vsel %vm1643_vm7, %v1632_v53, %v1289_v59 }
 0x1a3   : > { %v1347_v31 = vpop.permute.xlu1 %1346 }
 0x1a4   : > { %v1345_v7 = vpop.permute.xlu0 %1344  ;;  %3824 = vmatpush1.bf16.msra.mxu1 %v9308_v10  ;;  %v1724_v33 = vsel %vm1688_vm8, %v1679_v27, %v1347_v31 }
 0x1a5   : > { %3825 = vmatprep.subr.bf16.mxu1 %v13458_v28  ;;  %v1722_v60 = vsel %vm1688_vm8, %v1677_v13, %v1345_v7 }
 0x1a7   : > { %v1395_v11 = vpop.permute.xlu1 %1394 }
 0x1a8   : > { %v1393_v12 = vpop.permute.xlu0 %1392  ;;  %3826 = vmatpush1.bf16.msra.mxu1 %v9309_v16  ;;  %v1769_v35 = vsel %vm1733_vm9, %v1724_v33, %v1395_v11 }
 0x1a9   : > { %3827 = vmatprep.subr.bf16.mxu1 %v13458_v28  ;;  %v1767_v37 = vsel %vm1733_vm9, %v1722_v60, %v1393_v12 }
 0x1ab   : > { %v1440_v4 = vpop.permute.xlu1 %1439 }
 0x1ac   : > { %v1438_v5 = vpop.permute.xlu0 %1437  ;;  %v1814_v38 = vsel %vm1778_vm10, %v1769_v35, %v1440_v4  ;;  %3828 = vmatpush1.bf16.msra.mxu1 %v9310_v42 }
 0x1ad   : > { %v8853_v1 = vpop.f32.mrb[4].mxu1  ;;  %v1812_v32 = vsel %vm1778_vm10, %v1767_v37, %v1438_v5  ;;  %3829 = vmatprep.subr.bf16.mxu1 %v13458_v28 }
 0x1ae   : > { %v2036_v22 = vadd.f32 %v8853_v1, %v10446_v62  ;;  %v2027_v24 = vpop.f32.mrb[5].mxu1 }
 0x1af   : > { %v8854_v30 = vpop.f32.mrb[6].mxu1  ;;  %v1496_v23 = vpop.permute.xlu1 %1495 }
 0x1b0   : > { %v2039_v54 = vadd.f32 %v8854_v30, %v10446_v62  ;;  %v2030_v14 = vpop.f32.mrb[7].mxu1  ;;  %v1494_v19 = vpop.permute.xlu0 %1493  ;;  %v2192_v39 = vmax.f32 %v2036_v22, 0.0  ;;  %v1859_v41 = vsel %vm1823_vm11, %v1814_v38, %v1496_v23  ;;  %3830 = vmatpush1.bf16.msra.mxu1 %v9311_v55 }
 0x1b1   : > { %v1857_v44 = vsel %vm1823_vm11, %v1812_v32, %v1494_v19 }
 0x1b2   : > { %v2193_v26 = vmax.f32 %v2039_v54, 0.0 }
 0x1b3   : > { %v1544_v21 = vpop.permute.xlu1 %1543 }
 0x1b4   : > { %v2409_v45 = vpack.c.bf16 %v2193_v26, %v2192_v39  ;;  %v1904_v49 = vsel %vm1868_vm12, %v1859_v41, %v1544_v21  ;;  %v1542_v34 = vpop.permute.xlu0 %1541 }
 0x1b5   : > { %v1902_v40 = vsel %vm1868_vm12, %v1857_v44, %v1542_v34 }
 0x1b6   : > { %v2488_v56 = vshrl.u32 %v2409_v45, 16  ;;  %8879 = vmatprep.mubr.msk.bf16.mxu1 %vm1928_vm13, %v1902_v40  ;;  %v2491_v20 = vshll.u32 %v2409_v45, 16 }
 0x1b7   : > { %8880 = vmatmul.mubr.msk.bf16.gmra.mrb[32].mxu1 %vm1928_vm13, %v1904_v49  ;;  %v1095_v57 = vpop.permute.xlu1 %1094 }
 0x1b8   : > { %v2490_v51 = vrot.slane %v2488_v56, 7  ;;  %v1093_v47 = vpop.permute.xlu0 %1092  ;;  %v1593_v54 = vsel %vm1553_vm5, %v10110_v25, %v1095_v57 }
 0x1b9   : > { %v1591_v42 = vsel %vm1553_vm5, %v10089_v6, %v1093_v47 }
 0x1ba   : > { %v2493_v48 = vor.u32 %v2491_v20, %v2490_v51  ;;  %v2689_v50 = vsel %vm9580_vm2, %v2490_v51, 0 }
 0x1bb   : > { %v1250_v63 = vpop.permute.xlu1 %1249  ;;  %v3038_v59 = vrot.slane %v2689_v50, 1  ;;  %v2752_v31 = vshll.u32 %v2689_v50, 16 }
 0x1bc   : > { %v1248_v2 = vpop.permute.xlu0 %1247  ;;  %v10486_v36 = vsel %vm9580_vm2, 0, %v2493_v48  ;;  %v1638_v60 = vsel %vm1598_vm6, %v1593_v54, %v1250_v63 }
 0x1bd   : > { %3133 = vrot.lane.b32.xlu1 %v10486_v36, %s9458_s28  ;;  %3228 = vrot.lane.b32.xlu0 %v10486_v36, %s9459_s15  ;;  %v3037_v61 = vrot.slane %v10486_v36, 1  ;;  %v2747_v43 = vshll.u32 %v10486_v36, 16  ;;  %v2745_v11 = vshrl.u32 %v10486_v36, 16  ;;  %v2754_v16 = vrot.slane %v2752_v31, 1 }
 0x1be   : > { %v1636_v37 = vsel %vm1598_vm6, %v1591_v42, %v1248_v2 }
 0x1bf   : > { %v1295_v7 = vpop.permute.xlu1 %1294  ;;  %v3039_v10 = vsel %vm1144_vm3, %v3037_v61, %v3038_v59  ;;  %v2749_v12 = vrot.slane %v2747_v43, 1 }
 0x1c0   : > { %8896 = vmatmul.mubr.msk.bf16.vlgmr.msra.gmra.mrb[0].mxu0 %vm3322_vm14, %v3039_v10  ;;  %v1293_v4 = vpop.permute.xlu0 %1292  ;;  %v1683_v38 = vsel %vm1643_vm7, %v1638_v60, %v1295_v7 }
 0x1c1   : > { %3189 = vrot.lane.b32.xlu1 %v3039_v10, %s9457_s25  ;;  %v2750_v5 = vor.u32 %v2749_v12, %v2745_v11  ;;  %v1681_v41 = vsel %vm1643_vm7, %v1636_v37, %v1293_v4 }
 0x1c3   : > { %v1351_v0 = vpop.permute.xlu1 %1350  ;;  %v10499_v1 = vsel %vm791_vm4, %v2750_v5, %v2754_v16 }
 0x1c4   : > { %3280 = vrot.lane.b32.xlu0 %v10499_v1, %s9458_s28  ;;  %v1349_v17 = vpop.permute.xlu0 %1348  ;;  %v1728_v25 = vsel %vm1688_vm8, %v1683_v38, %v1351_v0 }
 0x1c5   : > { %3094 = vrot.lane.b32.xlu1 %v3039_v10, %s9459_s15  ;;  %v1726_v6 = vsel %vm1688_vm8, %v1681_v41, %v1349_v17 }
 0x1c7   : > { %v1399_v18 = vpop.permute.xlu1 %1398 }
 0x1c8   : > { %v1397_v22 = vpop.permute.xlu0 %1396  ;;  %v1773_v49 = vsel %vm1733_vm9, %v1728_v25, %v1399_v18 }
 0x1c9   : > { %2954 = vrot.lane.b32.xlu1 %v10499_v1, %s9457_s25  ;;  %v1771_v55 = vsel %vm1733_vm9, %v1726_v6, %v1397_v22 }
 0x1ca   : > { %v8857_v24 = vpop.f32.mrb[8].mxu1 }
 0x1cb   : > { %v2052_v53 = vadd.f32 %v8857_v24, %v10446_v62  ;;  %v2043_v27 = vpop.f32.mrb[9].mxu1  ;;  %v1444_v30 = vpop.permute.xlu1 %1443 }
 0x1cc   : > { %v2044_v23 = vadd.f32 %v10446_v62, %v2043_v27  ;;  %v8858_v13 = vpop.f32.mrb[10].mxu1  ;;  %v1442_v33 = vpop.permute.xlu0 %1441  ;;  %v1818_v40 = vsel %vm1778_vm10, %v1773_v49, %v1444_v30 }
 0x1cd   : > { %v2055_v14 = vadd.f32 %v8858_v13, %v10446_v62  ;;  %v2046_v19 = vpop.f32.mrb[11].mxu1  ;;  %v2196_v39 = vmax.f32 %v2052_v53, 0.0  ;;  %v1816_v51 = vsel %vm1778_vm10, %v1771_v55, %v1442_v33 }
 0x1ce   : > { %v2047_v35 = vadd.f32 %v10446_v62, %v2046_v19  ;;  %v2194_v21 = vmax.f32 %v2044_v23, 0.0 }
 0x1cf   : > { %v2197_v26 = vmax.f32 %v2055_v14, 0.0  ;;  %v1500_v32 = vpop.permute.xlu1 %1499 }
 0x1d0   : > { %v2195_v45 = vmax.f32 %v2047_v35, 0.0  ;;  %v1498_v44 = vpop.permute.xlu0 %1497  ;;  %v1863_v20 = vsel %vm1823_vm11, %v1818_v40, %v1500_v32 }
 0x1d1   : > { %v2411_v34 = vpack.c.bf16 %v2197_v26, %v2196_v39  ;;  %v1861_v50 = vsel %vm1823_vm11, %v1816_v51, %v1498_v44 }
 0x1d2   : > { %v2410_v56 = vpack.c.bf16 %v2195_v45, %v2194_v21 }
 0x1d3   : > { %v2502_v57 = vshrl.u32 %v2411_v34, 16  ;;  %v1548_v47 = vpop.permute.xlu1 %1547  ;;  %v2505_v59 = vshll.u32 %v2411_v34, 16 }
 0x1d4   : > { %v2495_v48 = vshrl.u32 %v2410_v56, 16  ;;  %v1908_v63 = vsel %vm1868_vm12, %v1863_v20, %v1548_v47  ;;  %v1546_v2 = vpop.permute.xlu0 %1545  ;;  %v2498_v7 = vshll.u32 %v2410_v56, 16 }
 0x1d5   : > { %v2504_v61 = vrot.slane %v2502_v57, 7  ;;  %v1906_v43 = vsel %vm1868_vm12, %v1861_v50, %v1546_v2 }
 0x1d6   : > { %v2497_v31 = vrot.slane %v2495_v48, 7  ;;  %8883 = vmatprep.mubr.msk.bf16.mxu1 %vm1928_vm13, %v1906_v43 }
 0x1d7   : > { %v2507_v10 = vor.u32 %v2505_v59, %v2504_v61  ;;  %v2691_v11 = vsel %vm9580_vm2, %v2504_v61, 0  ;;  %8884 = vmatmul.mubr.msk.bf16.gmra.mrb[36].mxu1 %vm1928_vm13, %v1908_v63  ;;  %v1099_v12 = vpop.permute.xlu1 %1098 }
 0x1d8   : > { %v2500_v4 = vor.u32 %v2498_v7, %v2497_v31  ;;  %v2690_v5 = vsel %vm9580_vm2, %v2497_v31, 0  ;;  %v1097_v16 = vpop.permute.xlu0 %1096  ;;  %v3044_v22 = vrot.slane %v2691_v11, 1  ;;  %v2776_v60 = vshll.u32 %v2691_v11, 16 }
 0x1d9   : > { %v10536_v0 = vsel %vm9580_vm2, 0, %v2507_v10  ;;  %v3041_v27 = vrot.slane %v2690_v5, 1  ;;  %v1597_v35 = vsel %vm1553_vm5, %v10217_v52, %v1099_v12  ;;  %v2764_v39 = vshll.u32 %v2690_v5, 16 }
 0x1da   : > { %3232 = vrot.lane.b32.xlu0 %v10536_v0, %s9459_s15  ;;  %v10542_v17 = vsel %vm9580_vm2, 0, %v2500_v4  ;;  %v3043_v18 = vrot.slane %v10536_v0, 1  ;;  %v2771_v24 = vshll.u32 %v10536_v0, 16  ;;  %v2769_v42 = vshrl.u32 %v10536_v0, 16 }
 0x1db   : > { %3230 = vrot.lane.b32.xlu1 %v10542_v17, %s9459_s15  ;;  %v3040_v53 = vrot.slane %v10542_v17, 1  ;;  %v2759_v30 = vshll.u32 %v10542_v17, 16  ;;  %v1254_v23 = vpop.permute.xlu1 %1253  ;;  %v2757_v38 = vshrl.u32 %v10542_v17, 16  ;;  %v1595_v26 = vsel %vm1553_vm5, %v10196_v29, %v1097_v16 }
 0x1dc   : > { %v10551_v13 = vsel %vm1144_vm3, %v3043_v18, %v3044_v22  ;;  %v1252_v33 = vpop.permute.xlu0 %1251  ;;  %v2773_v14 = vrot.slane %v2771_v24, 1  ;;  %v1642_v21 = vsel %vm1598_vm6, %v1597_v35, %v1254_v23  ;;  %v2778_v45 = vrot.slane %v2776_v60, 1 }
 0x1dd   : > { %v3042_v54 = vsel %vm1144_vm3, %v3040_v53, %v3041_v27  ;;  %v2761_v19 = vrot.slane %v2759_v30, 1  ;;  %v1640_v44 = vsel %vm1598_vm6, %v1595_v26, %v1252_v33  ;;  %v2766_v6 = vrot.slane %v2764_v39, 1 }
 0x1de   : > { %8899 = vmatprep.mubr.msk.bf16.mxu0 %vm3322_vm14, %v3042_v54  ;;  %3193 = vrot.lane.b32.xlu0 %v10551_v13, %s9457_s25  ;;  %v2774_v41 = vor.u32 %v2773_v14, %v2769_v42  ;;  %vm8083_vm5 = vcmask 1044484   ;;  %vm8085_vm6 = vcmask 1045509  }
 0x1df   : > { %3135 = vrot.lane.b32.xlu1 %v10542_v17, %s9458_s28  ;;  %8900 = vmatmul.mubr.msk.bf16.gmra.mrb[4].mxu0 %vm3322_vm14, %v10551_v13  ;;  %v1299_v37 = vpop.permute.xlu1 %1298  ;;  %v2762_v25 = vor.u32 %v2761_v19, %v2757_v38 }
 0x1e0   : > { %v1297_v32 = vpop.permute.xlu0 %1296  ;;  %v10572_v34 = vsel %vm791_vm4, %v2774_v41, %v2778_v45  ;;  %v1687_v29 = vsel %vm1643_vm7, %v1642_v21, %v1299_v37 }
 0x1e1   : > { %v10578_v55 = vsel %vm791_vm4, %v2762_v25, %v2766_v6  ;;  %v1685_v40 = vsel %vm1643_vm7, %v1640_v44, %v1297_v32  ;;  %vm8087_vm7 = vcmask 1046534  }
 0x1e2   : > { %3191 = vrot.lane.b32.xlu0 %v3042_v54, %s9457_s25 }
 0x1e3   : > { %3096 = vrot.lane.b32.xlu1 %v3042_v54, %s9459_s15  ;;  %v1355_v52 = vpop.permute.xlu1 %1354 }
 0x1e4   : > { %v1353_v49 = vpop.permute.xlu0 %1352  ;;  %v1732_v57 = vsel %vm1688_vm8, %v1687_v29, %v1355_v52 }
 0x1e5   : > { %v1730_v20 = vsel %vm1688_vm8, %v1685_v40, %v1353_v49  ;;  %vm8089_vm8 = vcmask 1047559  }
 0x1e6   : > { %3284 = vrot.lane.b32.xlu0 %v10572_v34, %s9458_s28 }
 0x1e7   : > { %2956 = vrot.lane.b32.xlu1 %v10578_v55, %s9457_s25  ;;  %v1403_v56 = vpop.permute.xlu1 %1402 }
 0x1e8   : > { %v1401_v51 = vpop.permute.xlu0 %1400  ;;  %v1777_v63 = vsel %vm1733_vm9, %v1732_v57, %v1403_v56 }
 0x1e9   : > { %v1775_v43 = vsel %vm1733_vm9, %v1730_v20, %v1401_v51 }
 0x1ea   : > { %v8861_v47 = vpop.f32.mrb[12].mxu1  ;;  %3282 = vrot.lane.b32.xlu0 %v10578_v55, %s9458_s28 }
 0x1eb   : > { %v2068_v48 = vadd.f32 %v8861_v47, %v10446_v62  ;;  %3137 = vrot.lane.b32.xlu1 %v10536_v0, %s9458_s28  ;;  %v2059_v50 = vpop.f32.mrb[13].mxu1  ;;  %v1448_v2 = vpop.permute.xlu1 %1447 }
 0x1ec   : > { %v2060_v61 = vadd.f32 %v10446_v62, %v2059_v50  ;;  %v8862_v59 = vpop.f32.mrb[14].mxu1  ;;  %v1446_v31 = vpop.permute.xlu0 %1445  ;;  %v1822_v12 = vsel %vm1778_vm10, %v1777_v63, %v1448_v2 }
 0x1ed   : > { %v2071_v7 = vadd.f32 %v8862_v59, %v10446_v62  ;;  %v2062_v10 = vpop.f32.mrb[15].mxu1  ;;  %v2200_v4 = vmax.f32 %v2068_v48, 0.0  ;;  %v1820_v16 = vsel %vm1778_vm10, %v1775_v43, %v1446_v31 }
 0x1ee   : > { %v2063_v11 = vadd.f32 %v10446_v62, %v2062_v10  ;;  %v2198_v22 = vmax.f32 %v2060_v61, 0.0 }
 0x1ef   : > { %v2201_v5 = vmax.f32 %v2071_v7, 0.0  ;;  %2958 = vrot.lane.b32.xlu1 %v10572_v34, %s9457_s25  ;;  %v1504_v18 = vpop.permute.xlu1 %1503 }
 0x1f0   : > { %v2199_v24 = vmax.f32 %v2063_v11, 0.0  ;;  %v1502_v53 = vpop.permute.xlu0 %1501  ;;  %v1867_v30 = vsel %vm1823_vm11, %v1822_v12, %v1504_v18 }
 0x1f1   : > { %v2413_v27 = vpack.c.bf16 %v2201_v5, %v2200_v4  ;;  %v1865_v33 = vsel %vm1823_vm11, %v1820_v16, %v1502_v53 }
 0x1f2   : > { %v2412_v23 = vpack.c.bf16 %v2199_v24, %v2198_v22 }
 0x1f3   : > { %v2516_v54 = vshrl.u32 %v2413_v27, 16  ;;  %3098 = vrot.lane.b32.xlu1 %v10551_v13, %s9459_s15  ;;  %v1552_v14 = vpop.permute.xlu1 %1551  ;;  %v2519_v37 = vshll.u32 %v2413_v27, 16 }
 0x1f4   : > { %v2509_v19 = vshrl.u32 %v2412_v23, 16  ;;  %v1912_v42 = vsel %vm1868_vm12, %v1867_v30, %v1552_v14  ;;  %v1550_v60 = vpop.permute.xlu0 %1549  ;;  %v2512_v26 = vshll.u32 %v2412_v23, 16 }
 0x1f5   : > { %v2518_v35 = vrot.slane %v2516_v54, 7  ;;  %v1910_v38 = vsel %vm1868_vm12, %v1865_v33, %v1550_v60 }
 0x1f6   : > { %v2511_v39 = vrot.slane %v2509_v19, 7  ;;  %8887 = vmatprep.mubr.msk.bf16.mxu1 %vm1928_vm13, %v1910_v38 }
 0x1f7   : > { %v2521_v32 = vor.u32 %v2519_v37, %v2518_v35  ;;  %8888 = vmatmul.mubr.msk.bf16.gmra.mrb[40].mxu1 %vm1928_vm13, %v1912_v42  ;;  %v2693_v45 = vsel %vm9580_vm2, %v2518_v35, 0  ;;  %v2949_v6 = vpop.permute.xlu1 %2948 }
 0x1f8   : > { %v2514_v41 = vor.u32 %v2512_v26, %v2511_v39  ;;  %v2692_v13 = vsel %vm9580_vm2, %v2511_v39, 0  ;;  %v10609_v25 = vpop.permute.xlu0 %9187  ;;  %v3050_v57 = vrot.slane %v2693_v45, 1  ;;  %v3324_v20 = vsel %vm3322_vm14, %v10166_v58, %v2949_v6 }
 0x1f9   : > { %v10613_v21 = vsel %vm9580_vm2, 0, %v2521_v32  ;;  %v3047_v29 = vrot.slane %v2692_v13, 1  ;;  %v2788_v56 = vshll.u32 %v2692_v13, 16  ;;  %v9189_v63 = vunpack.i.l.bf16 %v10609_v25 }
 0x1fa   : > { %v10619_v44 = vsel %vm9580_vm2, 0, %v2514_v41  ;;  %v3049_v52 = vrot.slane %v10613_v21, 1  ;;  %v2795_v59 = vshll.u32 %v10613_v21, 16  ;;  %v2793_v27 = vshrl.u32 %v10613_v21, 16 }
 0x1fb   : > { %3139 = vrot.lane.b32.xlu1 %v10619_v44, %s9458_s28  ;;  %3234 = vrot.lane.b32.xlu0 %v10619_v44, %s9459_s15  ;;  %v3046_v49 = vrot.slane %v10619_v44, 1  ;;  %v2783_v40 = vshll.u32 %v10619_v44, 16  ;;  %v2781_v51 = vshrl.u32 %v10619_v44, 16  ;;  %v2790_v7 = vrot.slane %v2788_v56, 1  ;;  %v3279_v11 = vpop.permute.xlu1 %3278 }
 0x1fc   : > { %v9193_v47 = vpop.permute.xlu0 %9192  ;;  %v3051_v61 = vsel %vm1144_vm3, %v3049_v52, %v3050_v57  ;;  %v3467_v10 = vsel %vm3322_vm14, %v10356_v3, %v9189_v63  ;;  %v2797_v24 = vrot.slane %v2795_v59, 1  ;;  %v2800_v30 = vshll.u32 %v2693_v45, 16 }
 0x1fd   : > { %v3048_v48 = vsel %vm1144_vm3, %v3046_v49, %v3047_v29  ;;  %v2785_v50 = vrot.slane %v2783_v40, 1  ;;  %v9195_v2 = vunpack.i.h.bf16 %v9193_v47  ;;  %v9194_v43 = vunpack.i.l.bf16 %v9193_v47 }
 0x1fe   : > { %8903 = vmatprep.mubr.msk.bf16.mxu0 %vm3322_vm14, %v3048_v48  ;;  %v2798_v23 = vor.u32 %v2797_v24, %v2793_v27  ;;  %v2802_v33 = vrot.slane %v2800_v30, 1 }
 0x1ff   : > { %8904 = vmatmul.mubr.msk.bf16.gmra.mrb[8].mxu0 %vm3322_vm14, %v3051_v61  ;;  %3195 = vrot.lane.b32.xlu0 %v3048_v48, %s9457_s25  ;;  %v2786_v31 = vor.u32 %v2785_v50, %v2781_v51  ;;  %v3526_v4 = vsel %vm3363_vm15, %v3467_v10, %v9194_v43  ;;  %v3365_v5 = vsel %vm3363_vm15, %v3324_v20, %v9195_v2 }
 0x200   : > { %v10640_v12 = vpop.permute.xlu0 %9197  ;;  %v3566_v22 = vsel %vm3404_vm0, %v3526_v4, %v3279_v11  ;;  %v10661_v14 = vsel %vm791_vm4, %v2798_v23, %v2802_v33  ;;  %v2951_v33 = vpop.permute.xlu1 %2950 }
 0x201   : > { %v10645_v16 = vsel %vm791_vm4, %v2786_v31, %v2790_v7  ;;  %v9199_v18 = vunpack.i.l.bf16 %v10640_v12  ;;  %3831 = vmatprep.mubr.bf16.mxu1 %v3566_v22 }
 0x202   : > { %2960 = vrot.lane.b32.xlu1 %v10645_v16, %s9457_s25 }
 0x203   : > { %3286 = vrot.lane.b32.xlu0 %v10645_v16, %s9458_s28  ;;  %v3406_v53 = vsel %vm3404_vm0, %v3365_v5, %v9199_v18 }
 0x204   : > { %3832 = vmatmul.mubr.bf16.vlgmr.msra.gmra.mrb[44].mxu1 %v3406_v53 }
 0x206   : > { %3100 = vrot.lane.b32.xlu1 %v3048_v48, %s9459_s15 }
 0x207   : > { %3236 = vrot.lane.b32.xlu0 %v10613_v21, %s9459_s15 }
 0x20a   : > { %3141 = vrot.lane.b32.xlu1 %v10613_v21, %s9458_s28  ;;  %v8865_v54 = vpop.f32.mrb[16].mxu1 }
 0x20b   : > { %v2084_v19 = vadd.f32 %v8865_v54, %v10446_v62  ;;  %v2075_v42 = vpop.f32.mrb[17].mxu1  ;;  %3288 = vrot.lane.b32.xlu0 %v10661_v14, %s9458_s28 }
 0x20c   : > { %v2076_v60 = vadd.f32 %v10446_v62, %v2075_v42  ;;  %v8866_v35 = vpop.f32.mrb[18].mxu1 }
 0x20d   : > { %v2087_v37 = vadd.f32 %v8866_v35, %v10446_v62  ;;  %v2078_v38 = vpop.f32.mrb[19].mxu1  ;;  %v2204_v26 = vmax.f32 %v2084_v19, 0.0 }
 0x20e   : > { %v2079_v39 = vadd.f32 %v10446_v62, %v2078_v38  ;;  %2962 = vrot.lane.b32.xlu1 %v10661_v14, %s9457_s25  ;;  %v2202_v41 = vmax.f32 %v2076_v60, 0.0  ;;  %v10714_v38 = vpop.permute.xlu0 %2952 }
 0x20f   : > { %v2205_v32 = vmax.f32 %v2087_v37, 0.0  ;;  %3197 = vrot.lane.b32.xlu0 %v3051_v61, %s9457_s25 }
 0x210   : > { %v2203_v13 = vmax.f32 %v2079_v39, 0.0 }
 0x211   : > { %v2415_v45 = vpack.c.bf16 %v2205_v32, %v2204_v26 }
 0x212   : > { %v2414_v52 = vpack.c.bf16 %v2203_v13, %v2202_v41  ;;  %3102 = vrot.lane.b32.xlu1 %v3051_v61, %s9459_s15  ;;  %v10720_v13 = vpop.permute.xlu1 %9202 }
 0x213   : > { %v2530_v6 = vshrl.u32 %v2415_v45, 16  ;;  %v2533_v40 = vshll.u32 %v2415_v45, 16 }
 0x214   : > { %v2523_v49 = vshrl.u32 %v2414_v52, 16  ;;  %v2526_v57 = vshll.u32 %v2414_v52, 16  ;;  %v9190_v52 = vunpack.i.h.bf16 %v10609_v25 }
 0x215   : > { %v2532_v29 = vrot.slane %v2530_v6, 7 }
 0x216   : > { %v2525_v56 = vrot.slane %v2523_v49, 7  ;;  %v9204_v49 = vunpack.i.l.bf16 %v10720_v13  ;;  %v3470_v25 = vsel %vm3322_vm14, %v10356_v3, %v9190_v52 }
 0x217   : > { %v2535_v51 = vor.u32 %v2533_v40, %v2532_v29  ;;  %v2695_v50 = vsel %vm9580_vm2, %v2532_v29, 0  ;;  %v3326_v40 = vsel %vm3322_vm14, %v10166_v58, %v2951_v33 }
 0x218   : > { %v2528_v20 = vor.u32 %v2526_v57, %v2525_v56  ;;  %v2694_v47 = vsel %vm9580_vm2, %v2525_v56, 0  ;;  %v3056_v7 = vrot.slane %v2695_v50, 1  ;;  %v2824_v23 = vshll.u32 %v2695_v50, 16 }
 0x219   : > { %v10677_v48 = vsel %vm9580_vm2, 0, %v2535_v51  ;;  %v3053_v59 = vrot.slane %v2694_v47, 1  ;;  %v2812_v31 = vshll.u32 %v2694_v47, 16 }
 0x21a   : > { %v10683_v63 = vsel %vm9580_vm2, 0, %v2528_v20  ;;  %v3055_v2 = vrot.slane %v10677_v48, 1  ;;  %v2819_v53 = vshll.u32 %v10677_v48, 16  ;;  %v2817_v30 = vshrl.u32 %v10677_v48, 16 }
 0x21b   : > { %3143 = vrot.lane.b32.xlu1 %v10683_v63, %s9458_s28  ;;  %3238 = vrot.lane.b32.xlu0 %v10683_v63, %s9459_s15  ;;  %v3052_v61 = vrot.slane %v10683_v63, 1  ;;  %v2807_v43 = vshll.u32 %v10683_v63, 16  ;;  %v2805_v11 = vshrl.u32 %v10683_v63, 16  ;;  %v2814_v22 = vrot.slane %v2812_v31, 1 }
 0x21c   : > { %v3057_v5 = vsel %vm1144_vm3, %v3055_v2, %v3056_v7  ;;  %v2821_v27 = vrot.slane %v2819_v53, 1  ;;  %v2826_v35 = vrot.slane %v2824_v23, 1  ;;  %v9200_v20 = vunpack.i.h.bf16 %v10640_v12 }
 0x21d   : > { %v3054_v10 = vsel %vm1144_vm3, %v3052_v61, %v3053_v59  ;;  %v2809_v4 = vrot.slane %v2807_v43, 1  ;;  %v3367_v61 = vsel %vm3363_vm15, %v3326_v40, %v9204_v49 }
 0x21e   : > { %8907 = vmatprep.mubr.msk.bf16.mxu0 %vm3322_vm14, %v3054_v10  ;;  %v2822_v54 = vor.u32 %v2821_v27, %v2817_v30 }
 0x21f   : > { %8908 = vmatmul.mubr.msk.bf16.gmra.mrb[12].mxu0 %vm3322_vm14, %v3057_v5  ;;  %v2810_v18 = vor.u32 %v2809_v4, %v2805_v11  ;;  %v3409_v4 = vsel %vm3404_vm0, %v3367_v61, %v9200_v20 }
 0x220   : > { %v10718_v41 = vsel %vm791_vm4, %v2822_v54, %v2826_v35 }
 0x221   : > { %v10698_v24 = vsel %vm791_vm4, %v2810_v18, %v2814_v22 }
 0x222   : > { %2964 = vrot.lane.b32.xlu1 %v10698_v24, %s9457_s25  ;;  %3290 = vrot.lane.b32.xlu0 %v10698_v24, %s9458_s28 }
 0x226   : > { %3104 = vrot.lane.b32.xlu1 %v3054_v10, %s9459_s15  ;;  %3199 = vrot.lane.b32.xlu0 %v3054_v10, %s9457_s25 }
 0x22a   : > { %3145 = vrot.lane.b32.xlu1 %v10677_v48, %s9458_s28  ;;  %v8869_v19 = vpop.f32.mrb[20].mxu1  ;;  %3240 = vrot.lane.b32.xlu0 %v10677_v48, %s9459_s15 }
 0x22b   : > { %v2100_v42 = vadd.f32 %v8869_v19, %v10446_v62  ;;  %v2091_v60 = vpop.f32.mrb[21].mxu1 }
 0x22c   : > { %v2092_v37 = vadd.f32 %v10446_v62, %v2091_v60  ;;  %v8870_v39 = vpop.f32.mrb[22].mxu1 }
 0x22d   : > { %v2103_v26 = vadd.f32 %v8870_v39, %v10446_v62  ;;  %v2094_v32 = vpop.f32.mrb[23].mxu1  ;;  %v2208_v6 = vmax.f32 %v2100_v42, 0.0 }
 0x22e   : > { %v2095_v45 = vadd.f32 %v10446_v62, %v2094_v32  ;;  %2966 = vrot.lane.b32.xlu1 %v10718_v41, %s9457_s25  ;;  %3292 = vrot.lane.b32.xlu0 %v10718_v41, %s9458_s28  ;;  %v2206_v56 = vmax.f32 %v2092_v37, 0.0 }
 0x22f   : > { %v2209_v29 = vmax.f32 %v2103_v26, 0.0  ;;  %v3229_v50 = vpop.permute.xlu0 %3228  ;;  %v10759_v37 = vpop.permute.xlu1 %3133 }
 0x230   : > { %v2207_v57 = vmax.f32 %v2095_v45, 0.0  ;;  %v3528_v11 = vsel %vm3363_vm15, %v3470_v25, %v3229_v50 }
 0x231   : > { %v2417_v51 = vpack.c.bf16 %v2209_v29, %v2208_v6 }
 0x232   : > { %v2416_v47 = vpack.c.bf16 %v2207_v57, %v2206_v56  ;;  %3106 = vrot.lane.b32.xlu1 %v3057_v5, %s9459_s15  ;;  %3201 = vrot.lane.b32.xlu0 %v3057_v5, %s9457_s25 }
 0x233   : > { %v2544_v2 = vshrl.u32 %v2417_v51, 16  ;;  %v2547_v31 = vshll.u32 %v2417_v51, 16  ;;  %v3190_v40 = vpop.permute.xlu1 %3189 }
 0x234   : > { %v2537_v59 = vshrl.u32 %v2416_v47, 16  ;;  %v2540_v10 = vshll.u32 %v2416_v47, 16 }
 0x235   : > { %v2546_v43 = vrot.slane %v2544_v2, 7 }
 0x236   : > { %v2539_v7 = vrot.slane %v2537_v59, 7  ;;  %v3281_v12 = vpop.permute.xlu0 %3280 }
 0x237   : > { %v2549_v18 = vor.u32 %v2547_v31, %v2546_v43  ;;  %v3569_v22 = vsel %vm3404_vm0, %v3528_v11, %v3281_v12  ;;  %v2697_v30 = vsel %vm9580_vm2, %v2546_v43, 0  ;;  %v10777_v20 = vpop.permute.xlu1 %3094 }
 0x238   : > { %v2542_v5 = vor.u32 %v2540_v10, %v2539_v7  ;;  %v2696_v53 = vsel %vm9580_vm2, %v2539_v7, 0  ;;  %3839 = vmatprep.mubr.bf16.mxu1 %v3569_v22  ;;  %v3062_v35 = vrot.slane %v2697_v30, 1  ;;  %v2848_v51 = vshll.u32 %v2697_v30, 16 }
 0x239   : > { %v10744_v27 = vsel %vm9580_vm2, 0, %v2549_v18  ;;  %3840 = vmatmul.mubr.bf16.gmra.mrb[48].mxu1 %v3409_v4  ;;  %v3059_v19 = vrot.slane %v2696_v53, 1  ;;  %v2836_v60 = vshll.u32 %v2696_v53, 16 }
 0x23a   : > { %v10750_v23 = vsel %vm9580_vm2, 0, %v2542_v5  ;;  %v3061_v33 = vrot.slane %v10744_v27, 1  ;;  %v2843_v29 = vshll.u32 %v10744_v27, 16  ;;  %v2841_v57 = vshrl.u32 %v10744_v27, 16 }
 0x23b   : > { %3147 = vrot.lane.b32.xlu1 %v10750_v23, %s9458_s28  ;;  %3242 = vrot.lane.b32.xlu0 %v10750_v23, %s9459_s15  ;;  %v3058_v54 = vrot.slane %v10750_v23, 1  ;;  %v2831_v42 = vshll.u32 %v10750_v23, 16  ;;  %v2829_v26 = vshrl.u32 %v10750_v23, 16  ;;  %v2838_v6 = vrot.slane %v2836_v60, 1  ;;  %v2955_v4 = vpop.permute.xlu1 %2954 }
 0x23c   : > { %v3063_v45 = vsel %vm1144_vm3, %v3061_v33, %v3062_v35  ;;  %v2845_v56 = vrot.slane %v2843_v29, 1  ;;  %v2850_v61 = vrot.slane %v2848_v51, 1 }
 0x23d   : > { %v3060_v39 = vsel %vm1144_vm3, %v3058_v54, %v3059_v19  ;;  %v2833_v32 = vrot.slane %v2831_v42, 1 }
 0x23e   : > { %8911 = vmatprep.mubr.msk.bf16.mxu0 %vm3322_vm14, %v3060_v39  ;;  %v2846_v47 = vor.u32 %v2845_v56, %v2841_v57 }
 0x23f   : > { %8912 = vmatmul.mubr.msk.bf16.gmra.mrb[16].mxu0 %vm3322_vm14, %v3063_v45  ;;  %v2834_v52 = vor.u32 %v2833_v32, %v2829_v26 }
 0x240   : > { %v10787_v11 = vsel %vm791_vm4, %v2846_v47, %v2850_v61 }
 0x241   : > { %v10767_v49 = vsel %vm791_vm4, %v2834_v52, %v2838_v6  ;;  %v3328_v52 = vsel %vm3322_vm14, %v10166_v58, %v10714_v38  ;;  %v3473_v38 = vsel %vm3322_vm14, %v10499_v1, %v3190_v40 }
 0x242   : > { %2968 = vrot.lane.b32.xlu1 %v10767_v49, %s9457_s25  ;;  %3294 = vrot.lane.b32.xlu0 %v10767_v49, %s9458_s28 }
 0x246   : > { %3108 = vrot.lane.b32.xlu1 %v3060_v39, %s9459_s15  ;;  %3203 = vrot.lane.b32.xlu0 %v3060_v39, %s9457_s25  ;;  %v9205_v39 = vunpack.i.h.bf16 %v10720_v13 }
 0x249   : > { %v8873_v50 = vpop.f32.mrb[24].mxu1 }
 0x24a   : > { %3149 = vrot.lane.b32.xlu1 %v10744_v27, %s9458_s28  ;;  %3244 = vrot.lane.b32.xlu0 %v10744_v27, %s9459_s15  ;;  %v2116_v2 = vadd.f32 %v8873_v50, %v10446_v62  ;;  %v2107_v25 = vpop.f32.mrb[25].mxu1 }
 0x24b   : > { %v2108_v59 = vadd.f32 %v10446_v62, %v2107_v25  ;;  %v8874_v43 = vpop.f32.mrb[26].mxu1 }
 0x24c   : > { %v3233_v31 = vpop.permute.xlu0 %3232  ;;  %v2119_v7 = vadd.f32 %v8874_v43, %v10446_v62  ;;  %v2110_v10 = vpop.f32.mrb[27].mxu1  ;;  %v2212_v18 = vmax.f32 %v2116_v2, 0.0  ;;  %v3369_v2 = vsel %vm3363_vm15, %v3328_v52, %v9205_v39 }
 0x24d   : > { %v2111_v12 = vadd.f32 %v10446_v62, %v2110_v10  ;;  %v2210_v5 = vmax.f32 %v2108_v59, 0.0  ;;  %v3231_v42 = vpop.permute.xlu1 %3230 }
 0x24e   : > { %2970 = vrot.lane.b32.xlu1 %v10787_v11, %s9457_s25  ;;  %3296 = vrot.lane.b32.xlu0 %v10787_v11, %s9458_s28  ;;  %v2213_v22 = vmax.f32 %v2119_v7, 0.0 }
 0x24f   : > { %v2211_v53 = vmax.f32 %v2111_v12, 0.0 }
 0x250   : > { %v10794_v30 = vpop.permute.xlu0 %3193  ;;  %v2419_v33 = vpack.c.bf16 %v2213_v22, %v2212_v18 }
 0x251   : > { %v2418_v54 = vpack.c.bf16 %v2211_v53, %v2210_v5  ;;  %v3136_v50 = vpop.permute.xlu1 %3135 }
 0x252   : > { %3110 = vrot.lane.b32.xlu1 %v3063_v45, %s9459_s15  ;;  %3205 = vrot.lane.b32.xlu0 %v3063_v45, %s9457_s25  ;;  %v2558_v19 = vshrl.u32 %v2419_v33, 16  ;;  %v2561_v32 = vshll.u32 %v2419_v33, 16  ;;  %v3412_v33 = vsel %vm3404_vm0, %v3369_v2, %v10759_v37  ;;  %v3330_v37 = vsel %vm3322_vm14, %v10486_v36, %v2955_v4 }
 0x253   : > { %v2551_v60 = vshrl.u32 %v2418_v54, 16  ;;  %v2554_v29 = vshll.u32 %v2418_v54, 16  ;;  %v3371_v52 = vsel %vm3363_vm15, %v3330_v37, %v10777_v20 }
 0x254   : > { %v3192_v35 = vpop.permute.xlu0 %3191  ;;  %v2560_v26 = vrot.slane %v2558_v19, 7 }
 0x255   : > { %v2553_v6 = vrot.slane %v2551_v60, 7  ;;  %v3476_v25 = vsel %vm3322_vm14, %v10578_v55, %v3192_v35  ;;  %v3530_v55 = vsel %vm3363_vm15, %v3473_v38, %v3231_v42  ;;  %v3097_v42 = vpop.permute.xlu1 %3096 }
 0x256   : > { %v2563_v56 = vor.u32 %v2561_v32, %v2560_v26  ;;  %v2699_v13 = vsel %vm9580_vm2, %v2560_v26, 0  ;;  %v3532_v19 = vsel %vm3363_vm15, %v3476_v25, %v3233_v31 }
 0x257   : > { %v2556_v57 = vor.u32 %v2554_v29, %v2553_v6  ;;  %v2698_v51 = vsel %vm9580_vm2, %v2553_v6, 0  ;;  %v3068_v12 = vrot.slane %v2699_v13, 1  ;;  %v3415_v29 = vsel %vm3404_vm0, %v3371_v52, %v3136_v50 }
 0x258   : > { %v3285_v45 = vpop.permute.xlu0 %3284  ;;  %v10806_v47 = vsel %vm9580_vm2, 0, %v2563_v56  ;;  %v3065_v7 = vrot.slane %v2698_v51, 1  ;;  %v2860_v40 = vshll.u32 %v2698_v51, 16  ;;  %v2872_v4 = vshll.u32 %v2699_v13, 16 }
 0x259   : > { %v10817_v61 = vsel %vm9580_vm2, 0, %v2556_v57  ;;  %v3067_v59 = vrot.slane %v10806_v47, 1  ;;  %v3575_v60 = vsel %vm3404_vm0, %v3532_v19, %v3285_v45  ;;  %v2867_v32 = vshll.u32 %v10806_v47, 16  ;;  %v2957_v31 = vpop.permute.xlu1 %2956 }
 0x25a   : > { %3151 = vrot.lane.b32.xlu1 %v10817_v61, %s9458_s28  ;;  %3246 = vrot.lane.b32.xlu0 %v10817_v61, %s9459_s15  ;;  %v3064_v43 = vrot.slane %v10817_v61, 1  ;;  %v2855_v1 = vshll.u32 %v10817_v61, 16  ;;  %v2853_v5 = vshrl.u32 %v10817_v61, 16  ;;  %v2862_v39 = vrot.slane %v2860_v40, 1 }
 0x25b   : > { %v3069_v54 = vsel %vm1144_vm3, %v3067_v59, %v3068_v12  ;;  %v2869_v6 = vrot.slane %v2867_v32, 1  ;;  %v2865_v36 = vshrl.u32 %v10806_v47, 16  ;;  %v2874_v2 = vrot.slane %v2872_v4, 1 }
 0x25c   : > { %v3283_v10 = vpop.permute.xlu0 %3282  ;;  %v3066_v22 = vsel %vm1144_vm3, %v3064_v43, %v3065_v7  ;;  %v2857_v53 = vrot.slane %v2855_v1, 1  ;;  %v3479_v19 = vsel %vm3322_vm14, %v10572_v34, %v10794_v30 }
 0x25d   : > { %v3572_v18 = vsel %vm3404_vm0, %v3530_v55, %v3283_v10  ;;  %8915 = vmatprep.mubr.msk.bf16.mxu0 %vm3322_vm14, %v3066_v22  ;;  %v2870_v56 = vor.u32 %v2869_v6, %v2865_v36  ;;  %v3138_v20 = vpop.permute.xlu1 %3137 }
 0x25e   : > { %3847 = vmatprep.mubr.bf16.mxu1 %v3572_v18  ;;  %8916 = vmatmul.mubr.msk.bf16.gmra.mrb[20].mxu0 %vm3322_vm14, %v3069_v54  ;;  %v2858_v35 = vor.u32 %v2857_v53, %v2853_v5  ;;  %v3332_v53 = vsel %vm3322_vm14, %v10542_v17, %v2957_v31 }
 0x25f   : > { %3848 = vmatmul.mubr.bf16.gmra.mrb[52].mxu1 %v3412_v33  ;;  %v10861_v13 = vsel %vm791_vm4, %v2870_v56, %v2874_v2  ;;  %v3373_v36 = vsel %vm3363_vm15, %v3332_v53, %v3097_v42 }
 0x260   : > { %3855 = vmatprep.mubr.bf16.mxu1 %v3575_v60  ;;  %v10838_v26 = vsel %vm791_vm4, %v2858_v35, %v2862_v39  ;;  %v3418_v34 = vsel %vm3404_vm0, %v3373_v36, %v3138_v20 }
 0x261   : > { %2972 = vrot.lane.b32.xlu1 %v10838_v26, %s9457_s25  ;;  %3298 = vrot.lane.b32.xlu0 %v10838_v26, %s9458_s28  ;;  %v2959_v12 = vpop.permute.xlu1 %2958 }
 0x265   : > { %3112 = vrot.lane.b32.xlu1 %v3066_v22, %s9459_s15  ;;  %3207 = vrot.lane.b32.xlu0 %v3066_v22, %s9457_s25  ;;  %v3099_v6 = vpop.permute.xlu1 %3098 }
 0x267   : > { %3856 = vmatmul.mubr.bf16.gmra.mrb[56].mxu1 %v3415_v29 }
 0x269   : > { %3153 = vrot.lane.b32.xlu1 %v10806_v47, %s9458_s28  ;;  %3248 = vrot.lane.b32.xlu0 %v10806_v47, %s9459_s15 }
 0x26a   : > { %v8877_v57 = vpop.f32.mrb[28].mxu1 }
 0x26b   : > { %v2132_v51 = vadd.f32 %v8877_v57, %v10446_v62  ;;  %v2123_v45 = vpop.f32.mrb[29].mxu1 }
 0x26c   : > { %v2124_v38 = vadd.f32 %v10446_v62, %v2123_v45  ;;  %v8878_v50 = vpop.f32.mrb[30].mxu1 }
 0x26d   : > { %v2135_v25 = vadd.f32 %v8878_v50, %v10446_v62  ;;  %v2126_v59 = vpop.f32.mrb[31].mxu1  ;;  %v3235_v7 = vpop.permute.xlu0 %3234  ;;  %2974 = vrot.lane.b32.xlu1 %v10861_v13, %s9457_s25  ;;  %3300 = vrot.lane.b32.xlu0 %v10861_v13, %s9458_s28  ;;  %v2216_v1 = vmax.f32 %v2132_v51, 0.0 }
 0x26e   : > { %v2127_v43 = vadd.f32 %v10446_v62, %v2126_v59  ;;  %v2214_v55 = vmax.f32 %v2124_v38, 0.0  ;;  %v3534_v37 = vsel %vm3363_vm15, %v3479_v19, %v3235_v7  ;;  %v3140_v51 = vpop.permute.xlu1 %3139 }
 0x26f   : > { %v2217_v40 = vmax.f32 %v2135_v25, 0.0 }
 0x270   : > { %v2215_v10 = vmax.f32 %v2127_v43, 0.0 }
 0x271   : > { %v2421_v18 = vpack.c.bf16 %v2217_v40, %v2216_v1  ;;  %v3196_v5 = vpop.permute.xlu0 %3195  ;;  %3114 = vrot.lane.b32.xlu1 %v3069_v54, %s9459_s15  ;;  %3209 = vrot.lane.b32.xlu0 %v3069_v54, %s9457_s25  ;;  %v3334_v1 = vsel %vm3322_vm14, %v10536_v0, %v2959_v12 }
 0x272   : > { %v2420_v22 = vpack.c.bf16 %v2215_v10, %v2214_v55  ;;  %v3482_v25 = vsel %vm3322_vm14, %v10645_v16, %v3196_v5 }
 0x273   : > { %v2572_v62 = vshrl.u32 %v2421_v18, 16  ;;  %v2575_v35 = vshll.u32 %v2421_v18, 16  ;;  %v3375_v18 = vsel %vm3363_vm15, %v3334_v1, %v3099_v6 }
 0x274   : > { %v2565_v33 = vshrl.u32 %v2420_v22, 16  ;;  %v2568_v32 = vshll.u32 %v2420_v22, 16  ;;  %v2961_v22 = vpop.permute.xlu1 %2960  ;;  %v3421_v53 = vsel %vm3404_vm0, %v3375_v18, %v3140_v51 }
 0x275   : > { %v2574_v60 = vrot.slane %v2572_v62, 7  ;;  %v3287_v52 = vpop.permute.xlu0 %3286  ;;  %v3336_v18 = vsel %vm3322_vm14, %v10619_v44, %v2961_v22 }
 0x276   : > { %v2567_v39 = vrot.slane %v2565_v33, 7  ;;  %v3578_v54 = vsel %vm3404_vm0, %v3534_v37, %v3287_v52  ;;  %v10929_v52 = vld [vmem:[%s13449_s2] ss:$0 sm:$0xff] }
 0x277   : > { %v2577_v29 = vor.u32 %v2575_v35, %v2574_v60  ;;  %3863 = vmatprep.mubr.bf16.mxu1 %v3578_v54  ;;  %v2701_v31 = vsel %vm9580_vm2, %v2574_v60, 0 }
 0x278   : > { %v2570_v4 = vor.u32 %v2568_v32, %v2567_v39  ;;  %v2700_v17 = vsel %vm9580_vm2, %v2567_v39, 0  ;;  %3864 = vmatmul.mubr.bf16.gmra.mrb[60].mxu1 %v3418_v34  ;;  %v3074_v50 = vrot.slane %v2701_v31, 1  ;;  %v3101_v33 = vpop.permute.xlu1 %3100  ;;  %v2896_v35 = vshll.u32 %v2701_v31, 16 }
 0x279   : > { %v10883_v30 = vsel %vm9580_vm2, 0, %v2577_v29  ;;  %v3237_v56 = vpop.permute.xlu0 %3236  ;;  %v3071_v45 = vrot.slane %v2700_v17, 1  ;;  %v2884_v38 = vshll.u32 %v2700_v17, 16 }
 0x27a   : > { %v10889_v57 = vsel %vm9580_vm2, 0, %v2570_v4  ;;  %v3073_v42 = vrot.slane %v10883_v30, 1  ;;  %v3536_v40 = vsel %vm3363_vm15, %v3482_v25, %v3237_v56  ;;  %v2891_v12 = vshll.u32 %v10883_v30, 16 }
 0x27b   : > { %3155 = vrot.lane.b32.xlu1 %v10889_v57, %s9458_s28  ;;  %3250 = vrot.lane.b32.xlu0 %v10889_v57, %s9459_s15  ;;  %v3070_v20 = vrot.slane %v10889_v57, 1  ;;  %v2879_v2 = vshll.u32 %v10889_v57, 16  ;;  %v2877_v43 = vshrl.u32 %v10889_v57, 16  ;;  %v2886_v62 = vrot.slane %v2884_v38, 1 }
 0x27c   : > { %v3075_v10 = vsel %vm1144_vm3, %v3073_v42, %v3074_v50  ;;  %v2893_v19 = vrot.slane %v2891_v12, 1  ;;  %v2889_v60 = vshrl.u32 %v10883_v30, 16  ;;  %v3142_v37 = vpop.permute.xlu1 %3141  ;;  %v2898_v54 = vrot.slane %v2896_v35, 1 }
 0x27d   : > { %v3072_v59 = vsel %vm1144_vm3, %v3070_v20, %v3071_v45  ;;  %v2881_v7 = vrot.slane %v2879_v2, 1  ;;  %v3289_v55 = vpop.permute.xlu0 %3288 }
 0x27e   : > { %8919 = vmatprep.mubr.msk.bf16.mxu0 %vm3322_vm14, %v3072_v59  ;;  %v3581_v16 = vsel %vm3404_vm0, %v3536_v40, %v3289_v55  ;;  %v2894_v39 = vor.u32 %v2893_v19, %v2889_v60  ;;  %v3377_v19 = vsel %vm3363_vm15, %v3336_v18, %v3101_v33 }
 0x27f   : > { %8920 = vmatmul.mubr.msk.bf16.gmra.mrb[24].mxu0 %vm3322_vm14, %v3075_v10  ;;  %v2882_v5 = vor.u32 %v2881_v7, %v2877_v43  ;;  %3871 = vmatprep.mubr.bf16.mxu1 %v3581_v16 }
 0x280   : > { %3872 = vmatmul.mubr.bf16.gmra.mrb[64].mxu1 %v3421_v53  ;;  %v10935_v56 = vsel %vm791_vm4, %v2894_v39, %v2898_v54  ;;  %v2963_v38 = vpop.permute.xlu1 %2962 }
 0x281   : > { %v10912_v0 = vsel %vm791_vm4, %v2882_v5, %v2886_v62  ;;  %v3198_v17 = vpop.permute.xlu0 %3197 }
 0x282   : > { %2976 = vrot.lane.b32.xlu1 %v10912_v0, %s9457_s25  ;;  %3302 = vrot.lane.b32.xlu0 %v10912_v0, %s9458_s28  ;;  %v3485_v1 = vsel %vm3322_vm14, %v10661_v14, %v3198_v17 }
 0x286   : > { %3116 = vrot.lane.b32.xlu1 %v3072_v59, %s9459_s15  ;;  %3211 = vrot.lane.b32.xlu0 %v3072_v59, %s9457_s25 }
 0x28a   : > { %3157 = vrot.lane.b32.xlu1 %v10883_v30, %s9458_s28  ;;  %v8881_v32 = vpop.f32.mrb[32].mxu1  ;;  %3252 = vrot.lane.b32.xlu0 %v10883_v30, %s9459_s15 }
 0x28b   : > { %v2148_v6 = vadd.f32 %v10929_v52, %v8881_v32  ;;  %v2139_v29 = vpop.f32.mrb[33].mxu1  ;;  %v3103_v32 = vpop.permute.xlu1 %3102 }
 0x28c   : > { %v2140_v36 = vadd.f32 %v10929_v52, %v2139_v29  ;;  %v8882_v4 = vpop.f32.mrb[34].mxu1 }
 0x28d   : > { %v2151_v34 = vadd.f32 %v10929_v52, %v8882_v4  ;;  %v2142_v31 = vpop.f32.mrb[35].mxu1  ;;  %v2220_v51 = vmax.f32 %v2148_v6, 0.0  ;;  %v3239_v25 = vpop.permute.xlu0 %3238  ;;  %v3424_v6 = vsel %vm3404_vm0, %v3377_v19, %v3142_v37 }
 0x28e   : > { %v2143_v42 = vadd.f32 %v10929_v52, %v2142_v31  ;;  %2978 = vrot.lane.b32.xlu1 %v10935_v56, %s9457_s25  ;;  %3304 = vrot.lane.b32.xlu0 %v10935_v56, %s9458_s28  ;;  %v2218_v45 = vmax.f32 %v2140_v36, 0.0  ;;  %v3538_v62 = vsel %vm3363_vm15, %v3485_v1, %v3239_v25 }
 0x28f   : > { %v2221_v20 = vmax.f32 %v2151_v34, 0.0  ;;  %v3144_v37 = vpop.permute.xlu1 %3143 }
 0x290   : > { %v2219_v2 = vmax.f32 %v2143_v42, 0.0 }
 0x291   : > { %v2423_v50 = vpack.c.bf16 %v2221_v20, %v2220_v51 }
 0x292   : > { %v2422_v59 = vpack.c.bf16 %v2219_v2, %v2218_v45  ;;  %3118 = vrot.lane.b32.xlu1 %v3075_v10, %s9459_s15  ;;  %3213 = vrot.lane.b32.xlu0 %v3075_v10, %s9457_s25 }
 0x293   : > { %v2586_v43 = vshrl.u32 %v2423_v50, 16  ;;  %v8897_v7 = vpop.f32.mrb[0].mxu0  ;;  %v2589_v5 = vshll.u32 %v2423_v50, 16 }
 0x294   : > { %v2579_v40 = vshrl.u32 %v2422_v59, 16  ;;  %v4026_v55 = vpop.f32.mrb[1].mxu0  ;;  %v3291_v53 = vpop.permute.xlu0 %3290  ;;  %v2582_v10 = vshll.u32 %v2422_v59, 16 }
 0x295   : > { %v2588_v16 = vrot.slane %v2586_v43, 7  ;;  %v8898_v12 = vpop.f32.mrb[2].mxu0  ;;  %v3584_v35 = vsel %vm3404_vm0, %v3538_v62, %v3291_v53  ;;  %v2965_v59 = vpop.permute.xlu1 %2964 }
 0x296   : > { %v2581_v60 = vrot.slane %v2579_v40, 7  ;;  %v4029_v39 = vpop.f32.mrb[3].mxu0  ;;  %3879 = vmatprep.mubr.bf16.mxu1 %v3584_v35  ;;  %v3338_v40 = vsel %vm3322_vm14, %v10613_v21, %v2963_v38 }
 0x297   : > { %v2591_v14 = vor.u32 %v2589_v5, %v2588_v16  ;;  %3880 = vmatmul.mubr.bf16.gmra.mrb[68].mxu1 %v3424_v6  ;;  %v2703_v33 = vsel %vm9580_vm2, %v2588_v16, 0  ;;  %v3379_v62 = vsel %vm3363_vm15, %v3338_v40, %v3103_v32 }
 0x298   : > { %v2584_v29 = vor.u32 %v2582_v10, %v2581_v60  ;;  %v2702_v44 = vsel %vm9580_vm2, %v2581_v60, 0  ;;  %v3200_v54 = vpop.permute.xlu0 %3199  ;;  %v3080_v51 = vrot.slane %v2703_v33, 1  ;;  %v3427_v21 = vsel %vm3404_vm0, %v3379_v62, %v3144_v37 }
 0x299   : > { %v10956_v22 = vsel %vm9580_vm2, 0, %v2591_v14  ;;  %v3077_v34 = vrot.slane %v2702_v44, 1  ;;  %v2908_v42 = vshll.u32 %v2702_v44, 16  ;;  %v3488_v1 = vsel %vm3322_vm14, %v10698_v24, %v3200_v54  ;;  %v3105_v38 = vpop.permute.xlu1 %3104 }
 0x29a   : > { %v10962_v36 = vsel %vm9580_vm2, 0, %v2584_v29  ;;  %v3079_v4 = vrot.slane %v10956_v22, 1  ;;  %v2915_v5 = vshll.u32 %v10956_v22, 16  ;;  %v2913_v12 = vshrl.u32 %v10956_v22, 16 }
 0x29b   : > { %3159 = vrot.lane.b32.xlu1 %v10962_v36, %s9458_s28  ;;  %3254 = vrot.lane.b32.xlu0 %v10962_v36, %s9459_s15  ;;  %v3076_v17 = vrot.slane %v10962_v36, 1  ;;  %v2903_v31 = vshll.u32 %v10962_v36, 16  ;;  %v2901_v2 = vshrl.u32 %v10962_v36, 16  ;;  %v2910_v7 = vrot.slane %v2908_v42, 1 }
 0x29c   : > { %v3241_v20 = vpop.permute.xlu0 %3240  ;;  %v3081_v25 = vsel %vm1144_vm3, %v3079_v4, %v3080_v51  ;;  %v2917_v53 = vrot.slane %v2915_v5, 1  ;;  %v2920_v19 = vshll.u32 %v2703_v33, 16 }
 0x29d   : > { %v3078_v45 = vsel %vm1144_vm3, %v3076_v17, %v3077_v34  ;;  %v2905_v50 = vrot.slane %v2903_v31, 1  ;;  %v3540_v55 = vsel %vm3363_vm15, %v3488_v1, %v3241_v20  ;;  %v3146_v35 = vpop.permute.xlu1 %3145 }
 0x29e   : > { %8923 = vmatprep.mubr.msk.bf16.mxu0 %vm3322_vm14, %v3078_v45  ;;  %v2918_v60 = vor.u32 %v2917_v53, %v2913_v12  ;;  %v2922_v32 = vrot.slane %v2920_v19, 1 }
 0x29f   : > { %8924 = vmatmul.mubr.msk.bf16.gmra.mrb[28].mxu0 %vm3322_vm14, %v3081_v25  ;;  %v2906_v43 = vor.u32 %v2905_v50, %v2901_v2  ;;  %v3340_v2 = vsel %vm3322_vm14, %v10683_v63, %v2965_v59 }
 0x2a0   : > { %v3293_v18 = vpop.permute.xlu0 %3292  ;;  %v11001_v54 = vsel %vm791_vm4, %v2918_v60, %v2922_v32  ;;  %v3381_v1 = vsel %vm3363_vm15, %v3340_v2, %v3105_v38 }
 0x2a1   : > { %v10982_v16 = vsel %vm791_vm4, %v2906_v43, %v2910_v7  ;;  %v3587_v24 = vsel %vm3404_vm0, %v3540_v55, %v3293_v18  ;;  %v2967_v17 = vpop.permute.xlu1 %2966 }
 0x2a2   : > { %2980 = vrot.lane.b32.xlu1 %v10982_v16, %s9457_s25  ;;  %3306 = vrot.lane.b32.xlu0 %v10982_v16, %s9458_s28 }
 0x2a3   : > { %3887 = vmatprep.mubr.bf16.mxu1 %v3587_v24 }
 0x2a4   : > { %3888 = vmatmul.mubr.bf16.gmra.mrb[72].mxu1 %v3427_v21  ;;  %v3202_v29 = vpop.permute.xlu0 %3201 }
 0x2a5   : > { %v3107_v18 = vpop.permute.xlu1 %3106 }
 0x2a6   : > { %3120 = vrot.lane.b32.xlu1 %v3078_v45, %s9459_s15  ;;  %3215 = vrot.lane.b32.xlu0 %v3078_v45, %s9457_s25 }
 0x2aa   : > { %3161 = vrot.lane.b32.xlu1 %v10956_v22, %s9458_s28  ;;  %v8885_v10 = vpop.f32.mrb[36].mxu1  ;;  %3256 = vrot.lane.b32.xlu0 %v10956_v22, %s9459_s15 }
 0x2ab   : > { %v2155_v39 = vpop.f32.mrb[37].mxu1 }
 0x2ac   : > { %v2156_v14 = vadd.f32 %v10929_v52, %v2155_v39  ;;  %v8886_v6 = vpop.f32.mrb[38].mxu1 }
 0x2ad   : > { %v2158_v44 = vpop.f32.mrb[39].mxu1  ;;  %v3243_v34 = vpop.permute.xlu0 %3242 }
 0x2ae   : > { %v2159_v33 = vadd.f32 %v10929_v52, %v2158_v44  ;;  %2982 = vrot.lane.b32.xlu1 %v11001_v54, %s9457_s25  ;;  %3308 = vrot.lane.b32.xlu0 %v11001_v54, %s9458_s28  ;;  %v2222_v4 = vmax.f32 %v2156_v14, 0.0  ;;  %v3491_v52 = vsel %vm3322_vm14, %v10718_v41, %v3202_v29  ;;  %v3430_v41 = vsel %vm3404_vm0, %v3381_v1, %v3146_v35  ;;  %v3148_v24 = vpop.permute.xlu1 %3147 }
 0x2af   : > { %v3542_v50 = vsel %vm3363_vm15, %v3491_v52, %v3243_v34  ;;  %v3342_v29 = vsel %vm3322_vm14, %v10677_v48, %v2967_v17 }
 0x2b0   : > { %v2223_v37 = vmax.f32 %v2159_v33, 0.0 }
 0x2b2   : > { %v2424_v31 = vpack.c.bf16 %v2223_v37, %v2222_v4  ;;  %v11008_v42 = vpop.f32.mrb[4].mxu0  ;;  %3122 = vrot.lane.b32.xlu1 %v3081_v25, %s9459_s15  ;;  %3217 = vrot.lane.b32.xlu0 %v3081_v25, %s9457_s25  ;;  %v3383_v37 = vsel %vm3363_vm15, %v3342_v29, %v3107_v18 }
 0x2b3   : > { %v11012_v51 = vpop.f32.mrb[5].mxu0 }
 0x2b4   : > { %v2593_v20 = vshrl.u32 %v2424_v31, 16  ;;  %v11016_v45 = vpop.f32.mrb[6].mxu0  ;;  %v3295_v43 = vpop.permute.xlu0 %3294  ;;  %v2596_v25 = vshll.u32 %v2424_v31, 16 }
 0x2b5   : > { %v11021_v7 = vpop.f32.mrb[7].mxu0  ;;  %v3590_v55 = vsel %vm3404_vm0, %v3542_v50, %v3295_v43  ;;  %v2969_v39 = vpop.permute.xlu1 %2968 }
 0x2b6   : > { %v2595_v40 = vrot.slane %v2593_v20, 7  ;;  %3895 = vmatprep.mubr.bf16.mxu1 %v3590_v55 }
 0x2b7   : > { %3896 = vmatmul.mubr.bf16.gmra.mrb[76].mxu1 %v3430_v41  ;;  %v3344_v41 = vsel %vm3322_vm14, %v10750_v23, %v2969_v39 }
 0x2b8   : > { %v2598_v5 = vor.u32 %v2596_v25, %v2595_v40  ;;  %v2704_v62 = vsel %vm9580_vm2, %v2595_v40, 0  ;;  %v3204_v63 = vpop.permute.xlu0 %3203 }
 0x2b9   : > { %v3083_v38 = vrot.slane %v2704_v62, 1  ;;  %v2932_v12 = vshll.u32 %v2704_v62, 16  ;;  %v3494_v6 = vsel %vm3322_vm14, %v10767_v49, %v3204_v63  ;;  %v3433_v49 = vsel %vm3404_vm0, %v3383_v37, %v3148_v24  ;;  %v3109_v48 = vpop.permute.xlu1 %3108 }
 0x2ba   : > { %v11030_v59 = vsel %vm9580_vm2, 0, %v2598_v5  ;;  %v3385_v24 = vsel %vm3363_vm15, %v3344_v41, %v3109_v48 }
 0x2bb   : > { %13488 = vst [vmem:[#allocation7_spill] sm:$0xff] %v11030_v59  ;;  %3163 = vrot.lane.b32.xlu1 %v11030_v59, %s9458_s28  ;;  %3258 = vrot.lane.b32.xlu0 %v11030_v59, %s9459_s15  ;;  %v3082_v21 = vrot.slane %v11030_v59, 1  ;;  %v2927_v53 = vshll.u32 %v11030_v59, 16  ;;  %v2925_v10 = vshrl.u32 %v11030_v59, 16  ;;  %v2934_v14 = vrot.slane %v2932_v12, 1 }
 0x2bc   : > { %v3245_v19 = vpop.permute.xlu0 %3244 }
 0x2bd   : > { %v11039_v60 = vsel %vm1144_vm3, %v3082_v21, %v3083_v38  ;;  %v2929_v35 = vrot.slane %v2927_v53, 1  ;;  %v3544_v44 = vsel %vm3363_vm15, %v3494_v6, %v3245_v19  ;;  %v3150_v31 = vpop.permute.xlu1 %3149 }
 0x2be   : > { %8927 = vmatprep.mubr.msk.bf16.mxu0 %vm3322_vm14, %v11039_v60  ;;  %v3436_v53 = vsel %vm3404_vm0, %v3385_v24, %v3150_v31 }
 0x2bf   : > { %v2930_v32 = vor.u32 %v2929_v35, %v2925_v10  ;;  %8928 = vmatmul.mubr.msk.bf16.gmra.mrb[32].mxu0 %vm3322_vm14, %v10185_v15  ;;  %4915 = vrot.lane.b32.xlu1 %v10356_v3, %s9459_s15 }
 0x2c0   : > { %8931 = vmatprep.mubr.msk.bf16.mxu0 %vm3322_vm14, %v10185_v15  ;;  %v3297_v33 = vpop.permute.xlu0 %3296 }
 0x2c1   : > { %v11056_v4 = vsel %vm791_vm4, %v2930_v32, %v2934_v14  ;;  %v3593_v34 = vsel %vm3404_vm0, %v3544_v44, %v3297_v33  ;;  %v2971_v43 = vpop.permute.xlu1 %2970 }
 0x2c2   : > { %3310 = vrot.lane.b32.xlu0 %v11056_v4, %s9458_s28  ;;  %3903 = vmatprep.mubr.bf16.mxu1 %v3593_v34  ;;  %v3346_v6 = vsel %vm3322_vm14, %v10744_v27, %v2971_v43  ;;  %v9312_v27 = vld [vmem:[%s13452_s5] sm:$0xff]  }
 0x2c3   : > { %4917 = vrot.lane.b32.xlu1 %v10356_v3, %s9459_s15  ;;  %3904 = vmatmul.mubr.bf16.gmra.mrb[80].mxu1 %v3433_v49 }
 0x2c4   : > { %v3206_v2 = vpop.permute.xlu0 %3205  ;;  %5616 = vmatpush1.bf16.msra.mxu0 %v9312_v27 }
 0x2c5   : > { %v3497_v55 = vsel %vm3322_vm14, %v10787_v11, %v3206_v2  ;;  %v3111_v38 = vpop.permute.xlu1 %3110  ;;  %5617 = vmatprep.subr.bf16.mxu0 %v13458_v28 }
 0x2c6   : > { %3219 = vrot.lane.b32.xlu0 %v11039_v60, %s9457_s25  ;;  %v3387_v33 = vsel %vm3363_vm15, %v3346_v6, %v3111_v38  ;;  %v9314_v38 = vld [vmem:[%s13452_s5 + $0x10] sm:$0xff]   ;;  %v9316_v6 = vld [vmem:[%s13452_s5 + $0x20] sm:$0xff]  }
 0x2c7   : > { %8932 = vmatmul.mubr.msk.bf16.gmra.mrb[36].mxu0 %vm3322_vm14, %v10185_v15 }
 0x2ca   : > { %3260 = vrot.lane.b32.xlu0 %v10166_v58, %s9459_s15  ;;  %v8889_v17 = vpop.f32.mrb[40].mxu1 }
 0x2cb   : > { %v2171_v52 = vpop.f32.mrb[41].mxu1 }
 0x2cc   : > { %v8890_v20 = vpop.f32.mrb[42].mxu1  ;;  %v3247_v1 = vpop.permute.xlu0 %3246 }
 0x2cd   : > { %v2174_v50 = vpop.f32.mrb[43].mxu1  ;;  %v3546_v5 = vsel %vm3363_vm15, %v3497_v55, %v3247_v1  ;;  %v3152_v23 = vpop.permute.xlu1 %3151 }
 0x2ce   : > { %3312 = vrot.lane.b32.xlu0 %v10356_v3, %s9458_s28  ;;  %v3439_v34 = vsel %vm3404_vm0, %v3387_v33, %v3152_v23 }
 0x2d2   : > { %v11073_v40 = vpop.f32.mrb[8].mxu0  ;;  %5042 = vrot.lane.b32.xlu0 %v10166_v58, %s9459_s15 }
 0x2d3   : > { %v11077_v25 = vpop.f32.mrb[9].mxu0  ;;  %v3299_v62 = vpop.permute.xlu0 %3298 }
 0x2d4   : > { %v11081_v18 = vpop.f32.mrb[10].mxu0  ;;  %v3596_v21 = vsel %vm3404_vm0, %v3546_v5, %v3299_v62  ;;  %v2973_v32 = vpop.permute.xlu1 %2972 }
 0x2d5   : > { %v11086_v63 = vpop.f32.mrb[11].mxu0  ;;  %3911 = vmatprep.mubr.bf16.mxu1 %v3596_v21  ;;  %v3348_v43 = vsel %vm3322_vm14, %v10817_v61, %v2973_v32 }
 0x2d6   : > { %3912 = vmatmul.mubr.bf16.gmra.mrb[84].mxu1 %v3436_v53 }
 0x2d7   : > { %v3833_v12 = vpop.f32.mrb[44].mxu1  ;;  %v3208_v19 = vpop.permute.xlu0 %3207 }
 0x2d8   : > { %v3835_v11 = vpop.f32.mrb[45].mxu1  ;;  %v3500_v14 = vsel %vm3322_vm14, %v10838_v26, %v3208_v19  ;;  %v3113_v49 = vpop.permute.xlu1 %3112 }
 0x2d9   : > { %v3836_v10 = vpop.f32.mrb[46].mxu1  ;;  %v3389_v5 = vsel %vm3363_vm15, %v3348_v43, %v3113_v49  ;;  %v9315_v11 = vld [vmem:[%s13452_s5 + $0x18] sm:$0xff]   ;;  %v9320_v43 = vld [vmem:[%s13452_s5 + $0x40] sm:$0xff]  }
 0x2da   : > { %v3838_v35 = vpop.f32.mrb[47].mxu1 }
 0x2db   : > { %v3249_v39 = vpop.permute.xlu0 %3248 }
 0x2dc   : > { %v3548_v29 = vsel %vm3363_vm15, %v3500_v14, %v3249_v39  ;;  %v3154_v48 = vpop.permute.xlu1 %3153 }
 0x2dd   : > { %v3442_v21 = vsel %vm3404_vm0, %v3389_v5, %v3154_v48  ;;  %v9319_v48 = vld [vmem:[%s13452_s5 + $0x38] sm:$0xff]  }
 0x2df   : > { %v3301_v44 = vpop.permute.xlu0 %3300 }
 0x2e0   : > { %v3599_v37 = vsel %vm3404_vm0, %v3548_v29, %v3301_v44  ;;  %v2975_v31 = vpop.permute.xlu1 %2974  ;;  %v9318_v44 = vld [vmem:[%s13452_s5 + $0x30] sm:$0xff]  }
 0x2e1   : > { %3919 = vmatprep.mubr.bf16.mxu1 %v3599_v37  ;;  %v3350_v35 = vsel %vm3322_vm14, %v10806_v47, %v2975_v31  ;;  %v9317_v47 = vld [vmem:[%s13452_s5 + $0x28] sm:$0xff]  }
 0x2e2   : > { %3920 = vmatmul.mubr.bf16.gmra.mrb[88].mxu1 %v3439_v34 }
 0x2e3   : > { %v3210_v17 = vpop.permute.xlu0 %3209 }
 0x2e4   : > { %v3503_v2 = vsel %vm3322_vm14, %v10861_v13, %v3210_v17  ;;  %v9313_v13 = vld [vmem:[%s13452_s5 + $0x8] sm:$0xff]   ;;  %v3115_v24 = vpop.permute.xlu1 %3114 }
 0x2e5   : > { %5618 = vmatpush1.bf16.msra.mxu0 %v9313_v13  ;;  %v3391_v32 = vsel %vm3363_vm15, %v3350_v35, %v3115_v24  ;;  %v9323_v35 = vld [vmem:[%s13452_s5 + $0x58] sm:$0xff]  }
 0x2e6   : > { %5619 = vmatprep.subr.bf16.mxu0 %v13458_v28 }
 0x2e9   : > { %5620 = vmatpush1.bf16.msra.mxu0 %v9314_v38 }
 0x2ea   : > { %5621 = vmatprep.subr.bf16.mxu0 %v13458_v28 }
 0x2ed   : > { %v3251_v52 = vpop.permute.xlu0 %3250  ;;  %v3156_v53 = vpop.permute.xlu1 %3155  ;;  %5622 = vmatpush1.bf16.msra.mxu0 %v9315_v11  ;;  %v9322_v11 = vld [vmem:[%s13452_s5 + $0x50] sm:$0xff]  }
 0x2ee   : > { %v3550_v1 = vsel %vm3363_vm15, %v3503_v2, %v3251_v52  ;;  %5623 = vmatprep.subr.bf16.mxu0 %v13458_v28 }
 0x2f1   : > { %5624 = vmatpush1.bf16.msra.mxu0 %v9316_v6 }
 0x2f2   : > { %v11099_v26 = vpop.f32.mrb[12].mxu0  ;;  %5625 = vmatprep.subr.bf16.mxu0 %v13458_v28 }
 0x2f3   : > { %v11104_v20 = vpop.f32.mrb[13].mxu0 }
 0x2f4   : > { %v11108_v50 = vpop.f32.mrb[14].mxu0  ;;  %v3303_v55 = vpop.permute.xlu0 %3302 }
 0x2f5   : > { %v11113_v41 = vpop.f32.mrb[15].mxu0  ;;  %v3602_v62 = vsel %vm3404_vm0, %v3550_v1, %v3303_v55  ;;  %v2977_v19 = vpop.permute.xlu1 %2976  ;;  %5626 = vmatpush1.bf16.msra.mxu0 %v9317_v47 }
 0x2f6   : > { %3927 = vmatprep.mubr.bf16.mxu1 %v3602_v62  ;;  %5627 = vmatprep.subr.bf16.mxu0 %v13458_v28  ;;  %v3352_v62 = vsel %vm3322_vm14, %v10889_v57, %v2977_v19 }
 0x2f7   : > { %3928 = vmatmul.mubr.bf16.gmra.mrb[92].mxu1 %v3442_v21 }
 0x2f8   : > { %v3212_v61 = vpop.permute.xlu0 %3211 }
 0x2f9   : > { %v3506_v10 = vsel %vm3322_vm14, %v10912_v0, %v3212_v61  ;;  %v3445_v0 = vsel %vm3404_vm0, %v3391_v32, %v3156_v53  ;;  %v3117_v29 = vpop.permute.xlu1 %3116  ;;  %5628 = vmatpush1.bf16.msra.mxu0 %v9318_v44 }
 0x2fa   : > { %5629 = vmatprep.subr.bf16.mxu0 %v13458_v28  ;;  %v3393_v61 = vsel %vm3363_vm15, %v3352_v62, %v3117_v29  ;;  %v9324_v29 = vld [vmem:[%s13452_s5 + $0x60] sm:$0xff]  }
 0x2fc   : > { %v3253_v12 = vpop.permute.xlu0 %3252 }
 0x2fd   : > { %v3552_v23 = vsel %vm3363_vm15, %v3506_v10, %v3253_v12  ;;  %v3158_v33 = vpop.permute.xlu1 %3157  ;;  %5630 = vmatpush1.bf16.msra.mxu0 %v9319_v48 }
 0x2fe   : > { %5631 = vmatprep.subr.bf16.mxu0 %v13458_v28  ;;  %v3448_v12 = vsel %vm3404_vm0, %v3393_v61, %v3158_v33  ;;  %v9326_v33 = vld [vmem:[%s13452_s5 + $0x70] sm:$0xff]  }
 0x300   : > { %v3305_v39 = vpop.permute.xlu0 %3304 }
 0x301   : > { %v3605_v14 = vsel %vm3404_vm0, %v3552_v23, %v3305_v39  ;;  %v2979_v52 = vpop.permute.xlu1 %2978  ;;  %5632 = vmatpush1.bf16.msra.mxu0 %v9320_v43 }
 0x302   : > { %3935 = vmatprep.mubr.bf16.mxu1 %v3605_v14  ;;  %5633 = vmatprep.subr.bf16.mxu0 %v13458_v28  ;;  %v3354_v32 = vsel %vm3322_vm14, %v10883_v30, %v2979_v52  ;;  %v9325_v30 = vld [vmem:[%s13452_s5 + $0x68] sm:$0xff]  }
 0x303   : > { %3936 = vmatmul.mubr.bf16.gmra.mrb[96].mxu1 %v3445_v0 }
 0x304   : > { %v3214_v34 = vpop.permute.xlu0 %3213 }
 0x305   : > { %v3509_v55 = vsel %vm3322_vm14, %v10935_v56, %v3214_v34  ;;  %v9321_v56 = vld [vmem:[%s13452_s5 + $0x48] sm:$0xff]   ;;  %v3119_v53 = vpop.permute.xlu1 %3118 }
 0x306   : > { %5634 = vmatpush1.bf16.msra.mxu0 %v9321_v56  ;;  %v3395_v0 = vsel %vm3363_vm15, %v3354_v32, %v3119_v53 }
 0x307   : > { %5635 = vmatprep.subr.bf16.mxu0 %v13458_v28 }
 0x30a   : > { %5636 = vmatpush1.bf16.msra.mxu0 %v9322_v11 }
 0x30b   : > { %5637 = vmatprep.subr.bf16.mxu0 %v13458_v28 }
 0x30c   : > { %v3841_v37 = vpop.f32.mrb[48].mxu1 }
 0x30d   : > { %v3843_v49 = vpop.f32.mrb[49].mxu1  ;;  %v3255_v27 = vpop.permute.xlu0 %3254 }
 0x30e   : > { %v3844_v17 = vpop.f32.mrb[50].mxu1  ;;  %v3554_v13 = vsel %vm3363_vm15, %v3509_v55, %v3255_v27  ;;  %v3160_v19 = vpop.permute.xlu1 %3159  ;;  %5638 = vmatpush1.bf16.msra.mxu0 %v9323_v35  ;;  %v9327_v49 = vld [vmem:[%s13452_s5 + $0x78] sm:$0xff]  }
 0x30f   : > { %v3846_v31 = vpop.f32.mrb[51].mxu1  ;;  %5639 = vmatprep.subr.bf16.mxu0 %v13458_v28  ;;  %v11213_v17 = vld [vmem:[%s13451_s4] ss:$0 sm:$0xff] }
 0x312   : > { %v11155_v2 = vpop.f32.mrb[16].mxu0  ;;  %5640 = vmatpush1.bf16.msra.mxu0 %v9324_v29 }
 0x313   : > { %v11160_v1 = vpop.f32.mrb[17].mxu0  ;;  %5641 = vmatprep.subr.bf16.mxu0 %v13458_v28 }
 0x314   : > { %v11164_v5 = vpop.f32.mrb[18].mxu0  ;;  %v3307_v24 = vpop.permute.xlu0 %3306 }
 0x315   : > { %v11169_v21 = vpop.f32.mrb[19].mxu0  ;;  %v3608_v38 = vsel %vm3404_vm0, %v3554_v13, %v3307_v24  ;;  %v2981_v23 = vpop.permute.xlu1 %2980 }
 0x316   : > { %3943 = vmatprep.mubr.bf16.mxu1 %v3608_v38  ;;  %5642 = vmatpush1.bf16.msra.mxu0 %v9325_v30  ;;  %v3356_v24 = vsel %vm3322_vm14, %v10962_v36, %v2981_v23 }
 0x317   : > { %3944 = vmatmul.mubr.bf16.gmra.mrb[100].mxu1 %v3448_v12  ;;  %5643 = vmatprep.subr.bf16.mxu0 %v13458_v28 }
 0x318   : > { %v3216_v57 = vpop.permute.xlu0 %3215 }
 0x319   : > { %v3512_v39 = vsel %vm3322_vm14, %v10982_v16, %v3216_v57  ;;  %v3451_v16 = vsel %vm3404_vm0, %v3395_v0, %v3160_v19  ;;  %v3121_v44 = vpop.permute.xlu1 %3120 }
 0x31a   : > { %5644 = vmatpush1.bf16.msra.mxu0 %v9326_v33  ;;  %v3397_v53 = vsel %vm3363_vm15, %v3356_v24, %v3121_v44 }
 0x31b   : > { %5645 = vmatprep.subr.bf16.mxu0 %v13458_v28 }
 0x31c   : > { %v3257_v10 = vpop.permute.xlu0 %3256 }
 0x31d   : > { %v3556_v14 = vsel %vm3363_vm15, %v3512_v39, %v3257_v10  ;;  %v3162_v37 = vpop.permute.xlu1 %3161 }
 0x31e   : > { %5646 = vmatpush1.bf16.msra.mxu0 %v9327_v49  ;;  %v3454_v36 = vsel %vm3404_vm0, %v3397_v53, %v3162_v37 }
 0x31f   : > { %5792 = vmatprep.subr.bf16.mxu0 %v13458_v28 }
 0x320   : > { %v3309_v6 = vpop.permute.xlu0 %3308 }
 0x321   : > { %v3611_v47 = vsel %vm3404_vm0, %v3556_v14, %v3309_v6  ;;  %v2983_v31 = vpop.permute.xlu1 %2982 }
 0x322   : > { %3951 = vmatprep.mubr.bf16.mxu1 %v3611_v47 }
 0x323   : > { %3952 = vmatmul.mubr.bf16.gmra.mrb[104].mxu1 %v3451_v16 }
 0x324   : > { %v3218_v34 = vpop.permute.xlu0 %3217 }
 0x325   : > { %v3515_v43 = vsel %vm3322_vm14, %v11001_v54, %v3218_v34  ;;  %v3123_v39 = vpop.permute.xlu1 %3122 }
 0x32d   : > { %v3259_v48 = vpop.permute.xlu0 %3258  ;;  %v3164_v37 = vpop.permute.xlu1 %3163 }
 0x32e   : > { %v3558_v61 = vsel %vm3363_vm15, %v3515_v43, %v3259_v48  ;;  %v3358_v48 = vsel %vm3322_vm14, %v10956_v22, %v2983_v31 }
 0x331   : > { %v11216_v27 = vpop.f32.mrb[20].mxu0  ;;  %v4916_v22 = vpop.permute.xlu1 %4915 }
 0x332   : > { %v3849_v52 = vpop.f32.mrb[52].mxu1  ;;  %v11221_v13 = vpop.f32.mrb[21].mxu0 }
 0x333   : > { %v3850_v55 = vadd.f32 %v11213_v17, %v3849_v52  ;;  %v3851_v62 = vpop.f32.mrb[53].mxu1  ;;  %v11226_v38 = vpop.f32.mrb[22].mxu0 }
 0x334   : > { %v3311_v56 = vpop.permute.xlu0 %3310  ;;  %v3852_v57 = vpop.f32.mrb[54].mxu1 }
 0x335   : > { %v4043_v12 = vadd.f32 %v11012_v51, %v3850_v55  ;;  %v11230_v11 = vpop.f32.mrb[23].mxu0  ;;  %v3614_v54 = vsel %vm3404_vm0, %v3558_v61, %v3311_v56  ;;  %v3853_v19 = vadd.f32 %v11213_v17, %v3852_v57  ;;  %v3854_v10 = vpop.f32.mrb[55].mxu1 }
 0x336   : > { %3959 = vmatprep.mubr.bf16.mxu1 %v3614_v54 }
 0x337   : > { %3960 = vmatmul.mubr.bf16.gmra.mrb[108].mxu1 %v3454_v36  ;;  %v4046_v35 = vadd.f32 %v11021_v7, %v3853_v19  ;;  %v4189_v32 = vmax.f32 %v4043_v12, 0.0 }
 0x338   : > { %v3220_v23 = vpop.permute.xlu0 %3219 }
 0x339   : > { %v4190_v14 = vmax.f32 %v4046_v35, 0.0  ;;  %v3518_v7 = vsel %vm3322_vm14, %v11056_v4, %v3220_v23  ;;  %v5152_v35 = vsel %vm3363_vm15, %v10166_v58, %v4916_v22 }
 0x33a   : > { %v3857_v6 = vpop.f32.mrb[56].mxu1 }
 0x33b   : > { %v3858_v51 = vadd.f32 %v11213_v17, %v3857_v6  ;;  %v3859_v0 = vpop.f32.mrb[57].mxu1  ;;  %v4387_v47 = vpack.c.bf16 %v4190_v14, %v4189_v32 }
 0x33c   : > { %v3261_v29 = vpop.permute.xlu0 %3260  ;;  %v3860_v16 = vpop.f32.mrb[58].mxu1 }
 0x33d   : > { %v4051_v30 = vadd.f32 %v11008_v42, %v3858_v51  ;;  %v3861_v44 = vadd.f32 %v11213_v17, %v3860_v16  ;;  %v3862_v33 = vpop.f32.mrb[59].mxu1  ;;  %v4494_v34 = vshrl.u32 %v4387_v47, 16  ;;  %v4497_v43 = vshll.u32 %v4387_v47, 16 }
 0x33e   : > { %v3560_v55 = vsel %vm3363_vm15, %v3518_v7, %v3261_v29  ;;  %v3399_v42 = vsel %vm3363_vm15, %v3358_v48, %v3123_v39 }
 0x33f   : > { %v4054_v49 = vadd.f32 %v11016_v45, %v3861_v44  ;;  %v4496_v52 = vrot.slane %v4494_v34, 7  ;;  %v4191_v24 = vmax.f32 %v4051_v30, 0.0  ;;  %v3457_v53 = vsel %vm3404_vm0, %v3399_v42, %v3164_v37 }
 0x340   : > { %v3313_v62 = vpop.permute.xlu0 %3312 }
 0x341   : > { %v4192_v61 = vmax.f32 %v4054_v49, 0.0  ;;  %v3617_v56 = vsel %vm3404_vm0, %v3560_v55, %v3313_v62  ;;  %v4499_v12 = vor.u32 %v4497_v43, %v4496_v52  ;;  %v11250_v45 = vsel %vm9580_vm2, %v4496_v52, 0 }
 0x342   : > { %3967 = vmatprep.mubr.bf16.mxu1 %v3617_v56  ;;  %v4731_v36 = vshll.u32 %v11250_v45, 16 }
 0x343   : > { %v4388_v31 = vpack.c.bf16 %v4192_v61, %v4191_v24  ;;  %3968 = vmatmul.mubr.bf16.gmra.mrb[112].mxu1 %v3457_v53  ;;  %v11254_v57 = vsel %vm9580_vm2, 0, %v4499_v12 }
 0x344   : > { %v5043_v54 = vpop.permute.xlu0 %5042  ;;  %5044 = vrot.lane.b32.xlu0 %v11254_v57, %s9459_s15  ;;  %v4726_v10 = vshll.u32 %v11254_v57, 16  ;;  %v4724_v14 = vshrl.u32 %v11254_v57, 16  ;;  %v4733_v0 = vrot.slane %v4731_v36, 1 }
 0x345   : > { %v4501_v19 = vshrl.u32 %v4388_v31, 16  ;;  %v5207_v23 = vsel %vm3363_vm15, %v10185_v15, %v5043_v54  ;;  %v4504_v32 = vshll.u32 %v4388_v31, 16 }
 0x346   : > { %v4728_v6 = vrot.slane %v4726_v10, 1  ;;  %5647 = vmatprep.mubr.bf16.mxu0 %v5207_v23 }
 0x347   : > { %v4503_v39 = vrot.slane %v4501_v19, 7  ;;  %5648 = vmatmul.mubr.bf16.vlgmr.msra.gmra.mrb[40].mxu0 %v5152_v35 }
 0x348   : > { %v4729_v51 = vor.u32 %v4728_v6, %v4724_v14 }
 0x349   : > { %v4506_v47 = vor.u32 %v4504_v32, %v4503_v39  ;;  %v11267_v29 = vsel %vm9580_vm2, %v4503_v39, 0 }
 0x34a   : > { %v11270_v16 = vsel %vm791_vm4, %v4729_v51, %v4733_v0  ;;  %v4743_v37 = vshll.u32 %v11267_v29, 16 }
 0x34b   : > { %v11274_v30 = vsel %vm9580_vm2, 0, %v4506_v47  ;;  %v3865_v44 = vpop.f32.mrb[60].mxu1  ;;  %4919 = vrot.lane.b32.xlu1 %v11270_v16, %s9459_s15 }
 0x34c   : > { %5046 = vrot.lane.b32.xlu0 %v11274_v30, %s9459_s15  ;;  %v4738_v33 = vshll.u32 %v11274_v30, 16  ;;  %v3866_v34 = vadd.f32 %v11213_v17, %v3865_v44  ;;  %v3867_v7 = vpop.f32.mrb[61].mxu1  ;;  %v4736_v48 = vshrl.u32 %v11274_v30, 16  ;;  %v4745_v24 = vrot.slane %v4743_v37, 1 }
 0x34d   : > { %v3868_v49 = vpop.f32.mrb[62].mxu1 }
 0x34e   : > { %v4740_v52 = vrot.slane %v4738_v33, 1  ;;  %v4059_v43 = vadd.f32 %v11077_v25, %v3866_v34  ;;  %v3869_v55 = vadd.f32 %v11213_v17, %v3868_v49  ;;  %v3870_v62 = vpop.f32.mrb[63].mxu1 }
 0x350   : > { %v4741_v42 = vor.u32 %v4740_v52, %v4736_v48  ;;  %v4062_v61 = vadd.f32 %v11086_v63, %v3869_v55  ;;  %v4193_v12 = vmax.f32 %v4059_v43, 0.0 }
 0x352   : > { %v11287_v56 = vpop.f32.mrb[24].mxu0  ;;  %v11290_v53 = vsel %vm791_vm4, %v4741_v42, %v4745_v24  ;;  %v4194_v22 = vmax.f32 %v4062_v61, 0.0 }
 0x353   : > { %v11292_v31 = vpop.f32.mrb[25].mxu0  ;;  %4921 = vrot.lane.b32.xlu1 %v11290_v53, %s9459_s15  ;;  %v3873_v25 = vpop.f32.mrb[64].mxu1 }
 0x354   : > { %v11296_v54 = vpop.f32.mrb[26].mxu0  ;;  %v4389_v19 = vpack.c.bf16 %v4194_v22, %v4193_v12  ;;  %v3874_v10 = vadd.f32 %v11213_v17, %v3873_v25  ;;  %v3875_v36 = vpop.f32.mrb[65].mxu1 }
 0x355   : > { %v11299_v63 = vpop.f32.mrb[27].mxu0  ;;  %v3876_v35 = vpop.f32.mrb[66].mxu1 }
 0x356   : > { %v4508_v23 = vshrl.u32 %v4389_v19, 16  ;;  %v4067_v39 = vadd.f32 %v11073_v40, %v3874_v10  ;;  %v3877_v32 = vadd.f32 %v11213_v17, %v3876_v35  ;;  %v3878_v14 = vpop.f32.mrb[67].mxu1  ;;  %v4511_v51 = vshll.u32 %v4389_v19, 16 }
 0x358   : > { %v4510_v6 = vrot.slane %v4508_v23, 7  ;;  %v4070_v0 = vadd.f32 %v11081_v18, %v3877_v32  ;;  %v4195_v47 = vmax.f32 %v4067_v39, 0.0 }
 0x35a   : > { %v4196_v44 = vmax.f32 %v4070_v0, 0.0  ;;  %v4513_v33 = vor.u32 %v4511_v51, %v4510_v6  ;;  %v11306_v37 = vsel %vm9580_vm2, %v4510_v6, 0 }
 0x35b   : > { %v4755_v49 = vshll.u32 %v11306_v37, 16 }
 0x35c   : > { %v4390_v34 = vpack.c.bf16 %v4196_v44, %v4195_v47  ;;  %v11310_v7 = vsel %vm9580_vm2, 0, %v4513_v33 }
 0x35d   : > { %5048 = vrot.lane.b32.xlu0 %v11310_v7, %s9459_s15  ;;  %v4750_v40 = vshll.u32 %v11310_v7, 16  ;;  %v4748_v48 = vshrl.u32 %v11310_v7, 16  ;;  %v4757_v42 = vrot.slane %v4755_v49, 1 }
 0x35e   : > { %v4515_v18 = vshrl.u32 %v4390_v34, 16  ;;  %v4518_v55 = vshll.u32 %v4390_v34, 16 }
 0x35f   : > { %v4752_v52 = vrot.slane %v4750_v40, 1 }
 0x360   : > { %v4517_v43 = vrot.slane %v4515_v18, 7 }
 0x361   : > { %v4753_v62 = vor.u32 %v4752_v52, %v4748_v48 }
 0x362   : > { %v4520_v24 = vor.u32 %v4518_v55, %v4517_v43  ;;  %v11319_v61 = vsel %vm9580_vm2, %v4517_v43, 0 }
 0x363   : > { %v11322_v12 = vsel %vm791_vm4, %v4753_v62, %v4757_v42  ;;  %v4767_v19 = vshll.u32 %v11319_v61, 16 }
 0x364   : > { %4923 = vrot.lane.b32.xlu1 %v11322_v12, %s9459_s15  ;;  %v11328_v22 = vsel %vm9580_vm2, 0, %v4520_v24 }
 0x365   : > { %5050 = vrot.lane.b32.xlu0 %v11328_v22, %s9459_s15  ;;  %v4762_v25 = vshll.u32 %v11328_v22, 16  ;;  %v4760_v10 = vshrl.u32 %v11328_v22, 16  ;;  %v4769_v23 = vrot.slane %v4767_v19, 1 }
 0x367   : > { %v4764_v36 = vrot.slane %v4762_v25, 1 }
 0x369   : > { %v4765_v35 = vor.u32 %v4764_v36, %v4760_v10 }
 0x36a   : > { %v3881_v39 = vpop.f32.mrb[68].mxu1 }
 0x36b   : > { %v3882_v32 = vadd.f32 %v11213_v17, %v3881_v39  ;;  %v3883_v14 = vpop.f32.mrb[69].mxu1  ;;  %v11337_v6 = vsel %vm791_vm4, %v4765_v35, %v4769_v23 }
 0x36c   : > { %v3884_v51 = vpop.f32.mrb[70].mxu1  ;;  %4925 = vrot.lane.b32.xlu1 %v11337_v6, %s9459_s15 }
 0x36d   : > { %v4075_v0 = vadd.f32 %v11104_v20, %v3882_v32  ;;  %v3885_v47 = vadd.f32 %v11213_v17, %v3884_v51  ;;  %v3886_v44 = vpop.f32.mrb[71].mxu1 }
 0x36f   : > { %v4078_v33 = vadd.f32 %v11113_v41, %v3885_v47  ;;  %v4197_v34 = vmax.f32 %v4075_v0, 0.0 }
 0x371   : > { %v4198_v40 = vmax.f32 %v4078_v33, 0.0 }
 0x372   : > { %v11344_v49 = vpop.f32.mrb[28].mxu0 }
 0x373   : > { %v11346_v18 = vpop.f32.mrb[29].mxu0  ;;  %v4391_v48 = vpack.c.bf16 %v4198_v40, %v4197_v34 }
 0x374   : > { %v11348_v52 = vpop.f32.mrb[30].mxu0 }
 0x375   : > { %v11350_v43 = vpop.f32.mrb[31].mxu0  ;;  %v4522_v55 = vshrl.u32 %v4391_v48, 16  ;;  %v4525_v20 = vshll.u32 %v4391_v48, 16 }
 0x377   : > { %v3889_v62 = vpop.f32.mrb[72].mxu1  ;;  %v4524_v42 = vrot.slane %v4522_v55, 7 }
 0x378   : > { %v3890_v24 = vadd.f32 %v11213_v17, %v3889_v62  ;;  %v3891_v25 = vpop.f32.mrb[73].mxu1 }
 0x379   : > { %v3892_v19 = vpop.f32.mrb[74].mxu1  ;;  %v4527_v35 = vor.u32 %v4525_v20, %v4524_v42  ;;  %v11357_v23 = vsel %vm9580_vm2, %v4524_v42, 0 }
 0x37a   : > { %v4083_v41 = vadd.f32 %v11099_v26, %v3890_v24  ;;  %v3893_v10 = vadd.f32 %v11213_v17, %v3892_v19  ;;  %v3894_v36 = vpop.f32.mrb[75].mxu1  ;;  %v4779_v26 = vshll.u32 %v11357_v23, 16 }
 0x37b   : > { %v11362_v32 = vsel %vm9580_vm2, 0, %v4527_v35 }
 0x37c   : > { %v4086_v39 = vadd.f32 %v11108_v50, %v3893_v10  ;;  %5052 = vrot.lane.b32.xlu0 %v11362_v32, %s9459_s15  ;;  %v4774_v14 = vshll.u32 %v11362_v32, 16  ;;  %v4199_v51 = vmax.f32 %v4083_v41, 0.0  ;;  %v4772_v47 = vshrl.u32 %v11362_v32, 16 }
 0x37d   : > { %v4781_v40 = vrot.slane %v4779_v26, 1 }
 0x37e   : > { %v4200_v0 = vmax.f32 %v4086_v39, 0.0  ;;  %v4776_v44 = vrot.slane %v4774_v14, 1 }
 0x380   : > { %v4392_v33 = vpack.c.bf16 %v4200_v0, %v4199_v51  ;;  %v4777_v34 = vor.u32 %v4776_v44, %v4772_v47 }
 0x382   : > { %v4529_v50 = vshrl.u32 %v4392_v33, 16  ;;  %v11370_v48 = vsel %vm791_vm4, %v4777_v34, %v4781_v40  ;;  %v4532_v62 = vshll.u32 %v4392_v33, 16 }
 0x383   : > { %13489 = vst [vmem:[#allocation8_spill] sm:$0xff] %v11370_v48  ;;  %4927 = vrot.lane.b32.xlu1 %v11370_v48, %s9459_s15 }
 0x384   : > { %v4531_v55 = vrot.slane %v4529_v50, 7 }
 0x386   : > { %v4534_v42 = vor.u32 %v4532_v62, %v4531_v55  ;;  %v11376_v20 = vsel %vm9580_vm2, %v4531_v55, 0 }
 0x387   : > { %v4791_v19 = vshll.u32 %v11376_v20, 16 }
 0x388   : > { %v11380_v24 = vsel %vm9580_vm2, 0, %v4534_v42 }
 0x389   : > { %5054 = vrot.lane.b32.xlu0 %v11380_v24, %s9459_s15  ;;  %v4786_v25 = vshll.u32 %v11380_v24, 16  ;;  %v4784_v10 = vshrl.u32 %v11380_v24, 16  ;;  %v4793_v51 = vrot.slane %v4791_v19, 1 }
 0x38a   : > { %v3897_v41 = vpop.f32.mrb[76].mxu1  ;;  %v13499_v9 = vld [vmem:[#allocation8_spill] sm:$0xff] }
 0x38b   : > { %v4788_v36 = vrot.slane %v4786_v25, 1  ;;  %v3898_v35 = vadd.f32 %v11213_v17, %v3897_v41  ;;  %v3899_v39 = vpop.f32.mrb[77].mxu1 }
 0x38c   : > { %v3900_v14 = vpop.f32.mrb[78].mxu1 }
 0x38d   : > { %v4789_v26 = vor.u32 %v4788_v36, %v4784_v10  ;;  %v4091_v0 = vadd.f32 %v11160_v1, %v3898_v35  ;;  %v3901_v47 = vadd.f32 %v11213_v17, %v3900_v14  ;;  %v3902_v44 = vpop.f32.mrb[79].mxu1 }
 0x38f   : > { %v11391_v33 = vsel %vm791_vm4, %v4789_v26, %v4793_v51  ;;  %v4094_v34 = vadd.f32 %v11169_v21, %v3901_v47  ;;  %v4201_v40 = vmax.f32 %v4091_v0, 0.0 }
 0x390   : > { %13490 = vst [vmem:[#allocation9_spill] sm:$0xff] %v11391_v33  ;;  %4929 = vrot.lane.b32.xlu1 %v11391_v33, %s9459_s15 }
 0x391   : > { %v4202_v50 = vmax.f32 %v4094_v34, 0.0 }
 0x392   : > { %v11396_v55 = vpop.f32.mrb[32].mxu0 }
 0x393   : > { %v11398_v62 = vpop.f32.mrb[33].mxu0  ;;  %v4393_v42 = vpack.c.bf16 %v4202_v50, %v4201_v40 }
 0x394   : > { %v11400_v25 = vpop.f32.mrb[34].mxu0 }
 0x395   : > { %v11402_v1 = vpop.f32.mrb[35].mxu0  ;;  %v4536_v19 = vshrl.u32 %v4393_v42, 16  ;;  %v4539_v36 = vshll.u32 %v4393_v42, 16 }
 0x396   : > { %v3905_v41 = vpop.f32.mrb[80].mxu1 }
 0x397   : > { %v4538_v10 = vrot.slane %v4536_v19, 7  ;;  %v3906_v21 = vadd.f32 %v11213_v17, %v3905_v41  ;;  %v3907_v35 = vpop.f32.mrb[81].mxu1 }
 0x398   : > { %v3908_v39 = vpop.f32.mrb[82].mxu1 }
 0x399   : > { %v4099_v14 = vadd.f32 %v11155_v2, %v3906_v21  ;;  %v3909_v26 = vadd.f32 %v11213_v17, %v3908_v39  ;;  %v3910_v51 = vpop.f32.mrb[83].mxu1  ;;  %v4541_v0 = vor.u32 %v4539_v36, %v4538_v10  ;;  %v11409_v47 = vsel %vm9580_vm2, %v4538_v10, 0 }
 0x39a   : > { %v8933_v44 = vpop.f32.mrb[36].mxu0  ;;  %v4803_v19 = vshll.u32 %v11409_v47, 16 }
 0x39b   : > { %v4170_v34 = vpop.f32.mrb[37].mxu0  ;;  %v4102_v40 = vadd.f32 %v11164_v5, %v3909_v26  ;;  %v11414_v50 = vsel %vm9580_vm2, 0, %v4541_v0  ;;  %v4203_v36 = vmax.f32 %v4099_v14, 0.0  ;;  %v9328_v44 = vld [vmem:[%s13452_s5 + $0x80] sm:$0xff]   ;;  %v9329_v14 = vld [vmem:[%s13452_s5 + $0x88] sm:$0xff]  }
 0x39c   : > { %v8934_v42 = vpop.f32.mrb[38].mxu0  ;;  %5056 = vrot.lane.b32.xlu0 %v11414_v50, %s9459_s15  ;;  %v4798_v2 = vshll.u32 %v11414_v50, 16  ;;  %v4796_v21 = vshrl.u32 %v11414_v50, 16  ;;  %v4805_v26 = vrot.slane %v4803_v19, 1  ;;  %5793 = vmatpush1.bf16.msra.mxu0 %v9328_v44 }
 0x39d   : > { %v4173_v41 = vpop.f32.mrb[39].mxu0  ;;  %v4204_v10 = vmax.f32 %v4102_v40, 0.0  ;;  %5794 = vmatprep.subr.bf16.mxu0 %v13458_v28 }
 0x39e   : > { %v4800_v35 = vrot.slane %v4798_v2, 1 }
 0x39f   : > { %v4394_v39 = vpack.c.bf16 %v4204_v10, %v4203_v36 }
 0x3a0   : > { %v4801_v5 = vor.u32 %v4800_v35, %v4796_v21  ;;  %5795 = vmatpush1.bf16.msra.mxu0 %v9329_v14  ;;  %v9330_v14 = vld [vmem:[%s13452_s5 + $0x90] sm:$0xff]  }
 0x3a1   : > { %v4543_v51 = vshrl.u32 %v4394_v39, 16  ;;  %v4546_v42 = vshll.u32 %v4394_v39, 16  ;;  %5796 = vmatprep.subr.bf16.mxu0 %v13458_v28 }
 0x3a2   : > { %v11422_v0 = vsel %vm791_vm4, %v4801_v5, %v4805_v26 }
 0x3a3   : > { %13491 = vst [vmem:[#allocation10_spill] sm:$0xff] %v11422_v0  ;;  %v4545_v34 = vrot.slane %v4543_v51, 7  ;;  %4931 = vrot.lane.b32.xlu1 %v11422_v0, %s9459_s15 }
 0x3a4   : > { %5797 = vmatpush1.bf16.msra.mxu0 %v9330_v14 }
 0x3a5   : > { %v4548_v40 = vor.u32 %v4546_v42, %v4545_v34  ;;  %v11434_v2 = vsel %vm9580_vm2, %v4545_v34, 0  ;;  %5798 = vmatprep.subr.bf16.mxu0 %v13458_v28 }
 0x3a6   : > { %v4815_v36 = vshll.u32 %v11434_v2, 16 }
 0x3a7   : > { %v11439_v19 = vsel %vm9580_vm2, 0, %v4548_v40 }
 0x3a8   : > { %5058 = vrot.lane.b32.xlu0 %v11439_v19, %s9459_s15  ;;  %v4810_v41 = vshll.u32 %v11439_v19, 16  ;;  %v4808_v21 = vshrl.u32 %v11439_v19, 16  ;;  %v4817_v44 = vrot.slane %v4815_v36, 1 }
 0x3a9   : > { %v3913_v10 = vpop.f32.mrb[84].mxu1 }
 0x3aa   : > { %v4812_v35 = vrot.slane %v4810_v41, 1  ;;  %v3914_v39 = vadd.f32 %v11213_v17, %v3913_v10  ;;  %v3915_v5 = vpop.f32.mrb[85].mxu1 }
 0x3ab   : > { %v3916_v26 = vpop.f32.mrb[86].mxu1 }
 0x3ac   : > { %v4813_v51 = vor.u32 %v4812_v35, %v4808_v21  ;;  %v4107_v34 = vadd.f32 %v11221_v13, %v3914_v39  ;;  %v3917_v42 = vadd.f32 %v11213_v17, %v3916_v26  ;;  %v3918_v40 = vpop.f32.mrb[87].mxu1  ;;  %v4918_v21 = vpop.permute.xlu1 %4917 }
 0x3ad   : > { %v5155_v26 = vsel %vm3363_vm15, %v10166_v58, %v4918_v21 }
 0x3ae   : > { %v11451_v0 = vsel %vm791_vm4, %v4813_v51, %v4817_v44  ;;  %v4110_v41 = vadd.f32 %v11230_v11, %v3917_v42  ;;  %v4205_v10 = vmax.f32 %v4107_v34, 0.0  ;;  %v9331_v11 = vld [vmem:[%s13452_s5 + $0x98] sm:$0xff]  }
 0x3af   : > { %13492 = vst [vmem:[#allocation11_spill] sm:$0xff] %v11451_v0  ;;  %4933 = vrot.lane.b32.xlu1 %v11451_v0, %s9459_s15  ;;  %5799 = vmatpush1.bf16.msra.mxu0 %v9331_v11  ;;  %v4994_v11 = vrot.slane %v11250_v45, 1 }
 0x3b0   : > { %v4206_v36 = vmax.f32 %v4110_v41, 0.0  ;;  %v4993_v41 = vrot.slane %v11254_v57, 1 }
 0x3b2   : > { %v4395_v13 = vpack.c.bf16 %v4206_v36, %v4205_v10 }
 0x3b4   : > { %v4550_v35 = vshrl.u32 %v4395_v13, 16  ;;  %v4553_v44 = vshll.u32 %v4395_v13, 16 }
 0x3b5   : > { %v3921_v39 = vpop.f32.mrb[88].mxu1 }
 0x3b6   : > { %v5045_v5 = vpop.permute.xlu0 %5044  ;;  %v4552_v51 = vrot.slane %v4550_v35, 7  ;;  %v3922_v42 = vadd.f32 %v11213_v17, %v3921_v39  ;;  %v3923_v34 = vpop.f32.mrb[89].mxu1  ;;  %v13493_v35 = vmov 0  }
 0x3b7   : > { %v5211_v40 = vsel %vm3363_vm15, %v10185_v15, %v5045_v5  ;;  %v3924_v14 = vpop.f32.mrb[90].mxu1  ;;  %5800 = vmatprep.subr.bf16.mxu0 %v13493_v35 }
 0x3b8   : > { %5655 = vmatprep.mubr.bf16.mxu0 %v5211_v40  ;;  %v4115_v10 = vadd.f32 %v11216_v27, %v3922_v42  ;;  %v3925_v36 = vadd.f32 %v11213_v17, %v3924_v14  ;;  %v3926_v21 = vpop.f32.mrb[91].mxu1  ;;  %v4555_v28 = vor.u32 %v4553_v44, %v4552_v51  ;;  %v11473_v13 = vsel %vm9580_vm2, %v4552_v51, 0 }
 0x3b9   : > { %5656 = vmatmul.mubr.bf16.gmra.mrb[44].mxu0 %v5155_v26  ;;  %v4827_v26 = vshll.u32 %v11473_v13, 16  ;;  %v11487_v40 = vsel %vm1144_vm3, %v4993_v41, %v4994_v11 }
 0x3ba   : > { %v4118_v39 = vadd.f32 %v11226_v38, %v3925_v36  ;;  %v11479_v5 = vsel %vm9580_vm2, 0, %v4555_v28  ;;  %v4207_v44 = vmax.f32 %v4115_v10, 0.0  ;;  %v9332_v36 = vld [vmem:[%s13452_s5 + $0xa0] sm:$0xff]  }
 0x3bb   : > { %5060 = vrot.lane.b32.xlu0 %v11479_v5, %s9459_s15  ;;  %v4822_v27 = vshll.u32 %v11479_v5, 16  ;;  %v4820_v38 = vshrl.u32 %v11479_v5, 16  ;;  %5801 = vmatpush1.bf16.msra.mxu0 %v9332_v36 }
 0x3bc   : > { %v4208_v51 = vmax.f32 %v4118_v39, 0.0  ;;  %v4829_v39 = vrot.slane %v4827_v26, 1  ;;  %5802 = vmatprep.subr.bf16.mxu0 %v13493_v35 }
 0x3bd   : > { %v4920_v42 = vpop.permute.xlu1 %4919  ;;  %v4824_v45 = vrot.slane %v4822_v27, 1 }
 0x3be   : > { %v5047_v34 = vpop.permute.xlu0 %5046  ;;  %v4396_v14 = vpack.c.bf16 %v4208_v51, %v4207_v44  ;;  %v11497_v10 = vsel %vm3363_vm15, %v11254_v57, %v4920_v42  ;;  %v9333_v42 = vld [vmem:[%s13452_s5 + $0xa8] sm:$0xff]  }
 0x3bf   : > { %v5215_v28 = vsel %vm3363_vm15, %v11487_v40, %v5047_v34  ;;  %v4825_v21 = vor.u32 %v4824_v45, %v4820_v38  ;;  %5803 = vmatpush1.bf16.msra.mxu0 %v9333_v42  ;;  %v4997_v42 = vrot.slane %v11267_v29, 1 }
 0x3c0   : > { %5663 = vmatprep.mubr.bf16.mxu0 %v5215_v28  ;;  %v4557_v41 = vshrl.u32 %v4396_v14, 16  ;;  %v4560_v44 = vshll.u32 %v4396_v14, 16  ;;  %5804 = vmatprep.subr.bf16.mxu0 %v13493_v35 }
 0x3c1   : > { %5664 = vmatmul.mubr.bf16.gmra.mrb[48].mxu0 %v11497_v10  ;;  %v11501_v11 = vsel %vm791_vm4, %v4825_v21, %v4829_v39  ;;  %v4996_v39 = vrot.slane %v11274_v30, 1 }
 0x3c2   : > { %13494 = vst [vmem:[#allocation12_spill] sm:$0xff] %v11501_v11  ;;  %v4559_v27 = vrot.slane %v4557_v41, 7  ;;  %4935 = vrot.lane.b32.xlu1 %v11501_v11, %s9459_s15 }
 0x3c4   : > { %v4562_v51 = vor.u32 %v4560_v44, %v4559_v27  ;;  %v11508_v57 = vsel %vm9580_vm2, %v4559_v27, 0 }
 0x3c5   : > { %v4839_v28 = vshll.u32 %v11508_v57, 16  ;;  %v4922_v33 = vpop.permute.xlu1 %4921 }
 0x3c6   : > { %v11512_v26 = vsel %vm9580_vm2, 0, %v4562_v51  ;;  %v11541_v29 = vsel %vm3363_vm15, %v11274_v30, %v4922_v33 }
 0x3c7   : > { %5062 = vrot.lane.b32.xlu0 %v11512_v26, %s9459_s15  ;;  %v4834_v34 = vshll.u32 %v11512_v26, 16  ;;  %v4832_v45 = vshrl.u32 %v11512_v26, 16  ;;  %v4841_v44 = vrot.slane %v4839_v28, 1 }
 0x3c9   : > { %v4836_v14 = vrot.slane %v4834_v34, 1 }
 0x3ca   : > { %v3929_v38 = vpop.f32.mrb[92].mxu1 }
 0x3cb   : > { %v3930_v36 = vadd.f32 %v11213_v17, %v3929_v38  ;;  %v3931_v21 = vpop.f32.mrb[93].mxu1  ;;  %v4837_v27 = vor.u32 %v4836_v14, %v4832_v45  ;;  %v11535_v45 = vsel %vm1144_vm3, %v4996_v39, %v4997_v42  ;;  %v4999_v14 = vrot.slane %v11310_v7, 1 }
 0x3cc   : > { %v3932_v41 = vpop.f32.mrb[94].mxu1 }
 0x3cd   : > { %v4123_v51 = vadd.f32 %v11292_v31, %v3930_v36  ;;  %v3933_v11 = vadd.f32 %v11213_v17, %v3932_v41  ;;  %v3934_v0 = vpop.f32.mrb[95].mxu1  ;;  %v11529_v34 = vsel %vm791_vm4, %v4837_v27, %v4841_v44 }
 0x3ce   : > { %13495 = vst [vmem:[#allocation13_spill] sm:$0xff] %v11529_v34  ;;  %4937 = vrot.lane.b32.xlu1 %v11529_v34, %s9459_s15 }
 0x3cf   : > { %v4126_v59 = vadd.f32 %v11299_v63, %v3933_v11  ;;  %v5049_v38 = vpop.permute.xlu0 %5048  ;;  %v4209_v28 = vmax.f32 %v4123_v51, 0.0  ;;  %v9334_v63 = vld [vmem:[%s13452_s5 + $0xb0] sm:$0xff]  }
 0x3d0   : > { %v5219_v31 = vsel %vm3363_vm15, %v11535_v45, %v5049_v38  ;;  %5805 = vmatpush1.bf16.msra.mxu0 %v9334_v63 }
 0x3d1   : > { %v4210_v0 = vmax.f32 %v4126_v59, 0.0  ;;  %5671 = vmatprep.mubr.bf16.mxu0 %v5219_v31  ;;  %5806 = vmatprep.subr.bf16.mxu0 %v13493_v35  ;;  %v5000_v59 = vrot.slane %v11306_v37, 1 }
 0x3d2   : > { %5672 = vmatmul.mubr.bf16.gmra.mrb[52].mxu0 %v11541_v29 }
 0x3d3   : > { %v4397_v11 = vpack.c.bf16 %v4210_v0, %v4209_v28  ;;  %v11552_v51 = vsel %vm1144_vm3, %v4999_v14, %v5000_v59  ;;  %v9335_v14 = vld [vmem:[%s13452_s5 + $0xb8] sm:$0xff]  }
 0x3d4   : > { %5807 = vmatpush1.bf16.msra.mxu0 %v9335_v14 }
 0x3d5   : > { %v4564_v36 = vshrl.u32 %v4397_v11, 16  ;;  %v4567_v30 = vshll.u32 %v4397_v11, 16  ;;  %5808 = vmatprep.subr.bf16.mxu0 %v13493_v35 }
 0x3d6   : > { %v3937_v21 = vpop.f32.mrb[96].mxu1  ;;  %v4924_v39 = vpop.permute.xlu1 %4923 }
 0x3d7   : > { %v4566_v41 = vrot.slane %v4564_v36, 7  ;;  %v3938_v33 = vadd.f32 %v11213_v17, %v3937_v21  ;;  %v3939_v27 = vpop.f32.mrb[97].mxu1  ;;  %v5051_v44 = vpop.permute.xlu0 %5050  ;;  %v11558_v31 = vsel %vm3363_vm15, %v11310_v7, %v4924_v39 }
 0x3d8   : > { %v3940_v42 = vpop.f32.mrb[98].mxu1  ;;  %v5223_v38 = vsel %vm3363_vm15, %v11552_v51, %v5051_v44 }
 0x3d9   : > { %v4131_v37 = vadd.f32 %v11287_v56, %v3938_v33  ;;  %v3941_v28 = vadd.f32 %v11213_v17, %v3940_v42  ;;  %v3942_v0 = vpop.f32.mrb[99].mxu1  ;;  %5679 = vmatprep.mubr.bf16.mxu0 %v5223_v38  ;;  %v4569_v63 = vor.u32 %v4567_v30, %v4566_v41  ;;  %v11564_v11 = vsel %vm9580_vm2, %v4566_v41, 0  ;;  %v9336_v38 = vld [vmem:[%s13452_s5 + $0xc0] sm:$0xff]  }
 0x3da   : > { %5680 = vmatmul.mubr.bf16.gmra.mrb[56].mxu0 %v11558_v31  ;;  %v4851_v59 = vshll.u32 %v11564_v11, 16 }
 0x3db   : > { %v4134_v7 = vadd.f32 %v11296_v54, %v3941_v28  ;;  %v11573_v56 = vsel %vm9580_vm2, 0, %v4569_v63  ;;  %v4211_v21 = vmax.f32 %v4131_v37, 0.0  ;;  %5809 = vmatpush1.bf16.msra.mxu0 %v9336_v38  ;;  %v9337_v37 = vld [vmem:[%s13452_s5 + $0xc8] sm:$0xff]  }
 0x3dc   : > { %5064 = vrot.lane.b32.xlu0 %v11573_v56, %s9459_s15  ;;  %v4846_v36 = vshll.u32 %v11573_v56, 16  ;;  %v4844_v41 = vshrl.u32 %v11573_v56, 16  ;;  %v4853_v27 = vrot.slane %v4851_v59, 1  ;;  %5810 = vmatprep.subr.bf16.mxu0 %v13493_v35 }
 0x3dd   : > { %v4212_v39 = vmax.f32 %v4134_v7, 0.0 }
 0x3de   : > { %v4848_v30 = vrot.slane %v4846_v36, 1 }
 0x3df   : > { %v4398_v54 = vpack.c.bf16 %v4212_v39, %v4211_v21  ;;  %5811 = vmatpush1.bf16.msra.mxu0 %v9337_v37 }
 0x3e0   : > { %v4849_v33 = vor.u32 %v4848_v30, %v4844_v41  ;;  %5812 = vmatprep.subr.bf16.mxu0 %v13493_v35  ;;  %v5002_v30 = vrot.slane %v11328_v22, 1 }
 0x3e1   : > { %v4571_v44 = vshrl.u32 %v4398_v54, 16  ;;  %v4574_v0 = vshll.u32 %v4398_v54, 16 }
 0x3e2   : > { %v11582_v42 = vsel %vm791_vm4, %v4849_v33, %v4853_v27 }
 0x3e3   : > { %13496 = vst [vmem:[#allocation14_spill] sm:$0xff] %v11582_v42  ;;  %v4573_v28 = vrot.slane %v4571_v44, 7  ;;  %4939 = vrot.lane.b32.xlu1 %v11582_v42, %s9459_s15 }
 0x3e5   : > { %v4576_v63 = vor.u32 %v4574_v0, %v4573_v28  ;;  %v11594_v14 = vsel %vm9580_vm2, %v4573_v28, 0  ;;  %v5003_v28 = vrot.slane %v11319_v61, 1  ;;  %v4926_v0 = vpop.permute.xlu1 %4925 }
 0x3e6   : > { %v4863_v59 = vshll.u32 %v11594_v14, 16 }
 0x3e7   : > { %v11599_v7 = vsel %vm9580_vm2, 0, %v4576_v63 }
 0x3e8   : > { %5066 = vrot.lane.b32.xlu0 %v11599_v7, %s9459_s15  ;;  %v4858_v36 = vshll.u32 %v11599_v7, 16  ;;  %v4856_v39 = vshrl.u32 %v11599_v7, 16  ;;  %v4865_v38 = vrot.slane %v4863_v59, 1 }
 0x3ea   : > { %v3945_v21 = vpop.f32.mrb[100].mxu1  ;;  %v4860_v41 = vrot.slane %v4858_v36, 1  ;;  %v11616_v36 = vsel %vm1144_vm3, %v5002_v30, %v5003_v28 }
 0x3eb   : > { %v3946_v54 = vadd.f32 %v11213_v17, %v3945_v21  ;;  %v3947_v33 = vpop.f32.mrb[101].mxu1 }
 0x3ec   : > { %v3948_v27 = vpop.f32.mrb[102].mxu1  ;;  %v4861_v44 = vor.u32 %v4860_v41, %v4856_v39 }
 0x3ed   : > { %v4139_v63 = vadd.f32 %v11346_v18, %v3946_v54  ;;  %v3949_v37 = vadd.f32 %v11213_v17, %v3948_v27  ;;  %v3950_v42 = vpop.f32.mrb[103].mxu1  ;;  %v11625_v18 = vsel %vm3363_vm15, %v11328_v22, %v4926_v0  ;;  %v5005_v54 = vrot.slane %v11362_v32, 1 }
 0x3ee   : > { %v5053_v34 = vpop.permute.xlu0 %5052  ;;  %v11613_v48 = vsel %vm791_vm4, %v4861_v44, %v4865_v38  ;;  %v5006_v38 = vrot.slane %v11357_v23, 1 }
 0x3ef   : > { %v4142_v21 = vadd.f32 %v11350_v43, %v3949_v37  ;;  %4941 = vrot.lane.b32.xlu1 %v11613_v48, %s9459_s15  ;;  %v5227_v61 = vsel %vm3363_vm15, %v11616_v36, %v5053_v34  ;;  %v4213_v42 = vmax.f32 %v4139_v63, 0.0  ;;  %v9338_v43 = vld [vmem:[%s13452_s5 + $0xd0] sm:$0xff]  }
 0x3f0   : > { %5687 = vmatprep.mubr.bf16.mxu0 %v5227_v61  ;;  %5813 = vmatpush1.bf16.msra.mxu0 %v9338_v43 }
 0x3f1   : > { %v4214_v59 = vmax.f32 %v4142_v21, 0.0  ;;  %5688 = vmatmul.mubr.bf16.gmra.mrb[60].mxu0 %v11625_v18  ;;  %5814 = vmatprep.subr.bf16.mxu0 %v13493_v35 }
 0x3f3   : > { %v4399_v39 = vpack.c.bf16 %v4214_v59, %v4213_v42  ;;  %v11642_v59 = vsel %vm1144_vm3, %v5005_v54, %v5006_v38 }
 0x3f5   : > { %v4578_v41 = vshrl.u32 %v4399_v39, 16  ;;  %v4581_v34 = vshll.u32 %v4399_v39, 16  ;;  %v4928_v28 = vpop.permute.xlu1 %4927 }
 0x3f6   : > { %v3953_v30 = vpop.f32.mrb[104].mxu1 }
 0x3f7   : > { %v4580_v33 = vrot.slane %v4578_v41, 7  ;;  %v3954_v27 = vadd.f32 %v11213_v17, %v3953_v30  ;;  %v3955_v44 = vpop.f32.mrb[105].mxu1  ;;  %v11655_v41 = vsel %vm3363_vm15, %v11362_v32, %v4928_v28  ;;  %v9340_v28 = vld [vmem:[%s13452_s5 + $0xe0] sm:$0xff]  }
 0x3f8   : > { %v3956_v22 = vpop.f32.mrb[106].mxu1 }
 0x3f9   : > { %v4147_v0 = vadd.f32 %v11344_v49, %v3954_v27  ;;  %v3957_v63 = vadd.f32 %v11213_v17, %v3956_v22  ;;  %v3958_v37 = vpop.f32.mrb[107].mxu1  ;;  %v4583_v21 = vor.u32 %v4581_v34, %v4580_v33  ;;  %v11639_v61 = vsel %vm9580_vm2, %v4580_v33, 0  ;;  %v9339_v33 = vld [vmem:[%s13452_s5 + $0xd8] sm:$0xff]  }
 0x3fa   : > { %v4875_v30 = vshll.u32 %v11639_v61, 16  ;;  %5815 = vmatpush1.bf16.msra.mxu0 %v9339_v33 }
 0x3fb   : > { %v5055_v42 = vpop.permute.xlu0 %5054  ;;  %v4150_v39 = vadd.f32 %v11348_v52, %v3957_v63  ;;  %v11647_v23 = vsel %vm9580_vm2, 0, %v4583_v21  ;;  %v4215_v52 = vmax.f32 %v4147_v0, 0.0  ;;  %5816 = vmatprep.subr.bf16.mxu0 %v13493_v35 }
 0x3fc   : > { %v5231_v49 = vsel %vm3363_vm15, %v11642_v59, %v5055_v42  ;;  %5068 = vrot.lane.b32.xlu0 %v11647_v23, %s9459_s15  ;;  %v4870_v43 = vshll.u32 %v11647_v23, 16  ;;  %v4868_v34 = vshrl.u32 %v11647_v23, 16  ;;  %v4877_v32 = vrot.slane %v4875_v30, 1 }
 0x3fd   : > { %5695 = vmatprep.mubr.bf16.mxu0 %v5231_v49  ;;  %v4216_v54 = vmax.f32 %v4150_v39, 0.0 }
 0x3fe   : > { %5696 = vmatmul.mubr.bf16.gmra.mrb[64].mxu0 %v11655_v41  ;;  %v4872_v27 = vrot.slane %v4870_v43, 1 }
 0x3ff   : > { %v4400_v44 = vpack.c.bf16 %v4216_v54, %v4215_v52  ;;  %5817 = vmatpush1.bf16.msra.mxu0 %v9340_v28 }
 0x400   : > { %v4873_v22 = vor.u32 %v4872_v27, %v4868_v34  ;;  %5818 = vmatprep.subr.bf16.mxu0 %v13493_v35  ;;  %v5008_v27 = vrot.slane %v11380_v24, 1 }
 0x401   : > { %v4585_v38 = vshrl.u32 %v4400_v44, 16  ;;  %v4588_v37 = vshll.u32 %v4400_v44, 16 }
 0x402   : > { %v11669_v0 = vsel %vm791_vm4, %v4873_v22, %v4877_v32  ;;  %v5009_v22 = vrot.slane %v11376_v20, 1 }
 0x403   : > { %13497 = vst [vmem:[#allocation15_spill] sm:$0xff] %v11669_v0  ;;  %v4587_v63 = vrot.slane %v4585_v38, 7  ;;  %4943 = vrot.lane.b32.xlu1 %v11669_v0, %s9459_s15 }
 0x405   : > { %v4590_v21 = vor.u32 %v4588_v37, %v4587_v63  ;;  %v11676_v42 = vsel %vm9580_vm2, %v4587_v63, 0 }
 0x406   : > { %v4887_v43 = vshll.u32 %v11676_v42, 16 }
 0x407   : > { %v11680_v39 = vsel %vm9580_vm2, 0, %v4590_v21  ;;  %v4930_v21 = vpop.permute.xlu1 %4929 }
 0x408   : > { %5070 = vrot.lane.b32.xlu0 %v11680_v39, %s9459_s15  ;;  %v4882_v49 = vshll.u32 %v11680_v39, 16  ;;  %v4880_v33 = vshrl.u32 %v11680_v39, 16  ;;  %v4889_v37 = vrot.slane %v4887_v43, 1  ;;  %v11705_v43 = vsel %vm3363_vm15, %v11380_v24, %v4930_v21 }
 0x40a   : > { %v3961_v30 = vpop.f32.mrb[108].mxu1  ;;  %v4884_v34 = vrot.slane %v4882_v49, 1  ;;  %v11697_v49 = vsel %vm1144_vm3, %v5008_v27, %v5009_v22 }
 0x40b   : > { %v3962_v52 = vadd.f32 %v11213_v17, %v3961_v30  ;;  %v3963_v54 = vpop.f32.mrb[109].mxu1 }
 0x40c   : > { %v3964_v44 = vpop.f32.mrb[110].mxu1  ;;  %v4885_v63 = vor.u32 %v4884_v34, %v4880_v33 }
 0x40d   : > { %v3965_v32 = vadd.f32 %v11213_v17, %v3964_v44  ;;  %v4155_v38 = vadd.f32 %v11398_v62, %v3962_v52  ;;  %v3966_v28 = vpop.f32.mrb[111].mxu1 }
 0x40e   : > { %v5057_v30 = vpop.permute.xlu0 %5056  ;;  %v11694_v54 = vsel %vm791_vm4, %v4885_v63, %v4889_v37  ;;  %v5012_v28 = vrot.slane %v11409_v47, 1 }
 0x40f   : > { %v4158_v0 = vadd.f32 %v11402_v1, %v3965_v32  ;;  %4945 = vrot.lane.b32.xlu1 %v11694_v54, %s9459_s15  ;;  %v5235_v17 = vsel %vm3363_vm15, %v11697_v49, %v5057_v30  ;;  %v4217_v20 = vmax.f32 %v4155_v38, 0.0  ;;  %v9341_v1 = vld [vmem:[%s13452_s5 + $0xe8] sm:$0xff]   ;;  %v5011_v32 = vrot.slane %v11414_v50, 1 }
 0x410   : > { %5703 = vmatprep.mubr.bf16.mxu0 %v5235_v17  ;;  %5819 = vmatpush1.bf16.msra.mxu0 %v9341_v1 }
 0x411   : > { %v4218_v62 = vmax.f32 %v4158_v0, 0.0  ;;  %5704 = vmatmul.mubr.bf16.gmra.mrb[68].mxu0 %v11705_v43  ;;  %5820 = vmatprep.subr.bf16.mxu0 %v13493_v35  ;;  %v9367_v0 = vld [vmem:[%s13451_s4] ss:$0 sm:$0xff] }
 0x413   : > { %v4401_v52 = vpack.c.bf16 %v4218_v62, %v4217_v20  ;;  %v9342_v62 = vld [vmem:[%s13452_s5 + $0xf0] sm:$0xff]  }
 0x414   : > { %5821 = vmatpush1.bf16.msra.mxu0 %v9342_v62 }
 0x415   : > { %v4592_v33 = vshrl.u32 %v4401_v52, 16  ;;  %v4595_v44 = vshll.u32 %v4401_v52, 16  ;;  %v4932_v20 = vpop.permute.xlu1 %4931  ;;  %5822 = vmatprep.subr.bf16.mxu0 %v13493_v35 }
 0x416   : > { %v3969_v34 = vpop.f32.mrb[112].mxu1 }
 0x417   : > { %v4594_v27 = vrot.slane %v4592_v33, 7  ;;  %v3970_v24 = vadd.f32 %v9367_v0, %v3969_v34  ;;  %v3971_v22 = vpop.f32.mrb[113].mxu1  ;;  %v11731_v33 = vsel %vm1144_vm3, %v5011_v32, %v5012_v28 }
 0x418   : > { %v3972_v38 = vpop.f32.mrb[114].mxu1  ;;  %v11741_v22 = vsel %vm3363_vm15, %v11414_v50, %v4932_v20  ;;  %v9343_v50 = vld [vmem:[%s13452_s5 + $0xf8] sm:$0xff]  }
 0x419   : > { %v4597_v63 = vor.u32 %v4595_v44, %v4594_v27  ;;  %v11719_v37 = vsel %vm9580_vm2, %v4594_v27, 0  ;;  %v4163_v21 = vadd.f32 %v11396_v55, %v3970_v24  ;;  %v3973_v30 = vadd.f32 %v9367_v0, %v3972_v38  ;;  %v3974_v17 = vpop.f32.mrb[115].mxu1  ;;  %5823 = vmatpush1.bf16.msra.mxu0 %v9343_v50 }
 0x41a   : > { %v5059_v52 = vpop.permute.xlu0 %5058  ;;  %v5649_v34 = vpop.f32.mrb[40].mxu0  ;;  %v4899_v44 = vshll.u32 %v11719_v37, 16  ;;  %v5017_v50 = vrot.slane %v11479_v5, 1 }
 0x41b   : > { %v4166_v1 = vadd.f32 %v11400_v25, %v3973_v30  ;;  %v11728_v47 = vsel %vm9580_vm2, 0, %v4597_v63  ;;  %v5239_v55 = vsel %vm3363_vm15, %v11731_v33, %v5059_v52  ;;  %v5651_v25 = vpop.f32.mrb[41].mxu0  ;;  %v4219_v0 = vmax.f32 %v4163_v21, 0.0 }
 0x41c   : > { %5072 = vrot.lane.b32.xlu0 %v11728_v47, %s9459_s15  ;;  %v4894_v27 = vshll.u32 %v11728_v47, 16  ;;  %5711 = vmatprep.mubr.bf16.mxu0 %v5239_v55  ;;  %v5652_v32 = vpop.f32.mrb[42].mxu0  ;;  %v4892_v38 = vshrl.u32 %v11728_v47, 16  ;;  %v4901_v62 = vrot.slane %v4899_v44, 1 }
 0x41d   : > { %v4220_v24 = vmax.f32 %v4166_v1, 0.0  ;;  %5712 = vmatmul.mubr.bf16.gmra.mrb[72].mxu0 %v11741_v22  ;;  %v5654_v63 = vpop.f32.mrb[43].mxu0  ;;  %v11770_v32 = vld [vmem:[%s13452_s5 + $0x100] sm:$0xff]  }
 0x41e   : > { %v4896_v28 = vrot.slane %v4894_v27, 1  ;;  %8935 = vmatprep.subr.bf16.mxu0 %v11770_v32 }
 0x41f   : > { %v4402_v30 = vpack.c.bf16 %v4220_v24, %v4219_v0 }
 0x420   : > { %v4897_v17 = vor.u32 %v4896_v28, %v4892_v38  ;;  %v5014_v38 = vrot.slane %v11439_v19, 1 }
 0x421   : > { %v4599_v52 = vshrl.u32 %v4402_v30, 16  ;;  %v4602_v34 = vshll.u32 %v4402_v30, 16  ;;  %v5015_v30 = vrot.slane %v11434_v2, 1 }
 0x422   : > { %v11747_v21 = vsel %vm791_vm4, %v4897_v17, %v4901_v62  ;;  %v4934_v17 = vpop.permute.xlu1 %4933 }
 0x423   : > { %v4601_v1 = vrot.slane %v4599_v52, 7  ;;  %4947 = vrot.lane.b32.xlu1 %v11747_v21, %s9459_s15  ;;  %v11791_v2 = vsel %vm3363_vm15, %v11439_v19, %v4934_v17  ;;  %v5027_v17 = vrot.slane %v11594_v14, 1  ;;  %v5033_v14 = vrot.slane %v11676_v42, 1 }
 0x425   : > { %v4604_v20 = vor.u32 %v4602_v34, %v4601_v1  ;;  %v11756_v55 = vsel %vm9580_vm2, %v4601_v1, 0  ;;  %v11783_v1 = vsel %vm1144_vm3, %v5014_v38, %v5015_v30  ;;  %v5021_v38 = vrot.slane %v11508_v57, 1 }
 0x426   : > { %v4911_v25 = vshll.u32 %v11756_v55, 16  ;;  %v5024_v30 = vrot.slane %v11564_v11, 1  ;;  %v5029_v57 = vrot.slane %v11647_v23, 1  ;;  %v5030_v11 = vrot.slane %v11639_v61, 1 }
 0x427   : > { %v11760_v27 = vsel %vm9580_vm2, 0, %v4604_v20  ;;  %v5018_v20 = vrot.slane %v11473_v13, 1  ;;  %v5020_v13 = vrot.slane %v11512_v26, 1 }
 0x428   : > { %5074 = vrot.lane.b32.xlu0 %v11760_v27, %s9459_s15  ;;  %v4906_v44 = vshll.u32 %v11760_v27, 16  ;;  %v4904_v0 = vshrl.u32 %v11760_v27, 16  ;;  %v4913_v63 = vrot.slane %v4911_v25, 1  ;;  %v5038_v42 = vrot.slane %v11760_v27, 1 }
 0x429   : > { %v11807_v25 = vsel %vm1144_vm3, %v5017_v50, %v5018_v20  ;;  %v5032_v50 = vrot.slane %v11680_v39, 1  ;;  %v11850_v20 = vsel %vm1144_vm3, %v5029_v57, %v5030_v11 }
 0x42a   : > { %v4908_v24 = vrot.slane %v4906_v44, 1 }
 0x42c   : > { %5076 = vrot.lane.b32.xlu0 %v10166_v58, %s9459_s15  ;;  %v4909_v28 = vor.u32 %v4908_v24, %v4904_v0 }
 0x42d   : > { %v5061_v52 = vpop.permute.xlu0 %5060 }
 0x42e   : > { %v11778_v62 = vsel %vm791_vm4, %v4909_v28, %v4913_v63  ;;  %v5243_v34 = vsel %vm3363_vm15, %v11783_v1, %v5061_v52  ;;  %v5023_v28 = vrot.slane %v11573_v56, 1  ;;  %v5026_v63 = vrot.slane %v11599_v7, 1 }
 0x42f   : > { %4949 = vrot.lane.b32.xlu1 %v11778_v62, %s9459_s15  ;;  %5719 = vmatprep.mubr.bf16.mxu0 %v5243_v34 }
 0x430   : > { %5094 = vrot.lane.b32.xlu0 %v10185_v15, %s9459_s15  ;;  %5720 = vmatmul.mubr.bf16.gmra.mrb[76].mxu0 %v11791_v2  ;;  %v11836_v52 = vsel %vm1144_vm3, %v5023_v28, %v5024_v30  ;;  %v11842_v34 = vsel %vm1144_vm3, %v5026_v63, %v5027_v17  ;;  %v5039_v63 = vrot.slane %v11756_v55, 1 }
 0x432   : > { %v11878_v30 = vsel %vm1144_vm3, %v5038_v42, %v5039_v63 }
 0x433   : > { %5096 = vrot.lane.b32.xlu1 %v11487_v40, %s9459_s15 }
 0x434   : > { %5098 = vrot.lane.b32.xlu0 %v11535_v45, %s9459_s15  ;;  %v4936_v19 = vpop.permute.xlu1 %4935 }
 0x435   : > { %v11815_v24 = vsel %vm3363_vm15, %v11479_v5, %v4936_v19  ;;  %v11828_v5 = vsel %vm1144_vm3, %v5020_v13, %v5021_v38  ;;  %v5035_v19 = vrot.slane %v11728_v47, 1 }
 0x437   : > { %5100 = vrot.lane.b32.xlu1 %v11552_v51, %s9459_s15 }
 0x438   : > { %5102 = vrot.lane.b32.xlu0 %v11616_v36, %s9459_s15 }
 0x439   : > { %v5063_v44 = vpop.permute.xlu0 %5062 }
 0x43a   : > { %v5247_v0 = vsel %vm3363_vm15, %v11807_v25, %v5063_v44  ;;  %v11856_v44 = vsel %vm1144_vm3, %v5032_v50, %v5033_v14 }
 0x43b   : > { %5104 = vrot.lane.b32.xlu1 %v11642_v59, %s9459_s15  ;;  %5727 = vmatprep.mubr.bf16.mxu0 %v5247_v0  ;;  %v5036_v0 = vrot.slane %v11719_v37, 1 }
 0x43c   : > { %5106 = vrot.lane.b32.xlu0 %v11697_v49, %s9459_s15  ;;  %5728 = vmatmul.mubr.bf16.gmra.mrb[80].mxu0 %v11815_v24 }
 0x43d   : > { %v11862_v61 = vsel %vm1144_vm3, %v5035_v19, %v5036_v0 }
 0x43f   : > { %5108 = vrot.lane.b32.xlu1 %v11731_v33, %s9459_s15 }
 0x440   : > { %5110 = vrot.lane.b32.xlu0 %v11783_v1, %s9459_s15  ;;  %v4938_v13 = vpop.permute.xlu1 %4937 }
 0x441   : > { %v11874_v37 = vsel %vm3363_vm15, %v11512_v26, %v4938_v13 }
 0x443   : > { %5112 = vrot.lane.b32.xlu1 %v11807_v25, %s9459_s15 }
 0x444   : > { %5114 = vrot.lane.b32.xlu0 %v11828_v5, %s9459_s15 }
 0x447   : > { %5116 = vrot.lane.b32.xlu1 %v11836_v52, %s9459_s15 }
 0x448   : > { %5118 = vrot.lane.b32.xlu0 %v11842_v34, %s9459_s15 }
 0x44b   : > { %5120 = vrot.lane.b32.xlu1 %v11850_v20, %s9459_s15 }
 0x44c   : > { %5122 = vrot.lane.b32.xlu0 %v11856_v44, %s9459_s15 }
 0x44e   : > { %v5065_v38 = vpop.permute.xlu0 %5064 }
 0x44f   : > { %5124 = vrot.lane.b32.xlu1 %v11862_v61, %s9459_s15  ;;  %v5251_v28 = vsel %vm3363_vm15, %v11828_v5, %v5065_v38 }
 0x450   : > { %5142 = vrot.lane.b32.xlu0 %v10356_v3, %s9459_s15  ;;  %5735 = vmatprep.mubr.bf16.mxu0 %v5251_v28 }
 0x451   : > { %5736 = vmatmul.mubr.bf16.gmra.mrb[84].mxu0 %v11874_v37 }
 0x453   : > { %5126 = vrot.lane.b32.xlu1 %v11878_v30, %s9459_s15 }
 0x454   : > { %5144 = vrot.lane.b32.xlu0 %v10356_v3, %s9459_s15 }
 0x455   : > { %v4940_v55 = vpop.permute.xlu1 %4939 }
 0x456   : > { %v11896_v57 = vsel %vm3363_vm15, %v11573_v56, %v4940_v55 }
 0x457   : > { %5128 = vrot.lane.b32.xlu1 %v10185_v15, %s9459_s15 }
 0x458   : > { %9207 = vrot.lane.b32.xlu0 %v10360_v8, %s9457_s25 }
 0x45a   : > { %v5067_v26 = vpop.permute.xlu0 %5066 }
 0x45b   : > { %2984 = vrot.lane.b32.xlu1 %v11056_v4, %s9457_s25  ;;  %v5255_v17 = vsel %vm3363_vm15, %v11836_v52, %v5067_v26 }
 0x45c   : > { %9212 = vrot.lane.b32.xlu0 %v10381_v46, %s9459_s15  ;;  %5743 = vmatprep.mubr.bf16.mxu0 %v5255_v17 }
 0x45d   : > { %5744 = vmatmul.mubr.bf16.gmra.mrb[88].mxu0 %v11896_v57 }
 0x45f   : > { %3124 = vrot.lane.b32.xlu1 %v11039_v60, %s9459_s15 }
 0x460   : > { %3314 = vrot.lane.b32.xlu0 %v10356_v3, %s9458_s28 }
 0x461   : > { %v4942_v4 = vpop.permute.xlu1 %4941 }
 0x462   : > { %v11915_v50 = vsel %vm3363_vm15, %v11599_v7, %v4942_v4 }
 0x463   : > { %9217 = vrot.lane.b32.xlu1 %v10381_v46, %s9458_s28 }
 0x464   : > { %2986 = vrot.lane.b32.xlu0 %v10356_v3, %s9457_s25 }
 0x467   : > { %9222 = vrot.lane.b32.xlu1 %v10360_v8, %s9459_s15 }
 0x468   : > { %3316 = vrot.lane.b32.xlu0 %v10356_v3, %s9458_s28 }
 0x46c   : > { %6771 = vrot.lane.b32.xlu0 %v10356_v3, %s9457_s25 }
 0x46e   : > { %v5069_v56 = vpop.permute.xlu0 %5068 }
 0x46f   : > { %v5259_v60 = vsel %vm3363_vm15, %v11842_v34, %v5069_v56 }
 0x470   : > { %5751 = vmatprep.mubr.bf16.mxu0 %v5259_v60 }
 0x471   : > { %5752 = vmatmul.mubr.bf16.gmra.mrb[92].mxu0 %v11915_v50 }
 0x475   : > { %v4944_v46 = vpop.permute.xlu1 %4943 }
 0x476   : > { %v11922_v19 = vsel %vm3363_vm15, %v11647_v23, %v4944_v46 }
 0x47a   : > { %v5071_v11 = vpop.permute.xlu0 %5070 }
 0x47b   : > { %v5263_v14 = vsel %vm3363_vm15, %v11850_v20, %v5071_v11 }
 0x47c   : > { %5759 = vmatprep.mubr.bf16.mxu0 %v5263_v14  ;;  %v9345_v14 = vld [vmem:[%s13452_s5 + $0x108] sm:$0xff]  }
 0x47d   : > { %5760 = vmatmul.mubr.bf16.gmra.mrb[96].mxu0 %v11922_v19 }
 0x481   : > { %v4946_v0 = vpop.permute.xlu1 %4945 }
 0x482   : > { %v11929_v42 = vsel %vm3363_vm15, %v11680_v39, %v4946_v0 }
 0x48e   : > { %v5073_v13 = vpop.permute.xlu0 %5072 }
 0x48f   : > { %v5267_v7 = vsel %vm3363_vm15, %v11856_v44, %v5073_v13 }
 0x490   : > { %5767 = vmatprep.mubr.bf16.mxu0 %v5267_v7 }
 0x491   : > { %5768 = vmatmul.mubr.bf16.gmra.mrb[100].mxu0 %v11929_v42 }
 0x495   : > { %v4948_v38 = vpop.permute.xlu1 %4947 }
 0x496   : > { %v11936_v63 = vsel %vm3363_vm15, %v11728_v47, %v4948_v38  ;;  %v9347_v38 = vld [vmem:[%s13452_s5 + $0x118] sm:$0xff]  }
 0x49a   : > { %v5075_v28 = vpop.permute.xlu0 %5074 }
 0x49b   : > { %v5271_v23 = vsel %vm3363_vm15, %v11862_v61, %v5075_v28 }
 0x49c   : > { %5775 = vmatprep.mubr.bf16.mxu0 %v5271_v23 }
 0x49d   : > { %5776 = vmatmul.mubr.bf16.gmra.mrb[104].mxu0 %v11936_v63 }
 0x49e   : > { %v5077_v55 = vpop.permute.xlu0 %5076 }
 0x49f   : > { %v5275_v26 = vsel %vm3363_vm15, %v11878_v30, %v5077_v55 }
 0x4a0   : > { %5783 = vmatprep.mubr.bf16.mxu0 %v5275_v26 }
 0x4a1   : > { %v4950_v39 = vpop.permute.xlu1 %4949 }
 0x4a2   : > { %v5095_v17 = vpop.permute.xlu0 %5094  ;;  %v11943_v4 = vsel %vm3363_vm15, %v11760_v27, %v4950_v39 }
 0x4a3   : > { %v5279_v46 = vsel %vm3363_vm15, %v10356_v3, %v5095_v17 }
 0x4a5   : > { %5784 = vmatmul.mubr.bf16.gmra.mrb[108].mxu0 %v11943_v4  ;;  %v5097_v56 = vpop.permute.xlu1 %5096 }
 0x4a6   : > { %v5099_v60 = vpop.permute.xlu0 %5098  ;;  %5824 = vmatprep.mubr.bf16.mxu0 %v11497_v10  ;;  %v9346_v10 = vld [vmem:[%s13452_s5 + $0x110] sm:$0xff]   ;;  %v5283_v28 = vsel %vm3363_vm15, %v11270_v16, %v5097_v56 }
 0x4a7   : > { %v5287_v26 = vsel %vm3363_vm15, %v11290_v53, %v5099_v60 }
 0x4a9   : > { %v5101_v47 = vpop.permute.xlu1 %5100 }
 0x4aa   : > { %v5103_v11 = vpop.permute.xlu0 %5102  ;;  %v5291_v56 = vsel %vm3363_vm15, %v11322_v12, %v5101_v47 }
 0x4ab   : > { %v5295_v60 = vsel %vm3363_vm15, %v11337_v6, %v5103_v11 }
 0x4ad   : > { %5825 = vmatmul.mubr.bf16.vlgmr.msra.gmra.mrb[112].mxu0 %v5279_v46  ;;  %v5105_v0 = vpop.permute.xlu1 %5104 }
 0x4ae   : > { %8936 = vmatpush3.bf16.msra.mxu0 %v11770_v32  ;;  %v5107_v27 = vpop.permute.xlu0 %5106  ;;  %5832 = vmatprep.mubr.bf16.mxu0 %v11541_v29  ;;  %v5299_v6 = vsel %vm3363_vm15, %v13499_v9, %v5105_v0  ;;  %v13502_v9 = vld [vmem:[#allocation10_spill] sm:$0xff]  ;;  %v13503_v0 = vld [vmem:[#allocation11_spill] sm:$0xff] }
 0x4af   : > { %8937 = vmatprep.subr.bf16.mxu0 %v9345_v14 }
 0x4b1   : > { %v5109_v13 = vpop.permute.xlu1 %5108 }
 0x4b2   : > { %v5111_v7 = vpop.permute.xlu0 %5110  ;;  %8938 = vmatpush3.bf16.msra.mxu0 %v9345_v14 }
 0x4b3   : > { %8939 = vmatprep.subr.bf16.mxu0 %v9346_v10 }
 0x4b5   : > { %5833 = vmatmul.mubr.bf16.gmra.mrb[44].mxu0 %v5283_v28  ;;  %v5113_v32 = vpop.permute.xlu1 %5112 }
 0x4b6   : > { %v5115_v23 = vpop.permute.xlu0 %5114  ;;  %5840 = vmatprep.mubr.bf16.mxu0 %v11558_v31  ;;  %8940 = vmatpush3.bf16.msra.mxu0 %v9346_v10 }
 0x4b7   : > { %8941 = vmatprep.subr.bf16.mxu0 %v9347_v38 }
 0x4b9   : > { %v5117_v29 = vpop.permute.xlu1 %5116 }
 0x4ba   : > { %v5119_v55 = vpop.permute.xlu0 %5118  ;;  %8942 = vmatpush3.bf16.msra.mxu0 %v9347_v38 }
 0x4bd   : > { %5841 = vmatmul.mubr.bf16.gmra.mrb[48].mxu0 %v5287_v26  ;;  %v5121_v39 = vpop.permute.xlu1 %5120 }
 0x4be   : > { %v5123_v17 = vpop.permute.xlu0 %5122  ;;  %5848 = vmatprep.mubr.bf16.mxu0 %v11625_v18 }
 0x4c1   : > { %v5125_v46 = vpop.permute.xlu1 %5124 }
 0x4c2   : > { %v5143_v16 = vpop.permute.xlu0 %5142 }
 0x4c5   : > { %5849 = vmatmul.mubr.bf16.gmra.mrb[52].mxu0 %v5291_v56  ;;  %v5127_v31 = vpop.permute.xlu1 %5126 }
 0x4c6   : > { %5856 = vmatprep.mubr.bf16.mxu0 %v11655_v41  ;;  %v5145_v14 = vpop.permute.xlu0 %5144 }
 0x4c9   : > { %v5129_v10 = vpop.permute.xlu1 %5128 }
 0x4ca   : > { %v11969_v38 = vpop.permute.xlu0 %9207 }
 0x4cb   : > { %v9209_v53 = vunpack.i.l.bf16 %v11969_v38 }
 0x4cd   : > { %5857 = vmatmul.mubr.bf16.gmra.mrb[56].mxu0 %v5295_v60  ;;  %v2985_v18 = vpop.permute.xlu1 %2984  ;;  %v3521_v12 = vsel %vm3322_vm14, %v10356_v3, %v9209_v53 }
 0x4ce   : > { %5864 = vmatprep.mubr.bf16.mxu0 %v11705_v43  ;;  %v11975_v28 = vpop.permute.xlu0 %9212  ;;  %v13500_v43 = vld [vmem:[#allocation7_spill] sm:$0xff] }
 0x4cf   : > { %13498 = vst [vmem:[#allocation16_spill] sm:$0xff] %v11975_v28  ;;  %v9214_v41 = vunpack.i.l.bf16 %v11975_v28  ;;  %v3360_v60 = vsel %vm3322_vm14, %v13500_v43, %v2985_v18  ;;  %v13504_v18 = vld [vmem:[#allocation12_spill] sm:$0xff] }
 0x4d1   : > { %v3125_v47 = vpop.permute.xlu1 %3124  ;;  %v3562_v26 = vsel %vm3363_vm15, %v3521_v12, %v9214_v41  ;;  %v13501_v41 = vld [vmem:[#allocation9_spill] sm:$0xff] }
 0x4d2   : > { %v3315_v56 = vpop.permute.xlu0 %3314  ;;  %v3401_v28 = vsel %vm3363_vm15, %v3360_v60, %v3125_v47 }
 0x4d3   : > { %v3620_v35 = vsel %vm3404_vm0, %v3562_v26, %v3315_v56  ;;  %v5303_v26 = vsel %vm3363_vm15, %v13501_v41, %v5107_v27  ;;  %v13505_v27 = vld [vmem:[#allocation13_spill] sm:$0xff] }
 0x4d4   : > { %3975 = vmatprep.mubr.bf16.mxu1 %v3620_v35  ;;  %v5307_v35 = vsel %vm3363_vm15, %v13502_v9, %v5109_v13  ;;  %v13506_v13 = vld [vmem:[#allocation14_spill] sm:$0xff] }
 0x4d5   : > { %5865 = vmatmul.mubr.bf16.gmra.mrb[60].mxu0 %v5299_v6  ;;  %v11984_v11 = vpop.permute.xlu1 %9217 }
 0x4d6   : > { %v9219_v53 = vunpack.i.l.bf16 %v11984_v11  ;;  %5872 = vmatprep.mubr.bf16.mxu0 %v11741_v22  ;;  %v5311_v22 = vsel %vm3363_vm15, %v13503_v0, %v5111_v7  ;;  %v13507_v7 = vld [vmem:[#allocation15_spill] sm:$0xff] }
 0x4d8   : > { %v3460_v12 = vsel %vm3404_vm0, %v3401_v28, %v9219_v53  ;;  %v5315_v28 = vsel %vm3363_vm15, %v13504_v18, %v5113_v32  ;;  %v9348_v53 = vld [vmem:[%s13454_s7 + $0x40] sm:$0xff]  }
 0x4d9   : > { %3976 = vmatmul.mubr.bf16.gmra.mrb[116].mxu1 %v3460_v12  ;;  %v9349_v12 = vld [vmem:[%s13454_s7] sm:$0xff]   ;;  %8713 = vmatprep.subr.bf16.mxu1 %v9348_v53  ;;  %v13508_v53 = vld [vmem:[#allocation16_spill] sm:$0xff] }
 0x4da   : > { %8714 = vmatpush3.bf16.msra.mxu1 %v9349_v12  ;;  %v9215_v12 = vunpack.i.h.bf16 %v13508_v53 }
 0x4dd   : > { %5873 = vmatmul.mubr.bf16.gmra.mrb[64].mxu0 %v5303_v26 }
 0x4de   : > { %5880 = vmatprep.mubr.bf16.mxu0 %v11791_v2  ;;  %v5319_v2 = vsel %vm3363_vm15, %v13505_v27, %v5115_v23 }
 0x4e5   : > { %5881 = vmatmul.mubr.bf16.gmra.mrb[68].mxu0 %v5307_v35 }
 0x4e6   : > { %5888 = vmatprep.mubr.bf16.mxu0 %v11815_v24  ;;  %v5323_v24 = vsel %vm3363_vm15, %v13506_v13, %v5117_v29 }
 0x4ed   : > { %5889 = vmatmul.mubr.bf16.gmra.mrb[72].mxu0 %v5311_v22 }
 0x4ee   : > { %5896 = vmatprep.mubr.bf16.mxu0 %v11874_v37  ;;  %v5327_v37 = vsel %vm3363_vm15, %v11613_v48, %v5119_v55  ;;  %v5339_v48 = vsel %vm3363_vm15, %v11747_v21, %v5125_v46 }
 0x4f5   : > { %5897 = vmatmul.mubr.bf16.gmra.mrb[76].mxu0 %v5315_v28 }
 0x4f6   : > { %5904 = vmatprep.mubr.bf16.mxu0 %v11896_v57  ;;  %v5331_v57 = vsel %vm3363_vm15, %v13507_v7, %v5121_v39  ;;  %v9351_v7 = vld [vmem:[%s13454_s7 + $0x8] sm:$0xff]  }
 0x4fd   : > { %5905 = vmatmul.mubr.bf16.gmra.mrb[80].mxu0 %v5319_v2 }
 0x4fe   : > { %5912 = vmatprep.mubr.bf16.mxu0 %v11915_v50  ;;  %v5335_v50 = vsel %vm3363_vm15, %v11694_v54, %v5123_v17  ;;  %v5347_v54 = vsel %vm3363_vm15, %v10356_v3, %v5129_v10 }
 0x505   : > { %5913 = vmatmul.mubr.bf16.gmra.mrb[84].mxu0 %v5323_v24 }
 0x506   : > { %5920 = vmatprep.mubr.bf16.mxu0 %v11922_v19  ;;  %v5350_v19 = vsel %vm3363_vm15, %v10166_v58, %v5143_v16 }
 0x50d   : > { %5921 = vmatmul.mubr.bf16.gmra.mrb[88].mxu0 %v5327_v37  ;;  %v9350_v37 = vld [vmem:[%s13454_s7 + $0x48] sm:$0xff]  }
 0x50e   : > { %5928 = vmatprep.mubr.bf16.mxu0 %v11929_v42  ;;  %v5353_v42 = vsel %vm3363_vm15, %v10166_v58, %v5145_v14  ;;  %8715 = vmatprep.subr.bf16.mxu1 %v9350_v37  ;;  %v12164_v37 = vpop.permute.xlu1 %9222 }
 0x50f   : > { %8716 = vmatpush3.bf16.msra.mxu1 %v9351_v7 }
 0x515   : > { %5929 = vmatmul.mubr.bf16.gmra.mrb[92].mxu0 %v5331_v57 }
 0x516   : > { %5936 = vmatprep.mubr.bf16.mxu0 %v11936_v63  ;;  %v5343_v63 = vsel %vm3363_vm15, %v11778_v62, %v5127_v31 }
 0x51d   : > { %5937 = vmatmul.mubr.bf16.gmra.mrb[96].mxu0 %v5335_v50 }
 0x51e   : > { %5944 = vmatprep.mubr.bf16.mxu0 %v11943_v4 }
 0x525   : > { %5945 = vmatmul.mubr.bf16.gmra.mrb[100].mxu0 %v5339_v48 }
 0x526   : > { %5952 = vmatprep.mubr.bf16.mxu0 %v5350_v19 }
 0x52d   : > { %5953 = vmatmul.mubr.bf16.gmra.mrb[104].mxu0 %v5343_v63 }
 0x52e   : > { %5960 = vmatprep.mubr.bf16.mxu0 %v5353_v42  ;;  %v9352_v42 = vld [vmem:[%s13454_s7 + $0x50] sm:$0xff]  }
 0x52f   : > { %8717 = vmatprep.subr.bf16.mxu1 %v9352_v42 }
 0x535   : > { %5961 = vmatmul.mubr.bf16.gmra.mrb[116].mxu0 %v5347_v54  ;;  %v9353_v54 = vld [vmem:[%s13454_s7 + $0x10] sm:$0xff]  }
 0x536   : > { %8943 = vmatprep.mubr.msk.bf16.mxu0 %vm3363_vm15, %v11487_v40  ;;  %8718 = vmatpush3.bf16.msra.mxu1 %v9353_v54 }
 0x53d   : > { %8944 = vmatmul.mubr.msk.bf16.vlgmr.msra.gmra.mrb[44].mxu0 %vm3363_vm15, %v11535_v45 }
 0x53e   : > { %8947 = vmatprep.mubr.msk.bf16.mxu0 %vm3363_vm15, %v11552_v51 }
 0x545   : > { %8948 = vmatmul.mubr.msk.bf16.gmra.mrb[120].mxu0 %vm3363_vm15, %v11616_v36 }
 0x546   : > { %8951 = vmatprep.mubr.msk.bf16.mxu0 %vm3363_vm15, %v11642_v59 }
 0x54d   : > { %8952 = vmatmul.mubr.msk.bf16.gmra.mrb[124].mxu0 %vm3363_vm15, %v11697_v49 }
 0x54e   : > { %8955 = vmatprep.mubr.msk.bf16.mxu0 %vm3363_vm15, %v11731_v33 }
 0x555   : > { %8956 = vmatmul.mubr.msk.bf16.gmra.mrb[128].mxu0 %vm3363_vm15, %v11783_v1 }
 0x556   : > { %8959 = vmatprep.mubr.msk.bf16.mxu0 %vm3363_vm15, %v11807_v25 }
 0x55d   : > { %8960 = vmatmul.mubr.msk.bf16.gmra.mrb[132].mxu0 %vm3363_vm15, %v11828_v5 }
 0x55e   : > { %8963 = vmatprep.mubr.msk.bf16.mxu0 %vm3363_vm15, %v11836_v52 }
 0x565   : > { %8964 = vmatmul.mubr.msk.bf16.gmra.mrb[136].mxu0 %vm3363_vm15, %v11842_v34 }
 0x566   : > { %8967 = vmatprep.mubr.msk.bf16.mxu0 %vm3363_vm15, %v11850_v20 }
 0x56d   : > { %8968 = vmatmul.mubr.msk.bf16.gmra.mrb[140].mxu0 %vm3363_vm15, %v11856_v44 }
 0x56e   : > { %8971 = vmatprep.mubr.msk.bf16.mxu0 %vm3363_vm15, %v11862_v61 }
 0x575   : > { %8972 = vmatmul.mubr.msk.bf16.gmra.mrb[144].mxu0 %vm3363_vm15, %v11878_v30 }
 0x576   : > { %8975 = vmatprep.mubr.msk.bf16.mxu0 %vm3363_vm15, %v10185_v15 }
 0x578   : > { %v5785_v40 = vpop.f32.mrb[108].mxu0 }
 0x579   : > { %v5787_v45 = vpop.f32.mrb[109].mxu0 }
 0x57a   : > { %v5788_v51 = vpop.f32.mrb[110].mxu0 }
 0x57b   : > { %v5790_v36 = vpop.f32.mrb[111].mxu0 }
 0x57d   : > { %8976 = vmatmul.mubr.msk.bf16.gmra.mrb[148].mxu0 %vm3363_vm15, %v10185_v15 }
 0x580   : > { %v5826_v59 = vpop.f32.mrb[112].mxu0 }
 0x581   : > { %v5828_v49 = vpop.f32.mrb[113].mxu0 }
 0x582   : > { %v5829_v33 = vpop.f32.mrb[114].mxu0 }
 0x583   : > { %v5831_v21 = vpop.f32.mrb[115].mxu0 }
 0x590   : > { %v12065_v62 = vpop.f32.mrb[48].mxu0 }
 0x591   : > { %v5844_v1 = vpop.f32.mrb[49].mxu0 }
 0x592   : > { %v12067_v25 = vpop.f32.mrb[50].mxu0  ;;  %v9354_v1 = vld [vmem:[%s13454_s7 + $0x58] sm:$0xff]  }
 0x593   : > { %v5847_v5 = vpop.f32.mrb[51].mxu0  ;;  %8719 = vmatprep.subr.bf16.mxu1 %v9354_v1 }
 0x598   : > { %v12071_v52 = vpop.f32.mrb[52].mxu0 }
 0x599   : > { %v5852_v34 = vpop.f32.mrb[53].mxu0 }
 0x59a   : > { %v12073_v20 = vpop.f32.mrb[54].mxu0 }
 0x59b   : > { %v5855_v44 = vpop.f32.mrb[55].mxu0 }
 0x5a0   : > { %v12075_v61 = vpop.f32.mrb[56].mxu0 }
 0x5a1   : > { %v5860_v30 = vpop.f32.mrb[57].mxu0 }
 0x5a2   : > { %v12077_v4 = vpop.f32.mrb[58].mxu0  ;;  %v9355_v30 = vld [vmem:[%s13454_s7 + $0x18] sm:$0xff]  }
 0x5a3   : > { %v5863_v32 = vpop.f32.mrb[59].mxu0  ;;  %8720 = vmatpush3.bf16.msra.mxu1 %v9355_v30 }
 0x5a8   : > { %v12079_v23 = vpop.f32.mrb[60].mxu0 }
 0x5a9   : > { %v5868_v29 = vpop.f32.mrb[61].mxu0 }
 0x5aa   : > { %v12081_v55 = vpop.f32.mrb[62].mxu0 }
 0x5ab   : > { %v5871_v39 = vpop.f32.mrb[63].mxu0 }
 0x5ac   : > { %v3977_v17 = vpop.f32.mrb[116].mxu1 }
 0x5ad   : > { %v3979_v8 = vpop.f32.mrb[117].mxu1 }
 0x5ae   : > { %v3980_v46 = vpop.f32.mrb[118].mxu1 }
 0x5af   : > { %v3982_v16 = vpop.f32.mrb[119].mxu1 }
 0x5b0   : > { %v12083_v31 = vpop.f32.mrb[64].mxu0  ;;  %v2987_v16 = vpop.permute.xlu0 %2986 }
 0x5b1   : > { %v5876_v14 = vpop.f32.mrb[65].mxu0 }
 0x5b2   : > { %v12085_v10 = vpop.f32.mrb[66].mxu0 }
 0x5b3   : > { %v5879_v47 = vpop.f32.mrb[67].mxu0 }
 0x5b8   : > { %v12087_v56 = vpop.f32.mrb[68].mxu0 }
 0x5b9   : > { %v5884_v6 = vpop.f32.mrb[69].mxu0 }
 0x5ba   : > { %v12089_v43 = vpop.f32.mrb[70].mxu0  ;;  %v9210_v6 = vunpack.i.h.bf16 %v11969_v38  ;;  %v3362_v38 = vsel %vm3322_vm14, %v10166_v58, %v2987_v16 }
 0x5bb   : > { %v5887_v60 = vpop.f32.mrb[71].mxu0 }
 0x5bc   : > { %v9356_v60 = vld [vmem:[%s13454_s7 + $0x60] sm:$0xff]  }
 0x5bd   : > { %8721 = vmatprep.subr.bf16.mxu1 %v9356_v60 }
 0x5c0   : > { %v12097_v41 = vpop.f32.mrb[72].mxu0 }
 0x5c1   : > { %v5892_v26 = vpop.f32.mrb[73].mxu0 }
 0x5c2   : > { %v12099_v9 = vpop.f32.mrb[74].mxu0  ;;  %v3317_v26 = vpop.permute.xlu0 %3316 }
 0x5c3   : > { %v5895_v35 = vpop.f32.mrb[75].mxu0 }
 0x5c8   : > { %v12101_v0 = vpop.f32.mrb[76].mxu0 }
 0x5c9   : > { %v5900_v22 = vpop.f32.mrb[77].mxu0 }
 0x5ca   : > { %v12103_v18 = vpop.f32.mrb[78].mxu0  ;;  %v3524_v22 = vsel %vm3322_vm14, %v10356_v3, %v9210_v6 }
 0x5cb   : > { %v5903_v28 = vpop.f32.mrb[79].mxu0  ;;  %v3564_v7 = vsel %vm3363_vm15, %v3524_v22, %v9215_v12 }
 0x5cc   : > { %v9357_v28 = vld [vmem:[%s13454_s7 + $0x20] sm:$0xff]   ;;  %v3623_v42 = vsel %vm3404_vm0, %v3564_v7, %v3317_v26 }
 0x5cd   : > { %8722 = vmatpush3.bf16.msra.mxu1 %v9357_v28  ;;  %3983 = vmatprep.mubr.bf16.mxu1 %v3623_v42 }
 0x5d0   : > { %v12105_v27 = vpop.f32.mrb[80].mxu0 }
 0x5d1   : > { %v5908_v2 = vpop.f32.mrb[81].mxu0 }
 0x5d2   : > { %v12107_v13 = vpop.f32.mrb[82].mxu0  ;;  %v9220_v2 = vunpack.i.h.bf16 %v11984_v11 }
 0x5d3   : > { %v5911_v24 = vpop.f32.mrb[83].mxu0 }
 0x5d8   : > { %v12115_v57 = vpop.f32.mrb[84].mxu0 }
 0x5d9   : > { %v5916_v50 = vpop.f32.mrb[85].mxu0 }
 0x5da   : > { %v12117_v19 = vpop.f32.mrb[86].mxu0 }
 0x5db   : > { %v5919_v48 = vpop.f32.mrb[87].mxu0 }
 0x5dc   : > { %v9224_v48 = vunpack.i.l.bf16 %v12164_v37 }
 0x5e0   : > { %v12122_v63 = vpop.f32.mrb[88].mxu0 }
 0x5e1   : > { %v5924_v40 = vpop.f32.mrb[89].mxu0 }
 0x5e2   : > { %v12127_v45 = vpop.f32.mrb[90].mxu0  ;;  %v3403_v40 = vsel %vm3363_vm15, %v3362_v38, %v9224_v48 }
 0x5e3   : > { %v5927_v51 = vpop.f32.mrb[91].mxu0  ;;  %v3463_v11 = vsel %vm3404_vm0, %v3403_v40, %v9220_v2 }
 0x5e4   : > { %3984 = vmatmul.mubr.bf16.gmra.mrb[120].mxu1 %v3463_v11  ;;  %v12174_v51 = vld [vmem:[%s13453_s6] ss:$0 sm:$0xff] }
 0x5e5   : > { %v9020_v60 = vadd.f32 %v12174_v51, %v12073_v20  ;;  %v9359_v20 = vld [vmem:[%s13454_s7 + $0x28] sm:$0xff]  }
 0x5e8   : > { %v12129_v36 = vpop.f32.mrb[92].mxu0 }
 0x5e9   : > { %v5932_v59 = vpop.f32.mrb[93].mxu0 }
 0x5ea   : > { %v12131_v49 = vpop.f32.mrb[94].mxu0 }
 0x5eb   : > { %v5935_v33 = vpop.f32.mrb[95].mxu0 }
 0x5f0   : > { %v12133_v21 = vpop.f32.mrb[96].mxu0 }
 0x5f1   : > { %v5940_v5 = vpop.f32.mrb[97].mxu0 }
 0x5f2   : > { %v12138_v34 = vpop.f32.mrb[98].mxu0 }
 0x5f3   : > { %v5943_v44 = vpop.f32.mrb[99].mxu0 }
 0x5f8   : > { %v12143_v32 = vpop.f32.mrb[100].mxu0 }
 0x5f9   : > { %v5948_v29 = vpop.f32.mrb[101].mxu0 }
 0x5fa   : > { %v12145_v39 = vpop.f32.mrb[102].mxu0 }
 0x5fb   : > { %v5951_v17 = vpop.f32.mrb[103].mxu0 }
 0x600   : > { %v12147_v8 = vpop.f32.mrb[104].mxu0 }
 0x601   : > { %v5956_v46 = vpop.f32.mrb[105].mxu0 }
 0x602   : > { %v12149_v14 = vpop.f32.mrb[106].mxu0  ;;  %v9019_v46 = vadd.f32 %v12174_v51, %v12071_v52  ;;  %v9358_v52 = vld [vmem:[%s13454_s7 + $0x68] sm:$0xff]  }
 0x603   : > { %v5959_v47 = vpop.f32.mrb[107].mxu0  ;;  %8723 = vmatprep.subr.bf16.mxu1 %v9358_v52 }
 0x604   : > { %v9017_v47 = vadd.f32 %v12174_v51, %v12065_v62  ;;  %8724 = vmatpush3.bf16.msra.mxu1 %v9359_v20  ;;  %v9361_v20 = vld [vmem:[%s13454_s7 + $0x30] sm:$0xff]  }
 0x608   : > { %v5962_v35 = vpop.f32.mrb[116].mxu0 }
 0x609   : > { %v5964_v24 = vpop.f32.mrb[117].mxu0  ;;  %v9018_v35 = vadd.f32 %v12174_v51, %v12067_v25 }
 0x60a   : > { %v5965_v50 = vpop.f32.mrb[118].mxu0 }
 0x60b   : > { %v5967_v54 = vpop.f32.mrb[119].mxu0 }
 0x610   : > { %v8945_v59 = vpop.f32.mrb[44].mxu0 }
 0x611   : > { %v9015_v33 = vadd.f32 %v8945_v59, %v12174_v51  ;;  %v6003_v1 = vpop.f32.mrb[45].mxu0  ;;  %v9021_v59 = vadd.f32 %v12174_v51, %v12075_v61  ;;  %v9022_v61 = vadd.f32 %v12174_v51, %v12077_v4 }
 0x612   : > { %v8946_v5 = vpop.f32.mrb[46].mxu0 }
 0x613   : > { %v9016_v44 = vadd.f32 %v8946_v5, %v12174_v51  ;;  %v6006_v30 = vpop.f32.mrb[47].mxu0  ;;  %v6148_v29 = vmax.f32 %v9015_v33, 0.0  ;;  %v9023_v33 = vadd.f32 %v12174_v51, %v12079_v23  ;;  %v9024_v23 = vadd.f32 %v12174_v51, %v12081_v55 }
 0x615   : > { %v6149_v17 = vmax.f32 %v9016_v44, 0.0 }
 0x617   : > { %v6327_v16 = vpack.c.bf16 %v6149_v17, %v6148_v29 }
 0x618   : > { %v8949_v6 = vpop.f32.mrb[120].mxu0 }
 0x619   : > { %v6389_v53 = vshrl.u32 %v6327_v16, 16  ;;  %v6028_v12 = vadd.f32 %v9019_v46, %v8949_v6  ;;  %v6019_v26 = vpop.f32.mrb[121].mxu0  ;;  %v6392_v24 = vshll.u32 %v6327_v16, 16 }
 0x61a   : > { %v6020_v22 = vadd.f32 %v9017_v47, %v6019_v26  ;;  %v8950_v28 = vpop.f32.mrb[122].mxu0 }
 0x61b   : > { %v6391_v2 = vrot.slane %v6389_v53, 7  ;;  %v6031_v38 = vadd.f32 %v9020_v60, %v8950_v28  ;;  %v6022_v62 = vpop.f32.mrb[123].mxu0  ;;  %v6152_v42 = vmax.f32 %v6028_v12, 0.0 }
 0x61c   : > { %v6023_v7 = vadd.f32 %v9018_v35, %v6022_v62  ;;  %v6150_v40 = vmax.f32 %v6020_v22, 0.0 }
 0x61d   : > { %v6394_v50 = vor.u32 %v6392_v24, %v6391_v2  ;;  %v12194_v25 = vsel %vm9580_vm2, %v6391_v2, 0  ;;  %v6153_v54 = vmax.f32 %v6031_v38, 0.0 }
 0x61e   : > { %v6151_v11 = vmax.f32 %v6023_v7, 0.0  ;;  %v6839_v17 = vrot.slane %v12194_v25, 1  ;;  %v6599_v35 = vshll.u32 %v12194_v25, 16  ;;  %v9360_v7 = vld [vmem:[%s13454_s7 + $0x70] sm:$0xff]  }
 0x61f   : > { %v6329_v1 = vpack.c.bf16 %v6153_v54, %v6152_v42  ;;  %v12202_v5 = vsel %vm9580_vm2, 0, %v6394_v50  ;;  %8725 = vmatprep.subr.bf16.mxu1 %v9360_v7 }
 0x620   : > { %v6328_v44 = vpack.c.bf16 %v6151_v11, %v6150_v40  ;;  %6916 = vrot.lane.b32.xlu1 %v12202_v5, %s9458_s28  ;;  %v8953_v30 = vpop.f32.mrb[124].mxu0  ;;  %v6838_v29 = vrot.slane %v12202_v5, 1  ;;  %v6594_v46 = vshll.u32 %v12202_v5, 16  ;;  %v6592_v55 = vshrl.u32 %v12202_v5, 16  ;;  %8726 = vmatpush3.bf16.msra.mxu1 %v9361_v20 }
 0x621   : > { %v6403_v16 = vshrl.u32 %v6329_v1, 16  ;;  %v6044_v47 = vadd.f32 %v9023_v33, %v8953_v30  ;;  %v6035_v6 = vpop.f32.mrb[125].mxu0  ;;  %v6406_v28 = vshll.u32 %v6329_v1, 16  ;;  %v9025_v40 = vadd.f32 %v12174_v51, %v12083_v31 }
 0x622   : > { %v6396_v60 = vshrl.u32 %v6328_v44, 16  ;;  %v6036_v53 = vadd.f32 %v9021_v59, %v6035_v6  ;;  %v8954_v12 = vpop.f32.mrb[126].mxu0  ;;  %v6840_v26 = vsel %vm1144_vm3, %v6838_v29, %v6839_v17  ;;  %v6596_v24 = vrot.slane %v6594_v46, 1 }
 0x623   : > { %v6405_v22 = vrot.slane %v6403_v16, 7  ;;  %v6047_v52 = vadd.f32 %v9024_v23, %v8954_v12  ;;  %v6038_v2 = vpop.f32.mrb[127].mxu0  ;;  %v6399_v4 = vshll.u32 %v6328_v44, 16  ;;  %v6156_v42 = vmax.f32 %v6044_v47, 0.0  ;;  %v9362_v23 = vld [vmem:[%s13454_s7 + $0x78] sm:$0xff]  }
 0x624   : > { %v6398_v38 = vrot.slane %v6396_v60, 7  ;;  %v6039_v62 = vadd.f32 %v9022_v61, %v6038_v2  ;;  %6964 = vrot.lane.b32.xlu1 %v6840_v26, %s9457_s25  ;;  %v6154_v59 = vmax.f32 %v6036_v53, 0.0  ;;  %v9027_v1 = vadd.f32 %v12174_v51, %v12087_v56  ;;  %v9363_v16 = vld [vmem:[%s13454_s7 + $0x38] sm:$0xff]   ;;  %8727 = vmatprep.subr.bf16.mxu1 %v9362_v23 }
 0x625   : > { %v6408_v50 = vor.u32 %v6406_v28, %v6405_v22  ;;  %v6564_v25 = vsel %vm9580_vm2, %v6405_v22, 0  ;;  %v6157_v54 = vmax.f32 %v6047_v52, 0.0  ;;  %v6597_v29 = vor.u32 %v6596_v24, %v6592_v55  ;;  %8728 = vmatpush3.bf16.msra.mxu1 %v9363_v16 }
 0x626   : > { %v6401_v11 = vor.u32 %v6399_v4, %v6398_v38  ;;  %v6155_v33 = vmax.f32 %v6039_v62, 0.0  ;;  %v6845_v61 = vrot.slane %v6564_v25, 1  ;;  %v9028_v47 = vadd.f32 %v12174_v51, %v12089_v43 }
 0x627   : > { %v12229_v44 = vpack.c.bf16 %v6157_v54, %v6156_v42  ;;  %v12233_v30 = vsel %vm9580_vm2, 0, %v6408_v50  ;;  %v6601_v53 = vrot.slane %v6599_v35, 1  ;;  %v9026_v12 = vadd.f32 %v12174_v51, %v12085_v10 }
 0x628   : > { %v12237_v17 = vsel %vm9580_vm2, 0, %v6401_v11  ;;  %v12239_v31 = vpack.c.bf16 %v6155_v33, %v6154_v59  ;;  %6885 = vrot.lane.b32.xlu1 %v6840_v26, %s9459_s15  ;;  %6999 = vrot.lane.b32.xlu0 %v12233_v30, %s9459_s15  ;;  %v8957_v56 = vpop.f32.mrb[128].mxu0  ;;  %v6844_v46 = vrot.slane %v12233_v30, 1  ;;  %v6563_v26 = vsel %vm9580_vm2, %v6398_v38, 0 }
 0x629   : > { %v6060_v6 = vadd.f32 %v9027_v1, %v8957_v56  ;;  %v6051_v60 = vpop.f32.mrb[129].mxu0  ;;  %v12261_v4 = vsel %vm791_vm4, %v6597_v29, %v6601_v53  ;;  %v6841_v43 = vrot.slane %v12237_v17, 1  ;;  %v9029_v10 = vadd.f32 %v12174_v51, %v12097_v41 }
 0x62a   : > { %v6052_v22 = vadd.f32 %v9025_v40, %v6051_v60  ;;  %v8958_v28 = vpop.f32.mrb[130].mxu0  ;;  %v12258_v52 = vsel %vm1144_vm3, %v6844_v46, %v6845_v61  ;;  %v9031_v35 = vadd.f32 %v12174_v51, %v12101_v0  ;;  %v6618_v62 = vshll.u32 %v12233_v30, 16 }
 0x62b   : > { %13510 = vst [vmem:[#allocation8_spill] sm:$0xff] %v12258_v52  ;;  %v6063_v2 = vadd.f32 %v9028_v47, %v8958_v28  ;;  %v6054_v24 = vpop.f32.mrb[131].mxu0  ;;  %v6160_v55 = vmax.f32 %v6060_v6, 0.0  ;;  %v6842_v20 = vrot.slane %v6563_v26, 1  ;;  %v6623_v50 = vshll.u32 %v6564_v25, 16 }
 0x62c   : > { %v6055_v38 = vadd.f32 %v9026_v12, %v6054_v24  ;;  %6773 = vrot.lane.b32.xlu1 %v12261_v4, %s9457_s25  ;;  %6968 = vrot.lane.b32.xlu0 %v12258_v52, %s9457_s25  ;;  %v6158_v42 = vmax.f32 %v6052_v22, 0.0  ;;  %v6616_v41 = vshrl.u32 %v12233_v30, 16  ;;  %v6620_v40 = vrot.slane %v6618_v62, 1 }
 0x62d   : > { %v6161_v7 = vmax.f32 %v6063_v2, 0.0  ;;  %v6417_v0 = vshrl.u32 %v12229_v44, 16  ;;  %v12278_v59 = vsel %vm1144_vm3, %v6841_v43, %v6842_v20  ;;  %v6606_v33 = vshll.u32 %v12237_v17, 16 }
 0x62e   : > { %v6159_v54 = vmax.f32 %v6055_v38, 0.0  ;;  %v9032_v1 = vadd.f32 %v12174_v51, %v12103_v18  ;;  %v6621_v56 = vor.u32 %v6620_v40, %v6616_v41  ;;  %v6625_v46 = vrot.slane %v6623_v50, 1 }
 0x62f   : > { %v12275_v11 = vpack.c.bf16 %v6161_v7, %v6160_v55  ;;  %v6604_v16 = vshrl.u32 %v12237_v17, 16  ;;  %v6608_v47 = vrot.slane %v6606_v33, 1  ;;  %v6611_v6 = vshll.u32 %v6563_v26, 16 }
 0x630   : > { %v12283_v29 = vpack.c.bf16 %v6159_v54, %v6158_v42  ;;  %6920 = vrot.lane.b32.xlu1 %v12233_v30, %s9458_s28  ;;  %v8961_v25 = vpop.f32.mrb[132].mxu0  ;;  %6966 = vrot.lane.b32.xlu0 %v12278_v59, %s9457_s25  ;;  %v9030_v18 = vadd.f32 %v12174_v51, %v12099_v9  ;;  %v6410_v60 = vshrl.u32 %v12239_v31, 16  ;;  %v6419_v22 = vrot.slane %v6417_v0, 7 }
 0x631   : > { %v6076_v61 = vadd.f32 %v9031_v35, %v8961_v25  ;;  %v6067_v23 = vpop.f32.mrb[133].mxu0  ;;  %v12294_v24 = vsel %vm791_vm4, %v6621_v56, %v6625_v46  ;;  %v6609_v43 = vor.u32 %v6608_v47, %v6604_v16  ;;  %v6420_v9 = vshll.u32 %v12229_v44, 16 }
 0x632   : > { %v6068_v53 = vadd.f32 %v9029_v10, %v6067_v23  ;;  %v8962_v12 = vpop.f32.mrb[134].mxu0  ;;  %v6613_v10 = vrot.slane %v6611_v6, 1  ;;  %v9035_v62 = vadd.f32 %v12174_v51, %v12115_v57  ;;  %v6412_v50 = vrot.slane %v6410_v60, 7 }
 0x633   : > { %v6079_v28 = vadd.f32 %v9032_v1, %v8962_v12  ;;  %v6070_v2 = vpop.f32.mrb[135].mxu0  ;;  %v6164_v26 = vmax.f32 %v6076_v61, 0.0  ;;  %v6422_v20 = vor.u32 %v6420_v9, %v6419_v22  ;;  %v9033_v41 = vadd.f32 %v12174_v51, %v12105_v27 }
 0x634   : > { %v6071_v35 = vadd.f32 %v9030_v18, %v6070_v2  ;;  %6997 = vrot.lane.b32.xlu1 %v12237_v17, %s9459_s15  ;;  %7043 = vrot.lane.b32.xlu0 %v12294_v24, %s9458_s28  ;;  %v6162_v55 = vmax.f32 %v6068_v53, 0.0  ;;  %v12306_v54 = vsel %vm791_vm4, %v6609_v43, %v6613_v10  ;;  %v9036_v57 = vadd.f32 %v12174_v51, %v12117_v19 }
 0x635   : > { %v6165_v38 = vmax.f32 %v6079_v28, 0.0  ;;  %v6413_v0 = vshll.u32 %v12239_v31, 16  ;;  %v9034_v25 = vadd.f32 %v12174_v51, %v12107_v13  ;;  %v12323_v16 = vsel %vm9580_vm2, 0, %v6422_v20 }
 0x636   : > { %v6163_v7 = vmax.f32 %v6071_v35, 0.0  ;;  %v9039_v13 = vadd.f32 %v12174_v51, %v12129_v36  ;;  %v6566_v6 = vsel %vm9580_vm2, %v6419_v22, 0  ;;  %v6850_v28 = vrot.slane %v12323_v16, 1 }
 0x637   : > { %v12303_v42 = vpack.c.bf16 %v6165_v38, %v6164_v26  ;;  %v6415_v46 = vor.u32 %v6413_v0, %v6412_v50  ;;  %v6642_v2 = vshll.u32 %v12323_v16, 16  ;;  %v9037_v43 = vadd.f32 %v12174_v51, %v12122_v63 }
 0x638   : > { %v12310_v40 = vpack.c.bf16 %v6163_v7, %v6162_v55  ;;  %v8965_v44 = vpop.f32.mrb[136].mxu0  ;;  %6918 = vrot.lane.b32.xlu1 %v12237_v17, %s9458_s28  ;;  %7041 = vrot.lane.b32.xlu0 %v12306_v54, %s9458_s28  ;;  %v9040_v22 = vadd.f32 %v12174_v51, %v12131_v49  ;;  %v6565_v9 = vsel %vm9580_vm2, %v6412_v50, 0  ;;  %v6851_v10 = vrot.slane %v6566_v6, 1 }
 0x639   : > { %v6092_v33 = vadd.f32 %v9035_v62, %v8965_v44  ;;  %v6083_v1 = vpop.f32.mrb[137].mxu0  ;;  %v12337_v12 = vsel %vm9580_vm2, 0, %v6415_v46  ;;  %v9038_v63 = vadd.f32 %v12174_v51, %v12127_v45  ;;  %v6848_v45 = vrot.slane %v6565_v9, 1 }
 0x63a   : > { %v6084_v27 = vadd.f32 %v9033_v41, %v6083_v1  ;;  %v8966_v56 = vpop.f32.mrb[138].mxu0  ;;  %v6847_v7 = vrot.slane %v12337_v12, 1  ;;  %v12357_v44 = vsel %vm1144_vm3, %v6850_v28, %v6851_v10  ;;  %v6630_v49 = vshll.u32 %v12337_v12, 16 }
 0x63b   : > { %v6095_v61 = vadd.f32 %v9036_v57, %v8966_v56  ;;  %v6086_v23 = vpop.f32.mrb[139].mxu0  ;;  %v6168_v19 = vmax.f32 %v6092_v33, 0.0  ;;  %13511 = vst [vmem:[#allocation7_spill] sm:$0xff] %v12357_v44  ;;  %v6644_v57 = vrot.slane %v6642_v2, 1  ;;  %v6640_v1 = vshrl.u32 %v12323_v16, 16 }
 0x63c   : > { %v6087_v47 = vadd.f32 %v9034_v25, %v6086_v23  ;;  %6889 = vrot.lane.b32.xlu1 %v12258_v52, %s9459_s15  ;;  %7003 = vrot.lane.b32.xlu0 %v12323_v16, %s9459_s15  ;;  %v6166_v18 = vmax.f32 %v6084_v27, 0.0  ;;  %v6647_v25 = vshll.u32 %v6566_v6, 16  ;;  %v9043_v27 = vadd.f32 %v12174_v51, %v12143_v32 }
 0x63d   : > { %v6169_v31 = vmax.f32 %v6095_v61, 0.0  ;;  %v6431_v56 = vshrl.u32 %v12275_v11, 16  ;;  %v9044_v6 = vadd.f32 %v12174_v51, %v12145_v39  ;;  %v6424_v39 = vshrl.u32 %v12283_v29, 16 }
 0x63e   : > { %v6167_v60 = vmax.f32 %v6087_v47, 0.0  ;;  %v12371_v47 = vsel %vm1144_vm3, %v6847_v7, %v6848_v45  ;;  %v6649_v2 = vrot.slane %v6647_v25, 1 }
 0x63f   : > { %v12333_v53 = vpack.c.bf16 %v6169_v31, %v6168_v19  ;;  %13512 = vst [vmem:[#allocation9_spill] sm:$0xff] %v12371_v47  ;;  %v6645_v19 = vor.u32 %v6644_v57, %v6640_v1  ;;  %v6632_v31 = vrot.slane %v6630_v49, 1  ;;  %v6426_v45 = vrot.slane %v6424_v39, 7 }
 0x640   : > { %v12343_v35 = vpack.c.bf16 %v6167_v60, %v6166_v18  ;;  %v8969_v36 = vpop.f32.mrb[140].mxu0  ;;  %6887 = vrot.lane.b32.xlu1 %v12278_v59, %s9459_s15  ;;  %7001 = vrot.lane.b32.xlu0 %v12337_v12, %s9459_s15  ;;  %v9045_v1 = vadd.f32 %v12174_v51, %v12147_v8 }
 0x641   : > { %v6108_v26 = vadd.f32 %v9039_v13, %v8969_v36  ;;  %v6099_v38 = vpop.f32.mrb[141].mxu0  ;;  %v9041_v13 = vadd.f32 %v12174_v51, %v12133_v21  ;;  %v6635_v36 = vshll.u32 %v6565_v9, 16  ;;  %v9042_v21 = vadd.f32 %v12174_v51, %v12138_v34 }
 0x642   : > { %v6100_v62 = vadd.f32 %v9037_v43, %v6099_v38  ;;  %v8970_v55 = vpop.f32.mrb[142].mxu0  ;;  %v6628_v43 = vshrl.u32 %v12337_v12, 16  ;;  %v6433_v38 = vrot.slane %v6431_v56, 7  ;;  %v6434_v34 = vshll.u32 %v12275_v11, 16 }
 0x643   : > { %v6111_v20 = vadd.f32 %v9040_v22, %v8970_v55  ;;  %v6102_v41 = vpop.f32.mrb[143].mxu0  ;;  %v6172_v50 = vmax.f32 %v6108_v26, 0.0  ;;  %v6427_v11 = vshll.u32 %v12283_v29, 16 }
 0x644   : > { %v6103_v0 = vadd.f32 %v9038_v63, %v6102_v41  ;;  %6777 = vrot.lane.b32.xlu1 %v12294_v24, %s9457_s25  ;;  %6972 = vrot.lane.b32.xlu0 %v12357_v44, %s9457_s25  ;;  %v6170_v46 = vmax.f32 %v6100_v62, 0.0  ;;  %v12388_v62 = vsel %vm791_vm4, %v6645_v19, %v6649_v2  ;;  %v6633_v55 = vor.u32 %v6632_v31, %v6628_v43 }
 0x645   : > { %v6173_v33 = vmax.f32 %v6111_v20, 0.0  ;;  %v6637_v41 = vrot.slane %v6635_v36, 1  ;;  %v6429_v31 = vor.u32 %v6427_v11, %v6426_v45  ;;  %v6568_v29 = vsel %vm9580_vm2, %v6433_v38, 0 }
 0x646   : > { %v6171_v61 = vmax.f32 %v6103_v0, 0.0  ;;  %v6436_v0 = vor.u32 %v6434_v34, %v6433_v38  ;;  %v6857_v36 = vrot.slane %v6568_v29, 1  ;;  %v6448_v11 = vshll.u32 %v12303_v42, 16 }
 0x647   : > { %v12368_v23 = vpack.c.bf16 %v6173_v33, %v6172_v50  ;;  %v12398_v33 = vsel %vm791_vm4, %v6633_v55, %v6637_v41  ;;  %v6671_v55 = vshll.u32 %v6568_v29, 16 }
 0x648   : > { %v12377_v18 = vpack.c.bf16 %v6171_v61, %v6170_v46  ;;  %v8973_v32 = vpop.f32.mrb[144].mxu0  ;;  %6775 = vrot.lane.b32.xlu1 %v12306_v54, %s9457_s25  ;;  %6970 = vrot.lane.b32.xlu0 %v12371_v47, %s9457_s25  ;;  %v9046_v46 = vadd.f32 %v12174_v51, %v12149_v14  ;;  %v12413_v8 = vsel %vm9580_vm2, 0, %v6436_v0  ;;  %v12424_v51 = vld [vmem:[%s13454_s7 + $0x80] sm:$0xff]  }
 0x649   : > { %v6124_v60 = vadd.f32 %v9043_v27, %v8973_v32  ;;  %v6115_v28 = vpop.f32.mrb[145].mxu0  ;;  %v6666_v2 = vshll.u32 %v12413_v8, 16  ;;  %8979 = vmatprep.subr.bf16.mxu1 %v12424_v51  ;;  %v6673_v41 = vrot.slane %v6671_v55, 1 }
 0x64a   : > { %v6116_v22 = vadd.f32 %v9041_v13, %v6115_v28  ;;  %v8974_v26 = vpop.f32.mrb[146].mxu0  ;;  %v6856_v28 = vrot.slane %v12413_v8, 1 }
 0x64b   : > { %v6127_v10 = vadd.f32 %v9044_v6, %v8974_v26  ;;  %v6118_v63 = vpop.f32.mrb[147].mxu0  ;;  %v6176_v9 = vmax.f32 %v6124_v60, 0.0  ;;  %v12428_v60 = vsel %vm9580_vm2, 0, %v6429_v31  ;;  %v6668_v26 = vrot.slane %v6666_v2, 1 }
 0x64c   : > { %v6119_v7 = vadd.f32 %v9042_v21, %v6118_v63  ;;  %6924 = vrot.lane.b32.xlu1 %v12323_v16, %s9458_s28  ;;  %7047 = vrot.lane.b32.xlu0 %v12388_v62, %s9458_s28  ;;  %v6174_v57 = vmax.f32 %v6116_v22, 0.0  ;;  %v6567_v21 = vsel %vm9580_vm2, %v6426_v45, 0  ;;  %v12442_v39 = vsel %vm1144_vm3, %v6856_v28, %v6857_v36 }
 0x64d   : > { %v6177_v20 = vmax.f32 %v6127_v10, 0.0  ;;  %13513 = vst [vmem:[#allocation10_spill] sm:$0xff] %v12442_v39  ;;  %v6853_v22 = vrot.slane %v12428_v60, 1  ;;  %v6654_v38 = vshll.u32 %v12428_v60, 16  ;;  %v6854_v10 = vrot.slane %v6567_v21, 1 }
 0x64e   : > { %v6175_v49 = vmax.f32 %v6119_v7, 0.0  ;;  %v6664_v63 = vshrl.u32 %v12413_v8, 16  ;;  %v6445_v7 = vshrl.u32 %v12303_v42, 16  ;;  %v6438_v45 = vshrl.u32 %v12310_v40, 16 }
 0x64f   : > { %v12395_v50 = vpack.c.bf16 %v6177_v20, %v6176_v9  ;;  %v12453_v34 = vsel %vm1144_vm3, %v6853_v22, %v6854_v10  ;;  %v6656_v20 = vrot.slane %v6654_v38, 1  ;;  %v6441_v31 = vshll.u32 %v12310_v40, 16 }
 0x650   : > { %v12402_v25 = vpack.c.bf16 %v6175_v49, %v6174_v57  ;;  %v8977_v27 = vpop.f32.mrb[148].mxu0  ;;  %6922 = vrot.lane.b32.xlu1 %v12337_v12, %s9458_s28  ;;  %7045 = vrot.lane.b32.xlu0 %v12398_v33, %s9458_s28  ;;  %13514 = vst [vmem:[#allocation11_spill] sm:$0xff] %v12453_v34  ;;  %v6669_v9 = vor.u32 %v6668_v26, %v6664_v63  ;;  %v6652_v57 = vshrl.u32 %v12428_v60, 16  ;;  %v6659_v49 = vshll.u32 %v6567_v21, 16 }
 0x651   : > { %v6131_v56 = vpop.f32.mrb[149].mxu0  ;;  %v6447_v0 = vrot.slane %v6445_v7, 7  ;;  %v6459_v63 = vshrl.u32 %v12333_v53, 16 }
 0x652   : > { %v6132_v61 = vadd.f32 %v9045_v1, %v6131_v56  ;;  %v8978_v19 = vpop.f32.mrb[150].mxu0  ;;  %v12462_v1 = vsel %vm791_vm4, %v6669_v9, %v6673_v41  ;;  %v6657_v27 = vor.u32 %v6656_v20, %v6652_v57  ;;  %v6661_v56 = vrot.slane %v6659_v49, 1 }
 0x653   : > { %v6134_v13 = vpop.f32.mrb[151].mxu0  ;;  %v6570_v42 = vsel %vm9580_vm2, %v6447_v0, 0  ;;  %v6461_v49 = vrot.slane %v6459_v63, 7 }
 0x654   : > { %v6135_v6 = vadd.f32 %v9046_v46, %v6134_v13  ;;  %6893 = vrot.lane.b32.xlu1 %v12357_v44, %s9459_s15  ;;  %7007 = vrot.lane.b32.xlu0 %v12413_v8, %s9459_s15  ;;  %v6178_v32 = vmax.f32 %v6132_v61, 0.0  ;;  %v6450_v46 = vor.u32 %v6448_v11, %v6447_v0  ;;  %v6440_v61 = vrot.slane %v6438_v45, 7 }
 0x655   : > { %v12470_v19 = vsel %vm791_vm4, %v6657_v27, %v6661_v56  ;;  %v6695_v10 = vshll.u32 %v6570_v42, 16  ;;  %v6452_v0 = vshrl.u32 %v12343_v35, 16  ;;  %v6462_v11 = vshll.u32 %v12333_v53, 16 }
 0x656   : > { %v6179_v14 = vmax.f32 %v6135_v6, 0.0  ;;  %v6443_v13 = vor.u32 %v6441_v31, %v6440_v61  ;;  %v12479_v6 = vsel %vm9580_vm2, 0, %v6450_v46  ;;  %v6569_v28 = vsel %vm9580_vm2, %v6440_v61, 0 }
 0x657   : > { %v6862_v40 = vrot.slane %v12479_v6, 1  ;;  %v6860_v26 = vrot.slane %v6569_v28, 1  ;;  %v6688_v38 = vshrl.u32 %v12479_v6, 16  ;;  %v6697_v20 = vrot.slane %v6695_v10, 1 }
 0x658   : > { %v12432_v43 = vpack.c.bf16 %v6179_v14, %v6178_v32  ;;  %6891 = vrot.lane.b32.xlu1 %v12371_v47, %s9459_s15  ;;  %7005 = vrot.lane.b32.xlu0 %v12428_v60, %s9459_s15  ;;  %v12489_v29 = vsel %vm9580_vm2, 0, %v6443_v13  ;;  %v6690_v32 = vshll.u32 %v12479_v6, 16  ;;  %v6863_v14 = vrot.slane %v6570_v42, 1 }
 0x659   : > { %v6859_v36 = vrot.slane %v12489_v29, 1  ;;  %v6678_v22 = vshll.u32 %v12489_v29, 16  ;;  %v6676_v41 = vshrl.u32 %v12489_v29, 16  ;;  %v6683_v57 = vshll.u32 %v6569_v28, 16 }
 0x65a   : > { %v12500_v2 = vsel %vm1144_vm3, %v6862_v40, %v6863_v14  ;;  %v6692_v21 = vrot.slane %v6690_v32, 1  ;;  %v6464_v46 = vor.u32 %v6462_v11, %v6461_v49  ;;  %v6454_v61 = vrot.slane %v6452_v0, 7 }
 0x65b   : > { %13515 = vst [vmem:[#allocation12_spill] sm:$0xff] %v12500_v2  ;;  %v12511_v55 = vsel %vm1144_vm3, %v6859_v36, %v6860_v26  ;;  %v6680_v9 = vrot.slane %v6678_v22, 1  ;;  %v6685_v56 = vrot.slane %v6683_v57, 1  ;;  %v6455_v13 = vshll.u32 %v12343_v35, 16 }
 0x65c   : > { %6781 = vrot.lane.b32.xlu1 %v12388_v62, %s9457_s25  ;;  %6976 = vrot.lane.b32.xlu0 %v12442_v39, %s9457_s25  ;;  %13516 = vst [vmem:[#allocation13_spill] sm:$0xff] %v12511_v55  ;;  %v6693_v7 = vor.u32 %v6692_v21, %v6688_v38  ;;  %v12537_v40 = vsel %vm9580_vm2, 0, %v6464_v46  ;;  %v6572_v53 = vsel %vm9580_vm2, %v6461_v49, 0  ;;  %v6571_v36 = vsel %vm9580_vm2, %v6454_v61, 0 }
 0x65d   : > { %v6681_v27 = vor.u32 %v6680_v9, %v6676_v41  ;;  %v6457_v42 = vor.u32 %v6455_v13, %v6454_v61  ;;  %v6868_v35 = vrot.slane %v12537_v40, 1  ;;  %v6714_v14 = vshll.u32 %v12537_v40, 16 }
 0x65e   : > { %v12520_v45 = vsel %vm791_vm4, %v6693_v7, %v6697_v20  ;;  %v6869_v28 = vrot.slane %v6572_v53, 1  ;;  %v6866_v10 = vrot.slane %v6571_v36, 1  ;;  %v6712_v63 = vshrl.u32 %v12537_v40, 16 }
 0x65f   : > { %v12528_v31 = vsel %vm791_vm4, %v6681_v27, %v6685_v56  ;;  %v12547_v32 = vsel %vm9580_vm2, 0, %v6457_v42  ;;  %v6716_v26 = vrot.slane %v6714_v14, 1  ;;  %v6719_v7 = vshll.u32 %v6572_v53, 16 }
 0x660   : > { %6779 = vrot.lane.b32.xlu1 %v12398_v33, %s9457_s25  ;;  %6974 = vrot.lane.b32.xlu0 %v12453_v34, %s9457_s25  ;;  %v12558_v21 = vsel %vm1144_vm3, %v6868_v35, %v6869_v28  ;;  %v6865_v22 = vrot.slane %v12547_v32, 1  ;;  %v6702_v38 = vshll.u32 %v12547_v32, 16  ;;  %v6473_v9 = vshrl.u32 %v12368_v23, 16  ;;  %v6772_v35 = vpop.permute.xlu0 %6771 }
 0x661   : > { %13517 = vst [vmem:[#allocation14_spill] sm:$0xff] %v12558_v21  ;;  %v6717_v41 = vor.u32 %v6716_v26, %v6712_v63  ;;  %v6721_v49 = vrot.slane %v6719_v7, 1  ;;  %v6700_v0 = vshrl.u32 %v12547_v32, 16  ;;  %v6707_v27 = vshll.u32 %v6571_v36, 16 }
 0x662   : > { %v12569_v20 = vsel %vm1144_vm3, %v6865_v22, %v6866_v10  ;;  %v6704_v57 = vrot.slane %v6702_v38, 1  ;;  %v6475_v56 = vrot.slane %v6473_v9, 7  ;;  %v6466_v46 = vshrl.u32 %v12377_v18, 16 }
 0x663   : > { %13518 = vst [vmem:[#allocation15_spill] sm:$0xff] %v12569_v20  ;;  %v12580_v61 = vsel %vm791_vm4, %v6717_v41, %v6721_v49  ;;  %v6476_v42 = vshll.u32 %v12368_v23, 16  ;;  %v6709_v53 = vrot.slane %v6707_v27, 1  ;;  %v6469_v26 = vshll.u32 %v12377_v18, 16 }
 0x664   : > { %6928 = vrot.lane.b32.xlu1 %v12413_v8, %s9458_s28  ;;  %7051 = vrot.lane.b32.xlu0 %v12462_v1, %s9458_s28  ;;  %v6705_v13 = vor.u32 %v6704_v57, %v6700_v0  ;;  %v6468_v36 = vrot.slane %v6466_v46, 7  ;;  %v6574_v7 = vsel %vm9580_vm2, %v6475_v56, 0 }
 0x665   : > { %v6478_v28 = vor.u32 %v6476_v42, %v6475_v56  ;;  %v6875_v0 = vrot.slane %v6574_v7, 1  ;;  %v6743_v15 = vshll.u32 %v6574_v7, 16 }
 0x666   : > { %v12588_v22 = vsel %vm791_vm4, %v6705_v13, %v6709_v53  ;;  %v6471_v23 = vor.u32 %v6469_v26, %v6468_v36  ;;  %v6573_v27 = vsel %vm9580_vm2, %v6468_v36, 0  ;;  %v6487_v26 = vshrl.u32 %v12395_v50, 16 }
 0x667   : > { %v12599_v63 = vsel %vm9580_vm2, 0, %v6478_v28  ;;  %v6872_v36 = vrot.slane %v6573_v27, 1  ;;  %v6745_v7 = vrot.slane %v6743_v15, 1  ;;  %v6731_v44 = vshll.u32 %v6573_v27, 16 }
 0x668   : > { %6926 = vrot.lane.b32.xlu1 %v12428_v60, %s9458_s28  ;;  %7049 = vrot.lane.b32.xlu0 %v12470_v19, %s9458_s28  ;;  %v12613_v41 = vsel %vm9580_vm2, 0, %v6471_v23  ;;  %v6874_v57 = vrot.slane %v12599_v63, 1  ;;  %v6738_v49 = vshll.u32 %v12599_v63, 16  ;;  %v6736_v23 = vshrl.u32 %v12599_v63, 16 }
 0x669   : > { %v6871_v42 = vrot.slane %v12613_v41, 1  ;;  %v6726_v28 = vshll.u32 %v12613_v41, 16 }
 0x66a   : > { %v12626_v13 = vsel %vm1144_vm3, %v6874_v57, %v6875_v0  ;;  %v6740_v53 = vrot.slane %v6738_v49, 1  ;;  %v9225_v57 = vunpack.i.h.bf16 %v12164_v37  ;;  %v7078_v49 = vsel %vm3322_vm14, %v10166_v58, %v6772_v35 }
 0x66b   : > { %v6724_v35 = vshrl.u32 %v12613_v41, 16 }
 0x66c   : > { %6897 = vrot.lane.b32.xlu1 %v12442_v39, %s9459_s15  ;;  %7011 = vrot.lane.b32.xlu0 %v12479_v6, %s9459_s15  ;;  %v6489_v39 = vrot.slane %v6487_v26, 7 }
 0x670   : > { %6895 = vrot.lane.b32.xlu1 %v12453_v34, %s9459_s15  ;;  %7009 = vrot.lane.b32.xlu0 %v12489_v29, %s9459_s15  ;;  %v6480_v34 = vshrl.u32 %v12402_v25, 16 }
 0x672   : > { %v6482_v52 = vrot.slane %v6480_v34, 7 }
 0x674   : > { %6785 = vrot.lane.b32.xlu1 %v12462_v1, %s9457_s25  ;;  %6980 = vrot.lane.b32.xlu0 %v12500_v2, %s9457_s25 }
 0x678   : > { %6783 = vrot.lane.b32.xlu1 %v12470_v19, %s9457_s25  ;;  %6978 = vrot.lane.b32.xlu0 %v12511_v55, %s9457_s25 }
 0x67c   : > { %6932 = vrot.lane.b32.xlu1 %v12479_v6, %s9458_s28  ;;  %7055 = vrot.lane.b32.xlu0 %v12520_v45, %s9458_s28 }
 0x680   : > { %6930 = vrot.lane.b32.xlu1 %v12489_v29, %s9458_s28  ;;  %7053 = vrot.lane.b32.xlu0 %v12528_v31, %s9458_s28 }
 0x684   : > { %6901 = vrot.lane.b32.xlu1 %v12500_v2, %s9459_s15  ;;  %7015 = vrot.lane.b32.xlu0 %v12537_v40, %s9459_s15  ;;  %v6741_v2 = vor.u32 %v6740_v53, %v6736_v23  ;;  %v7110_v53 = vsel %vm3363_vm15, %v7078_v49, %v9225_v57 }
 0x686   : > { %v12656_v47 = vsel %vm791_vm4, %v6741_v2, %v6745_v7  ;;  %v9365_v2 = vld [vmem:[%s13454_s7 + $0x88] sm:$0xff]   ;;  %v6575_v7 = vsel %vm9580_vm2, %v6482_v52, 0 }
 0x688   : > { %6899 = vrot.lane.b32.xlu1 %v12511_v55, %s9459_s15  ;;  %7013 = vrot.lane.b32.xlu0 %v12547_v32, %s9459_s15  ;;  %v6728_v55 = vrot.slane %v6726_v28, 1 }
 0x68a   : > { %v6729_v15 = vor.u32 %v6728_v55, %v6724_v35  ;;  %v6483_v55 = vshll.u32 %v12402_v25, 16 }
 0x68c   : > { %6789 = vrot.lane.b32.xlu1 %v12520_v45, %s9457_s25  ;;  %6984 = vrot.lane.b32.xlu0 %v12558_v21, %s9457_s25 }
 0x690   : > { %6787 = vrot.lane.b32.xlu1 %v12528_v31, %s9457_s25  ;;  %6982 = vrot.lane.b32.xlu0 %v12569_v20, %s9457_s25 }
 0x692   : > { %v12576_v11 = vpop.permute.xlu1 %6916 }
 0x694   : > { %6936 = vrot.lane.b32.xlu1 %v12537_v40, %s9458_s28  ;;  %7059 = vrot.lane.b32.xlu0 %v12580_v61, %s9458_s28 }
 0x696   : > { %v6965_v14 = vpop.permute.xlu1 %6964 }
 0x697   : > { %v7191_v37 = vsel %vm3322_vm14, %v12261_v4, %v6965_v14 }
 0x698   : > { %6934 = vrot.lane.b32.xlu1 %v12547_v32, %s9458_s28  ;;  %7057 = vrot.lane.b32.xlu0 %v12588_v22, %s9458_s28 }
 0x69a   : > { %v7000_v38 = vpop.permute.xlu0 %6999  ;;  %v12595_v10 = vpop.permute.xlu1 %6885 }
 0x69c   : > { %6905 = vrot.lane.b32.xlu1 %v12558_v21, %s9459_s15  ;;  %7019 = vrot.lane.b32.xlu0 %v12599_v63, %s9459_s15 }
 0x69e   : > { %v12607_v9 = vpop.permute.xlu0 %6968  ;;  %v12609_v18 = vpop.permute.xlu1 %6773 }
 0x6a0   : > { %6903 = vrot.lane.b32.xlu1 %v12569_v20, %s9459_s15  ;;  %7017 = vrot.lane.b32.xlu0 %v12613_v41, %s9459_s15  ;;  %v12640_v20 = vsel %vm1144_vm3, %v6871_v42, %v6872_v36  ;;  %v6490_v42 = vshll.u32 %v12395_v50, 16 }
 0x6a2   : > { %v6967_v56 = vpop.permute.xlu0 %6966  ;;  %v12623_v46 = vpop.permute.xlu1 %6920  ;;  %v6492_v14 = vor.u32 %v6490_v42, %v6489_v39 }
 0x6a3   : > { %v7194_v28 = vsel %vm3322_vm14, %v12306_v54, %v6967_v56  ;;  %v7142_v54 = vsel %vm3404_vm0, %v7110_v53, %v12576_v11 }
 0x6a4   : > { %6793 = vrot.lane.b32.xlu1 %v12580_v61, %s9457_s25  ;;  %6988 = vrot.lane.b32.xlu0 %v12626_v13, %s9457_s25  ;;  %v7240_v50 = vsel %vm3363_vm15, %v7194_v28, %v7000_v38  ;;  %v12685_v25 = vsel %vm9580_vm2, 0, %v6492_v14  ;;  %v7080_v38 = vsel %vm3322_vm14, %v12202_v5, %v12609_v18  ;;  %v6576_v18 = vsel %vm9580_vm2, %v6489_v39, 0 }
 0x6a5   : > { %v7112_v49 = vsel %vm3363_vm15, %v7080_v38, %v12595_v10  ;;  %v6878_v39 = vrot.slane %v6575_v7, 1 }
 0x6a6   : > { %v7044_v0 = vpop.permute.xlu0 %7043  ;;  %v6998_v21 = vpop.permute.xlu1 %6997 }
 0x6a7   : > { %v7238_v26 = vsel %vm3363_vm15, %v7191_v37, %v6998_v21  ;;  %v6733_v21 = vrot.slane %v6731_v44, 1  ;;  %v7273_v56 = vsel %vm3404_vm0, %v7240_v50, %v7044_v0  ;;  %v6485_v44 = vor.u32 %v6483_v55, %v6482_v52 }
 0x6a8   : > { %6791 = vrot.lane.b32.xlu1 %v12588_v22, %s9457_s25  ;;  %6986 = vrot.lane.b32.xlu0 %v12640_v20, %s9457_s25  ;;  %v6760_v52 = vshrl.u32 %v12685_v25, 16  ;;  %v6755_v55 = vshll.u32 %v6575_v7, 16 }
 0x6a9   : > { %v12676_v11 = vsel %vm791_vm4, %v6729_v15, %v6733_v21  ;;  %v12699_v37 = vsel %vm9580_vm2, 0, %v6485_v44 }
 0x6aa   : > { %v7042_v36 = vpop.permute.xlu0 %7041  ;;  %v6919_v23 = vpop.permute.xlu1 %6918  ;;  %v6877_v53 = vrot.slane %v12699_v37, 1  ;;  %v6750_v10 = vshll.u32 %v12699_v37, 16  ;;  %v6757_v7 = vrot.slane %v6755_v55, 1 }
 0x6ab   : > { %v7270_v4 = vsel %vm3404_vm0, %v7238_v26, %v7042_v36  ;;  %v7145_v5 = vsel %vm3404_vm0, %v7112_v49, %v6919_v23  ;;  %v6494_v26 = vshrl.u32 %v12432_v43, 16  ;;  %v6767_v36 = vshll.u32 %v6576_v18, 16 }
 0x6ac   : > { %6940 = vrot.lane.b32.xlu1 %v12599_v63, %s9458_s28  ;;  %7063 = vrot.lane.b32.xlu0 %v12656_v47, %s9458_s28  ;;  %v12717_v15 = vsel %vm1144_vm3, %v6877_v53, %v6878_v39 }
 0x6ad   : > { %7511 = vmatprep.mubr.bf16.mxu1 %v7270_v4  ;;  %v6496_v50 = vrot.slane %v6494_v26, 7  ;;  %v6769_v21 = vrot.slane %v6767_v36, 1 }
 0x6ae   : > { %7512 = vmatmul.mubr.bf16.vlgmr.msra.gmra.mrb[124].mxu1 %v7142_v54  ;;  %v12670_v34 = vpop.permute.xlu0 %7003  ;;  %v12672_v27 = vpop.permute.xlu1 %6889  ;;  %v6752_v54 = vrot.slane %v6750_v10, 1 }
 0x6af   : > { %7519 = vmatprep.mubr.bf16.mxu1 %v7273_v56  ;;  %8980 = vmatpush3.bf16.msra.mxu1 %v12424_v51  ;;  %v6762_v51 = vshll.u32 %v12685_v25, 16  ;;  %v6497_v56 = vshll.u32 %v12432_v43, 16  ;;  %v7197_v43 = vsel %vm3322_vm14, %v12294_v24, %v12607_v9 }
 0x6b0   : > { %6938 = vrot.lane.b32.xlu1 %v12613_v41, %s9458_s28  ;;  %7061 = vrot.lane.b32.xlu0 %v12676_v11, %s9458_s28 }
 0x6b1   : > { %8981 = vmatprep.subr.bf16.mxu1 %v9365_v2  ;;  %v6764_v28 = vrot.slane %v6762_v51, 1  ;;  %v6499_v53 = vor.u32 %v6497_v56, %v6496_v50 }
 0x6b2   : > { %v7002_v57 = vpop.permute.xlu0 %7001  ;;  %v6888_v0 = vpop.permute.xlu1 %6887 }
 0x6b3   : > { %8982 = vmatpush3.bf16.msra.mxu1 %v9365_v2  ;;  %v6765_v14 = vor.u32 %v6764_v28, %v6760_v52  ;;  %v6748_v2 = vshrl.u32 %v12699_v37, 16  ;;  %v7242_v28 = vsel %vm3363_vm15, %v7197_v43, %v7002_v57  ;;  %v6559_v24 = vsel %vm9580_vm2, 0, %v6499_v53 }
 0x6b4   : > { %6909 = vrot.lane.b32.xlu1 %v12626_v13, %s9459_s15  ;;  %7023 = vrot.lane.b32.xlu0 %v12685_v25, %s9459_s15  ;;  %v6881_v57 = vrot.slane %v6576_v18, 1  ;;  %v6961_v55 = vrot.slane %v6559_v24, 1  ;;  %v6949_v53 = vshrl.u32 %v6559_v24, 16 }
 0x6b5   : > { %v12730_v49 = vsel %vm791_vm4, %v6765_v14, %v6769_v21  ;;  %v6951_v21 = vshll.u32 %v6559_v24, 16 }
 0x6b6   : > { %7520 = vmatmul.mubr.bf16.gmra.mrb[128].mxu1 %v7145_v5  ;;  %v12706_v35 = vpop.permute.xlu0 %6972  ;;  %v6778_v42 = vpop.permute.xlu1 %6777  ;;  %v6753_v5 = vor.u32 %v6752_v54, %v6748_v2 }
 0x6b7   : > { %v6953_v56 = vrot.slane %v6951_v21, 1 }
 0x6b8   : > { %6907 = vrot.lane.b32.xlu1 %v12640_v20, %s9459_s15  ;;  %7021 = vrot.lane.b32.xlu0 %v12699_v37, %s9459_s15  ;;  %v12744_v52 = vsel %vm791_vm4, %v6753_v5, %v6757_v7 }
 0x6b9   : > { %v6954_v43 = vor.u32 %v6953_v56, %v6949_v53 }
 0x6ba   : > { %v6971_v23 = vpop.permute.xlu0 %6970  ;;  %v6776_v4 = vpop.permute.xlu1 %6775 }
 0x6bb   : > { %v7082_v51 = vsel %vm3322_vm14, %v12237_v17, %v6776_v4  ;;  %v7200_v17 = vsel %vm3322_vm14, %v12398_v33, %v6971_v23  ;;  %v6880_v4 = vrot.slane %v12685_v25, 1 }
 0x6bc   : > { %6797 = vrot.lane.b32.xlu1 %v12656_v47, %s9457_s25  ;;  %6990 = vrot.lane.b32.xlu0 %v12717_v15, %s9457_s25  ;;  %v7114_v39 = vsel %vm3363_vm15, %v7082_v51, %v6888_v0  ;;  %v7244_v9 = vsel %vm3363_vm15, %v7200_v17, %v12670_v34  ;;  %v6577_v34 = vsel %vm9580_vm2, %v6496_v50, 0  ;;  %vm8079_vm2 = vcmask 1042434  }
 0x6bd   : > { %v7148_v33 = vsel %vm3404_vm0, %v7114_v39, %v12623_v46  ;;  %v12760_v54 = vsel %vm1144_vm3, %v6880_v4, %v6881_v57  ;;  %v7084_v46 = vsel %vm3322_vm14, %v12233_v30, %v6778_v42  ;;  %v6962_v5 = vrot.slane %v6577_v34, 1 }
 0x6be   : > { %v7048_v44 = vpop.permute.xlu0 %7047  ;;  %v12725_v38 = vpop.permute.xlu1 %6924  ;;  %v6956_v30 = vshll.u32 %v6577_v34, 16 }
 0x6bf   : > { %v7279_v14 = vsel %vm3404_vm0, %v7244_v9, %v7048_v44  ;;  %v7116_v44 = vsel %vm3363_vm15, %v7084_v46, %v12672_v27  ;;  %v12777_v50 = vsel %vm1144_vm3, %v6961_v55, %v6962_v5  ;;  %v3985_v34 = vpop.f32.mrb[120].mxu1  ;;  %vm8077_vm3 = vcmask 1041409  }
 0x6c0   : > { %6795 = vrot.lane.b32.xlu1 %v12676_v11, %s9457_s25  ;;  %7067 = vrot.lane.b32.xlu0 %v12730_v49, %s9458_s28  ;;  %v6958_v7 = vrot.slane %v6956_v30, 1 }
 0x6c2   : > { %v7046_v10 = vpop.permute.xlu0 %7045  ;;  %v6923_v26 = vpop.permute.xlu1 %6922  ;;  %v12784_v17 = vsel %vm791_vm4, %v6954_v43, %v6958_v7  ;;  %vm8081_vm4 = vcmask 1043459  }
 0x6c3   : > { %v7276_v36 = vsel %vm3404_vm0, %v7242_v28, %v7046_v10  ;;  %v7151_v51 = vsel %vm3404_vm0, %v7116_v44, %v6923_v26 }
 0x6c4   : > { %6942 = vrot.lane.b32.xlu1 %v12699_v37, %s9458_s28  ;;  %7065 = vrot.lane.b32.xlu0 %v12744_v52, %s9458_s28 }
 0x6c5   : > { %7527 = vmatprep.mubr.bf16.mxu1 %v7276_v36  ;;  %v7203_v36 = vsel %vm3322_vm14, %v12388_v62, %v12706_v35 }
 0x6c6   : > { %7528 = vmatmul.mubr.bf16.gmra.mrb[132].mxu1 %v7148_v33  ;;  %v7008_v0 = vpop.permute.xlu0 %7007  ;;  %v6894_v23 = vpop.permute.xlu1 %6893 }
 0x6c7   : > { %7535 = vmatprep.mubr.bf16.mxu1 %v7279_v14 }
 0x6c8   : > { %6911 = vrot.lane.b32.xlu1 %v12717_v15, %s9459_s15  ;;  %6992 = vrot.lane.b32.xlu0 %v12760_v54, %s9457_s25 }
 0x6ca   : > { %v7006_v18 = vpop.permute.xlu0 %7005  ;;  %v6892_v2 = vpop.permute.xlu1 %6891 }
 0x6cb   : > { %v7246_v4 = vsel %vm3363_vm15, %v7203_v36, %v7006_v18 }
 0x6cc   : > { %6944 = vrot.lane.b32.xlu1 %v12685_v25, %s9458_s28  ;;  %7025 = vrot.lane.b32.xlu0 %v6559_v24, %s9459_s15 }
 0x6ce   : > { %7536 = vmatmul.mubr.bf16.gmra.mrb[136].mxu1 %v7151_v51  ;;  %v6977_v48 = vpop.permute.xlu0 %6976  ;;  %v6782_v42 = vpop.permute.xlu1 %6781 }
 0x6cf   : > { %v7088_v46 = vsel %vm3322_vm14, %v12323_v16, %v6782_v42  ;;  %v7209_v42 = vsel %vm3322_vm14, %v12462_v1, %v6977_v48 }
 0x6d0   : > { %6799 = vrot.lane.b32.xlu1 %v12744_v52, %s9457_s25  ;;  %6994 = vrot.lane.b32.xlu0 %v12777_v50, %s9457_s25 }
 0x6d2   : > { %v6975_v27 = vpop.permute.xlu0 %6974  ;;  %v6780_v28 = vpop.permute.xlu1 %6779 }
 0x6d3   : > { %v7086_v39 = vsel %vm3322_vm14, %v12337_v12, %v6780_v28  ;;  %v7206_v33 = vsel %vm3322_vm14, %v12470_v19, %v6975_v27 }
 0x6d4   : > { %7069 = vrot.lane.b32.xlu0 %v12784_v17, %s9458_s28  ;;  %6801 = vrot.lane.b32.xlu1 %v12730_v49, %s9457_s25  ;;  %v7118_v14 = vsel %vm3363_vm15, %v7086_v39, %v6892_v2  ;;  %v7248_v62 = vsel %vm3363_vm15, %v7206_v33, %v7008_v0  ;;  %v3987_v2 = vpop.f32.mrb[121].mxu1 }
 0x6d5   : > { %v3988_v55 = vpop.f32.mrb[122].mxu1 }
 0x6d6   : > { %v7052_v10 = vpop.permute.xlu0 %7051  ;;  %v6929_v26 = vpop.permute.xlu1 %6928 }
 0x6d7   : > { %v7285_v21 = vsel %vm3404_vm0, %v7248_v62, %v7052_v10  ;;  %v3990_v56 = vpop.f32.mrb[123].mxu1 }
 0x6d8   : > { %7027 = vrot.lane.b32.xlu0 %v10166_v58, %s9459_s15  ;;  %6913 = vrot.lane.b32.xlu1 %v12760_v54, %s9459_s15  ;;  %v7154_v58 = vsel %vm3404_vm0, %v7118_v14, %v12725_v38  ;;  %s337_s15 = sand.u32 1, %s9430_s10  }
 0x6d9   : > { %s8457_s16 = sshll.u32 %s337_s15, 5  ;;  %s13400_s12 = scalar_lea.sflag [#allocation3], %s337_s15 }
 0x6da   : > { %v7050_v9 = vpop.permute.xlu0 %7049  ;;  %v6927_v57 = vpop.permute.xlu1 %6926  ;;  %s13283_s29 = scalar_lea.vmem [#allocation2], %s8457_s16 }
 0x6db   : > { %v7282_v12 = vsel %vm3404_vm0, %v7246_v4, %v7050_v9  ;;  %s8377_s18 = sshll.u32 %s13283_s29, 4  ;;  %s13393_s18 = int_to_ptr.vmem [resolvable:$true] %s8377_s18 }
 0x6dc   : > { %7071 = vrot.lane.b32.xlu0 %v10356_v3, %s9458_s28  ;;  %6946 = vrot.lane.b32.xlu1 %v6559_v24, %s9458_s28  ;;  %v7120_v24 = vsel %vm3363_vm15, %v7088_v46, %v6894_v23  ;;  %s9368_s25 = scalar_lea.vmem %s13393_s18, 512  ;;  %s9461_s28 = smov [#allocation2]  }
 0x6dd   : > { %7543 = vmatprep.mubr.bf16.mxu1 %v7282_v12  ;;  %v7157_v38 = vsel %vm3404_vm0, %v7120_v24, %v6927_v57  ;;  %p9369_p12 = scmp.ne.s32.totalorder %s13393_s18, %s9368_s25  ;;  %s9372_s16 = sshll.u32 %s9461_s28, 4  ;;  %s9373_s16 = int_to_ptr.vmem [resolvable:$false] %s9372_s16 }
 0x6de   : > { %7544 = vmatmul.mubr.bf16.gmra.mrb[140].mxu1 %v7154_v58  ;;  %v7012_v35 = vpop.permute.xlu0 %7011  ;;  %v6898_v19 = vpop.permute.xlu1 %6897  ;;  %s9374_s23 = scalar_lea.vmem %s9373_s16, 1024  ;;  %p9375_p1 = scmp.lt.s32.totalorder %s13393_s18, %s9373_s16 }
 0x6df   : > { %7551 = vmatprep.mubr.bf16.mxu1 %v7285_v21  ;;  %p9370_p13 = pnand %p9369_p12, %p9553_p4  ;;  %p9376_p2 = scmp.lt.s32.totalorder %s9374_s23, %s9368_s25 }
 0x6e1   : > { %p9371_p0 = pneg %p9370_p13  ;;  %p9377_p3 = por %p9376_p2, %p9375_p1 }
 0x6e2   : > { %v7010_v18 = vpop.permute.xlu0 %7009  ;;  %v6896_v3 = vpop.permute.xlu1 %6895 }
 0x6e3   : > { %v7250_v7 = vsel %vm3363_vm15, %v7209_v42, %v7010_v18  ;;  %p9378_p5 = pnand %p9377_p3, %p9371_p0 }
 0x6e6   : > { %7552 = vmatmul.mubr.bf16.gmra.mrb[144].mxu1 %v7157_v38  ;;  %v6981_v0 = vpop.permute.xlu0 %6980  ;;  %v6786_v44 = vpop.permute.xlu1 %6785 }
 0x6e7   : > { %v7215_v46 = vsel %vm3322_vm14, %v12520_v45, %v6981_v0 }
 0x6ea   : > { %v6979_v51 = vpop.permute.xlu0 %6978  ;;  %v6784_v5 = vpop.permute.xlu1 %6783 }
 0x6eb   : > { %v7090_v53 = vsel %vm3322_vm14, %v12428_v60, %v6784_v5  ;;  %v7212_v23 = vsel %vm3322_vm14, %v12528_v31, %v6979_v51  ;;  %v7092_v31 = vsel %vm3322_vm14, %v12413_v8, %v6786_v44 }
 0x6ec   : > { %v7122_v43 = vsel %vm3363_vm15, %v7090_v53, %v6896_v3  ;;  %v7252_v60 = vsel %vm3363_vm15, %v7212_v23, %v7012_v35  ;;  %v7124_v9 = vsel %vm3363_vm15, %v7092_v31, %v6898_v19 }
 0x6ed   : > { %v7160_v39 = vsel %vm3404_vm0, %v7122_v43, %v6929_v26 }
 0x6ee   : > { %v7056_v30 = vpop.permute.xlu0 %7055  ;;  %v6933_v16 = vpop.permute.xlu1 %6932 }
 0x6ef   : > { %v7291_v36 = vsel %vm3404_vm0, %v7252_v60, %v7056_v30 }
 0x6f2   : > { %v7054_v27 = vpop.permute.xlu0 %7053  ;;  %v6931_v28 = vpop.permute.xlu1 %6930 }
 0x6f3   : > { %v7288_v10 = vsel %vm3404_vm0, %v7250_v7, %v7054_v27  ;;  %v7163_v57 = vsel %vm3404_vm0, %v7124_v9, %v6931_v28 }
 0x6f4   : > { %7559 = vmatprep.mubr.bf16.mxu1 %v7288_v10 }
 0x6f5   : > { %7560 = vmatmul.mubr.bf16.gmra.mrb[148].mxu1 %v7160_v39 }
 0x6f6   : > { %v7016_v1 = vpop.permute.xlu0 %7015  ;;  %v6902_v48 = vpop.permute.xlu1 %6901  ;;  %7567 = vmatprep.mubr.bf16.mxu1 %v7291_v36 }
 0x6fa   : > { %v7014_v4 = vpop.permute.xlu0 %7013  ;;  %v6900_v33 = vpop.permute.xlu1 %6899 }
 0x6fb   : > { %v7254_v34 = vsel %vm3363_vm15, %v7215_v46, %v7014_v4 }
 0x6fd   : > { %7568 = vmatmul.mubr.bf16.gmra.mrb[152].mxu1 %v7163_v57 }
 0x6fe   : > { %v6985_v14 = vpop.permute.xlu0 %6984  ;;  %v6790_v26 = vpop.permute.xlu1 %6789 }
 0x6ff   : > { %v7221_v7 = vsel %vm3322_vm14, %v12580_v61, %v6985_v14 }
 0x702   : > { %v6983_v12 = vpop.permute.xlu0 %6982  ;;  %v6788_v58 = vpop.permute.xlu1 %6787 }
 0x703   : > { %v7094_v62 = vsel %vm3322_vm14, %v12489_v29, %v6788_v58  ;;  %v7218_v8 = vsel %vm3322_vm14, %v12588_v22, %v6983_v12  ;;  %v7096_v22 = vsel %vm3322_vm14, %v12479_v6, %v6790_v26 }
 0x704   : > { %v7126_v19 = vsel %vm3363_vm15, %v7094_v62, %v6900_v33  ;;  %v7256_v29 = vsel %vm3363_vm15, %v7218_v8, %v7016_v1  ;;  %v7128_v44 = vsel %vm3363_vm15, %v7096_v22, %v6902_v48 }
 0x705   : > { %v7166_v24 = vsel %vm3404_vm0, %v7126_v19, %v6933_v16 }
 0x706   : > { %v7060_v35 = vpop.permute.xlu0 %7059  ;;  %v6937_v21 = vpop.permute.xlu1 %6936 }
 0x707   : > { %v7297_v55 = vsel %vm3404_vm0, %v7256_v29, %v7060_v35 }
 0x70a   : > { %v7058_v18 = vpop.permute.xlu0 %7057  ;;  %v6935_v3 = vpop.permute.xlu1 %6934 }
 0x70b   : > { %v7294_v2 = vsel %vm3404_vm0, %v7254_v34, %v7058_v18  ;;  %v7169_v51 = vsel %vm3404_vm0, %v7128_v44, %v6935_v3 }
 0x70c   : > { %7575 = vmatprep.mubr.bf16.mxu1 %v7294_v2 }
 0x70d   : > { %7576 = vmatmul.mubr.bf16.gmra.mrb[156].mxu1 %v7166_v24 }
 0x70e   : > { %v7020_v45 = vpop.permute.xlu0 %7019  ;;  %v6906_v38 = vpop.permute.xlu1 %6905  ;;  %7583 = vmatprep.mubr.bf16.mxu1 %v7297_v55 }
 0x712   : > { %v7018_v56 = vpop.permute.xlu0 %7017  ;;  %v6904_v0 = vpop.permute.xlu1 %6903 }
 0x713   : > { %v7258_v28 = vsel %vm3363_vm15, %v7221_v7, %v7018_v56 }
 0x715   : > { %7584 = vmatmul.mubr.bf16.gmra.mrb[160].mxu1 %v7169_v51 }
 0x716   : > { %v6989_v5 = vpop.permute.xlu0 %6988  ;;  %v6794_v53 = vpop.permute.xlu1 %6793 }
 0x717   : > { %v7227_v62 = vsel %vm3322_vm14, %v12656_v47, %v6989_v5 }
 0x71a   : > { %v6987_v30 = vpop.permute.xlu0 %6986  ;;  %v6792_v16 = vpop.permute.xlu1 %6791 }
 0x71b   : > { %v7098_v42 = vsel %vm3322_vm14, %v12547_v32, %v6792_v16  ;;  %v7224_v6 = vsel %vm3322_vm14, %v12676_v11, %v6987_v30  ;;  %v7100_v11 = vsel %vm3322_vm14, %v12537_v40, %v6794_v53 }
 0x71c   : > { %v7130_v27 = vsel %vm3363_vm15, %v7098_v42, %v6904_v0  ;;  %v7260_v32 = vsel %vm3363_vm15, %v7224_v6, %v7020_v45  ;;  %v7132_v33 = vsel %vm3363_vm15, %v7100_v11, %v6906_v38 }
 0x71d   : > { %v7172_v36 = vsel %vm3404_vm0, %v7130_v27, %v6937_v21 }
 0x71e   : > { %v7064_v23 = vpop.permute.xlu0 %7063  ;;  %v6941_v43 = vpop.permute.xlu1 %6940 }
 0x71f   : > { %v7303_v1 = vsel %vm3404_vm0, %v7260_v32, %v7064_v23  ;;  %v13527_v32 = vld [vmem:[#allocation14_spill] sm:$0xff] }
 0x722   : > { %v7062_v10 = vpop.permute.xlu0 %7061  ;;  %v6939_v39 = vpop.permute.xlu1 %6938 }
 0x723   : > { %v7300_v60 = vsel %vm3404_vm0, %v7258_v28, %v7062_v10  ;;  %v7175_v9 = vsel %vm3404_vm0, %v7132_v33, %v6939_v39  ;;  %v13519_v28 = vld [vmem:[#allocation8_spill] sm:$0xff]  ;;  %v13522_v10 = vld [vmem:[#allocation11_spill] sm:$0xff]  ;;  %v13523_v39 = vld [vmem:[#allocation10_spill] sm:$0xff] }
 0x724   : > { %7591 = vmatprep.mubr.bf16.mxu1 %v7300_v60  ;;  %v13524_v60 = vld [vmem:[#allocation13_spill] sm:$0xff] }
 0x725   : > { %7592 = vmatmul.mubr.bf16.gmra.mrb[164].mxu1 %v7172_v36  ;;  %v13525_v36 = vld [vmem:[#allocation12_spill] sm:$0xff] }
 0x726   : > { %v7024_v61 = vpop.permute.xlu0 %7023  ;;  %v6910_v48 = vpop.permute.xlu1 %6909  ;;  %7599 = vmatprep.mubr.bf16.mxu1 %v7303_v1 }
 0x72a   : > { %v7022_v31 = vpop.permute.xlu0 %7021  ;;  %v6908_v4 = vpop.permute.xlu1 %6907 }
 0x72b   : > { %v7262_v21 = vsel %vm3363_vm15, %v7227_v62, %v7022_v31 }
 0x72d   : > { %7600 = vmatmul.mubr.bf16.gmra.mrb[168].mxu1 %v7175_v9 }
 0x72e   : > { %v6991_v57 = vpop.permute.xlu0 %6990  ;;  %v6798_v14 = vpop.permute.xlu1 %6797 }
 0x72f   : > { %v7230_v40 = vsel %vm3322_vm14, %v12744_v52, %v6991_v57  ;;  %v7104_v52 = vsel %vm3322_vm14, %v12599_v63, %v6798_v14 }
 0x730   : > { %v7264_v18 = vsel %vm3363_vm15, %v7230_v40, %v7024_v61  ;;  %v7136_v29 = vsel %vm3363_vm15, %v7104_v52, %v6910_v48 }
 0x732   : > { %v7068_v26 = vpop.permute.xlu0 %7067  ;;  %v6796_v12 = vpop.permute.xlu1 %6795 }
 0x733   : > { %v7102_v58 = vsel %vm3322_vm14, %v12613_v41, %v6796_v12  ;;  %v7309_v41 = vsel %vm3404_vm0, %v7264_v18, %v7068_v26 }
 0x734   : > { %v7134_v35 = vsel %vm3363_vm15, %v7102_v58, %v6908_v4 }
 0x735   : > { %v7178_v34 = vsel %vm3404_vm0, %v7134_v35, %v6941_v43 }
 0x736   : > { %v7066_v46 = vpop.permute.xlu0 %7065  ;;  %v6943_v8 = vpop.permute.xlu1 %6942 }
 0x737   : > { %v7306_v19 = vsel %vm3404_vm0, %v7262_v21, %v7066_v46  ;;  %v7181_v55 = vsel %vm3404_vm0, %v7136_v29, %v6943_v8 }
 0x738   : > { %7607 = vmatprep.mubr.bf16.mxu1 %v7306_v19 }
 0x739   : > { %7608 = vmatmul.mubr.bf16.gmra.mrb[172].mxu1 %v7178_v34 }
 0x73a   : > { %v6993_v47 = vpop.permute.xlu0 %6992  ;;  %v6912_v3 = vpop.permute.xlu1 %6911  ;;  %7615 = vmatprep.mubr.bf16.mxu1 %v7309_v41 }
 0x73b   : > { %v7233_v56 = vsel %vm3322_vm14, %v12730_v49, %v6993_v47 }
 0x73e   : > { %v7026_v2 = vpop.permute.xlu0 %7025  ;;  %v6945_v24 = vpop.permute.xlu1 %6944 }
 0x73f   : > { %v7266_v44 = vsel %vm3363_vm15, %v7233_v56, %v7026_v2 }
 0x741   : > { %7616 = vmatmul.mubr.bf16.gmra.mrb[176].mxu1 %v7181_v55 }
 0x742   : > { %v6995_v45 = vpop.permute.xlu0 %6994  ;;  %v6800_v38 = vpop.permute.xlu1 %6799 }
 0x743   : > { %v7106_v22 = vsel %vm3322_vm14, %v12699_v37, %v6800_v38  ;;  %v7236_v37 = vsel %vm3322_vm14, %v12784_v17, %v6995_v45  ;;  %v13520_v17 = vld [vmem:[#allocation9_spill] sm:$0xff] }
 0x744   : > { %v7138_v0 = vsel %vm3363_vm15, %v7106_v22, %v6912_v3 }
 0x745   : > { %v7184_v53 = vsel %vm3404_vm0, %v7138_v0, %v6945_v24 }
 0x746   : > { %v7070_v63 = vpop.permute.xlu0 %7069  ;;  %v6802_v51 = vpop.permute.xlu1 %6801 }
 0x747   : > { %v7312_v5 = vsel %vm3404_vm0, %v7266_v44, %v7070_v63  ;;  %v7108_v49 = vsel %vm3322_vm14, %v12685_v25, %v6802_v51  ;;  %v13521_v25 = vld [vmem:[#allocation7_spill] sm:$0xff] }
 0x748   : > { %7623 = vmatprep.mubr.bf16.mxu1 %v7312_v5 }
 0x749   : > { %7624 = vmatmul.mubr.bf16.gmra.mrb[180].mxu1 %v7184_v53 }
 0x74a   : > { %v7028_v30 = vpop.permute.xlu0 %7027  ;;  %v6914_v16 = vpop.permute.xlu1 %6913 }
 0x74b   : > { %v7268_v42 = vsel %vm3363_vm15, %v7236_v37, %v7028_v30  ;;  %v7140_v23 = vsel %vm3363_vm15, %v7108_v49, %v6914_v16 }
 0x74e   : > { %v7072_v43 = vpop.permute.xlu0 %7071  ;;  %v6947_v7 = vpop.permute.xlu1 %6946 }
 0x74f   : > { %v7315_v6 = vsel %vm3404_vm0, %v7268_v42, %v7072_v43  ;;  %v7187_v27 = vsel %vm3404_vm0, %v7140_v23, %v6947_v7 }
 0x750   : > { %7631 = vmatprep.mubr.bf16.mxu1 %v7315_v6 }
 0x751   : > { %7632 = vmatmul.mubr.bf16.gmra.mrb[184].mxu1 %v7187_v27 }
 0x752   : > { %8983 = vmatprep.mubr.msk.bf16.mxu1 %vm3322_vm14, %v12278_v59  ;;  %v13526_v59 = vld [vmem:[#allocation15_spill] sm:$0xff] }
 0x759   : > { %8984 = vmatmul.mubr.msk.bf16.vlgmr.msra.gmra.mrb[188].mxu1 %vm3322_vm14, %v13519_v28 }
 0x75a   : > { %8987 = vmatprep.mubr.msk.bf16.mxu1 %vm3322_vm14, %v13520_v17 }
 0x761   : > { %8988 = vmatmul.mubr.msk.bf16.gmra.mrb[192].mxu1 %vm3322_vm14, %v13521_v25 }
 0x762   : > { %8991 = vmatprep.mubr.msk.bf16.mxu1 %vm3322_vm14, %v13522_v10 }
 0x769   : > { %8992 = vmatmul.mubr.msk.bf16.gmra.mrb[196].mxu1 %vm3322_vm14, %v13523_v39 }
 0x76a   : > { %8995 = vmatprep.mubr.msk.bf16.mxu1 %vm3322_vm14, %v13524_v60 }
 0x771   : > { %8996 = vmatmul.mubr.msk.bf16.gmra.mrb[200].mxu1 %vm3322_vm14, %v13525_v36 }
 0x772   : > { %8999 = vmatprep.mubr.msk.bf16.mxu1 %vm3322_vm14, %v13526_v59 }
 0x779   : > { %9000 = vmatmul.mubr.msk.bf16.gmra.mrb[204].mxu1 %vm3322_vm14, %v13527_v32 }
 0x77a   : > { %9003 = vmatprep.mubr.msk.bf16.mxu1 %vm3322_vm14, %v12640_v20 }
 0x781   : > { %v8729_v1 = vpop.f32.mrb[124].mxu1  ;;  %9004 = vmatmul.mubr.msk.bf16.gmra.mrb[208].mxu1 %vm3322_vm14, %v12626_v13 }
 0x782   : > { %v8730_v61 = vpop.f32.mrb[125].mxu1  ;;  %9007 = vmatprep.mubr.msk.bf16.mxu1 %vm3322_vm14, %v12717_v15  ;;  %v13528_v15 = vld [vmem:[#allocation6_spill] sm:$0xff] }
 0x783   : > { %v12921_v48 = vadd.f32 %v8730_v61, %v8729_v1  ;;  %v8732_v11 = vpop.f32.mrb[126].mxu1 }
 0x784   : > { %v8733_v31 = vpop.f32.mrb[127].mxu1 }
 0x785   : > { %v12923_v4 = vadd.f32 %v8733_v31, %v8732_v11 }
 0x789   : > { %v8735_v33 = vpop.f32.mrb[128].mxu1  ;;  %9008 = vmatmul.mubr.msk.bf16.gmra.mrb[212].mxu1 %vm3322_vm14, %v12760_v54 }
 0x78a   : > { %v8736_v9 = vpop.f32.mrb[129].mxu1  ;;  %9011 = vmatprep.mubr.msk.bf16.mxu1 %vm3322_vm14, %v12777_v50 }
 0x78b   : > { %v12929_v20 = vadd.f32 %v8736_v9, %v8735_v33  ;;  %v8738_v13 = vpop.f32.mrb[130].mxu1 }
 0x78c   : > { %v8739_v57 = vpop.f32.mrb[131].mxu1 }
 0x78d   : > { %v12931_v14 = vadd.f32 %v8739_v57, %v8738_v13 }
 0x791   : > { %9012 = vmatmul.mubr.msk.bf16.gmra.mrb[216].mxu1 %vm3322_vm14, %v13528_v15 }
 0x799   : > { %v8741_v26 = vpop.f32.mrb[132].mxu1 }
 0x79a   : > { %v8742_v12 = vpop.f32.mrb[133].mxu1 }
 0x79b   : > { %v12935_v58 = vadd.f32 %v8742_v12, %v8741_v26  ;;  %v8744_v62 = vpop.f32.mrb[134].mxu1 }
 0x79c   : > { %v8745_v40 = vpop.f32.mrb[135].mxu1 }
 0x79d   : > { %v12937_v54 = vadd.f32 %v8745_v40, %v8744_v62 }
 0x7a1   : > { %v8747_v35 = vpop.f32.mrb[136].mxu1 }
 0x7a2   : > { %v8748_v21 = vpop.f32.mrb[137].mxu1 }
 0x7a3   : > { %v12939_v50 = vadd.f32 %v8748_v21, %v8747_v35  ;;  %v8750_v46 = vpop.f32.mrb[138].mxu1 }
 0x7a4   : > { %v8751_v8 = vpop.f32.mrb[139].mxu1 }
 0x7a5   : > { %v12941_v19 = vadd.f32 %v8751_v8, %v8750_v46 }
 0x7b1   : > { %v8753_v34 = vpop.f32.mrb[140].mxu1 }
 0x7b2   : > { %v8754_v18 = vpop.f32.mrb[141].mxu1 }
 0x7b3   : > { %v12943_v41 = vadd.f32 %v8754_v18, %v8753_v34  ;;  %v8756_v47 = vpop.f32.mrb[142].mxu1 }
 0x7b4   : > { %v8757_v3 = vpop.f32.mrb[143].mxu1 }
 0x7b5   : > { %v12945_v52 = vadd.f32 %v8757_v3, %v8756_v47 }
 0x7b9   : > { %v8759_v2 = vpop.f32.mrb[144].mxu1 }
 0x7ba   : > { %v8760_v24 = vpop.f32.mrb[145].mxu1 }
 0x7bb   : > { %v12947_v29 = vadd.f32 %v8760_v24, %v8759_v2  ;;  %v8762_v55 = vpop.f32.mrb[146].mxu1 }
 0x7bc   : > { %v8763_v45 = vpop.f32.mrb[147].mxu1 }
 0x7bd   : > { %v12949_v38 = vadd.f32 %v8763_v45, %v8762_v55 }
 0x7c8   : > { %v8765_v22 = vpop.f32.mrb[148].mxu1 }
 0x7c9   : > { %v8766_v56 = vpop.f32.mrb[149].mxu1 }
 0x7ca   : > { %v12951_v0 = vadd.f32 %v8766_v56, %v8765_v22  ;;  %v8768_v44 = vpop.f32.mrb[150].mxu1 }
 0x7cb   : > { %v8769_v63 = vpop.f32.mrb[151].mxu1 }
 0x7cc   : > { %v12953_v51 = vadd.f32 %v8769_v63, %v8768_v44 }
 0x7d0   : > { %v8771_v5 = vpop.f32.mrb[152].mxu1 }
 0x7d1   : > { %v8772_v53 = vpop.f32.mrb[153].mxu1 }
 0x7d2   : > { %v12955_v30 = vadd.f32 %v8772_v53, %v8771_v5  ;;  %v8774_v16 = vpop.f32.mrb[154].mxu1 }
 0x7d3   : > { %v8775_v37 = vpop.f32.mrb[155].mxu1 }
 0x7d4   : > { %v12957_v49 = vadd.f32 %v8775_v37, %v8774_v16 }
 0x7e0   : > { %v8777_v42 = vpop.f32.mrb[156].mxu1 }
 0x7e1   : > { %v8778_v23 = vpop.f32.mrb[157].mxu1 }
 0x7e2   : > { %v12959_v43 = vadd.f32 %v8778_v23, %v8777_v42  ;;  %v8780_v7 = vpop.f32.mrb[158].mxu1  ;;  %v12994_v42 = vld [vmem:[%s13455_s8] ss:$0 sm:$0xff] }
 0x7e3   : > { %v8781_v6 = vpop.f32.mrb[159].mxu1  ;;  %v7522_v23 = vadd.f32 %v12929_v20, %v12994_v42  ;;  %v9460_v20 = vmov 1  }
 0x7e4   : > { %v12961_v27 = vadd.f32 %v8781_v6, %v8780_v7  ;;  %v7514_v6 = vadd.f32 %v12921_v48, %v12994_v42  ;;  %v7538_v48 = vadd.f32 %v12939_v50, %v12994_v42 }
 0x7e8   : > { %v8783_v28 = vpop.f32.mrb[160].mxu1 }
 0x7e9   : > { %v8784_v17 = vpop.f32.mrb[161].mxu1 }
 0x7ea   : > { %v12963_v25 = vadd.f32 %v8784_v17, %v8783_v28  ;;  %v8786_v10 = vpop.f32.mrb[162].mxu1 }
 0x7eb   : > { %v8787_v39 = vpop.f32.mrb[163].mxu1 }
 0x7ec   : > { %v12965_v60 = vadd.f32 %v8787_v39, %v8786_v10  ;;  %v7525_v10 = vadd.f32 %v12931_v14, %v12994_v42  ;;  %v7530_v14 = vadd.f32 %v12935_v58, %v12994_v42  ;;  %v7554_v58 = vadd.f32 %v12947_v29, %v12994_v42 }
 0x7f8   : > { %v8789_v36 = vpop.f32.mrb[164].mxu1 }
 0x7f9   : > { %v8790_v59 = vpop.f32.mrb[165].mxu1 }
 0x7fa   : > { %v12967_v32 = vadd.f32 %v8790_v59, %v8789_v36  ;;  %v8792_v1 = vpop.f32.mrb[166].mxu1  ;;  %v7517_v59 = vadd.f32 %v12923_v4, %v12994_v42  ;;  %v7541_v4 = vadd.f32 %v12941_v19, %v12994_v42  ;;  %v7546_v19 = vadd.f32 %v12943_v41, %v12994_v42 }
 0x7fb   : > { %v8793_v61 = vpop.f32.mrb[167].mxu1  ;;  %v7570_v41 = vadd.f32 %v12955_v30, %v12994_v42  ;;  %v7565_v30 = vadd.f32 %v12953_v51, %v12994_v42  ;;  %v7589_v51 = vadd.f32 %v12965_v60, %v12994_v42 }
 0x7fc   : > { %v12969_v11 = vadd.f32 %v8793_v61, %v8792_v1 }
 0x800   : > { %v8795_v31 = vpop.f32.mrb[168].mxu1 }
 0x801   : > { %v8796_v33 = vpop.f32.mrb[169].mxu1 }
 0x802   : > { %v12971_v9 = vadd.f32 %v8796_v33, %v8795_v31  ;;  %v8798_v13 = vpop.f32.mrb[170].mxu1 }
 0x803   : > { %v8799_v57 = vpop.f32.mrb[171].mxu1 }
 0x804   : > { %v12973_v15 = vadd.f32 %v8799_v57, %v8798_v13  ;;  %v7602_v60 = vadd.f32 %v12971_v9, %v12994_v42 }
 0x80c   : > { %v8801_v26 = vpop.f32.mrb[172].mxu1 }
 0x80d   : > { %v8802_v12 = vpop.f32.mrb[173].mxu1 }
 0x80e   : > { %v12975_v62 = vadd.f32 %v8802_v12, %v8801_v26  ;;  %v8804_v40 = vpop.f32.mrb[174].mxu1 }
 0x80f   : > { %v8805_v35 = vpop.f32.mrb[175].mxu1 }
 0x810   : > { %v12977_v21 = vadd.f32 %v8805_v35, %v8804_v40  ;;  %v7533_v40 = vadd.f32 %v12937_v54, %v12994_v42  ;;  %v7557_v54 = vadd.f32 %v12949_v38, %v12994_v42  ;;  %v7562_v38 = vadd.f32 %v12951_v0, %v12994_v42 }
 0x814   : > { %v8807_v46 = vpop.f32.mrb[176].mxu1 }
 0x815   : > { %v8808_v8 = vpop.f32.mrb[177].mxu1 }
 0x816   : > { %v12979_v34 = vadd.f32 %v8808_v8, %v8807_v46  ;;  %v8810_v18 = vpop.f32.mrb[178].mxu1 }
 0x817   : > { %v8811_v47 = vpop.f32.mrb[179].mxu1 }
 0x818   : > { %v12981_v3 = vadd.f32 %v8811_v47, %v8810_v18 }
 0x81c   : > { %v8813_v2 = vpop.f32.mrb[180].mxu1 }
 0x81d   : > { %v8814_v24 = vpop.f32.mrb[181].mxu1 }
 0x81e   : > { %v12983_v55 = vadd.f32 %v8814_v24, %v8813_v2  ;;  %v8816_v45 = vpop.f32.mrb[182].mxu1 }
 0x81f   : > { %v8817_v22 = vpop.f32.mrb[183].mxu1 }
 0x820   : > { %v12985_v56 = vadd.f32 %v8817_v22, %v8816_v45  ;;  %v7549_v45 = vadd.f32 %v12945_v52, %v12994_v42  ;;  %v7573_v52 = vadd.f32 %v12957_v49, %v12994_v42  ;;  %v7578_v49 = vadd.f32 %v12959_v43, %v12994_v42 }
 0x824   : > { %v8819_v44 = vpop.f32.mrb[184].mxu1 }
 0x825   : > { %v8820_v63 = vpop.f32.mrb[185].mxu1 }
 0x826   : > { %v12987_v5 = vadd.f32 %v8820_v63, %v8819_v44  ;;  %v8822_v53 = vpop.f32.mrb[186].mxu1  ;;  %v13529_v63 = vmov 0  }
 0x827   : > { %v8823_v16 = vpop.f32.mrb[187].mxu1 }
 0x828   : > { %v12989_v37 = vadd.f32 %v8823_v16, %v8822_v53 }
 0x82c   : > { %v8985_v7 = vpop.f32.mrb[188].mxu1 }
 0x82d   : > { %v7683_v28 = vadd.f32 %v8985_v7, %v7522_v23  ;;  %v7674_v17 = vpop.f32.mrb[189].mxu1 }
 0x82e   : > { %v7675_v39 = vadd.f32 %v7674_v17, %v7514_v6  ;;  %v8986_v36 = vpop.f32.mrb[190].mxu1 }
 0x82f   : > { %v7686_v1 = vadd.f32 %v8986_v36, %v7525_v10  ;;  %v7677_v61 = vpop.f32.mrb[191].mxu1  ;;  %7840 = vperm.xlu1 %9226, %v7683_v28   ;;  %v7586_v10 = vadd.f32 %v12963_v25, %v12994_v42  ;;  %v7581_v25 = vadd.f32 %v12961_v27, %v12994_v42  ;;  %v7605_v27 = vadd.f32 %v12973_v15, %v12994_v42 }
 0x830   : > { %v7678_v31 = vadd.f32 %v7677_v61, %v7517_v59  ;;  %7834 = vperm.xlu0 %9228, %v7675_v39   ;;  %v7618_v15 = vadd.f32 %v12979_v34, %v12994_v42 }
 0x833   : > { %9227 = vset.pattern.permute.xlu1 %v9460_v20 }
 0x834   : > { %v8989_v33 = vpop.f32.mrb[192].mxu1  ;;  %8109 = vperm.xlu1 %9227, %v7683_v28   ;;  %7843 = vperm.xlu0 %9228, %v7686_v1  }
 0x835   : > { %v7699_v13 = vadd.f32 %v8989_v33, %v7538_v48  ;;  %v7690_v57 = vpop.f32.mrb[193].mxu1 }
 0x836   : > { %v7691_v26 = vadd.f32 %v7690_v57, %v7530_v14  ;;  %v8990_v12 = vpop.f32.mrb[194].mxu1  ;;  %v7594_v14 = vadd.f32 %v12967_v32, %v12994_v42 }
 0x837   : > { %v7702_v35 = vadd.f32 %v8990_v12, %v7541_v4  ;;  %v7693_v46 = vpop.f32.mrb[195].mxu1  ;;  %v7597_v12 = vadd.f32 %v12969_v11, %v12994_v42  ;;  %v7610_v11 = vadd.f32 %v12975_v62, %v12994_v42  ;;  %v7634_v62 = vadd.f32 %v12987_v5, %v12994_v42 }
 0x838   : > { %v7694_v8 = vadd.f32 %v7693_v46, %v7533_v40  ;;  %8103 = vperm.xlu1 %9227, %v7675_v39   ;;  %9230 = vset.pattern.permute.xlu0 %v9460_v20  ;;  %v7629_v5 = vadd.f32 %v12985_v56, %v12994_v42 }
 0x839   : > { %8106 = vperm.xlu0 %9230, %v7678_v31  }
 0x83c   : > { %v8993_v50 = vpop.f32.mrb[196].mxu1  ;;  %8112 = vperm.xlu1 %9227, %v7686_v1  }
 0x83d   : > { %v7715_v18 = vadd.f32 %v8993_v50, %v7554_v58  ;;  %v7706_v47 = vpop.f32.mrb[197].mxu1  ;;  %8121 = vperm.xlu0 %9230, %v7699_v13   ;;  %v7621_v58 = vadd.f32 %v12981_v3, %v12994_v42 }
 0x83e   : > { %v7707_v2 = vadd.f32 %v7706_v47, %v7546_v19  ;;  %v8994_v24 = vpop.f32.mrb[198].mxu1 }
 0x83f   : > { %v13022_v22 = vadd.f32 %v8994_v24, %v7557_v54  ;;  %v7709_v44 = vpop.f32.mrb[199].mxu1 }
 0x840   : > { %v13024_v29 = vadd.f32 %v7709_v44, %v7549_v45  ;;  %9229 = vset.pattern.permute.xlu1 %v13529_v63  ;;  %v7637_v45 = vadd.f32 %v12989_v37, %v12994_v42 }
 0x841   : > { %7837 = vperm.xlu1 %9229, %v7678_v31   ;;  %8115 = vperm.xlu0 %9230, %v7691_v26  }
 0x844   : > { %v8997_v53 = vpop.f32.mrb[200].mxu1 }
 0x845   : > { %v13031_v16 = vadd.f32 %v8997_v53, %v7570_v41  ;;  %v7722_v23 = vpop.f32.mrb[201].mxu1  ;;  %7852 = vperm.xlu1 %9229, %v7699_v13   ;;  %9231 = vset.pattern.permute.xlu0 %v13529_v63 }
 0x846   : > { %v13036_v7 = vadd.f32 %v7722_v23, %v7562_v38  ;;  %v8998_v6 = vpop.f32.mrb[202].mxu1  ;;  %7855 = vperm.xlu0 %9231, %v7702_v35  }
 0x847   : > { %v13040_v28 = vadd.f32 %v8998_v6, %v7573_v52  ;;  %v7725_v17 = vpop.f32.mrb[203].mxu1 }
 0x848   : > { %v13042_v0 = vadd.f32 %v7725_v17, %v7565_v30 }
 0x849   : > { %7846 = vperm.xlu1 %9229, %v7691_v26  }
 0x84a   : > { %7849 = vperm.xlu0 %9231, %v7694_v8  }
 0x84c   : > { %v9001_v39 = vpop.f32.mrb[204].mxu1 }
 0x84d   : > { %v13048_v36 = vadd.f32 %v9001_v39, %v7586_v10  ;;  %v7738_v59 = vpop.f32.mrb[205].mxu1  ;;  %9232 = vset.pattern.permute.xlu1 %v9460_v20 }
 0x84e   : > { %v13053_v1 = vadd.f32 %v7738_v59, %v7578_v49  ;;  %v9002_v61 = vpop.f32.mrb[206].mxu1  ;;  %8124 = vperm.xlu1 %9232, %v7702_v35   ;;  %9234 = vset.pattern.permute.xlu0 %v9460_v20 }
 0x84f   : > { %v13058_v31 = vadd.f32 %v9002_v61, %v7589_v51  ;;  %v7741_v43 = vpop.f32.mrb[207].mxu1  ;;  %8133 = vperm.xlu0 %9234, %v7715_v18  }
 0x850   : > { %v13060_v48 = vadd.f32 %v7741_v43, %v7581_v25 }
 0x852   : > { %8118 = vperm.xlu1 %9232, %v7694_v8  }
 0x853   : > { %8127 = vperm.xlu0 %9234, %v7707_v2  }
 0x854   : > { %v9005_v33 = vpop.f32.mrb[208].mxu1 }
 0x855   : > { %v13066_v13 = vadd.f32 %v9005_v33, %v7602_v60  ;;  %v7754_v57 = vpop.f32.mrb[209].mxu1 }
 0x856   : > { %v13070_v4 = vadd.f32 %v7754_v57, %v7594_v14  ;;  %v9006_v26 = vpop.f32.mrb[210].mxu1  ;;  %9233 = vset.pattern.permute.xlu1 %v13529_v63 }
 0x857   : > { %v13075_v40 = vadd.f32 %v9006_v26, %v7605_v27  ;;  %v7757_v9 = vpop.f32.mrb[211].mxu1  ;;  %7864 = vperm.xlu1 %9233, %v7715_v18   ;;  %9235 = vset.pattern.permute.xlu0 %v13529_v63  ;;  %v7613_v18 = vadd.f32 %v12977_v21, %v12994_v42  ;;  %v7626_v21 = vadd.f32 %v12983_v55, %v12994_v42 }
 0x858   : > { %v13078_v32 = vadd.f32 %v7757_v9, %v7597_v12  ;;  %7867 = vperm.xlu0 %9235, %v13022_v22  }
 0x85b   : > { %7858 = vperm.xlu1 %9233, %v7707_v2  }
 0x85c   : > { %v9009_v35 = vpop.f32.mrb[212].mxu1  ;;  %7861 = vperm.xlu0 %9235, %v13024_v29  }
 0x85d   : > { %v13086_v46 = vadd.f32 %v9009_v35, %v7618_v15  ;;  %v7770_v8 = vpop.f32.mrb[213].mxu1 }
 0x85e   : > { %v13090_v50 = vadd.f32 %v7770_v8, %v7610_v11  ;;  %v9010_v19 = vpop.f32.mrb[214].mxu1 }
 0x85f   : > { %v13094_v47 = vadd.f32 %v9010_v19, %v7621_v58  ;;  %v7773_v34 = vpop.f32.mrb[215].mxu1  ;;  %9236 = vset.pattern.permute.xlu1 %v9460_v20 }
 0x860   : > { %v13097_v54 = vadd.f32 %v7773_v34, %v7613_v18  ;;  %8136 = vperm.xlu1 %9236, %v13022_v22   ;;  %9238 = vset.pattern.permute.xlu0 %v9460_v20 }
 0x861   : > { %8145 = vperm.xlu0 %9238, %v13031_v16  }
 0x864   : > { %v9013_v3 = vpop.f32.mrb[216].mxu1  ;;  %8130 = vperm.xlu1 %9236, %v13024_v29  }
 0x865   : > { %v13107_v2 = vadd.f32 %v9013_v3, %v7634_v62  ;;  %v7786_v24 = vpop.f32.mrb[217].mxu1  ;;  %8139 = vperm.xlu0 %9238, %v13036_v7  }
 0x866   : > { %v13112_v22 = vadd.f32 %v7786_v24, %v7626_v21  ;;  %v9014_v44 = vpop.f32.mrb[218].mxu1 }
 0x867   : > { %v13116_v41 = vadd.f32 %v9014_v44, %v7637_v45  ;;  %v7789_v29 = vpop.f32.mrb[219].mxu1 }
 0x868   : > { %v13118_v53 = vadd.f32 %v7789_v29, %v7629_v5  ;;  %9237 = vset.pattern.permute.xlu1 %v13529_v63 }
 0x869   : > { %7876 = vperm.xlu1 %9237, %v13031_v16   ;;  %9239 = vset.pattern.permute.xlu0 %v13529_v63 }
 0x86a   : > { %7879 = vperm.xlu0 %9239, %v13040_v28  }
 0x86d   : > { %7870 = vperm.xlu1 %9237, %v13036_v7  }
 0x86e   : > { %7873 = vperm.xlu0 %9239, %v13042_v0  }
 0x871   : > { %9240 = vset.pattern.permute.xlu1 %v9460_v20 }
 0x872   : > { %8148 = vperm.xlu1 %9240, %v13040_v28   ;;  %7891 = vperm.xlu0 %9239, %v13058_v31  }
 0x876   : > { %8142 = vperm.xlu1 %9240, %v13042_v0   ;;  %9245 = vset.pattern.permute.xlu0 %v9460_v20 }
 0x877   : > { %8160 = vperm.xlu0 %9245, %v13058_v31  }
 0x87a   : > { %9241 = vset.pattern.permute.xlu1 %v13529_v63 }
 0x87b   : > { %7888 = vperm.xlu1 %9241, %v13048_v36   ;;  %9246 = vset.pattern.permute.xlu0 %v13529_v63 }
 0x87c   : > { %7885 = vperm.xlu0 %9246, %v13060_v48  }
 0x87f   : > { %9242 = vset.pattern.permute.xlu1 %v9460_v20 }
 0x880   : > { %8157 = vperm.xlu1 %9242, %v13048_v36   ;;  %9247 = vset.pattern.permute.xlu0 %v9460_v20  ;;  %v7929_v36 = vlaneseq }
 0x881   : > { %8154 = vperm.xlu0 %9247, %v13060_v48  }
 0x882   : > { %v7930_v51 = vand.u32 127, %v7929_v36  ;;  %v7932_v61 = vshrl.u32 %v7929_v36, 7 }
 0x884   : > { %9243 = vset.pattern.permute.xlu1 %v13529_v63  ;;  %v7935_v25 = vadd.s32 4294967288, %v7930_v51  ;;  %v13210_v43 = vsub.s32 %v7930_v51, %v7932_v61 }
 0x885   : > { %7882 = vperm.xlu1 %9243, %v13053_v1   ;;  %9252 = vset.pattern.permute.xlu0 %v13529_v63 }
 0x886   : > { %7903 = vperm.xlu0 %9252, %v13075_v40   ;;  %v13212_v48 = vsub.s32 %v7935_v25, %v7932_v61 }
 0x889   : > { %9244 = vset.pattern.permute.xlu1 %v9460_v20 }
 0x88a   : > { %8151 = vperm.xlu1 %9244, %v13053_v1   ;;  %9253 = vset.pattern.permute.xlu0 %v9460_v20 }
 0x88b   : > { %8172 = vperm.xlu0 %9253, %v13075_v40  }
 0x88e   : > { %9248 = vset.pattern.permute.xlu1 %v13529_v63 }
 0x88f   : > { %7900 = vperm.xlu1 %9248, %v13066_v13   ;;  %9254 = vset.pattern.permute.xlu0 %v13529_v63 }
 0x890   : > { %7897 = vperm.xlu0 %9254, %v13078_v32  }
 0x893   : > { %9249 = vset.pattern.permute.xlu1 %v9460_v20 }
 0x894   : > { %8169 = vperm.xlu1 %9249, %v13066_v13   ;;  %9255 = vset.pattern.permute.xlu0 %v9460_v20 }
 0x895   : > { %8166 = vperm.xlu0 %9255, %v13078_v32  }
 0x898   : > { %9250 = vset.pattern.permute.xlu1 %v13529_v63 }
 0x899   : > { %7894 = vperm.xlu1 %9250, %v13070_v4   ;;  %9260 = vset.pattern.permute.xlu0 %v13529_v63 }
 0x89a   : > { %7915 = vperm.xlu0 %9260, %v13094_v47  }
 0x89d   : > { %9251 = vset.pattern.permute.xlu1 %v9460_v20 }
 0x89e   : > { %8163 = vperm.xlu1 %9251, %v13070_v4   ;;  %9261 = vset.pattern.permute.xlu0 %v9460_v20 }
 0x89f   : > { %8184 = vperm.xlu0 %9261, %v13094_v47  }
 0x8a2   : > { %9256 = vset.pattern.permute.xlu1 %v13529_v63 }
 0x8a3   : > { %7912 = vperm.xlu1 %9256, %v13086_v46   ;;  %9262 = vset.pattern.permute.xlu0 %v13529_v63 }
 0x8a4   : > { %7909 = vperm.xlu0 %9262, %v13097_v54  }
 0x8a7   : > { %9257 = vset.pattern.permute.xlu1 %v9460_v20 }
 0x8a8   : > { %8181 = vperm.xlu1 %9257, %v13086_v46   ;;  %9263 = vset.pattern.permute.xlu0 %v9460_v20 }
 0x8a9   : > { %8178 = vperm.xlu0 %9263, %v13097_v54  }
 0x8ac   : > { %9258 = vset.pattern.permute.xlu1 %v13529_v63 }
 0x8ad   : > { %7906 = vperm.xlu1 %9258, %v13090_v50   ;;  %8187 = vperm.xlu0 %9263, %v13112_v22  }
 0x8ae   : > { %v7841_v55 = vpop.permute.xlu1 %7840 }
 0x8af   : > { %v7835_v56 = vpop.permute.xlu0 %7834  ;;  %v7945_v40 = vrot.slane %v7841_v55, %v13210_v43 }
 0x8b0   : > { %v7934_v27 = vrot.slane %v7835_v56, %v13210_v43 }
 0x8b1   : > { %9259 = vset.pattern.permute.xlu1 %v9460_v20  ;;  %9265 = vset.pattern.permute.xlu0 %v13529_v63 }
 0x8b2   : > { %8175 = vperm.xlu1 %9259, %v13090_v50   ;;  %7927 = vperm.xlu0 %9265, %v13116_v41  }
 0x8b3   : > { %v13179_v37 = vpop.permute.xlu1 %8109  ;;  %v7844_v42 = vpop.permute.xlu0 %7843 }
 0x8b4   : > { %v7949_v4 = vrot.slane %v7844_v42, %v13212_v48  ;;  %v8210_v34 = vrot.slane %v13179_v37, %v13210_v43 }
 0x8b6   : > { %9264 = vset.pattern.permute.xlu1 %v13529_v63  ;;  %7921 = vperm.xlu0 %9265, %v13118_v53   ;;  %v7950_v11 = vsel %vm7940_vm1, %v7949_v4, %v7945_v40 }
 0x8b7   : > { %7924 = vperm.xlu1 %9264, %v13107_v2   ;;  %v13184_v38 = vpop.permute.xlu1 %8103 }
 0x8b8   : > { %v13186_v16 = vpop.permute.xlu0 %8106  ;;  %v8201_v54 = vrot.slane %v13184_v38, %v13210_v43 }
 0x8b9   : > { %v8205_v21 = vrot.slane %v13186_v16, %v13212_v48 }
 0x8ba   : > { %9267 = vset.pattern.permute.xlu0 %v9460_v20 }
 0x8bb   : > { %7918 = vperm.xlu1 %9264, %v13112_v22   ;;  %v13190_v23 = vpop.permute.xlu1 %8112  ;;  %8193 = vperm.xlu0 %9267, %v13107_v2  }
 0x8bc   : > { %v13193_v52 = vpop.permute.xlu0 %8121  ;;  %v8214_v58 = vrot.slane %v13190_v23, %v13212_v48  ;;  %v8206_v23 = vsel %vm7940_vm1, %v8205_v21, %v8201_v54 }
 0x8be   : > { %v8215_v22 = vsel %vm7940_vm1, %v8214_v58, %v8210_v34 }
 0x8bf   : > { %9266 = vset.pattern.permute.xlu1 %v9460_v20 }
 0x8c0   : > { %8190 = vperm.xlu1 %9266, %v13118_v53   ;;  %v7838_v63 = vpop.permute.xlu1 %7837  ;;  %v13197_v7 = vpop.permute.xlu0 %8115 }
 0x8c1   : > { %v7939_v14 = vrot.slane %v7838_v63, %v13212_v48  ;;  %v8219_v44 = vrot.slane %v13197_v7, %v13210_v43 }
 0x8c3   : > { %v7941_v9 = vsel %vm7940_vm1, %v7939_v14, %v7934_v27 }
 0x8c4   : > { %8196 = vperm.xlu1 %9266, %v13116_v41   ;;  %v7853_v6 = vpop.permute.xlu1 %7852  ;;  %v8078_v50 = vsel %vm8077_vm3, %v7950_v11, %v7941_v9 }
 0x8c5   : > { %v7856_v30 = vpop.permute.xlu0 %7855  ;;  %v7963_v46 = vrot.slane %v7853_v6, %v13210_v43  ;;  %v8342_v6 = vsel %vm8077_vm3, %v8215_v22, %v8206_v23 }
 0x8c6   : > { %v7967_v8 = vrot.slane %v7856_v30, %v13212_v48 }
 0x8c8   : > { %v7847_v28 = vpop.permute.xlu1 %7846  ;;  %v7968_v2 = vsel %vm7940_vm1, %v7967_v8, %v7963_v46 }
 0x8c9   : > { %v7850_v17 = vpop.permute.xlu0 %7849  ;;  %v7954_v13 = vrot.slane %v7847_v28, %v13210_v43 }
 0x8ca   : > { %v7958_v57 = vrot.slane %v7850_v17, %v13212_v48 }
 0x8cc   : > { %v7959_v32 = vsel %vm7940_vm1, %v7958_v57, %v7954_v13 }
 0x8cd   : > { %v13200_v0 = vpop.permute.xlu1 %8124  ;;  %v8080_v18 = vsel %vm8079_vm2, %v7959_v32, %v8078_v50 }
 0x8ce   : > { %v13202_v10 = vpop.permute.xlu0 %8133  ;;  %v8082_v5 = vsel %vm8081_vm4, %v7968_v2, %v8080_v18  ;;  %v8232_v63 = vrot.slane %v13200_v0, %v13212_v48 }
 0x8d1   : > { %v8119_v39 = vpop.permute.xlu1 %8118 }
 0x8d2   : > { %v13204_v49 = vpop.permute.xlu0 %8127  ;;  %v8223_v62 = vrot.slane %v8119_v39, %v13212_v48  ;;  %v8228_v39 = vrot.slane %v13193_v52, %v13210_v43 }
 0x8d3   : > { %v8237_v30 = vrot.slane %v13204_v49, %v13210_v43 }
 0x8d4   : > { %v8224_v42 = vsel %vm7940_vm1, %v8223_v62, %v8219_v44  ;;  %v8233_v49 = vsel %vm7940_vm1, %v8232_v63, %v8228_v39 }
 0x8d5   : > { %v8343_v36 = vsel %vm8079_vm2, %v8224_v42, %v8342_v6 }
 0x8d6   : > { %v13206_v20 = vpop.permute.xlu1 %7864  ;;  %v8344_v52 = vsel %vm8081_vm4, %v8233_v49, %v8343_v36 }
 0x8d7   : > { %v13208_v59 = vpop.permute.xlu0 %7867  ;;  %v7981_v24 = vrot.slane %v13206_v20, %v13210_v43 }
 0x8d8   : > { %v7985_v45 = vrot.slane %v13208_v59, %v13212_v48 }
 0x8da   : > { %v7859_v1 = vpop.permute.xlu1 %7858  ;;  %v7986_v7 = vsel %vm7940_vm1, %v7985_v45, %v7981_v24 }
 0x8db   : > { %v7862_v31 = vpop.permute.xlu0 %7861  ;;  %v7972_v15 = vrot.slane %v7859_v1, %v13210_v43 }
 0x8dc   : > { %v7976_v35 = vrot.slane %v7862_v31, %v13212_v48  ;;  %v8246_v31 = vrot.slane %v13202_v10, %v13210_v43 }
 0x8de   : > { %v7977_v3 = vsel %vm7940_vm1, %v7976_v35, %v7972_v15 }
 0x8df   : > { %v13214_v60 = vpop.permute.xlu1 %8136  ;;  %v8084_v29 = vsel %vm8083_vm5, %v7977_v3, %v8082_v5 }
 0x8e0   : > { %v13216_v33 = vpop.permute.xlu0 %8145  ;;  %v8086_v28 = vsel %vm8085_vm6, %v7986_v7, %v8084_v29  ;;  %v8250_v25 = vrot.slane %v13214_v60, %v13212_v48 }
 0x8e1   : > { %v8264_v40 = vrot.slane %v13216_v33, %v13210_v43 }
 0x8e3   : > { %v8131_v26 = vpop.permute.xlu1 %8130 }
 0x8e4   : > { %v13223_v12 = vpop.permute.xlu0 %8139  ;;  %v8241_v38 = vrot.slane %v8131_v26, %v13212_v48  ;;  %v8251_v26 = vsel %vm7940_vm1, %v8250_v25, %v8246_v31 }
 0x8e5   : > { %v8255_v27 = vrot.slane %v13223_v12, %v13210_v43 }
 0x8e6   : > { %v8242_v1 = vsel %vm7940_vm1, %v8241_v38, %v8237_v30 }
 0x8e7   : > { %v8345_v14 = vsel %vm8083_vm5, %v8242_v1, %v8344_v52 }
 0x8e8   : > { %v7877_v19 = vpop.permute.xlu1 %7876  ;;  %v8346_v10 = vsel %vm8085_vm6, %v8251_v26, %v8345_v14 }
 0x8e9   : > { %v7880_v47 = vpop.permute.xlu0 %7879  ;;  %v7999_v53 = vrot.slane %v7877_v19, %v13210_v43 }
 0x8ea   : > { %v8003_v55 = vrot.slane %v7880_v47, %v13212_v48 }
 0x8ec   : > { %v7871_v41 = vpop.permute.xlu1 %7870  ;;  %v8004_v20 = vsel %vm7940_vm1, %v8003_v55, %v7999_v53 }
 0x8ed   : > { %v7990_v56 = vrot.slane %v7871_v41, %v13210_v43  ;;  %v7874_v37 = vpop.permute.xlu0 %7873 }
 0x8ee   : > { %v7994_v16 = vrot.slane %v7874_v37, %v13212_v48 }
 0x8f0   : > { %v7995_v17 = vsel %vm7940_vm1, %v7994_v16, %v7990_v56 }
 0x8f1   : > { %v8088_v0 = vsel %vm8087_vm7, %v7995_v17, %v8086_v28  ;;  %v8149_v59 = vpop.permute.xlu1 %8148  ;;  %v7892_v51 = vpop.permute.xlu0 %7891 }
 0x8f2   : > { %v8090_v61 = vsel %vm8089_vm8, %v8004_v20, %v8088_v0  ;;  %v8268_v13 = vrot.slane %v8149_v59, %v13212_v48  ;;  %v8021_v38 = vrot.slane %v7892_v51, %v13212_v48 }
 0x8f3   : > { %8100 = vst.msk [vmem:[%s13283_s29] sm:$0xff] %vm1868_vm12, %v8090_v61 }
 0x8f4   : > { %v8269_v32 = vsel %vm7940_vm1, %v8268_v13, %v8264_v40 }
 0x8f5   : > { %v8143_v57 = vpop.permute.xlu1 %8142 }
 0x8f6   : > { %v8259_v60 = vrot.slane %v8143_v57, %v13212_v48  ;;  %v13295_v4 = vpop.permute.xlu0 %8160 }
 0x8f7   : > { %v8286_v31 = vrot.slane %v13295_v4, %v13212_v48 }
 0x8f8   : > { %v8260_v9 = vsel %vm7940_vm1, %v8259_v60, %v8255_v27 }
 0x8f9   : > { %v8347_v15 = vsel %vm8087_vm7, %v8260_v9, %v8346_v10 }
 0x8fa   : > { %v8348_v35 = vsel %vm8089_vm8, %v8269_v32, %v8347_v15  ;;  %v7889_v12 = vpop.permute.xlu1 %7888 }
 0x8fb   : > { %8637 = vst.msk [vmem:[%s13283_s29 + $0x10] sm:$0xff] %vm1868_vm12, %v8348_v35  ;;  %v7886_v11 = vpop.permute.xlu0 %7885  ;;  %v8017_v55 = vrot.slane %v7889_v12, %v13210_v43 }
 0x8fc   : > { %v8012_v56 = vrot.slane %v7886_v11, %v13212_v48 }
 0x8fd   : > { %v8022_v6 = vsel %vm7940_vm1, %v8021_v38, %v8017_v55 }
 0x8ff   : > { %v8158_v46 = vpop.permute.xlu1 %8157 }
 0x900   : > { %v8155_v8 = vpop.permute.xlu0 %8154  ;;  %v8282_v1 = vrot.slane %v8158_v46, %v13210_v43 }
 0x901   : > { %v8277_v61 = vrot.slane %v8155_v8, %v13212_v48 }
 0x902   : > { %v8287_v15 = vsel %vm7940_vm1, %v8286_v31, %v8282_v1 }
 0x904   : > { %v7883_v58 = vpop.permute.xlu1 %7882 }
 0x905   : > { %v7904_v50 = vpop.permute.xlu0 %7903  ;;  %v8008_v29 = vrot.slane %v7883_v58, %v13210_v43 }
 0x906   : > { %v8039_v39 = vrot.slane %v7904_v50, %v13212_v48 }
 0x907   : > { %v8013_v16 = vsel %vm7940_vm1, %v8012_v56, %v8008_v29 }
 0x908   : > { %v8091_v28 = vsel %vm8077_vm3, %v8022_v6, %v8013_v16 }
 0x909   : > { %v8152_v19 = vpop.permute.xlu1 %8151 }
 0x90a   : > { %v13307_v33 = vpop.permute.xlu0 %8172  ;;  %v8273_v36 = vrot.slane %v8152_v19, %v13210_v43 }
 0x90b   : > { %v8304_v19 = vrot.slane %v13307_v33, %v13212_v48 }
 0x90c   : > { %v8278_v57 = vsel %vm7940_vm1, %v8277_v61, %v8273_v36 }
 0x90d   : > { %v8349_v46 = vsel %vm8077_vm3, %v8287_v15, %v8278_v57 }
 0x90e   : > { %v7901_v18 = vpop.permute.xlu1 %7900 }
 0x90f   : > { %v7898_v47 = vpop.permute.xlu0 %7897  ;;  %v8035_v30 = vrot.slane %v7901_v18, %v13210_v43 }
 0x910   : > { %v8030_v37 = vrot.slane %v7898_v47, %v13212_v48 }
 0x911   : > { %v8040_v49 = vsel %vm7940_vm1, %v8039_v39, %v8035_v30 }
 0x913   : > { %v13309_v34 = vpop.permute.xlu1 %8169 }
 0x914   : > { %v8167_v54 = vpop.permute.xlu0 %8166  ;;  %v8300_v35 = vrot.slane %v13309_v34, %v13210_v43 }
 0x915   : > { %v8295_v14 = vrot.slane %v8167_v54, %v13212_v48 }
 0x918   : > { %v7895_v62 = vpop.permute.xlu1 %7894 }
 0x919   : > { %v7916_v3 = vpop.permute.xlu0 %7915  ;;  %v8026_v53 = vrot.slane %v7895_v62, %v13210_v43 }
 0x91a   : > { %v8057_v27 = vrot.slane %v7916_v3, %v13212_v48 }
 0x91b   : > { %v8031_v63 = vsel %vm7940_vm1, %v8030_v37, %v8026_v53 }
 0x91c   : > { %v8092_v20 = vsel %vm8079_vm2, %v8031_v63, %v8091_v28 }
 0x91d   : > { %v8164_v21 = vpop.permute.xlu1 %8163  ;;  %v8093_v13 = vsel %vm8081_vm4, %v8040_v49, %v8092_v20 }
 0x91e   : > { %v13311_v2 = vpop.permute.xlu0 %8184  ;;  %v8291_v59 = vrot.slane %v8164_v21, %v13210_v43  ;;  %v8305_v21 = vsel %vm7940_vm1, %v8304_v19, %v8300_v35 }
 0x91f   : > { %v8322_v29 = vrot.slane %v13311_v2, %v13212_v48 }
 0x920   : > { %v8296_v9 = vsel %vm7940_vm1, %v8295_v14, %v8291_v59 }
 0x921   : > { %v8350_v18 = vsel %vm8079_vm2, %v8296_v9, %v8349_v46 }
 0x922   : > { %v7913_v24 = vpop.permute.xlu1 %7912 }
 0x923   : > { %v7910_v45 = vpop.permute.xlu0 %7909  ;;  %v8053_v25 = vrot.slane %v7913_v24, %v13210_v43 }
 0x924   : > { %v8048_v17 = vrot.slane %v7910_v45, %v13212_v48 }
 0x925   : > { %v8058_v12 = vsel %vm7940_vm1, %v8057_v27, %v8053_v25 }
 0x927   : > { %v13313_v22 = vpop.permute.xlu1 %8181 }
 0x928   : > { %v8179_v44 = vpop.permute.xlu0 %8178  ;;  %v8318_v24 = vrot.slane %v13313_v22, %v13210_v43 }
 0x929   : > { %v8313_v8 = vrot.slane %v8179_v44, %v13212_v48  ;;  %v8351_v44 = vsel %vm8081_vm4, %v8305_v21, %v8350_v18 }
 0x92a   : > { %v8323_v56 = vsel %vm7940_vm1, %v8322_v29, %v8318_v24 }
 0x92c   : > { %v7907_v5 = vpop.permute.xlu1 %7906  ;;  %v13315_v41 = vpop.permute.xlu0 %8187 }
 0x92d   : > { %v8044_v7 = vrot.slane %v7907_v5, %v13210_v43  ;;  %v8327_v45 = vrot.slane %v13315_v41, %v13210_v43 }
 0x92f   : > { %v8049_v51 = vsel %vm7940_vm1, %v8048_v17, %v8044_v7 }
 0x930   : > { %v8094_v60 = vsel %vm8083_vm5, %v8049_v51, %v8093_v13 }
 0x931   : > { %v8176_v42 = vpop.permute.xlu1 %8175  ;;  %v7928_v23 = vpop.permute.xlu0 %7927  ;;  %v8095_v50 = vsel %vm8085_vm6, %v8058_v12, %v8094_v60 }
 0x932   : > { %v8309_v10 = vrot.slane %v8176_v42, %v13210_v43  ;;  %v8075_v11 = vrot.slane %v7928_v23, %v13212_v48 }
 0x934   : > { %v8314_v54 = vsel %vm7940_vm1, %v8313_v8, %v8309_v10 }
 0x935   : > { %v7922_v52 = vpop.permute.xlu0 %7921  ;;  %v8352_v53 = vsel %vm8083_vm5, %v8314_v54, %v8351_v44 }
 0x936   : > { %v7925_v0 = vpop.permute.xlu1 %7924  ;;  %v8066_v32 = vrot.slane %v7922_v52, %v13212_v48  ;;  %v8353_v42 = vsel %vm8085_vm6, %v8323_v56, %v8352_v53 }
 0x937   : > { %v8071_v26 = vrot.slane %v7925_v0, %v13210_v43 }
 0x939   : > { %v8076_v47 = vsel %vm7940_vm1, %v8075_v11, %v8071_v26 }
 0x93a   : > { %v7919_v40 = vpop.permute.xlu1 %7918  ;;  %v8194_v5 = vpop.permute.xlu0 %8193 }
 0x93b   : > { %v8062_v4 = vrot.slane %v7919_v40, %v13210_v43  ;;  %v8336_v41 = vrot.slane %v8194_v5, %v13210_v43 }
 0x93d   : > { %v8067_v58 = vsel %vm7940_vm1, %v8066_v32, %v8062_v4 }
 0x93e   : > { %v8096_v34 = vsel %vm8087_vm7, %v8067_v58, %v8095_v50 }
 0x93f   : > { %v8097_v62 = vsel %vm8089_vm8, %v8076_v47, %v8096_v34  ;;  %v8191_v3 = vpop.permute.xlu1 %8190 }
 0x940   : > { %8101 = vst.msk [vmem:[%s13283_s29 + $0x8] sm:$0xff] %vm1868_vm12, %v8097_v62  ;;  %v8331_v33 = vrot.slane %v8191_v3, %v13212_v48 }
 0x942   : > { %v8332_v22 = vsel %vm7940_vm1, %v8331_v33, %v8327_v45 }
 0x943   : > { %v8197_v55 = vpop.permute.xlu1 %8196  ;;  %v8354_v2 = vsel %vm8087_vm7, %v8332_v22, %v8353_v42 }
 0x944   : > { %v8340_v37 = vrot.slane %v8197_v55, %v13212_v48 }
 0x946   : > { %v8341_v38 = vsel %vm7940_vm1, %v8340_v37, %v8336_v41 }
 0x947   : > { %v8355_v43 = vsel %vm8089_vm8, %v8341_v38, %v8354_v2 }
 0x948   : > { %8638 = vst.msk [vmem:[%s13283_s29 + $0x18] sm:$0xff] %vm1868_vm12, %v8355_v43 }
 0x949   : > { %9381 = shalt.err (!%p9378_p5)
}
 0x94a   : > { %s9382_s15 = scalar_lea.hbm %s13389_s27, 512  ;;  %s9386_s20 = scalar_lea.hbm %s13456_s9, 1024 }
 0x94b   : > { %p9383_p6 = scmp.ne.s32.totalorder %s13389_s27, %s9382_s15  ;;  %p9387_p10 = scmp.lt.u32.totalorder %s13389_s27, %s13456_s9 }
 0x94c   : > { %p9388_p11 = scmp.lt.u32.totalorder %s9386_s20, %s9382_s15  ;;  %p9390_p13 = scmp.lt.u32.totalorder %s9382_s15, %s13389_s27 }
 0x94d   : > { %p9384_p7 = pnand %p9383_p6, %p9553_p4 }
 0x94e   : > { %p9389_p12 = por %p9388_p11, %p9387_p10 }
 0x94f   : > { %p9385_p9 = pneg %p9384_p7 }
 0x950   : > { %p9391_p0 = por %p9390_p13, %p9389_p12 }
 0x952   : > { %p9392_p1 = pnand %p9391_p0, %p9385_p9 }
 0x954   : > { %9395 = shalt.err (!%p9392_p1)
}
 0x955   : > { %s9462_s25 = smov 128  }
 0x956   : > { %9117 = dma.vmem_to_hbm [thread:$0]  (%p9553_p4), %s13393_s18, 512, %s13389_s27, %s13400_s12, %s9462_s25, %s9462_s25, %s9453_s26  }
 0x957 PF: > { %p9123_p2 = scmp.ge.s32.totalorder %s9446_s14, 2  ;;  %s8392_s23 = sand.u32 1, %s9426_s30  }
 0x958   : > { %s8393_s15 = scalar_lea.sflag [#allocation3], %s8392_s23 }
 0x959   : > { %p9120_p3 = pnand %p9123_p2, %p9560_p8 }
 0x95b   : > { %9421 = dma.done.wait (!%p9120_p3), %s8393_s15, 512  }
 0x95c   : > { %9423 = vsyncadd (!%p9120_p3), %s8393_s15, 4294966784  ;;  %s22_s14 = sadd.s32 1, %s9446_s14   ;;  %s13530_s30 = smov %s9430_s10 }
 0x95d   : > { %p19_p5 = scmp.ge.s32.totalorder %s22_s14, 4   ;;  %s13531_s10 = smov %s9434_s11 }
 0x95e   : > { %s13532_s11 = smov %s9566_s22  ;;  %s13533_s12 = smov %s9442_s13 }
 0x95f   : > { %s13534_s13 = smov %s13536_s17  ;;  %21 = sbr.rel (!%p19_p5) target bundleno = 4 (0x4), region = 93 }
 0x966   :  { %8398 = vsyncpa [#allocation3], 1 }
 0x967   :  { %8400 = vsyncpa [#allocation3 + $0x1], 1 }

</bundles_post_ra>
